<compile_context>
chip_gen: v6e
topology: v6e:2x2x1
jax: 0.10.0
libtpu: 0.0.40
codegen_flags: <defaults>
</compile_context>

<pallas_src>
import math
import functools

import jax
import jax.numpy as jnp
from jax.experimental import pallas as pl
from jax.experimental.pallas import tpu as pltpu

NTOKEN = 631      # ntoken hard-coded in CycleLossT
SEQ_EACH = 40     # fixed by linear_out in_features = 631 * 40 * 2
NHEAD = 2
NHID = 120
NLAYERS = 2
LN_EPS = 1e-5
NCLASS = 2

LAYER_PARAM_ORDER = (
    "in_proj_wT", "in_proj_b", "out_proj_wT", "out_proj_b",
    "ln1_g", "ln1_b", "lin1_wT", "lin1_b",
    "lin2_wT", "lin2_b", "ln2_g", "ln2_b",
)
PARAMS_PER_LAYER = len(LAYER_PARAM_ORDER)


def _full_spec(shape):
    """BlockSpec covering the whole array as a single VMEM block (no grid)."""
    nd = len(shape)
    return pl.BlockSpec(shape, lambda *_: (0,) * nd)


# ----------------------------------------------------------------------------
# Fused forward kernel
# ----------------------------------------------------------------------------
def _cycle_loss_kernel(B, S, E, nlayers, *refs):
    n_fixed = 8
    (src_ref, enc_w_ref, enc_b_ref, pe_ref,
     dec_w_ref, dec_b_ref, outw_ref, outb_ref) = refs[:n_fixed]
    layer_refs = refs[n_fixed:n_fixed + PARAMS_PER_LAYER * nlayers]
    o_ref = refs[n_fixed + PARAMS_PER_LAYER * nlayers]

    hd = E // NHEAD
    attn_scale = 1.0 / math.sqrt(hd)

    def mm(x, w_ref, b_ref):
        # MXU matmul in bf16 with f32 accumulate + f32 bias.
        return (jnp.dot(x.astype(jnp.bfloat16), w_ref[...],
                        preferred_element_type=jnp.float32) + b_ref[...])

    def layer_norm(x, g_ref, b_ref):
        mu = jnp.mean(x, axis=-1, keepdims=True)
        d = x - mu
        var = jnp.mean(d * d, axis=-1, keepdims=True)
        return d * jax.lax.rsqrt(var + LN_EPS) * g_ref[...] + b_ref[...]

    # ---- token embedding * sqrt(ninp) + positional encoding (fused) --------
    h = mm(src_ref[...], enc_w_ref, enc_b_ref) * math.sqrt(E)     # (B*S, E) f32
    h = h + jnp.concatenate([pe_ref[...]] * B, axis=0)            # pe tiled over B
    # TODO(synk): PositionalEncoding dropout -> eval-mode identity.

    # ---- transformer encoder layers (post-LN, PyTorch default) -------------
    for l in range(nlayers):
        (inw, inb, opw, opb, g1, be1,
         w1, b1, w2, b2, g2, be2) = layer_refs[PARAMS_PER_LAYER * l:
                                               PARAMS_PER_LAYER * (l + 1)]

        qkv = mm(h, inw, inb)                                     # (B*S, 3E)

        # self-attention: all (batch, head) slices inside this one kernel
        head_outs = []
        for hh in range(NHEAD):
            c0 = hh * hd
            batch_rows = []
            for b in range(B):
                r0 = b * S
                q = qkv[r0:r0 + S, c0:c0 + hd]                    # (S, hd)
                k = qkv[r0:r0 + S, E + c0:E + c0 + hd]
                v = qkv[r0:r0 + S, 2 * E + c0:2 * E + c0 + hd]
                s = jnp.dot(q.astype(jnp.bfloat16),
                            k.T.astype(jnp.bfloat16),
                            preferred_element_type=jnp.float32) * attn_scale
                s = s - jnp.max(s, axis=-1, keepdims=True)
                p = jnp.exp(s)
                p = p * pl.reciprocal(jnp.sum(p, axis=-1, keepdims=True),
                                      approx=True)
                batch_rows.append(
                    jnp.dot(p.astype(jnp.bfloat16), v.astype(jnp.bfloat16),
                            preferred_element_type=jnp.float32))  # (S, hd)
            head_outs.append(jnp.concatenate(batch_rows, axis=0)) # (B*S, hd)
        attn = jnp.concatenate(head_outs, axis=1)                 # (B*S, E)
        attn = mm(attn, opw, opb)                                 # out_proj

        h = layer_norm(h + attn, g1, be1)                         # post-LN
        ff = jnp.maximum(mm(h, w1, b1), 0.0)                      # linear1+relu
        ff = mm(ff, w2, b2)                                       # linear2
        h = layer_norm(h + ff, g2, be2)

    # ---- decoder: Linear(ninp -> NTOKEN) ------------------------------------
    dec = mm(h, dec_w_ref, dec_b_ref)                             # (B*S, NTOKEN)

    # ---- classifier head: lane-dense (2*S, NTOKEN) weight -------------------
    # logits[b, c] = sum_{s,t} dec[b*S+s, t] * W[c*S+s, t] + bias[c]
    outw = outw_ref[...]                                          # (2*S, NTOKEN)
    logit_rows = []
    for b in range(B):
        dec_b = dec[b * S:(b + 1) * S, :]                         # (S, NTOKEN)
        lg = []
        for c in range(NCLASS):
            w_c = outw[c * S:(c + 1) * S, :]                      # (S, NTOKEN)
            part = jnp.sum(dec_b * w_c, axis=1, keepdims=True)    # (S, 1) lane red.
            lg.append(jnp.sum(part, axis=0, keepdims=True))       # (1, 1)
        logit_rows.append(jnp.concatenate(lg, axis=1) + outb_ref[...])  # (1, 2)
    logits = jnp.concatenate(logit_rows, axis=0)                  # (B, 2)

    m = jnp.max(logits, axis=-1, keepdims=True)
    e = jnp.exp(logits - m)
    o_ref[...] = e / jnp.sum(e, axis=-1, keepdims=True)


# ----------------------------------------------------------------------------
# Wrapper
# ----------------------------------------------------------------------------
def cycle_loss_t_forward(params, x, y, n_words):
    # torch.cat([x, y]) along the sequence (dim 0)
    src = jnp.concatenate([x, y], axis=0)                         # (S, B, 631)
    S, B, T = src.shape
    E = 2 * n_words

    # batch-major rows (b, s) -> attention / classifier slices are contiguous.
    src_bs = src.transpose(1, 0, 2).reshape(B * S, T).astype(jnp.bfloat16)

    flat_inputs = [src_bs,
                   params["enc_wT"], params["enc_b"], params["pe"][:S],
                   params["dec_wT"], params["dec_b"],
                   params["out_w"], params["out_b"]]
    for lp in params["layers"]:
        flat_inputs += [lp[k] for k in LAYER_PARAM_ORDER]

    kernel = functools.partial(_cycle_loss_kernel, B, S, E, len(params["layers"]))
    return pl.pallas_call(
        kernel,
        out_shape=jax.ShapeDtypeStruct((B, NCLASS), jnp.float32),
        in_specs=[_full_spec(a.shape) for a in flat_inputs],
        out_specs=_full_spec((B, NCLASS)),
        compiler_params=pltpu.CompilerParams(
            vmem_limit_bytes=32 * 1024 * 1024),
    )(*flat_inputs)


# ----------------------------------------------------------------------------
# Parameter init (bias/LN params pre-reshaped, matmul weights bf16)
# ----------------------------------------------------------------------------
def init_params(key, n_words):
    ninp = 2 * n_words
    keys = jax.random.split(key, 32)
    it = iter(keys)

    def u(shape, a=0.1):
        return jax.random.uniform(next(it), shape, jnp.float32, -a, a)

    params = {}
    params["enc_wT"] = u((NTOKEN, ninp)).astype(jnp.bfloat16)     # Linear(631->ninp), W^T
    params["enc_b"] = u((ninp,)).reshape(1, ninp)

    # sinusoidal positional-encoding table (matches PositionalEncoding buffer)
    max_len = 2 * SEQ_EACH
    pos = jnp.arange(max_len, dtype=jnp.float32)[:, None]
    div = jnp.exp(jnp.arange(0, ninp, 2, dtype=jnp.float32)
                  * (-math.log(10000.0) / ninp))
    ang = pos * div
    pe = jnp.zeros((max_len, ninp), jnp.float32)
    pe = pe.at[:, 0::2].set(jnp.sin(ang))
    pe = pe.at[:, 1::2].set(jnp.cos(ang))
    params["pe"] = pe

    layers = []
    for _ in range(NLAYERS):
        s_e = 1.0 / math.sqrt(ninp)
        s_h = 1.0 / math.sqrt(NHID)
        layers.append(dict(
            in_proj_wT=u((ninp, 3 * ninp), s_e).astype(jnp.bfloat16),
            in_proj_b=jnp.zeros((1, 3 * ninp), jnp.float32),
            out_proj_wT=u((ninp, ninp), s_e).astype(jnp.bfloat16),
            out_proj_b=jnp.zeros((1, ninp), jnp.float32),
            ln1_g=jnp.ones((1, ninp), jnp.float32),
            ln1_b=jnp.zeros((1, ninp), jnp.float32),
            lin1_wT=u((ninp, NHID), s_e).astype(jnp.bfloat16),
            lin1_b=u((NHID,), s_e).reshape(1, NHID),
            lin2_wT=u((NHID, ninp), s_h).astype(jnp.bfloat16),
            lin2_b=u((ninp,), s_h).reshape(1, ninp),
            ln2_g=jnp.ones((1, ninp), jnp.float32),
            ln2_b=jnp.zeros((1, ninp), jnp.float32),
        ))
    params["layers"] = layers

    params["dec_wT"] = u((ninp, NTOKEN)).astype(jnp.bfloat16)     # Linear(ninp->631), W^T
    params["dec_b"] = jnp.zeros((1, NTOKEN), jnp.float32)

    # classifier Linear(631*40*2 -> 2), stored lane-dense:
    # row c*S + s of out_w holds W[c, s*NTOKEN:(s+1)*NTOKEN]
    S_total = 2 * SEQ_EACH
    dflat = NTOKEN * S_total
    params["out_w"] = u((NCLASS * S_total, NTOKEN), 1.0 / math.sqrt(dflat))
    params["out_b"] = jnp.zeros((1, NCLASS), jnp.float32)
    return params


if __name__ == "__main__":
    n_words = 8        # ninp = 16, divisible by nhead=2
    B = 2
    key = jax.random.PRNGKey(0)
    kp, kx, ky = jax.random.split(key, 3)
    params = init_params(kp, n_words)
    x = jax.random.normal(kx, (SEQ_EACH, B, NTOKEN), jnp.float32)
    y = jax.random.normal(ky, (SEQ_EACH, B, NTOKEN), jnp.float32)

    fwd = jax.jit(functools.partial(cycle_loss_t_forward, n_words=n_words))
    out = jax.block_until_ready(fwd(params, x, y))

    assert out.shape == (B, NCLASS), out.shape
    assert bool(jnp.all(jnp.isfinite(out)))
    assert bool(jnp.allclose(jnp.sum(out, axis=-1), 1.0, atol=1e-5))
    print("KERNEL_OK")
</pallas_src>

<mosaic_0001>
module attributes {stable_mosaic.version = 11 : i64} {
  func.func @_cycle_loss_kernel(%arg0: memref<160x631xbf16, #tpu.memory_space<vmem>>, %arg1: memref<631x16xbf16, #tpu.memory_space<vmem>>, %arg2: memref<1x16xf32, #tpu.memory_space<vmem>>, %arg3: memref<80x16xf32, #tpu.memory_space<vmem>>, %arg4: memref<16x631xbf16, #tpu.memory_space<vmem>>, %arg5: memref<1x631xf32, #tpu.memory_space<vmem>>, %arg6: memref<160x631xf32, #tpu.memory_space<vmem>>, %arg7: memref<1x2xf32, #tpu.memory_space<vmem>>, %arg8: memref<16x48xbf16, #tpu.memory_space<vmem>>, %arg9: memref<1x48xf32, #tpu.memory_space<vmem>>, %arg10: memref<16x16xbf16, #tpu.memory_space<vmem>>, %arg11: memref<1x16xf32, #tpu.memory_space<vmem>>, %arg12: memref<1x16xf32, #tpu.memory_space<vmem>>, %arg13: memref<1x16xf32, #tpu.memory_space<vmem>>, %arg14: memref<16x120xbf16, #tpu.memory_space<vmem>>, %arg15: memref<1x120xf32, #tpu.memory_space<vmem>>, %arg16: memref<120x16xbf16, #tpu.memory_space<vmem>>, %arg17: memref<1x16xf32, #tpu.memory_space<vmem>>, %arg18: memref<1x16xf32, #tpu.memory_space<vmem>>, %arg19: memref<1x16xf32, #tpu.memory_space<vmem>>, %arg20: memref<16x48xbf16, #tpu.memory_space<vmem>>, %arg21: memref<1x48xf32, #tpu.memory_space<vmem>>, %arg22: memref<16x16xbf16, #tpu.memory_space<vmem>>, %arg23: memref<1x16xf32, #tpu.memory_space<vmem>>, %arg24: memref<1x16xf32, #tpu.memory_space<vmem>>, %arg25: memref<1x16xf32, #tpu.memory_space<vmem>>, %arg26: memref<16x120xbf16, #tpu.memory_space<vmem>>, %arg27: memref<1x120xf32, #tpu.memory_space<vmem>>, %arg28: memref<120x16xbf16, #tpu.memory_space<vmem>>, %arg29: memref<1x16xf32, #tpu.memory_space<vmem>>, %arg30: memref<1x16xf32, #tpu.memory_space<vmem>>, %arg31: memref<1x16xf32, #tpu.memory_space<vmem>>, %arg32: memref<2x2xf32, #tpu.memory_space<vmem>>) attributes {dimension_semantics = [], scalar_prefetch = 0 : i64, scratch_operands = 0 : i64, tpu.core_type = #tpu.core_type<tc>} {
    %c0 = arith.constant 0 : index
    %c0_0 = arith.constant 0 : index
    %0 = vector.load %arg0[%c0, %c0_0] : memref<160x631xbf16, #tpu.memory_space<vmem>>, vector<160x631xbf16>
    %c0_1 = arith.constant 0 : index
    %c0_2 = arith.constant 0 : index
    %1 = vector.load %arg1[%c0_1, %c0_2] : memref<631x16xbf16, #tpu.memory_space<vmem>>, vector<631x16xbf16>
    %cst = arith.constant dense<0.000000e+00> : vector<160x16xf32>
    %2 = tpu.matmul %0, %1, %cst {dimension_numbers = #tpu.dot_dimension_numbers<[1], [0], [0], [1], [0, 0, 1, 1], [], []>} : vector<160x631xbf16>, vector<631x16xbf16>, vector<160x16xf32> -> vector<160x16xf32>
    %c0_3 = arith.constant 0 : index
    %c0_4 = arith.constant 0 : index
    %3 = vector.load %arg2[%c0_3, %c0_4] : memref<1x16xf32, #tpu.memory_space<vmem>>, vector<1x16xf32>
    %4 = vector.broadcast %3 : vector<1x16xf32> to vector<160x16xf32>
    %5 = arith.addf %2, %4 : vector<160x16xf32>
    %cst_5 = arith.constant 4.000000e+00 : f32
    %6 = vector.broadcast %cst_5 : f32 to vector<160x16xf32>
    %7 = arith.mulf %5, %6 : vector<160x16xf32>
    %c0_6 = arith.constant 0 : index
    %c0_7 = arith.constant 0 : index
    %8 = vector.load %arg3[%c0_6, %c0_7] : memref<80x16xf32, #tpu.memory_space<vmem>>, vector<80x16xf32>
    %9 = tpu.concatenate %8, %8 in 0 : vector<80x16xf32>, vector<80x16xf32> -> vector<160x16xf32>
    %10 = arith.addf %7, %9 : vector<160x16xf32>
    %11 = arith.truncf %10 : vector<160x16xf32> to vector<160x16xbf16>
    %c0_8 = arith.constant 0 : index
    %c0_9 = arith.constant 0 : index
    %12 = vector.load %arg8[%c0_8, %c0_9] : memref<16x48xbf16, #tpu.memory_space<vmem>>, vector<16x48xbf16>
    %cst_10 = arith.constant dense<0.000000e+00> : vector<160x48xf32>
    %13 = tpu.matmul %11, %12, %cst_10 {dimension_numbers = #tpu.dot_dimension_numbers<[1], [0], [0], [1], [0, 0, 1, 1], [], []>} : vector<160x16xbf16>, vector<16x48xbf16>, vector<160x48xf32> -> vector<160x48xf32>
    %c0_11 = arith.constant 0 : index
    %c0_12 = arith.constant 0 : index
    %14 = vector.load %arg9[%c0_11, %c0_12] : memref<1x48xf32, #tpu.memory_space<vmem>>, vector<1x48xf32>
    %15 = vector.broadcast %14 : vector<1x48xf32> to vector<160x48xf32>
    %16 = arith.addf %13, %15 : vector<160x48xf32>
    %17 = vector.extract_strided_slice %16 {offsets = [0, 0], sizes = [80, 8], strides = [1, 1]} : vector<160x48xf32> to vector<80x8xf32>
    %18 = vector.extract_strided_slice %16 {offsets = [0, 16], sizes = [80, 8], strides = [1, 1]} : vector<160x48xf32> to vector<80x8xf32>
    %19 = vector.extract_strided_slice %16 {offsets = [0, 32], sizes = [80, 8], strides = [1, 1]} : vector<160x48xf32> to vector<80x8xf32>
    %20 = arith.truncf %17 : vector<80x8xf32> to vector<80x8xbf16>
    %21 = tpu.transpose %18, [1, 0] : vector<80x8xf32> -> vector<8x80xf32>
    %22 = arith.truncf %21 : vector<8x80xf32> to vector<8x80xbf16>
    %cst_13 = arith.constant dense<0.000000e+00> : vector<80x80xf32>
    %23 = tpu.matmul %20, %22, %cst_13 {dimension_numbers = #tpu.dot_dimension_numbers<[1], [0], [0], [1], [0, 0, 1, 1], [], []>} : vector<80x8xbf16>, vector<8x80xbf16>, vector<80x80xf32> -> vector<80x80xf32>
    %cst_14 = arith.constant 0.353553385 : f32
    %24 = vector.broadcast %cst_14 : f32 to vector<80x80xf32>
    %25 = arith.mulf %23, %24 : vector<80x80xf32>
    %cst_15 = arith.constant dense<0xFF800000> : vector<80xf32>
    %26 = vector.multi_reduction <maximumf>, %25, %cst_15 [1] : vector<80x80xf32> to vector<80xf32>
    %27 = vector.shape_cast %26 : vector<80xf32> to vector<80x1xf32>
    %28 = vector.broadcast %27 : vector<80x1xf32> to vector<80x80xf32>
    %29 = arith.subf %25, %28 : vector<80x80xf32>
    %30 = math.exp %29 : vector<80x80xf32>
    %cst_16 = arith.constant dense<0.000000e+00> : vector<80xf32>
    %31 = vector.multi_reduction <add>, %30, %cst_16 [1] : vector<80x80xf32> to vector<80xf32>
    %32 = vector.shape_cast %31 : vector<80xf32> to vector<80x1xf32>
    %33 = tpu.reciprocal %32 {approx = true} : vector<80x1xf32> -> vector<80x1xf32>
    %34 = vector.broadcast %33 : vector<80x1xf32> to vector<80x80xf32>
    %35 = arith.mulf %30, %34 : vector<80x80xf32>
    %36 = arith.truncf %35 : vector<80x80xf32> to vector<80x80xbf16>
    %37 = arith.truncf %19 : vector<80x8xf32> to vector<80x8xbf16>
    %cst_17 = arith.constant dense<0.000000e+00> : vector<80x8xf32>
    %38 = tpu.matmul %36, %37, %cst_17 {dimension_numbers = #tpu.dot_dimension_numbers<[1], [0], [0], [1], [0, 0, 1, 1], [], []>} : vector<80x80xbf16>, vector<80x8xbf16>, vector<80x8xf32> -> vector<80x8xf32>
    %39 = vector.extract_strided_slice %16 {offsets = [80, 0], sizes = [80, 8], strides = [1, 1]} : vector<160x48xf32> to vector<80x8xf32>
    %40 = vector.extract_strided_slice %16 {offsets = [80, 16], sizes = [80, 8], strides = [1, 1]} : vector<160x48xf32> to vector<80x8xf32>
    %41 = vector.extract_strided_slice %16 {offsets = [80, 32], sizes = [80, 8], strides = [1, 1]} : vector<160x48xf32> to vector<80x8xf32>
    %42 = arith.truncf %39 : vector<80x8xf32> to vector<80x8xbf16>
    %43 = tpu.transpose %40, [1, 0] : vector<80x8xf32> -> vector<8x80xf32>
    %44 = arith.truncf %43 : vector<8x80xf32> to vector<8x80xbf16>
    %cst_18 = arith.constant dense<0.000000e+00> : vector<80x80xf32>
    %45 = tpu.matmul %42, %44, %cst_18 {dimension_numbers = #tpu.dot_dimension_numbers<[1], [0], [0], [1], [0, 0, 1, 1], [], []>} : vector<80x8xbf16>, vector<8x80xbf16>, vector<80x80xf32> -> vector<80x80xf32>
    %cst_19 = arith.constant 0.353553385 : f32
    %46 = vector.broadcast %cst_19 : f32 to vector<80x80xf32>
    %47 = arith.mulf %45, %46 : vector<80x80xf32>
    %cst_20 = arith.constant dense<0xFF800000> : vector<80xf32>
    %48 = vector.multi_reduction <maximumf>, %47, %cst_20 [1] : vector<80x80xf32> to vector<80xf32>
    %49 = vector.shape_cast %48 : vector<80xf32> to vector<80x1xf32>
    %50 = vector.broadcast %49 : vector<80x1xf32> to vector<80x80xf32>
    %51 = arith.subf %47, %50 : vector<80x80xf32>
    %52 = math.exp %51 : vector<80x80xf32>
    %cst_21 = arith.constant dense<0.000000e+00> : vector<80xf32>
    %53 = vector.multi_reduction <add>, %52, %cst_21 [1] : vector<80x80xf32> to vector<80xf32>
    %54 = vector.shape_cast %53 : vector<80xf32> to vector<80x1xf32>
    %55 = tpu.reciprocal %54 {approx = true} : vector<80x1xf32> -> vector<80x1xf32>
    %56 = vector.broadcast %55 : vector<80x1xf32> to vector<80x80xf32>
    %57 = arith.mulf %52, %56 : vector<80x80xf32>
    %58 = arith.truncf %57 : vector<80x80xf32> to vector<80x80xbf16>
    %59 = arith.truncf %41 : vector<80x8xf32> to vector<80x8xbf16>
    %cst_22 = arith.constant dense<0.000000e+00> : vector<80x8xf32>
    %60 = tpu.matmul %58, %59, %cst_22 {dimension_numbers = #tpu.dot_dimension_numbers<[1], [0], [0], [1], [0, 0, 1, 1], [], []>} : vector<80x80xbf16>, vector<80x8xbf16>, vector<80x8xf32> -> vector<80x8xf32>
    %61 = tpu.concatenate %38, %60 in 0 : vector<80x8xf32>, vector<80x8xf32> -> vector<160x8xf32>
    %62 = vector.extract_strided_slice %16 {offsets = [0, 8], sizes = [80, 8], strides = [1, 1]} : vector<160x48xf32> to vector<80x8xf32>
    %63 = vector.extract_strided_slice %16 {offsets = [0, 24], sizes = [80, 8], strides = [1, 1]} : vector<160x48xf32> to vector<80x8xf32>
    %64 = vector.extract_strided_slice %16 {offsets = [0, 40], sizes = [80, 8], strides = [1, 1]} : vector<160x48xf32> to vector<80x8xf32>
    %65 = arith.truncf %62 : vector<80x8xf32> to vector<80x8xbf16>
    %66 = tpu.transpose %63, [1, 0] : vector<80x8xf32> -> vector<8x80xf32>
    %67 = arith.truncf %66 : vector<8x80xf32> to vector<8x80xbf16>
    %cst_23 = arith.constant dense<0.000000e+00> : vector<80x80xf32>
    %68 = tpu.matmul %65, %67, %cst_23 {dimension_numbers = #tpu.dot_dimension_numbers<[1], [0], [0], [1], [0, 0, 1, 1], [], []>} : vector<80x8xbf16>, vector<8x80xbf16>, vector<80x80xf32> -> vector<80x80xf32>
    %cst_24 = arith.constant 0.353553385 : f32
    %69 = vector.broadcast %cst_24 : f32 to vector<80x80xf32>
    %70 = arith.mulf %68, %69 : vector<80x80xf32>
    %cst_25 = arith.constant dense<0xFF800000> : vector<80xf32>
    %71 = vector.multi_reduction <maximumf>, %70, %cst_25 [1] : vector<80x80xf32> to vector<80xf32>
    %72 = vector.shape_cast %71 : vector<80xf32> to vector<80x1xf32>
    %73 = vector.broadcast %72 : vector<80x1xf32> to vector<80x80xf32>
    %74 = arith.subf %70, %73 : vector<80x80xf32>
    %75 = math.exp %74 : vector<80x80xf32>
    %cst_26 = arith.constant dense<0.000000e+00> : vector<80xf32>
    %76 = vector.multi_reduction <add>, %75, %cst_26 [1] : vector<80x80xf32> to vector<80xf32>
    %77 = vector.shape_cast %76 : vector<80xf32> to vector<80x1xf32>
    %78 = tpu.reciprocal %77 {approx = true} : vector<80x1xf32> -> vector<80x1xf32>
    %79 = vector.broadcast %78 : vector<80x1xf32> to vector<80x80xf32>
    %80 = arith.mulf %75, %79 : vector<80x80xf32>
    %81 = arith.truncf %80 : vector<80x80xf32> to vector<80x80xbf16>
    %82 = arith.truncf %64 : vector<80x8xf32> to vector<80x8xbf16>
    %cst_27 = arith.constant dense<0.000000e+00> : vector<80x8xf32>
    %83 = tpu.matmul %81, %82, %cst_27 {dimension_numbers = #tpu.dot_dimension_numbers<[1], [0], [0], [1], [0, 0, 1, 1], [], []>} : vector<80x80xbf16>, vector<80x8xbf16>, vector<80x8xf32> -> vector<80x8xf32>
    %84 = vector.extract_strided_slice %16 {offsets = [80, 8], sizes = [80, 8], strides = [1, 1]} : vector<160x48xf32> to vector<80x8xf32>
    %85 = vector.extract_strided_slice %16 {offsets = [80, 24], sizes = [80, 8], strides = [1, 1]} : vector<160x48xf32> to vector<80x8xf32>
    %86 = vector.extract_strided_slice %16 {offsets = [80, 40], sizes = [80, 8], strides = [1, 1]} : vector<160x48xf32> to vector<80x8xf32>
    %87 = arith.truncf %84 : vector<80x8xf32> to vector<80x8xbf16>
    %88 = tpu.transpose %85, [1, 0] : vector<80x8xf32> -> vector<8x80xf32>
    %89 = arith.truncf %88 : vector<8x80xf32> to vector<8x80xbf16>
    %cst_28 = arith.constant dense<0.000000e+00> : vector<80x80xf32>
    %90 = tpu.matmul %87, %89, %cst_28 {dimension_numbers = #tpu.dot_dimension_numbers<[1], [0], [0], [1], [0, 0, 1, 1], [], []>} : vector<80x8xbf16>, vector<8x80xbf16>, vector<80x80xf32> -> vector<80x80xf32>
    %cst_29 = arith.constant 0.353553385 : f32
    %91 = vector.broadcast %cst_29 : f32 to vector<80x80xf32>
    %92 = arith.mulf %90, %91 : vector<80x80xf32>
    %cst_30 = arith.constant dense<0xFF800000> : vector<80xf32>
    %93 = vector.multi_reduction <maximumf>, %92, %cst_30 [1] : vector<80x80xf32> to vector<80xf32>
    %94 = vector.shape_cast %93 : vector<80xf32> to vector<80x1xf32>
    %95 = vector.broadcast %94 : vector<80x1xf32> to vector<80x80xf32>
    %96 = arith.subf %92, %95 : vector<80x80xf32>
    %97 = math.exp %96 : vector<80x80xf32>
    %cst_31 = arith.constant dense<0.000000e+00> : vector<80xf32>
    %98 = vector.multi_reduction <add>, %97, %cst_31 [1] : vector<80x80xf32> to vector<80xf32>
    %99 = vector.shape_cast %98 : vector<80xf32> to vector<80x1xf32>
    %100 = tpu.reciprocal %99 {approx = true} : vector<80x1xf32> -> vector<80x1xf32>
    %101 = vector.broadcast %100 : vector<80x1xf32> to vector<80x80xf32>
    %102 = arith.mulf %97, %101 : vector<80x80xf32>
    %103 = arith.truncf %102 : vector<80x80xf32> to vector<80x80xbf16>
    %104 = arith.truncf %86 : vector<80x8xf32> to vector<80x8xbf16>
    %cst_32 = arith.constant dense<0.000000e+00> : vector<80x8xf32>
    %105 = tpu.matmul %103, %104, %cst_32 {dimension_numbers = #tpu.dot_dimension_numbers<[1], [0], [0], [1], [0, 0, 1, 1], [], []>} : vector<80x80xbf16>, vector<80x8xbf16>, vector<80x8xf32> -> vector<80x8xf32>
    %106 = tpu.concatenate %83, %105 in 0 : vector<80x8xf32>, vector<80x8xf32> -> vector<160x8xf32>
    %107 = tpu.concatenate %61, %106 in 1 : vector<160x8xf32>, vector<160x8xf32> -> vector<160x16xf32>
    %108 = arith.truncf %107 : vector<160x16xf32> to vector<160x16xbf16>
    %c0_33 = arith.constant 0 : index
    %c0_34 = arith.constant 0 : index
    %109 = vector.load %arg10[%c0_33, %c0_34] : memref<16x16xbf16, #tpu.memory_space<vmem>>, vector<16x16xbf16>
    %cst_35 = arith.constant dense<0.000000e+00> : vector<160x16xf32>
    %110 = tpu.matmul %108, %109, %cst_35 {dimension_numbers = #tpu.dot_dimension_numbers<[1], [0], [0], [1], [0, 0, 1, 1], [], []>} : vector<160x16xbf16>, vector<16x16xbf16>, vector<160x16xf32> -> vector<160x16xf32>
    %c0_36 = arith.constant 0 : index
    %c0_37 = arith.constant 0 : index
    %111 = vector.load %arg11[%c0_36, %c0_37] : memref<1x16xf32, #tpu.memory_space<vmem>>, vector<1x16xf32>
    %112 = vector.broadcast %111 : vector<1x16xf32> to vector<160x16xf32>
    %113 = arith.addf %110, %112 : vector<160x16xf32>
    %114 = arith.addf %10, %113 : vector<160x16xf32>
    %cst_38 = arith.constant dense<0.000000e+00> : vector<160xf32>
    %115 = vector.multi_reduction <add>, %114, %cst_38 [1] : vector<160x16xf32> to vector<160xf32>
    %116 = vector.shape_cast %115 : vector<160xf32> to vector<160x1xf32>
    %cst_39 = arith.constant 1.600000e+01 : f32
    %117 = vector.broadcast %cst_39 : f32 to vector<160x1xf32>
    %118 = arith.divf %116, %117 : vector<160x1xf32>
    %119 = vector.broadcast %118 : vector<160x1xf32> to vector<160x16xf32>
    %120 = arith.subf %114, %119 : vector<160x16xf32>
    %121 = arith.mulf %120, %120 : vector<160x16xf32>
    %cst_40 = arith.constant dense<0.000000e+00> : vector<160xf32>
    %122 = vector.multi_reduction <add>, %121, %cst_40 [1] : vector<160x16xf32> to vector<160xf32>
    %123 = vector.shape_cast %122 : vector<160xf32> to vector<160x1xf32>
    %cst_41 = arith.constant 1.600000e+01 : f32
    %124 = vector.broadcast %cst_41 : f32 to vector<160x1xf32>
    %125 = arith.divf %123, %124 : vector<160x1xf32>
    %cst_42 = arith.constant 9.99999974E-6 : f32
    %126 = vector.broadcast %cst_42 : f32 to vector<160x1xf32>
    %127 = arith.addf %125, %126 : vector<160x1xf32>
    %128 = math.rsqrt %127 : vector<160x1xf32>
    %129 = vector.broadcast %128 : vector<160x1xf32> to vector<160x16xf32>
    %130 = arith.mulf %120, %129 : vector<160x16xf32>
    %c0_43 = arith.constant 0 : index
    %c0_44 = arith.constant 0 : index
    %131 = vector.load %arg12[%c0_43, %c0_44] : memref<1x16xf32, #tpu.memory_space<vmem>>, vector<1x16xf32>
    %132 = vector.broadcast %131 : vector<1x16xf32> to vector<160x16xf32>
    %133 = arith.mulf %130, %132 : vector<160x16xf32>
    %c0_45 = arith.constant 0 : index
    %c0_46 = arith.constant 0 : index
    %134 = vector.load %arg13[%c0_45, %c0_46] : memref<1x16xf32, #tpu.memory_space<vmem>>, vector<1x16xf32>
    %135 = vector.broadcast %134 : vector<1x16xf32> to vector<160x16xf32>
    %136 = arith.addf %133, %135 : vector<160x16xf32>
    %137 = arith.truncf %136 : vector<160x16xf32> to vector<160x16xbf16>
    %c0_47 = arith.constant 0 : index
    %c0_48 = arith.constant 0 : index
    %138 = vector.load %arg14[%c0_47, %c0_48] : memref<16x120xbf16, #tpu.memory_space<vmem>>, vector<16x120xbf16>
    %cst_49 = arith.constant dense<0.000000e+00> : vector<160x120xf32>
    %139 = tpu.matmul %137, %138, %cst_49 {dimension_numbers = #tpu.dot_dimension_numbers<[1], [0], [0], [1], [0, 0, 1, 1], [], []>} : vector<160x16xbf16>, vector<16x120xbf16>, vector<160x120xf32> -> vector<160x120xf32>
    %c0_50 = arith.constant 0 : index
    %c0_51 = arith.constant 0 : index
    %140 = vector.load %arg15[%c0_50, %c0_51] : memref<1x120xf32, #tpu.memory_space<vmem>>, vector<1x120xf32>
    %141 = vector.broadcast %140 : vector<1x120xf32> to vector<160x120xf32>
    %142 = arith.addf %139, %141 : vector<160x120xf32>
    %cst_52 = arith.constant 0.000000e+00 : f32
    %143 = vector.broadcast %cst_52 : f32 to vector<160x120xf32>
    %144 = arith.maximumf %142, %143 : vector<160x120xf32>
    %145 = arith.truncf %144 : vector<160x120xf32> to vector<160x120xbf16>
    %c0_53 = arith.constant 0 : index
    %c0_54 = arith.constant 0 : index
    %146 = vector.load %arg16[%c0_53, %c0_54] : memref<120x16xbf16, #tpu.memory_space<vmem>>, vector<120x16xbf16>
    %cst_55 = arith.constant dense<0.000000e+00> : vector<160x16xf32>
    %147 = tpu.matmul %145, %146, %cst_55 {dimension_numbers = #tpu.dot_dimension_numbers<[1], [0], [0], [1], [0, 0, 1, 1], [], []>} : vector<160x120xbf16>, vector<120x16xbf16>, vector<160x16xf32> -> vector<160x16xf32>
    %c0_56 = arith.constant 0 : index
    %c0_57 = arith.constant 0 : index
    %148 = vector.load %arg17[%c0_56, %c0_57] : memref<1x16xf32, #tpu.memory_space<vmem>>, vector<1x16xf32>
    %149 = vector.broadcast %148 : vector<1x16xf32> to vector<160x16xf32>
    %150 = arith.addf %147, %149 : vector<160x16xf32>
    %151 = arith.addf %136, %150 : vector<160x16xf32>
    %cst_58 = arith.constant dense<0.000000e+00> : vector<160xf32>
    %152 = vector.multi_reduction <add>, %151, %cst_58 [1] : vector<160x16xf32> to vector<160xf32>
    %153 = vector.shape_cast %152 : vector<160xf32> to vector<160x1xf32>
    %cst_59 = arith.constant 1.600000e+01 : f32
    %154 = vector.broadcast %cst_59 : f32 to vector<160x1xf32>
    %155 = arith.divf %153, %154 : vector<160x1xf32>
    %156 = vector.broadcast %155 : vector<160x1xf32> to vector<160x16xf32>
    %157 = arith.subf %151, %156 : vector<160x16xf32>
    %158 = arith.mulf %157, %157 : vector<160x16xf32>
    %cst_60 = arith.constant dense<0.000000e+00> : vector<160xf32>
    %159 = vector.multi_reduction <add>, %158, %cst_60 [1] : vector<160x16xf32> to vector<160xf32>
    %160 = vector.shape_cast %159 : vector<160xf32> to vector<160x1xf32>
    %cst_61 = arith.constant 1.600000e+01 : f32
    %161 = vector.broadcast %cst_61 : f32 to vector<160x1xf32>
    %162 = arith.divf %160, %161 : vector<160x1xf32>
    %cst_62 = arith.constant 9.99999974E-6 : f32
    %163 = vector.broadcast %cst_62 : f32 to vector<160x1xf32>
    %164 = arith.addf %162, %163 : vector<160x1xf32>
    %165 = math.rsqrt %164 : vector<160x1xf32>
    %166 = vector.broadcast %165 : vector<160x1xf32> to vector<160x16xf32>
    %167 = arith.mulf %157, %166 : vector<160x16xf32>
    %c0_63 = arith.constant 0 : index
    %c0_64 = arith.constant 0 : index
    %168 = vector.load %arg18[%c0_63, %c0_64] : memref<1x16xf32, #tpu.memory_space<vmem>>, vector<1x16xf32>
    %169 = vector.broadcast %168 : vector<1x16xf32> to vector<160x16xf32>
    %170 = arith.mulf %167, %169 : vector<160x16xf32>
    %c0_65 = arith.constant 0 : index
    %c0_66 = arith.constant 0 : index
    %171 = vector.load %arg19[%c0_65, %c0_66] : memref<1x16xf32, #tpu.memory_space<vmem>>, vector<1x16xf32>
    %172 = vector.broadcast %171 : vector<1x16xf32> to vector<160x16xf32>
    %173 = arith.addf %170, %172 : vector<160x16xf32>
    %174 = arith.truncf %173 : vector<160x16xf32> to vector<160x16xbf16>
    %c0_67 = arith.constant 0 : index
    %c0_68 = arith.constant 0 : index
    %175 = vector.load %arg20[%c0_67, %c0_68] : memref<16x48xbf16, #tpu.memory_space<vmem>>, vector<16x48xbf16>
    %cst_69 = arith.constant dense<0.000000e+00> : vector<160x48xf32>
    %176 = tpu.matmul %174, %175, %cst_69 {dimension_numbers = #tpu.dot_dimension_numbers<[1], [0], [0], [1], [0, 0, 1, 1], [], []>} : vector<160x16xbf16>, vector<16x48xbf16>, vector<160x48xf32> -> vector<160x48xf32>
    %c0_70 = arith.constant 0 : index
    %c0_71 = arith.constant 0 : index
    %177 = vector.load %arg21[%c0_70, %c0_71] : memref<1x48xf32, #tpu.memory_space<vmem>>, vector<1x48xf32>
    %178 = vector.broadcast %177 : vector<1x48xf32> to vector<160x48xf32>
    %179 = arith.addf %176, %178 : vector<160x48xf32>
    %180 = vector.extract_strided_slice %179 {offsets = [0, 0], sizes = [80, 8], strides = [1, 1]} : vector<160x48xf32> to vector<80x8xf32>
    %181 = vector.extract_strided_slice %179 {offsets = [0, 16], sizes = [80, 8], strides = [1, 1]} : vector<160x48xf32> to vector<80x8xf32>
    %182 = vector.extract_strided_slice %179 {offsets = [0, 32], sizes = [80, 8], strides = [1, 1]} : vector<160x48xf32> to vector<80x8xf32>
    %183 = arith.truncf %180 : vector<80x8xf32> to vector<80x8xbf16>
    %184 = tpu.transpose %181, [1, 0] : vector<80x8xf32> -> vector<8x80xf32>
    %185 = arith.truncf %184 : vector<8x80xf32> to vector<8x80xbf16>
    %cst_72 = arith.constant dense<0.000000e+00> : vector<80x80xf32>
    %186 = tpu.matmul %183, %185, %cst_72 {dimension_numbers = #tpu.dot_dimension_numbers<[1], [0], [0], [1], [0, 0, 1, 1], [], []>} : vector<80x8xbf16>, vector<8x80xbf16>, vector<80x80xf32> -> vector<80x80xf32>
    %cst_73 = arith.constant 0.353553385 : f32
    %187 = vector.broadcast %cst_73 : f32 to vector<80x80xf32>
    %188 = arith.mulf %186, %187 : vector<80x80xf32>
    %cst_74 = arith.constant dense<0xFF800000> : vector<80xf32>
    %189 = vector.multi_reduction <maximumf>, %188, %cst_74 [1] : vector<80x80xf32> to vector<80xf32>
    %190 = vector.shape_cast %189 : vector<80xf32> to vector<80x1xf32>
    %191 = vector.broadcast %190 : vector<80x1xf32> to vector<80x80xf32>
    %192 = arith.subf %188, %191 : vector<80x80xf32>
    %193 = math.exp %192 : vector<80x80xf32>
    %cst_75 = arith.constant dense<0.000000e+00> : vector<80xf32>
    %194 = vector.multi_reduction <add>, %193, %cst_75 [1] : vector<80x80xf32> to vector<80xf32>
    %195 = vector.shape_cast %194 : vector<80xf32> to vector<80x1xf32>
    %196 = tpu.reciprocal %195 {approx = true} : vector<80x1xf32> -> vector<80x1xf32>
    %197 = vector.broadcast %196 : vector<80x1xf32> to vector<80x80xf32>
    %198 = arith.mulf %193, %197 : vector<80x80xf32>
    %199 = arith.truncf %198 : vector<80x80xf32> to vector<80x80xbf16>
    %200 = arith.truncf %182 : vector<80x8xf32> to vector<80x8xbf16>
    %cst_76 = arith.constant dense<0.000000e+00> : vector<80x8xf32>
    %201 = tpu.matmul %199, %200, %cst_76 {dimension_numbers = #tpu.dot_dimension_numbers<[1], [0], [0], [1], [0, 0, 1, 1], [], []>} : vector<80x80xbf16>, vector<80x8xbf16>, vector<80x8xf32> -> vector<80x8xf32>
    %202 = vector.extract_strided_slice %179 {offsets = [80, 0], sizes = [80, 8], strides = [1, 1]} : vector<160x48xf32> to vector<80x8xf32>
    %203 = vector.extract_strided_slice %179 {offsets = [80, 16], sizes = [80, 8], strides = [1, 1]} : vector<160x48xf32> to vector<80x8xf32>
    %204 = vector.extract_strided_slice %179 {offsets = [80, 32], sizes = [80, 8], strides = [1, 1]} : vector<160x48xf32> to vector<80x8xf32>
    %205 = arith.truncf %202 : vector<80x8xf32> to vector<80x8xbf16>
    %206 = tpu.transpose %203, [1, 0] : vector<80x8xf32> -> vector<8x80xf32>
    %207 = arith.truncf %206 : vector<8x80xf32> to vector<8x80xbf16>
    %cst_77 = arith.constant dense<0.000000e+00> : vector<80x80xf32>
    %208 = tpu.matmul %205, %207, %cst_77 {dimension_numbers = #tpu.dot_dimension_numbers<[1], [0], [0], [1], [0, 0, 1, 1], [], []>} : vector<80x8xbf16>, vector<8x80xbf16>, vector<80x80xf32> -> vector<80x80xf32>
    %cst_78 = arith.constant 0.353553385 : f32
    %209 = vector.broadcast %cst_78 : f32 to vector<80x80xf32>
    %210 = arith.mulf %208, %209 : vector<80x80xf32>
    %cst_79 = arith.constant dense<0xFF800000> : vector<80xf32>
    %211 = vector.multi_reduction <maximumf>, %210, %cst_79 [1] : vector<80x80xf32> to vector<80xf32>
    %212 = vector.shape_cast %211 : vector<80xf32> to vector<80x1xf32>
    %213 = vector.broadcast %212 : vector<80x1xf32> to vector<80x80xf32>
    %214 = arith.subf %210, %213 : vector<80x80xf32>
    %215 = math.exp %214 : vector<80x80xf32>
    %cst_80 = arith.constant dense<0.000000e+00> : vector<80xf32>
    %216 = vector.multi_reduction <add>, %215, %cst_80 [1] : vector<80x80xf32> to vector<80xf32>
    %217 = vector.shape_cast %216 : vector<80xf32> to vector<80x1xf32>
    %218 = tpu.reciprocal %217 {approx = true} : vector<80x1xf32> -> vector<80x1xf32>
    %219 = vector.broadcast %218 : vector<80x1xf32> to vector<80x80xf32>
    %220 = arith.mulf %215, %219 : vector<80x80xf32>
    %221 = arith.truncf %220 : vector<80x80xf32> to vector<80x80xbf16>
    %222 = arith.truncf %204 : vector<80x8xf32> to vector<80x8xbf16>
    %cst_81 = arith.constant dense<0.000000e+00> : vector<80x8xf32>
    %223 = tpu.matmul %221, %222, %cst_81 {dimension_numbers = #tpu.dot_dimension_numbers<[1], [0], [0], [1], [0, 0, 1, 1], [], []>} : vector<80x80xbf16>, vector<80x8xbf16>, vector<80x8xf32> -> vector<80x8xf32>
    %224 = tpu.concatenate %201, %223 in 0 : vector<80x8xf32>, vector<80x8xf32> -> vector<160x8xf32>
    %225 = vector.extract_strided_slice %179 {offsets = [0, 8], sizes = [80, 8], strides = [1, 1]} : vector<160x48xf32> to vector<80x8xf32>
    %226 = vector.extract_strided_slice %179 {offsets = [0, 24], sizes = [80, 8], strides = [1, 1]} : vector<160x48xf32> to vector<80x8xf32>
    %227 = vector.extract_strided_slice %179 {offsets = [0, 40], sizes = [80, 8], strides = [1, 1]} : vector<160x48xf32> to vector<80x8xf32>
    %228 = arith.truncf %225 : vector<80x8xf32> to vector<80x8xbf16>
    %229 = tpu.transpose %226, [1, 0] : vector<80x8xf32> -> vector<8x80xf32>
    %230 = arith.truncf %229 : vector<8x80xf32> to vector<8x80xbf16>
    %cst_82 = arith.constant dense<0.000000e+00> : vector<80x80xf32>
    %231 = tpu.matmul %228, %230, %cst_82 {dimension_numbers = #tpu.dot_dimension_numbers<[1], [0], [0], [1], [0, 0, 1, 1], [], []>} : vector<80x8xbf16>, vector<8x80xbf16>, vector<80x80xf32> -> vector<80x80xf32>
    %cst_83 = arith.constant 0.353553385 : f32
    %232 = vector.broadcast %cst_83 : f32 to vector<80x80xf32>
    %233 = arith.mulf %231, %232 : vector<80x80xf32>
    %cst_84 = arith.constant dense<0xFF800000> : vector<80xf32>
    %234 = vector.multi_reduction <maximumf>, %233, %cst_84 [1] : vector<80x80xf32> to vector<80xf32>
    %235 = vector.shape_cast %234 : vector<80xf32> to vector<80x1xf32>
    %236 = vector.broadcast %235 : vector<80x1xf32> to vector<80x80xf32>
    %237 = arith.subf %233, %236 : vector<80x80xf32>
    %238 = math.exp %237 : vector<80x80xf32>
    %cst_85 = arith.constant dense<0.000000e+00> : vector<80xf32>
    %239 = vector.multi_reduction <add>, %238, %cst_85 [1] : vector<80x80xf32> to vector<80xf32>
    %240 = vector.shape_cast %239 : vector<80xf32> to vector<80x1xf32>
    %241 = tpu.reciprocal %240 {approx = true} : vector<80x1xf32> -> vector<80x1xf32>
    %242 = vector.broadcast %241 : vector<80x1xf32> to vector<80x80xf32>
    %243 = arith.mulf %238, %242 : vector<80x80xf32>
    %244 = arith.truncf %243 : vector<80x80xf32> to vector<80x80xbf16>
    %245 = arith.truncf %227 : vector<80x8xf32> to vector<80x8xbf16>
    %cst_86 = arith.constant dense<0.000000e+00> : vector<80x8xf32>
    %246 = tpu.matmul %244, %245, %cst_86 {dimension_numbers = #tpu.dot_dimension_numbers<[1], [0], [0], [1], [0, 0, 1, 1], [], []>} : vector<80x80xbf16>, vector<80x8xbf16>, vector<80x8xf32> -> vector<80x8xf32>
    %247 = vector.extract_strided_slice %179 {offsets = [80, 8], sizes = [80, 8], strides = [1, 1]} : vector<160x48xf32> to vector<80x8xf32>
    %248 = vector.extract_strided_slice %179 {offsets = [80, 24], sizes = [80, 8], strides = [1, 1]} : vector<160x48xf32> to vector<80x8xf32>
    %249 = vector.extract_strided_slice %179 {offsets = [80, 40], sizes = [80, 8], strides = [1, 1]} : vector<160x48xf32> to vector<80x8xf32>
    %250 = arith.truncf %247 : vector<80x8xf32> to vector<80x8xbf16>
    %251 = tpu.transpose %248, [1, 0] : vector<80x8xf32> -> vector<8x80xf32>
    %252 = arith.truncf %251 : vector<8x80xf32> to vector<8x80xbf16>
    %cst_87 = arith.constant dense<0.000000e+00> : vector<80x80xf32>
    %253 = tpu.matmul %250, %252, %cst_87 {dimension_numbers = #tpu.dot_dimension_numbers<[1], [0], [0], [1], [0, 0, 1, 1], [], []>} : vector<80x8xbf16>, vector<8x80xbf16>, vector<80x80xf32> -> vector<80x80xf32>
    %cst_88 = arith.constant 0.353553385 : f32
    %254 = vector.broadcast %cst_88 : f32 to vector<80x80xf32>
    %255 = arith.mulf %253, %254 : vector<80x80xf32>
    %cst_89 = arith.constant dense<0xFF800000> : vector<80xf32>
    %256 = vector.multi_reduction <maximumf>, %255, %cst_89 [1] : vector<80x80xf32> to vector<80xf32>
    %257 = vector.shape_cast %256 : vector<80xf32> to vector<80x1xf32>
    %258 = vector.broadcast %257 : vector<80x1xf32> to vector<80x80xf32>
    %259 = arith.subf %255, %258 : vector<80x80xf32>
    %260 = math.exp %259 : vector<80x80xf32>
    %cst_90 = arith.constant dense<0.000000e+00> : vector<80xf32>
    %261 = vector.multi_reduction <add>, %260, %cst_90 [1] : vector<80x80xf32> to vector<80xf32>
    %262 = vector.shape_cast %261 : vector<80xf32> to vector<80x1xf32>
    %263 = tpu.reciprocal %262 {approx = true} : vector<80x1xf32> -> vector<80x1xf32>
    %264 = vector.broadcast %263 : vector<80x1xf32> to vector<80x80xf32>
    %265 = arith.mulf %260, %264 : vector<80x80xf32>
    %266 = arith.truncf %265 : vector<80x80xf32> to vector<80x80xbf16>
    %267 = arith.truncf %249 : vector<80x8xf32> to vector<80x8xbf16>
    %cst_91 = arith.constant dense<0.000000e+00> : vector<80x8xf32>
    %268 = tpu.matmul %266, %267, %cst_91 {dimension_numbers = #tpu.dot_dimension_numbers<[1], [0], [0], [1], [0, 0, 1, 1], [], []>} : vector<80x80xbf16>, vector<80x8xbf16>, vector<80x8xf32> -> vector<80x8xf32>
    %269 = tpu.concatenate %246, %268 in 0 : vector<80x8xf32>, vector<80x8xf32> -> vector<160x8xf32>
    %270 = tpu.concatenate %224, %269 in 1 : vector<160x8xf32>, vector<160x8xf32> -> vector<160x16xf32>
    %271 = arith.truncf %270 : vector<160x16xf32> to vector<160x16xbf16>
    %c0_92 = arith.constant 0 : index
    %c0_93 = arith.constant 0 : index
    %272 = vector.load %arg22[%c0_92, %c0_93] : memref<16x16xbf16, #tpu.memory_space<vmem>>, vector<16x16xbf16>
    %cst_94 = arith.constant dense<0.000000e+00> : vector<160x16xf32>
    %273 = tpu.matmul %271, %272, %cst_94 {dimension_numbers = #tpu.dot_dimension_numbers<[1], [0], [0], [1], [0, 0, 1, 1], [], []>} : vector<160x16xbf16>, vector<16x16xbf16>, vector<160x16xf32> -> vector<160x16xf32>
    %c0_95 = arith.constant 0 : index
    %c0_96 = arith.constant 0 : index
    %274 = vector.load %arg23[%c0_95, %c0_96] : memref<1x16xf32, #tpu.memory_space<vmem>>, vector<1x16xf32>
    %275 = vector.broadcast %274 : vector<1x16xf32> to vector<160x16xf32>
    %276 = arith.addf %273, %275 : vector<160x16xf32>
    %277 = arith.addf %173, %276 : vector<160x16xf32>
    %cst_97 = arith.constant dense<0.000000e+00> : vector<160xf32>
    %278 = vector.multi_reduction <add>, %277, %cst_97 [1] : vector<160x16xf32> to vector<160xf32>
    %279 = vector.shape_cast %278 : vector<160xf32> to vector<160x1xf32>
    %cst_98 = arith.constant 1.600000e+01 : f32
    %280 = vector.broadcast %cst_98 : f32 to vector<160x1xf32>
    %281 = arith.divf %279, %280 : vector<160x1xf32>
    %282 = vector.broadcast %281 : vector<160x1xf32> to vector<160x16xf32>
    %283 = arith.subf %277, %282 : vector<160x16xf32>
    %284 = arith.mulf %283, %283 : vector<160x16xf32>
    %cst_99 = arith.constant dense<0.000000e+00> : vector<160xf32>
    %285 = vector.multi_reduction <add>, %284, %cst_99 [1] : vector<160x16xf32> to vector<160xf32>
    %286 = vector.shape_cast %285 : vector<160xf32> to vector<160x1xf32>
    %cst_100 = arith.constant 1.600000e+01 : f32
    %287 = vector.broadcast %cst_100 : f32 to vector<160x1xf32>
    %288 = arith.divf %286, %287 : vector<160x1xf32>
    %cst_101 = arith.constant 9.99999974E-6 : f32
    %289 = vector.broadcast %cst_101 : f32 to vector<160x1xf32>
    %290 = arith.addf %288, %289 : vector<160x1xf32>
    %291 = math.rsqrt %290 : vector<160x1xf32>
    %292 = vector.broadcast %291 : vector<160x1xf32> to vector<160x16xf32>
    %293 = arith.mulf %283, %292 : vector<160x16xf32>
    %c0_102 = arith.constant 0 : index
    %c0_103 = arith.constant 0 : index
    %294 = vector.load %arg24[%c0_102, %c0_103] : memref<1x16xf32, #tpu.memory_space<vmem>>, vector<1x16xf32>
    %295 = vector.broadcast %294 : vector<1x16xf32> to vector<160x16xf32>
    %296 = arith.mulf %293, %295 : vector<160x16xf32>
    %c0_104 = arith.constant 0 : index
    %c0_105 = arith.constant 0 : index
    %297 = vector.load %arg25[%c0_104, %c0_105] : memref<1x16xf32, #tpu.memory_space<vmem>>, vector<1x16xf32>
    %298 = vector.broadcast %297 : vector<1x16xf32> to vector<160x16xf32>
    %299 = arith.addf %296, %298 : vector<160x16xf32>
    %300 = arith.truncf %299 : vector<160x16xf32> to vector<160x16xbf16>
    %c0_106 = arith.constant 0 : index
    %c0_107 = arith.constant 0 : index
    %301 = vector.load %arg26[%c0_106, %c0_107] : memref<16x120xbf16, #tpu.memory_space<vmem>>, vector<16x120xbf16>
    %cst_108 = arith.constant dense<0.000000e+00> : vector<160x120xf32>
    %302 = tpu.matmul %300, %301, %cst_108 {dimension_numbers = #tpu.dot_dimension_numbers<[1], [0], [0], [1], [0, 0, 1, 1], [], []>} : vector<160x16xbf16>, vector<16x120xbf16>, vector<160x120xf32> -> vector<160x120xf32>
    %c0_109 = arith.constant 0 : index
    %c0_110 = arith.constant 0 : index
    %303 = vector.load %arg27[%c0_109, %c0_110] : memref<1x120xf32, #tpu.memory_space<vmem>>, vector<1x120xf32>
    %304 = vector.broadcast %303 : vector<1x120xf32> to vector<160x120xf32>
    %305 = arith.addf %302, %304 : vector<160x120xf32>
    %cst_111 = arith.constant 0.000000e+00 : f32
    %306 = vector.broadcast %cst_111 : f32 to vector<160x120xf32>
    %307 = arith.maximumf %305, %306 : vector<160x120xf32>
    %308 = arith.truncf %307 : vector<160x120xf32> to vector<160x120xbf16>
    %c0_112 = arith.constant 0 : index
    %c0_113 = arith.constant 0 : index
    %309 = vector.load %arg28[%c0_112, %c0_113] : memref<120x16xbf16, #tpu.memory_space<vmem>>, vector<120x16xbf16>
    %cst_114 = arith.constant dense<0.000000e+00> : vector<160x16xf32>
    %310 = tpu.matmul %308, %309, %cst_114 {dimension_numbers = #tpu.dot_dimension_numbers<[1], [0], [0], [1], [0, 0, 1, 1], [], []>} : vector<160x120xbf16>, vector<120x16xbf16>, vector<160x16xf32> -> vector<160x16xf32>
    %c0_115 = arith.constant 0 : index
    %c0_116 = arith.constant 0 : index
    %311 = vector.load %arg29[%c0_115, %c0_116] : memref<1x16xf32, #tpu.memory_space<vmem>>, vector<1x16xf32>
    %312 = vector.broadcast %311 : vector<1x16xf32> to vector<160x16xf32>
    %313 = arith.addf %310, %312 : vector<160x16xf32>
    %314 = arith.addf %299, %313 : vector<160x16xf32>
    %cst_117 = arith.constant dense<0.000000e+00> : vector<160xf32>
    %315 = vector.multi_reduction <add>, %314, %cst_117 [1] : vector<160x16xf32> to vector<160xf32>
    %316 = vector.shape_cast %315 : vector<160xf32> to vector<160x1xf32>
    %cst_118 = arith.constant 1.600000e+01 : f32
    %317 = vector.broadcast %cst_118 : f32 to vector<160x1xf32>
    %318 = arith.divf %316, %317 : vector<160x1xf32>
    %319 = vector.broadcast %318 : vector<160x1xf32> to vector<160x16xf32>
    %320 = arith.subf %314, %319 : vector<160x16xf32>
    %321 = arith.mulf %320, %320 : vector<160x16xf32>
    %cst_119 = arith.constant dense<0.000000e+00> : vector<160xf32>
    %322 = vector.multi_reduction <add>, %321, %cst_119 [1] : vector<160x16xf32> to vector<160xf32>
    %323 = vector.shape_cast %322 : vector<160xf32> to vector<160x1xf32>
    %cst_120 = arith.constant 1.600000e+01 : f32
    %324 = vector.broadcast %cst_120 : f32 to vector<160x1xf32>
    %325 = arith.divf %323, %324 : vector<160x1xf32>
    %cst_121 = arith.constant 9.99999974E-6 : f32
    %326 = vector.broadcast %cst_121 : f32 to vector<160x1xf32>
    %327 = arith.addf %325, %326 : vector<160x1xf32>
    %328 = math.rsqrt %327 : vector<160x1xf32>
    %329 = vector.broadcast %328 : vector<160x1xf32> to vector<160x16xf32>
    %330 = arith.mulf %320, %329 : vector<160x16xf32>
    %c0_122 = arith.constant 0 : index
    %c0_123 = arith.constant 0 : index
    %331 = vector.load %arg30[%c0_122, %c0_123] : memref<1x16xf32, #tpu.memory_space<vmem>>, vector<1x16xf32>
    %332 = vector.broadcast %331 : vector<1x16xf32> to vector<160x16xf32>
    %333 = arith.mulf %330, %332 : vector<160x16xf32>
    %c0_124 = arith.constant 0 : index
    %c0_125 = arith.constant 0 : index
    %334 = vector.load %arg31[%c0_124, %c0_125] : memref<1x16xf32, #tpu.memory_space<vmem>>, vector<1x16xf32>
    %335 = vector.broadcast %334 : vector<1x16xf32> to vector<160x16xf32>
    %336 = arith.addf %333, %335 : vector<160x16xf32>
    %337 = arith.truncf %336 : vector<160x16xf32> to vector<160x16xbf16>
    %c0_126 = arith.constant 0 : index
    %c0_127 = arith.constant 0 : index
    %338 = vector.load %arg4[%c0_126, %c0_127] : memref<16x631xbf16, #tpu.memory_space<vmem>>, vector<16x631xbf16>
    %cst_128 = arith.constant dense<0.000000e+00> : vector<160x631xf32>
    %339 = tpu.matmul %337, %338, %cst_128 {dimension_numbers = #tpu.dot_dimension_numbers<[1], [0], [0], [1], [0, 0, 1, 1], [], []>} : vector<160x16xbf16>, vector<16x631xbf16>, vector<160x631xf32> -> vector<160x631xf32>
    %c0_129 = arith.constant 0 : index
    %c0_130 = arith.constant 0 : index
    %340 = vector.load %arg5[%c0_129, %c0_130] : memref<1x631xf32, #tpu.memory_space<vmem>>, vector<1x631xf32>
    %341 = vector.broadcast %340 : vector<1x631xf32> to vector<160x631xf32>
    %342 = arith.addf %339, %341 : vector<160x631xf32>
    %c0_131 = arith.constant 0 : index
    %c0_132 = arith.constant 0 : index
    %343 = vector.load %arg6[%c0_131, %c0_132] : memref<160x631xf32, #tpu.memory_space<vmem>>, vector<160x631xf32>
    %344 = vector.extract_strided_slice %342 {offsets = [0, 0], sizes = [80, 631], strides = [1, 1]} : vector<160x631xf32> to vector<80x631xf32>
    %345 = vector.extract_strided_slice %343 {offsets = [0, 0], sizes = [80, 631], strides = [1, 1]} : vector<160x631xf32> to vector<80x631xf32>
    %346 = arith.mulf %344, %345 : vector<80x631xf32>
    %cst_133 = arith.constant dense<0.000000e+00> : vector<80xf32>
    %347 = vector.multi_reduction <add>, %346, %cst_133 [1] : vector<80x631xf32> to vector<80xf32>
    %348 = vector.shape_cast %347 : vector<80xf32> to vector<80x1xf32>
    %cst_134 = arith.constant dense<0.000000e+00> : vector<1xf32>
    %349 = vector.multi_reduction <add>, %348, %cst_134 [0] : vector<80x1xf32> to vector<1xf32>
    %350 = vector.shape_cast %349 : vector<1xf32> to vector<1x1xf32>
    %351 = vector.extract_strided_slice %343 {offsets = [80, 0], sizes = [80, 631], strides = [1, 1]} : vector<160x631xf32> to vector<80x631xf32>
    %352 = arith.mulf %344, %351 : vector<80x631xf32>
    %cst_135 = arith.constant dense<0.000000e+00> : vector<80xf32>
    %353 = vector.multi_reduction <add>, %352, %cst_135 [1] : vector<80x631xf32> to vector<80xf32>
    %354 = vector.shape_cast %353 : vector<80xf32> to vector<80x1xf32>
    %cst_136 = arith.constant dense<0.000000e+00> : vector<1xf32>
    %355 = vector.multi_reduction <add>, %354, %cst_136 [0] : vector<80x1xf32> to vector<1xf32>
    %356 = vector.shape_cast %355 : vector<1xf32> to vector<1x1xf32>
    %357 = tpu.concatenate %350, %356 in 1 : vector<1x1xf32>, vector<1x1xf32> -> vector<1x2xf32>
    %c0_137 = arith.constant 0 : index
    %c0_138 = arith.constant 0 : index
    %358 = vector.load %arg7[%c0_137, %c0_138] : memref<1x2xf32, #tpu.memory_space<vmem>>, vector<1x2xf32>
    %359 = arith.addf %357, %358 : vector<1x2xf32>
    %360 = vector.extract_strided_slice %342 {offsets = [80, 0], sizes = [80, 631], strides = [1, 1]} : vector<160x631xf32> to vector<80x631xf32>
    %361 = vector.extract_strided_slice %343 {offsets = [0, 0], sizes = [80, 631], strides = [1, 1]} : vector<160x631xf32> to vector<80x631xf32>
    %362 = arith.mulf %360, %361 : vector<80x631xf32>
    %cst_139 = arith.constant dense<0.000000e+00> : vector<80xf32>
    %363 = vector.multi_reduction <add>, %362, %cst_139 [1] : vector<80x631xf32> to vector<80xf32>
    %364 = vector.shape_cast %363 : vector<80xf32> to vector<80x1xf32>
    %cst_140 = arith.constant dense<0.000000e+00> : vector<1xf32>
    %365 = vector.multi_reduction <add>, %364, %cst_140 [0] : vector<80x1xf32> to vector<1xf32>
    %366 = vector.shape_cast %365 : vector<1xf32> to vector<1x1xf32>
    %367 = vector.extract_strided_slice %343 {offsets = [80, 0], sizes = [80, 631], strides = [1, 1]} : vector<160x631xf32> to vector<80x631xf32>
    %368 = arith.mulf %360, %367 : vector<80x631xf32>
    %cst_141 = arith.constant dense<0.000000e+00> : vector<80xf32>
    %369 = vector.multi_reduction <add>, %368, %cst_141 [1] : vector<80x631xf32> to vector<80xf32>
    %370 = vector.shape_cast %369 : vector<80xf32> to vector<80x1xf32>
    %cst_142 = arith.constant dense<0.000000e+00> : vector<1xf32>
    %371 = vector.multi_reduction <add>, %370, %cst_142 [0] : vector<80x1xf32> to vector<1xf32>
    %372 = vector.shape_cast %371 : vector<1xf32> to vector<1x1xf32>
    %373 = tpu.concatenate %366, %372 in 1 : vector<1x1xf32>, vector<1x1xf32> -> vector<1x2xf32>
    %c0_143 = arith.constant 0 : index
    %c0_144 = arith.constant 0 : index
    %374 = vector.load %arg7[%c0_143, %c0_144] : memref<1x2xf32, #tpu.memory_space<vmem>>, vector<1x2xf32>
    %375 = arith.addf %373, %374 : vector<1x2xf32>
    %376 = tpu.concatenate %359, %375 in 0 : vector<1x2xf32>, vector<1x2xf32> -> vector<2x2xf32>
    %cst_145 = arith.constant dense<0xFF800000> : vector<2xf32>
    %377 = vector.multi_reduction <maximumf>, %376, %cst_145 [1] : vector<2x2xf32> to vector<2xf32>
    %378 = vector.shape_cast %377 : vector<2xf32> to vector<2x1xf32>
    %379 = vector.broadcast %378 : vector<2x1xf32> to vector<2x2xf32>
    %380 = arith.subf %376, %379 : vector<2x2xf32>
    %381 = math.exp %380 : vector<2x2xf32>
    %cst_146 = arith.constant dense<0.000000e+00> : vector<2xf32>
    %382 = vector.multi_reduction <add>, %381, %cst_146 [1] : vector<2x2xf32> to vector<2xf32>
    %383 = vector.shape_cast %382 : vector<2xf32> to vector<2x1xf32>
    %384 = vector.broadcast %383 : vector<2x1xf32> to vector<2x2xf32>
    %385 = arith.divf %381, %384 : vector<2x2xf32>
    %c0_147 = arith.constant 0 : index
    %c0_148 = arith.constant 0 : index
    %386 = vector.load %arg32[%c0_147, %c0_148] : memref<2x2xf32, #tpu.memory_space<vmem>>, vector<2x2xf32>
    tpu.vector_store %arg32[%c0_147, %c0_148], %385 {strides = array<i32>} : memref<2x2xf32, #tpu.memory_space<vmem>>, vector<2x2xf32>,
    return
  }
}

</mosaic_0001>

<bundles_post_ra>
// kernel: cycle_loss_t_forward.1
= control target key start
LH: loop header
LB: loop body
LE: loop exit
PB: predicated region body
PF: predicated region fallthrough
CT: control target
= control target key end

     0   :  { %s11112_s6 = smov 1   ;;  %s11113_s10 = smov 2   ;;  %s16142_s0 = inlined_call_operand.smem [shape: u32[33], index: -1, kind: input, shape index: {}] }
   0x1   :  { %s11163_s5 = sld [smem:[%s16142_s0]]   ;;  %s11114_s14 = smov 3  }
   0x2   :  { %s11168_s9 = sld [smem:[%s16142_s0 + %s11112_s6]]   ;;  %s11115_s18 = smov 4  }
   0x3   :  { %s11173_s13 = sld [smem:[%s16142_s0 + %s11113_s10]]   ;;  %s11116_s22 = smov 5  }
   0x4   :  { %s11178_s17 = sld [smem:[%s16142_s0 + %s11114_s14]]   ;;  %s11117_s26 = smov 6  }
   0x5   :  { %s11183_s21 = sld [smem:[%s16142_s0 + %s11115_s18]]   ;;  %s11118_s30 = smov 7  }
   0x6   :  { %s11188_s25 = sld [smem:[%s16142_s0 + %s11116_s22]]   ;;  %s11119_s4 = smov 8  }
   0x7   :  { %s11193_s29 = sld [smem:[%s16142_s0 + %s11117_s26]]   ;;  %s11120_s10 = smov 9  }
   0x8   :  { %s11198_s3 = sld [smem:[%s16142_s0 + %s11118_s30]]   ;;  %s11121_s15 = smov 10  }
   0x9   :  { %s11203_s8 = sld [smem:[%s16142_s0 + %s11119_s4]]   ;;  %s11122_s20 = smov 11  }
   0xa   :  { %s11208_s14 = sld [smem:[%s16142_s0 + %s11120_s10]]   ;;  %s11123_s26 = smov 12  }
   0xb   :  { %16256 = sst [smem:[#allocation5_spill]] %s11183_s21  ;;  %s11124_s1 = smov 13  }
   0xc   :  { %16257 = sst [smem:[#allocation6_spill]] %s11188_s25  ;;  %s11125_s7 = smov 14  }
   0xd   :  { %16258 = sst [smem:[#allocation7_spill]] %s11193_s29  ;;  %s11127_s22 = smov 16  }
   0xe   :  { %16259 = sst [smem:[#allocation8_spill]] %s11198_s3  ;;  %s11128_s28 = smov 17  }
   0xf   :  { %s11213_s19 = sld [smem:[%s16142_s0 + %s11121_s15]]   ;;  %s11126_s15 = smov 15  }
  0x10   :  { %s11218_s24 = sld [smem:[%s16142_s0 + %s11122_s20]]  }
  0x11   :  { %s11223_s30 = sld [smem:[%s16142_s0 + %s11123_s26]]  }
  0x12   :  { %s11228_s6 = sld [smem:[%s16142_s0 + %s11124_s1]]  }
  0x13   :  { %s11233_s12 = sld [smem:[%s16142_s0 + %s11125_s7]]   ;;  %s11129_s7 = smov 18  }
  0x14   :  { %s11238_s20 = sld [smem:[%s16142_s0 + %s11126_s15]]   ;;  %s11130_s15 = smov 19  }
  0x15   :  { %s11243_s27 = sld [smem:[%s16142_s0 + %s11127_s22]]   ;;  %s11131_s22 = smov 20  }
  0x16   :  { %s11248_s4 = sld [smem:[%s16142_s0 + %s11128_s28]]   ;;  %s11132_s28 = smov 21  }
  0x17   :  { %s11253_s3 = sld [smem:[%s16142_s0 + %s11129_s7]]   ;;  %s11133_s7 = smov 22  }
  0x18   :  { %s11258_s29 = sld [smem:[%s16142_s0 + %s11130_s15]]   ;;  %s11134_s15 = smov 23  }
  0x19   :  { %s11263_s25 = sld [smem:[%s16142_s0 + %s11131_s22]]   ;;  %s11135_s22 = smov 24  }
  0x1a   :  { %s11268_s21 = sld [smem:[%s16142_s0 + %s11132_s28]]   ;;  %s11136_s28 = smov 25  }
  0x1d   :  { %16260 = sst [smem:[#allocation9_spill]] %s11253_s3 }
  0x1e   :  { %16261 = sst [smem:[#allocation10_spill]] %s11258_s29 }
  0x1f   :  { %16262 = sst [smem:[#allocation11_spill]] %s11263_s25 }
  0x20   :  { %16263 = sst [smem:[#allocation12_spill]] %s11268_s21 }
  0x21   :  { %s11273_s3 = sld [smem:[%s16142_s0 + %s11133_s7]]   ;;  %s11137_s7 = smov 26  }
  0x22   :  { %s11278_s29 = sld [smem:[%s16142_s0 + %s11134_s15]]   ;;  %s11138_s15 = smov 27  }
  0x23   :  { %s11283_s25 = sld [smem:[%s16142_s0 + %s11135_s22]]   ;;  %s11139_s22 = smov 28  }
  0x24   :  { %s11288_s21 = sld [smem:[%s16142_s0 + %s11136_s28]]   ;;  %s11140_s28 = smov 29  }
  0x27   :  { %16264 = sst [smem:[#allocation13_spill]] %s11273_s3 }
  0x28   :  { %16265 = sst [smem:[#allocation14_spill]] %s11278_s29 }
  0x29   :  { %16266 = sst [smem:[#allocation15_spill]] %s11283_s25 }
  0x2a   :  { %16267 = sst [smem:[#allocation16_spill]] %s11288_s21 }
  0x2b   :  { %s11293_s3 = sld [smem:[%s16142_s0 + %s11137_s7]]   ;;  %s11141_s7 = smov 30  }
  0x2c   :  { %s11298_s29 = sld [smem:[%s16142_s0 + %s11138_s15]]   ;;  %s11142_s15 = smov 31  }
  0x2d   :  { %s11303_s25 = sld [smem:[%s16142_s0 + %s11139_s22]]   ;;  %s11143_s22 = smov 32  }
  0x2e   :  { %s11308_s21 = sld [smem:[%s16142_s0 + %s11140_s28]]  }
  0x31   :  { %16268 = sst [smem:[#allocation17_spill]] %s11293_s3 }
  0x32   :  { %16269 = sst [smem:[#allocation18_spill]] %s11298_s29 }
  0x33   :  { %16270 = sst [smem:[#allocation19_spill]] %s11303_s25 }
  0x34   :  { %s11313_s3 = sld [smem:[%s16142_s0 + %s11141_s7]]  }
  0x35   :  { %s11318_s29 = sld [smem:[%s16142_s0 + %s11142_s15]]  }
  0x36   :  { %s11323_s25 = sld [smem:[%s16142_s0 + %s11143_s22]]  }
  0x37   :  { %v10463_v0 = vld [vmem:[%s11168_s9 + $0x78] sm:$0xff]   ;;  %v10467_v4 = vld [vmem:[%s11168_s9 + $0x70] sm:$0xff]   ;;  %v10471_v8 = vld [vmem:[%s11168_s9 + $0x68] sm:$0xff]   ;;  %vm800_vm0 = vcmask 1042432   ;;  %vm801_vm1 = vcmask 1043456   ;;  %v11144_v40 = vmov 65535  }
  0x38   :  { %v10464_v1 = vld [vmem:[%s11168_s9 + $0x38] sm:$0xff]   ;;  %8929 = vmatprep.subr.bf16.mxu0 %v10463_v0  ;;  %v10468_v5 = vld [vmem:[%s11168_s9 + $0x30] sm:$0xff]   ;;  %v10472_v9 = vld [vmem:[%s11168_s9 + $0x28] sm:$0xff]   ;;  %v802_v41 = vsel %vm800_vm0, 4294967295, %v11144_v40 }
  0x39   :  { %v10465_v2 = vld [vmem:[%s11168_s9 + $0xf8] sm:$0xff]   ;;  %8930 = vmatpush3.bf16.msra.mxu0 %v10464_v1  ;;  %v10469_v6 = vld [vmem:[%s11168_s9 + $0xf0] sm:$0xff]   ;;  %v10473_v10 = vld [vmem:[%s11168_s9 + $0xe8] sm:$0xff]   ;;  %v803_v44 = vsel %vm801_vm1, %v802_v41, 0 }
  0x3a   :  { %v10466_v3 = vld [vmem:[%s11168_s9 + $0xb8] sm:$0xff]   ;;  %9005 = vmatprep.subr.bf16.mxu1 %v10465_v2  ;;  %8931 = vmatprep.subr.bf16.mxu0 %v10467_v4  ;;  %v10470_v7 = vld [vmem:[%s11168_s9 + $0xb0] sm:$0xff]   ;;  %v10474_v11 = vld [vmem:[%s11168_s9 + $0xa8] sm:$0xff]  }
  0x3b   :  { %9006 = vmatpush3.bf16.msra.mxu1 %v10466_v3  ;;  %v10475_v12 = vld [vmem:[%s11168_s9 + $0x60] sm:$0xff]   ;;  %v10479_v16 = vld [vmem:[%s11168_s9 + $0x58] sm:$0xff]   ;;  %v10483_v20 = vld [vmem:[%s11168_s9 + $0x50] sm:$0xff]  }
  0x3c   :  { %9007 = vmatprep.subr.bf16.mxu1 %v10469_v6  ;;  %v10476_v13 = vld [vmem:[%s11168_s9 + $0x20] sm:$0xff]   ;;  %v10480_v17 = vld [vmem:[%s11168_s9 + $0x18] sm:$0xff]   ;;  %v10484_v21 = vld [vmem:[%s11168_s9 + $0x10] sm:$0xff]  }
  0x3d   :  { %8932 = vmatpush3.bf16.msra.mxu0 %v10468_v5  ;;  %v10477_v14 = vld [vmem:[%s11168_s9 + $0xe0] sm:$0xff]   ;;  %v10481_v18 = vld [vmem:[%s11168_s9 + $0xd8] sm:$0xff]   ;;  %v10485_v22 = vld [vmem:[%s11168_s9 + $0xd0] sm:$0xff]  }
  0x3e   :  { %8933 = vmatprep.subr.bf16.mxu0 %v10471_v8  ;;  %v10478_v15 = vld [vmem:[%s11168_s9 + $0xa0] sm:$0xff]   ;;  %v10482_v19 = vld [vmem:[%s11168_s9 + $0x98] sm:$0xff]   ;;  %v10486_v23 = vld [vmem:[%s11168_s9 + $0x90] sm:$0xff]  }
  0x3f   :  { %9008 = vmatpush3.bf16.msra.mxu1 %v10470_v7  ;;  %v10487_v24 = vld [vmem:[%s11168_s9 + $0x48] sm:$0xff]   ;;  %v10491_v28 = vld [vmem:[%s11168_s9 + $0x40] sm:$0xff]   ;;  %v10510_v43 = vld [vmem:[%s11163_s5 + $0x5c] ss:$20 sps:$4 sm:$0xff]  }
  0x40   :  { %9009 = vmatprep.subr.bf16.mxu1 %v10473_v10  ;;  %v10488_v25 = vld [vmem:[%s11168_s9 + $0x8] sm:$0xff]   ;;  %v10492_v29 = vld [vmem:[%s11168_s9] sm:$0xff]   ;;  %v10525_v45 = vld [vmem:[%s11168_s9 + $0x138] ss:$0 sps:$4 sm:$0xff]  }
  0x41   :  { %8934 = vmatpush3.bf16.msra.mxu0 %v10472_v9  ;;  %v10489_v26 = vld [vmem:[%s11168_s9 + $0xc8] sm:$0xff]   ;;  %v10493_v30 = vld [vmem:[%s11168_s9 + $0xc0] sm:$0xff]   ;;  %v805_v47 = vand.u32 %v10525_v45, %v803_v44  ;;  %v10513_v48 = vld [vmem:[%s11163_s5 + $0x7c] ss:$20 sps:$4 sm:$0xff]  }
  0x42   :  { %8935 = vmatprep.subr.bf16.mxu0 %v10475_v12  ;;  %v10490_v27 = vld [vmem:[%s11168_s9 + $0x88] sm:$0xff]   ;;  %v10494_v31 = vld [vmem:[%s11163_s5] ss:$20 sps:$4 sm:$0xff]   ;;  %v10496_v32 = vld [vmem:[%s11163_s5 + $0x4] ss:$20 sps:$4 sm:$0xff]  }
  0x43   :  { %9010 = vmatpush3.bf16.msra.mxu1 %v10474_v11  ;;  %v10497_v33 = vld [vmem:[%s11168_s9 + $0x80] sm:$0xff]   ;;  %839 = vmatprep.mubr.bf16.mxu0 %v10496_v32  ;;  %v10498_v34 = vld [vmem:[%s11163_s5 + $0x8] ss:$20 sps:$4 sm:$0xff]   ;;  %v10532_v49 = vld [vmem:[%s11168_s9 + $0x130] sm:$0xff]  }
  0x44   :  { %9011 = vmatprep.subr.bf16.mxu1 %v10477_v14  ;;  %v10500_v35 = vld [vmem:[%s11163_s5 + $0xc] ss:$20 sps:$4 sm:$0xff]   ;;  %v10504_v37 = vld [vmem:[%s11163_s5 + $0x34] ss:$20 sps:$4 sm:$0xff]   ;;  %v10506_v42 = vld [vmem:[%s11163_s5 + $0x30] ss:$20 sps:$4 sm:$0xff]  }
  0x45   :  { %8936 = vmatpush3.bf16.msra.mxu0 %v10476_v13  ;;  %v10501_v36 = vld [vmem:[%s11163_s5 + $0x2c] ss:$20 sps:$4 sm:$0xff]   ;;  %952 = vmatprep.mubr.bf16.mxu1 %v10500_v35  ;;  %v10503_v38 = vld [vmem:[%s11163_s5 + $0x28] ss:$20 sps:$4 sm:$0xff]   ;;  %v10509_v46 = vld [vmem:[%s11163_s5 + $0x50] ss:$20 sps:$4 sm:$0xff]  }
  0x46   :  { %8937 = vmatprep.subr.bf16.mxu0 %v10479_v16  ;;  %v10507_v39 = vld [vmem:[%s11163_s5 + $0x54] ss:$20 sps:$4 sm:$0xff]   ;;  %v10512_v50 = vld [vmem:[%s11163_s5 + $0x58] ss:$20 sps:$4 sm:$0xff]   ;;  %v10546_v55 = vld [vmem:[%s11168_s9 + $0x120] sm:$0xff]  }
  0x47   :  { %9012 = vmatpush3.bf16.msra.mxu1 %v10478_v15  ;;  %v10516_v51 = vld [vmem:[%s11163_s5 + $0x84] ss:$20 sps:$4 sm:$0xff]   ;;  %v10542_v52 = vld [vmem:[%s11168_s9 + $0x128] sm:$0xff]   ;;  %v10518_v56 = vld [vmem:[%s11163_s5 + $0x80] ss:$20 sps:$4 sm:$0xff]  }
  0x48   :  { %9013 = vmatprep.subr.bf16.mxu1 %v10481_v18  ;;  %v10515_v53 = vld [vmem:[%s11163_s5 + $0x78] ss:$20 sps:$4 sm:$0xff]   ;;  %v10521_v59 = vld [vmem:[%s11163_s5 + $0xa0] ss:$20 sps:$4 sm:$0xff]   ;;  %v10524_v62 = vld [vmem:[%s11163_s5 + $0xa8] ss:$20 sps:$4 sm:$0xff]  }
  0x49   :  { %8938 = vmatpush3.bf16.msra.mxu0 %v10480_v17  ;;  %v10519_v54 = vld [vmem:[%s11163_s5 + $0xa4] ss:$20 sps:$4 sm:$0xff]   ;;  %v10522_v57 = vld [vmem:[%s11163_s5 + $0xac] ss:$20 sps:$4 sm:$0xff]   ;;  %v10554_v60 = vld [vmem:[%s11168_s9 + $0x110] sm:$0xff]  }
  0x4a   :  { %8939 = vmatprep.subr.bf16.mxu0 %v10483_v20  ;;  %v10550_v58 = vld [vmem:[%s11168_s9 + $0x118] sm:$0xff]   ;;  %v10526_v61 = vld [vmem:[%s11163_s5 + $0xcc] ss:$20 sps:$4 sm:$0xff]   ;;  %v10529_v63 = vld [vmem:[%s11163_s5 + $0xd4] ss:$20 sps:$4 sm:$0xff]  }
  0x4b   :  { %9014 = vmatpush3.bf16.msra.mxu1 %v10482_v19  ;;  %v10558_v0 = vld [vmem:[%s11168_s9 + $0x108] sm:$0xff]   ;;  %v10562_v2 = vld [vmem:[%s11168_s9 + $0x100] sm:$0xff]   ;;  %v10536_v5 = vld [vmem:[%s11163_s5 + $0xfc] ss:$20 sps:$4 sm:$0xff]  }
  0x4c   :  { %9015 = vmatprep.subr.bf16.mxu1 %v10485_v22  ;;  %v10528_v1 = vld [vmem:[%s11163_s5 + $0xc8] ss:$20 sps:$4 sm:$0xff]   ;;  %v10531_v4 = vld [vmem:[%s11163_s5 + $0xd0] ss:$20 sps:$4 sm:$0xff]   ;;  %v10538_v8 = vld [vmem:[%s11163_s5 + $0xf8] ss:$20 sps:$4 sm:$0xff]  }
  0x4d   :  { %8940 = vmatpush3.bf16.msra.mxu0 %v10484_v21  ;;  %v10533_v3 = vld [vmem:[%s11163_s5 + $0xf4] ss:$20 sps:$4 sm:$0xff]   ;;  %v10535_v6 = vld [vmem:[%s11163_s5 + $0xf0] ss:$20 sps:$4 sm:$0xff]   ;;  %v10541_v10 = vld [vmem:[%s11163_s5 + $0x118] ss:$20 sps:$4 sm:$0xff]  }
  0x4e   :  { %8941 = vmatprep.subr.bf16.mxu0 %v10487_v24  ;;  %v10539_v7 = vld [vmem:[%s11163_s5 + $0x11c] ss:$20 sps:$4 sm:$0xff]   ;;  %v10543_v9 = vld [vmem:[%s11163_s5 + $0x124] ss:$20 sps:$4 sm:$0xff]   ;;  %v10545_v12 = vld [vmem:[%s11163_s5 + $0x120] ss:$20 sps:$4 sm:$0xff]  }
  0x4f   :  { %9016 = vmatpush3.bf16.msra.mxu1 %v10486_v23  ;;  %v10547_v11 = vld [vmem:[%s11163_s5 + $0x144] ss:$20 sps:$4 sm:$0xff]   ;;  %v10551_v13 = vld [vmem:[%s11163_s5 + $0x14c] ss:$20 sps:$4 sm:$0xff]  }
  0x50   :  { %9017 = vmatprep.subr.bf16.mxu1 %v10489_v26 }
  0x51   :  { %8942 = vmatpush3.bf16.msra.mxu0 %v10488_v25 }
  0x52   :  { %8943 = vmatprep.subr.bf16.mxu0 %v10491_v28 }
  0x53   :  { %9018 = vmatpush3.bf16.msra.mxu1 %v10490_v27 }
  0x54   :  { %9019 = vmatprep.subr.bf16.mxu1 %v10493_v30 }
  0x55   :  { %8944 = vmatpush3.bf16.msra.mxu0 %v10492_v29 }
  0x56   :  { %9340 = vmatprep.subr.bf16.mxu0 %v805_v47 }
  0x57   :  { %9020 = vmatpush3.bf16.msra.mxu1 %v10497_v33 }
  0x58   :  { %840 = vmatmul.mubr.bf16.vlgmr.msra.gmra.mxu0 %v10494_v31 }
  0x59   :  { %847 = vmatprep.mubr.bf16.mxu0 %v10501_v36  ;;  %9341 = vmatpush3.bf16.msra.mxu0 %v805_v47 }
  0x5a   :  { %953 = vmatmul.mubr.bf16.vlgmr.msra.gmra.mxu1 %v10498_v34  ;;  %9342 = vmatprep.subr.bf16.mxu0 %v10532_v49 }
  0x5b   :  { %960 = vmatprep.mubr.bf16.mxu1 %v10504_v37 }
  0x5d   :  { %9343 = vmatpush3.bf16.msra.mxu0 %v10532_v49 }
  0x5e   :  { %9344 = vmatprep.subr.bf16.mxu0 %v10542_v52 }
  0x60   :  { %848 = vmatmul.mubr.bf16.gmra.mxu0 %v10503_v38 }
  0x61   :  { %855 = vmatprep.mubr.bf16.mxu0 %v10507_v39  ;;  %9345 = vmatpush3.bf16.msra.mxu0 %v10542_v52 }
  0x62   :  { %961 = vmatmul.mubr.bf16.gmra.mxu1 %v10506_v42  ;;  %9346 = vmatprep.subr.bf16.mxu0 %v10546_v55 }
  0x63   :  { %968 = vmatprep.mubr.bf16.mxu1 %v10510_v43 }
  0x65   :  { %9347 = vmatpush3.bf16.msra.mxu0 %v10546_v55 }
  0x66   :  { %9348 = vmatprep.subr.bf16.mxu0 %v10550_v58 }
  0x68   :  { %856 = vmatmul.mubr.bf16.gmra.mxu0 %v10509_v46 }
  0x69   :  { %863 = vmatprep.mubr.bf16.mxu0 %v10513_v48  ;;  %9349 = vmatpush3.bf16.msra.mxu0 %v10550_v58 }
  0x6a   :  { %969 = vmatmul.mubr.bf16.gmra.mxu1 %v10512_v50  ;;  %9350 = vmatprep.subr.bf16.mxu0 %v10554_v60 }
  0x6b   :  { %976 = vmatprep.mubr.bf16.mxu1 %v10516_v51 }
  0x6d   :  { %9351 = vmatpush3.bf16.msra.mxu0 %v10554_v60 }
  0x6e   :  { %9352 = vmatprep.subr.bf16.mxu0 %v10558_v0 }
  0x70   :  { %864 = vmatmul.mubr.bf16.gmra.mxu0 %v10515_v53 }
  0x71   :  { %871 = vmatprep.mubr.bf16.mxu0 %v10519_v54  ;;  %9353 = vmatpush3.bf16.msra.mxu0 %v10558_v0 }
  0x72   :  { %977 = vmatmul.mubr.bf16.gmra.mxu1 %v10518_v56  ;;  %9354 = vmatprep.subr.bf16.mxu0 %v10562_v2 }
  0x73   :  { %984 = vmatprep.mubr.bf16.mxu1 %v10522_v57 }
  0x75   :  { %9355 = vmatpush3.bf16.msra.mxu0 %v10562_v2 }
  0x78   :  { %872 = vmatmul.mubr.bf16.gmra.mxu0 %v10521_v59 }
  0x79   :  { %879 = vmatprep.mubr.bf16.mxu0 %v10526_v61 }
  0x7a   :  { %985 = vmatmul.mubr.bf16.gmra.mxu1 %v10524_v62 }
  0x7b   :  { %992 = vmatprep.mubr.bf16.mxu1 %v10529_v63 }
  0x80   :  { %880 = vmatmul.mubr.bf16.gmra.mxu0 %v10528_v1 }
  0x81   :  { %887 = vmatprep.mubr.bf16.mxu0 %v10533_v3 }
  0x82   :  { %993 = vmatmul.mubr.bf16.gmra.mxu1 %v10531_v4 }
  0x83   :  { %1000 = vmatprep.mubr.bf16.mxu1 %v10536_v5 }
  0x88   :  { %888 = vmatmul.mubr.bf16.gmra.mxu0 %v10535_v6 }
  0x89   :  { %895 = vmatprep.mubr.bf16.mxu0 %v10539_v7 }
  0x8a   :  { %1001 = vmatmul.mubr.bf16.gmra.mxu1 %v10538_v8 }
  0x8b   :  { %1008 = vmatprep.mubr.bf16.mxu1 %v10543_v9 }
  0x90   :  { %896 = vmatmul.mubr.bf16.gmra.mxu0 %v10541_v10 }
  0x91   :  { %903 = vmatprep.mubr.bf16.mxu0 %v10547_v11 }
  0x92   :  { %70 = vsyncpa [#allocation3], 0  ;;  %1009 = vmatmul.mubr.bf16.gmra.mxu1 %v10545_v12  ;;  %v10549_v14 = vld [vmem:[%s11163_s5 + $0x140] ss:$20 sps:$4 sm:$0xff]   ;;  %v10553_v16 = vld [vmem:[%s11163_s5 + $0x148] ss:$20 sps:$4 sm:$0xff]  }
  0x93   :  { %1016 = vmatprep.mubr.bf16.mxu1 %v10551_v13  ;;  %v10555_v15 = vld [vmem:[%s11163_s5 + $0x16c] ss:$20 sps:$4 sm:$0xff]   ;;  %v10559_v17 = vld [vmem:[%s11163_s5 + $0x174] ss:$20 sps:$4 sm:$0xff]   ;;  %v10563_v19 = vld [vmem:[%s11163_s5 + $0x10] ss:$20 sps:$4 sm:$0xff]  }
  0x94   :  { %v10557_v18 = vld [vmem:[%s11163_s5 + $0x168] ss:$20 sps:$4 sm:$0xff]   ;;  %vm769_vm2 = vcmask 973824   ;;  %v10561_v20 = vld [vmem:[%s11163_s5 + $0x170] ss:$20 sps:$4 sm:$0xff]   ;;  %vm1221_vm3 = vcmask 130048  }
  0x95   :  { %v10564_v21 = vld [vmem:[%s11163_s5 + $0x38] ss:$20 sps:$4 sm:$0xff]   ;;  %v10565_v22 = vld [vmem:[%s11163_s5 + $0x60] ss:$20 sps:$4 sm:$0xff]   ;;  %v10566_v23 = vld [vmem:[%s11163_s5 + $0x88] ss:$20 sps:$4 sm:$0xff]  }
  0x96   :  { %v10567_v24 = vld [vmem:[%s11163_s5 + $0xb0] ss:$20 sps:$4 sm:$0xff]   ;;  %v10568_v25 = vld [vmem:[%s11163_s5 + $0xd8] ss:$20 sps:$4 sm:$0xff]   ;;  %v10569_v26 = vld [vmem:[%s11163_s5 + $0x100] ss:$20 sps:$4 sm:$0xff]  }
  0x97   :  { %v10570_v27 = vld [vmem:[%s11163_s5 + $0x128] ss:$20 sps:$4 sm:$0xff]   ;;  %v10571_v28 = vld [vmem:[%s11163_s5 + $0x150] ss:$20 sps:$4 sm:$0xff]   ;;  %v10572_v29 = vld [vmem:[%s11163_s5 + $0x178] ss:$20 sps:$4 sm:$0xff]  }
  0x98   :  { %904 = vmatmul.mubr.bf16.gmra.mxu0 %v10549_v14  ;;  %v10573_v30 = vld [vmem:[%s11203_s8] sm:$0xff]   ;;  %s11145_s0 = smov 112   ;;  %s11146_s5 = smov 104   ;;  %vm11149_vm4 = vmmov 0   ;;  %vm1443_vm5 = vcmask 64512   ;;  %vm1545_vm6 = vcmask 654336  }
  0x99   :  { %911 = vmatprep.mubr.bf16.mxu0 %v10555_v15  ;;  %9376 = vmatprep.subr.bf16.mxu1 %v10573_v30  ;;  %s11147_s9 = smov 120   ;;  %s11152_s8 = smov 8   ;;  %vm3823_vm7 = vcmask 982016   ;;  %vm8255_vm8 = vcmask 7168   ;;  %vm8534_vm9 = vcmask 1040384   ;;  %vm8536_vm10 = vcmask 9216  }
  0x9a   :  { %1017 = vmatmul.mubr.bf16.gmra.mxu1 %v10553_v16  ;;  %s16433_s28 = sld [smem:[#allocation16_spill]]  ;;  %s11154_s7 = smov [#allocation2]  }
  0x9b   :  { %1024 = vmatprep.mubr.bf16.mxu1 %v10559_v17  ;;  %9377 = vmatpush3.bf16.msra.mxu1 %v10573_v30  ;;  %s16434_s1 = sld [smem:[#allocation18_spill]]  ;;  %s8555_s10 = sshll.u32 %s11154_s7, 4  ;;  %s8556_s10 = int_to_ptr.vmem [resolvable:$true] %s8555_s10 }
  0x9c   :  { %s16680_s2 = sld [smem:[#allocation8_spill]]  ;;  %s11090_s11 = scalar_lea.vmem %s8556_s10, 32 }
  0x9d   :  { %p11091_p0 = scmp.ne.s32.totalorder %s8556_s10, %s11090_s11  ;;  %p11095_p1 = scmp.lt.s32.totalorder %s8556_s10, %s8556_s10 }
  0x9e   :  { %p11096_p2 = scmp.lt.s32.totalorder %s11090_s11, %s11090_s11 }
  0xa0   :  { %912 = vmatmul.mubr.bf16.gmra.mxu0 %v10557_v18  ;;  %p11097_p3 = por %p11096_p2, %p11095_p1 }
  0xa1   :  { %9356 = vmatprep.mubr.msk.bf16.mxu0 %vm769_vm2, %v10563_v19 }
  0xa2   :  { %1025 = vmatmul.mubr.bf16.gmra.mxu1 %v10561_v20  ;;  %p11098_p4 = pnand %p11097_p3, %p11091_p0 }
  0xa8   :  { %9357 = vmatmul.mubr.msk.bf16.vlgmr.msra.gmra.mxu0 %vm769_vm2, %v10564_v21 }
  0xa9   :  { %9360 = vmatprep.mubr.msk.bf16.mxu0 %vm769_vm2, %v10565_v22 }
  0xb0   :  { %9361 = vmatmul.mubr.msk.bf16.gmra.mxu0 %vm769_vm2, %v10566_v23 }
  0xb1   :  { %9364 = vmatprep.mubr.msk.bf16.mxu0 %vm769_vm2, %v10567_v24 }
  0xb8   :  { %9365 = vmatmul.mubr.msk.bf16.gmra.mxu0 %vm769_vm2, %v10568_v25 }
  0xb9   :  { %9368 = vmatprep.mubr.msk.bf16.mxu0 %vm769_vm2, %v10569_v26 }
  0xc0   :  { %9369 = vmatmul.mubr.msk.bf16.gmra.mxu0 %vm769_vm2, %v10570_v27 }
  0xc1   :  { %9372 = vmatprep.mubr.msk.bf16.mxu0 %vm769_vm2, %v10571_v28 }
  0xc8   :  { %9373 = vmatmul.mubr.msk.bf16.gmra.mxu0 %vm769_vm2, %v10572_v29 }
 0x118   :  { %v8945_v31 = vpop.f32.mrf.mxu0 }
 0x11a   :  { %v8946_v32 = vpop.f32.mrf.mxu0  ;;  %v11429_v34 = vpop.f32.mrf.mxu1 }
 0x11b   :  { %v11427_v33 = vadd.f32 %v8946_v32, %v8945_v31 }
 0x11c   :  { %v11431_v35 = vpop.f32.mrf.mxu0  ;;  %v11433_v36 = vpop.f32.mrf.mxu1 }
 0x11e   :  { %v11435_v37 = vpop.f32.mrf.mxu0  ;;  %v11437_v38 = vpop.f32.mrf.mxu1 }
 0x120   :  { %v8951_v39 = vpop.f32.mrf.mxu0  ;;  %v11439_v40 = vpop.f32.mrf.mxu1 }
 0x122   :  { %v8952_v41 = vpop.f32.mrf.mxu0  ;;  %v11443_v43 = vpop.f32.mrf.mxu1 }
 0x123   :  { %v11441_v42 = vadd.f32 %v8952_v41, %v8951_v39 }
 0x124   :  { %v8954_v44 = vpop.f32.mrf.mxu0  ;;  %v11445_v45 = vpop.f32.mrf.mxu1 }
 0x126   :  { %v8955_v46 = vpop.f32.mrf.mxu0  ;;  %v11447_v47 = vpop.f32.mrf.mxu1 }
 0x128   :  { %v8957_v48 = vpop.f32.mrf.mxu0  ;;  %v11449_v49 = vpop.f32.mrf.mxu1 }
 0x12a   :  { %v8958_v50 = vpop.f32.mrf.mxu0  ;;  %v11453_v52 = vpop.f32.mrf.mxu1 }
 0x12b   :  { %v11451_v51 = vadd.f32 %v8958_v50, %v8957_v48 }
 0x12c   :  { %v11455_v53 = vpop.f32.mrf.mxu0  ;;  %v11457_v54 = vpop.f32.mrf.mxu1 }
 0x12e   :  { %v11459_v55 = vpop.f32.mrf.mxu0  ;;  %v11461_v56 = vpop.f32.mrf.mxu1 }
 0x130   :  { %v11463_v57 = vpop.f32.mrf.mxu0  ;;  %v11465_v58 = vpop.f32.mrf.mxu1 }
 0x132   :  { %v8964_v59 = vpop.f32.mrf.mxu0  ;;  %v11467_v60 = vpop.f32.mrf.mxu1 }
 0x134   :  { %v8966_v61 = vpop.f32.mrf.mxu0  ;;  %v11469_v62 = vpop.f32.mrf.mxu1 }
 0x136   :  { %v8967_v63 = vpop.f32.mrf.mxu0  ;;  %v11471_v0 = vpop.f32.mrf.mxu1 }
 0x138   :  { %v11473_v1 = vpop.f32.mrf.mxu0  ;;  %v11475_v2 = vpop.f32.mrf.mxu1 }
 0x13a   :  { %v11477_v3 = vpop.f32.mrf.mxu0  ;;  %v11479_v4 = vpop.f32.mrf.mxu1 }
 0x13c   :  { %v11481_v5 = vpop.f32.mrf.mxu0  ;;  %v11483_v6 = vpop.f32.mrf.mxu1 }
 0x13e   :  { %v11485_v7 = vpop.f32.mrf.mxu0  ;;  %v11487_v8 = vpop.f32.mrf.mxu1 }
 0x140   :  { %v11489_v9 = vpop.f32.mrf.mxu0  ;;  %v11491_v10 = vpop.f32.mrf.mxu1 }
 0x142   :  { %v11493_v11 = vpop.f32.mrf.mxu0  ;;  %v11495_v12 = vpop.f32.mrf.mxu1 }
 0x144   :  { %v11497_v13 = vpop.f32.mrf.mxu0  ;;  %v11499_v14 = vpop.f32.mrf.mxu1 }
 0x146   :  { %v11501_v15 = vpop.f32.mrf.mxu0  ;;  %v11503_v16 = vpop.f32.mrf.mxu1 }
 0x148   :  { %v11505_v17 = vpop.f32.mrf.mxu0  ;;  %v11507_v18 = vpop.f32.mrf.mxu1 }
 0x14a   :  { %v11509_v19 = vpop.f32.mrf.mxu0  ;;  %v11511_v20 = vpop.f32.mrf.mxu1 }
 0x14b   :  { %16271 = vst [vmem:[#allocation20_spill] sm:$0xff] %v11511_v20  ;;  %v8956_v20 = vadd.f32 %v8955_v46, %v8954_v44 }
 0x14c   :  { %v11513_v21 = vpop.f32.mrf.mxu0  ;;  %v11515_v22 = vpop.f32.mrf.mxu1 }
 0x14d   :  { %16272 = vst [vmem:[#allocation21_spill] sm:$0xff] %v11515_v22 }
 0x14e   :  { %v11517_v23 = vpop.f32.mrf.mxu0  ;;  %v11519_v24 = vpop.f32.mrf.mxu1 }
 0x14f   :  { %16273 = vst [vmem:[#allocation22_spill] sm:$0xff] %v11519_v24 }
 0x150   :  { %v11521_v25 = vpop.f32.mrf.mxu0  ;;  %v11525_v27 = vpop.f32.mrf.mxu1 }
 0x151   :  { %16274 = vst [vmem:[#allocation23_spill] sm:$0xff] %v11525_v27  ;;  %v11548_v27 = vld [vmem:[%s11173_s13] ss:$0 sm:$0xff]  ;;  %s11150_s13 = smov 96  }
 0x152   :  { %v11523_v26 = vpop.f32.mrf.mxu0  ;;  %v11531_v30 = vpop.f32.mrf.mxu1  ;;  %v853_v46 = vadd.f32 %v8956_v20, %v11548_v27 }
 0x153   :  { %16275 = vst [vmem:[#allocation24_spill] sm:$0xff] %v11531_v30 }
 0x154   :  { %v11527_v28 = vpop.f32.mrf.mxu0  ;;  %v11537_v39 = vpop.f32.mrf.mxu1 }
 0x156   :  { %v11529_v29 = vpop.f32.mrf.mxu0  ;;  %v11543_v50 = vpop.f32.mrf.mxu1 }
 0x157   :  { %16280 = vst [vmem:[#allocation29_spill] sm:$0xff] %v11543_v50 }
 0x158   :  { %v11533_v31 = vpop.f32.mrf.mxu0  ;;  %v11552_v30 = vpop.f32.mrf.mxu1 }
 0x159   :  { %16276 = vst [vmem:[#allocation25_spill] sm:$0xff] %v11533_v31  ;;  %16283 = vst [vmem:[#allocation32_spill] sm:$0xff] %v11552_v30 }
 0x15a   :  { %v11535_v32 = vpop.f32.mrf.mxu0 }
 0x15b   :  { %16277 = vst [vmem:[#allocation26_spill] sm:$0xff] %v11535_v32  ;;  %v842_v32 = vadd.f32 %v11427_v33, %v11548_v27  ;;  %v11571_v33 = vpop.f32.mrf.mxu1 }
 0x15c   :  { %v11539_v41 = vpop.f32.mrf.mxu0  ;;  %16286 = vst [vmem:[#allocation35_spill] sm:$0xff] %v11571_v33 }
 0x15d   :  { %16278 = vst [vmem:[#allocation27_spill] sm:$0xff] %v11539_v41  ;;  %v9023_v41 = vadd.f32 %v11433_v36, %v11429_v34 }
 0x15e   :  { %v11541_v48 = vpop.f32.mrf.mxu0 }
 0x15f   :  { %16279 = vst [vmem:[#allocation28_spill] sm:$0xff] %v11541_v48  ;;  %v8950_v48 = vadd.f32 %v11435_v37, %v11431_v35  ;;  %v9026_v35 = vadd.f32 %v11439_v40, %v11437_v38  ;;  %v955_v36 = vadd.f32 %v9023_v41, %v842_v32  ;;  %v8965_v37 = vadd.f32 %v8964_v59, %v11463_v57  ;;  %v11603_v32 = vld [vmem:[%s11178_s17 + $0x8] sm:$0xff] }
 0x160   :  { %v11545_v24 = vpop.f32.mrf.mxu0  ;;  %v9035_v38 = vadd.f32 %v11457_v54, %v11453_v52 }
 0x161   :  { %16281 = vst [vmem:[#allocation30_spill] sm:$0xff] %v11545_v24  ;;  %v850_v24 = vadd.f32 %v11441_v42, %v11548_v27  ;;  %v845_v34 = vadd.f32 %v8950_v48, %v11548_v27  ;;  %v8968_v42 = vadd.f32 %v8967_v63, %v8966_v61  ;;  %v858_v48 = vadd.f32 %v11451_v51, %v11548_v27 }
 0x162   :  { %v11550_v22 = vpop.f32.mrf.mxu0  ;;  %v866_v59 = vadd.f32 %v8965_v37, %v11548_v27  ;;  %v9041_v61 = vadd.f32 %v11469_v62, %v11467_v60  ;;  %v9044_v63 = vadd.f32 %v11475_v2, %v11471_v0  ;;  %v11600_v62 = vld [vmem:[%s11178_s17] sm:$0xff]  ;;  %v8971_v0 = vadd.f32 %v11477_v3, %v11473_v1  ;;  %v11608_v2 = vld [vmem:[%s11178_s17 + $0x10] sm:$0xff] }
 0x163   :  { %16282 = vst [vmem:[#allocation31_spill] sm:$0xff] %v11550_v22  ;;  %v9029_v22 = vadd.f32 %v11445_v45, %v11443_v43  ;;  %v958_v57 = vadd.f32 %v9026_v35, %v845_v34  ;;  %v8974_v37 = vadd.f32 %v11485_v7, %v11481_v5  ;;  %v9053_v7 = vadd.f32 %v11499_v14, %v11495_v12 }
 0x164   :  { %v11554_v31 = vpop.f32.mrf.mxu0  ;;  %v9050_v12 = vadd.f32 %v11491_v10, %v11487_v8  ;;  %v8989_v8 = vadd.f32 %v11523_v26, %v11521_v25  ;;  %v8992_v10 = vadd.f32 %v11529_v29, %v11527_v28 }
 0x165   :  { %16284 = vst [vmem:[#allocation33_spill] sm:$0xff] %v11554_v31  ;;  %v9032_v31 = vadd.f32 %v11449_v49, %v11447_v47  ;;  %v963_v43 = vadd.f32 %v9029_v22, %v850_v24  ;;  %v8962_v47 = vadd.f32 %v11459_v55, %v11455_v53  ;;  %v11579_v49 = vpop.f32.mrf.mxu1  ;;  %v869_v53 = vadd.f32 %v8968_v42, %v11548_v27  ;;  %v11592_v24 = vld [vmem:[%s11178_s17 + $0x18] sm:$0xff] }
 0x166   :  { %v11566_v44 = vpop.f32.mrf.mxu0 }
 0x167   :  { %16285 = vst [vmem:[#allocation34_spill] sm:$0xff] %v11566_v44  ;;  %v966_v50 = vadd.f32 %v9032_v31, %v853_v46  ;;  %v861_v54 = vadd.f32 %v8962_v47, %v11548_v27  ;;  %v11597_v31 = vpop.f32.mrf.mxu1  ;;  %v8977_v46 = vadd.f32 %v11493_v11, %v11489_v9 }
 0x168   :  { %v9358_v30 = vpop.f32.mrf.mxu0 }
 0x169   :  { %v1076_v20 = vadd.f32 %v9358_v30, %v963_v43  ;;  %v9038_v30 = vadd.f32 %v11465_v58, %v11461_v56  ;;  %v8980_v56 = vadd.f32 %v11501_v15, %v11497_v13  ;;  %v11625_v9 = vpop.f32.mrf.mxu1  ;;  %v874_v43 = vadd.f32 %v8971_v0, %v11548_v27 }
 0x16a   :  { %v1067_v45 = vpop.f32.mrf.mxu0  ;;  %v882_v5 = vadd.f32 %v8977_v46, %v11548_v27 }
 0x16b   :  { %v1068_v44 = vadd.f32 %v1067_v45, %v955_v36  ;;  %v1148_v60 = vmul.f32 4.0, %v1076_v20  ;;  %v982_v36 = vadd.f32 %v9044_v63, %v869_v53  ;;  %v974_v42 = vadd.f32 %v9038_v30, %v861_v54  ;;  %v11650_v14 = vpop.f32.mrf.mxu1  ;;  %v11653_v63 = vld [vmem:[%s11178_s17 + $0x20] sm:$0xff] }
 0x16c   :  { %v9359_v33 = vpop.f32.mrf.mxu0  ;;  %v9047_v45 = vadd.f32 %v11483_v6, %v11479_v4  ;;  %v9056_v4 = vadd.f32 %v11507_v18, %v11503_v16  ;;  %v877_v53 = vadd.f32 %v8974_v37, %v11548_v27  ;;  %v8983_v18 = vadd.f32 %v11509_v19, %v11505_v17 }
 0x16d   :  { %v1079_v40 = vadd.f32 %v9359_v33, %v966_v50  ;;  %v1146_v51 = vmul.f32 4.0, %v1068_v44  ;;  %v971_v44 = vadd.f32 %v9035_v38, %v858_v48  ;;  %v979_v33 = vadd.f32 %v9041_v61, %v866_v59  ;;  %v11644_v59 = vld [vmem:[%s11178_s17 + $0x38] sm:$0xff]  ;;  %v9076_v25 = vpop.f32.mrf.mxu1 }
 0x16e   :  { %v1070_v55 = vpop.f32.mrf.mxu0  ;;  %v11628_v11 = vadd.f32 %v11608_v2, %v1148_v60  ;;  %v885_v48 = vadd.f32 %v8980_v56, %v11548_v27  ;;  %v987_v54 = vadd.f32 %v9047_v45, %v874_v43  ;;  %v995_v60 = vadd.f32 %v9053_v7, %v882_v5  ;;  %v16298_v45 = vld [vmem:[#allocation29_spill] sm:$0xff] }
 0x16f   :  { %v1149_v22 = vmul.f32 4.0, %v1079_v40  ;;  %v1071_v52 = vadd.f32 %v1070_v55, %v958_v57  ;;  %v11618_v35 = vadd.f32 %v11600_v62, %v1146_v51  ;;  %v11656_v51 = vld [vmem:[%s11178_s17 + $0x28] sm:$0xff]  ;;  %v990_v46 = vadd.f32 %v9050_v12, %v877_v53  ;;  %v9078_v53 = vpop.f32.mrf.mxu1 }
 0x170   :  { %v9362_v41 = vpop.f32.mrf.mxu0  ;;  %16290 = vst [vmem:[#allocation39_spill] sm:$0xff] %v11628_v11  ;;  %v890_v56 = vadd.f32 %v8983_v18, %v11548_v27 }
 0x171   :  { %v1147_v50 = vmul.f32 4.0, %v1071_v52  ;;  %v11615_v58 = vadd.f32 %v11592_v24, %v1149_v22  ;;  %16288 = vst [vmem:[#allocation37_spill] sm:$0xff] %v11618_v35  ;;  %v1092_v13 = vadd.f32 %v9362_v41, %v979_v33  ;;  %v11662_v22 = vld [vmem:[%s11178_s17 + $0x30] sm:$0xff]  ;;  %v16295_v33 = vld [vmem:[#allocation20_spill] sm:$0xff] }
 0x172   :  { %v1083_v34 = vpop.f32.mrf.mxu0 }
 0x173   :  { %16287 = vst [vmem:[#allocation36_spill] sm:$0xff] %v11615_v58  ;;  %v11621_v1 = vadd.f32 %v11603_v32, %v1147_v50  ;;  %v1084_v3 = vadd.f32 %v1083_v34, %v971_v44  ;;  %v1197_v38 = vpack.c.bf16 %v11615_v58, %v11628_v11  ;;  %v1152_v55 = vmul.f32 4.0, %v1092_v13  ;;  %v16296_v34 = vld [vmem:[#allocation21_spill] sm:$0xff] }
 0x174   :  { %v9363_v15 = vpop.f32.mrf.mxu0  ;;  %v998_v50 = vadd.f32 %v9056_v4, %v885_v48  ;;  %v8986_v44 = vadd.f32 %v11517_v23, %v11513_v21  ;;  %v898_v13 = vadd.f32 %v8989_v8, %v11548_v27  ;;  %v16297_v21 = vld [vmem:[#allocation24_spill] sm:$0xff]  ;;  %v16301_v4 = vld [vmem:[#allocation23_spill] sm:$0xff]  ;;  %v16304_v8 = vld [vmem:[#allocation30_spill] sm:$0xff] }
 0x175   :  { %16289 = vst [vmem:[#allocation38_spill] sm:$0xff] %v11621_v1  ;;  %v1196_v47 = vpack.c.bf16 %v11621_v1, %v11618_v35  ;;  %v1095_v20 = vadd.f32 %v9363_v15, %v982_v36  ;;  %v1150_v6 = vmul.f32 4.0, %v1084_v3  ;;  %v11680_v26 = vadd.f32 %v11662_v22, %v1152_v55  ;;  %v11702_v55 = vld [vmem:[%s11178_s17 + $0x40] sm:$0xff] }
 0x176   :  { %v1086_v40 = vpop.f32.mrf.mxu0  ;;  %v9059_v3 = vadd.f32 %v16296_v34, %v16295_v33  ;;  %v9065_v23 = vadd.f32 %v11537_v39, %v16297_v21  ;;  %v901_v15 = vadd.f32 %v8992_v10, %v11548_v27  ;;  %v16302_v39 = vld [vmem:[#allocation25_spill] sm:$0xff]  ;;  %v16305_v10 = vld [vmem:[#allocation31_spill] sm:$0xff] }
 0x177   :  { %v1153_v57 = vmul.f32 4.0, %v1095_v20  ;;  %v1087_v61 = vadd.f32 %v1086_v40, %v974_v42  ;;  %9378 = vmatprep.mubr.msk.bf16.mxu1 %vm1221_vm3, %v1196_v47  ;;  %v11672_v0 = vadd.f32 %v11653_v63, %v1150_v6  ;;  %16294 = vst [vmem:[#allocation43_spill] sm:$0xff] %v11680_v26  ;;  %v16299_v47 = vld [vmem:[#allocation32_spill] sm:$0xff]  ;;  %v16300_v40 = vld [vmem:[#allocation22_spill] sm:$0xff] }
 0x178   :  { %v9366_v16 = vpop.f32.mrf.mxu0  ;;  %9379 = vmatmul.mubr.msk.bf16.vlgmr.msra.gmra.mxu1 %vm1221_vm3, %v1197_v38  ;;  %v9068_v20 = vadd.f32 %v16299_v47, %v16298_v45  ;;  %v893_v38 = vadd.f32 %v8986_v44, %v11548_v27  ;;  %v9062_v6 = vadd.f32 %v16301_v4, %v16300_v40  ;;  %v16314_v45 = vld [vmem:[#allocation28_spill] sm:$0xff] }
 0x179   :  { %v1151_v52 = vmul.f32 4.0, %v1087_v61  ;;  %v11669_v30 = vadd.f32 %v11644_v59, %v1153_v57  ;;  %16292 = vst [vmem:[#allocation41_spill] sm:$0xff] %v11672_v0  ;;  %v1108_v28 = vadd.f32 %v9366_v16, %v995_v60  ;;  %v16303_v57 = vld [vmem:[#allocation26_spill] sm:$0xff]  ;;  %v11705_v16 = vld [vmem:[%s11178_s17 + $0x48] sm:$0xff]  ;;  %v9001_v60 = vadd.f32 %v16305_v10, %v16304_v8  ;;  %s11151_s17 = smov 88  }
 0x17a   :  { %v1099_v41 = vpop.f32.mrf.mxu0  ;;  %v8995_v61 = vadd.f32 %v16303_v57, %v16302_v39 }
 0x17b   :  { %16291 = vst [vmem:[#allocation40_spill] sm:$0xff] %v11669_v30  ;;  %v11675_v17 = vadd.f32 %v11656_v51, %v1151_v52  ;;  %v1100_v19 = vadd.f32 %v1099_v41, %v987_v54  ;;  %v1199_v42 = vpack.c.bf16 %v11669_v30, %v11680_v26  ;;  %v1156_v12 = vmul.f32 4.0, %v1108_v28  ;;  %v16306_v41 = vld [vmem:[#allocation33_spill] sm:$0xff] }
 0x17c   :  { %v9367_v29 = vpop.f32.mrf.mxu0  ;;  %v1003_v54 = vadd.f32 %v9059_v3, %v890_v56  ;;  %v906_v56 = vadd.f32 %v8995_v61, %v11548_v27  ;;  %v9079_v3 = vpop.f32.mrf.mxu1 }
 0x17d   :  { %16293 = vst [vmem:[#allocation42_spill] sm:$0xff] %v11675_v17  ;;  %v1198_v36 = vpack.c.bf16 %v11675_v17, %v11672_v0  ;;  %v1111_v37 = vadd.f32 %v9367_v29, %v998_v50  ;;  %v1154_v5 = vmul.f32 4.0, %v1100_v19  ;;  %v16307_v19 = vld [vmem:[#allocation34_spill] sm:$0xff]  ;;  %v1011_v29 = vadd.f32 %v9065_v23, %v898_v13  ;;  %v16313_v23 = vld [vmem:[#allocation27_spill] sm:$0xff] }
 0x17e   :  { %v1102_v43 = vpop.f32.mrf.mxu0  ;;  %v9004_v50 = vadd.f32 %v16307_v19, %v16306_v41  ;;  %v8998_v47 = vadd.f32 %v16314_v45, %v16313_v23  ;;  %v9080_v40 = vadd.f32 %v9079_v3, %v9078_v53 }
 0x17f   :  { %v1157_v7 = vmul.f32 4.0, %v1111_v37  ;;  %v1103_v48 = vadd.f32 %v1102_v43, %v990_v46  ;;  %9382 = vmatprep.mubr.msk.bf16.mxu1 %vm1221_vm3, %v1198_v36  ;;  %v11716_v46 = vadd.f32 %v11702_v55, %v1154_v5  ;;  %v1014_v36 = vadd.f32 %v9068_v20, %v901_v15  ;;  %v16312_v43 = vld [vmem:[#allocation35_spill] sm:$0xff] }
 0x180   :  { %v9370_v18 = vpop.f32.mrf.mxu0  ;;  %9383 = vmatmul.mubr.msk.bf16.gmra.mxu1 %vm1221_vm3, %v1199_v42  ;;  %v11723_v37 = vadd.f32 %v11600_v62, %v1156_v12  ;;  %v9071_v13 = vadd.f32 %v11579_v49, %v16312_v43  ;;  %v914_v15 = vadd.f32 %v9001_v60, %v11548_v27  ;;  %v9077_v20 = vadd.f32 %v9076_v25, %v11650_v14  ;;  %v11778_v43 = vld [vmem:[%s11208_s14] ss:$0 sm:$0xff]  ;;  %s16368_s14 = sld [smem:[#allocation11_spill]] }
 0x181   :  { %v1155_v52 = vmul.f32 4.0, %v1103_v48  ;;  %v11713_v44 = vadd.f32 %v11603_v32, %v1157_v7  ;;  %16309 = vst [vmem:[#allocation21_spill] sm:$0xff] %v11716_v46  ;;  %v1124_v21 = vadd.f32 %v9370_v18, %v1011_v29  ;;  %v1006_v32 = vadd.f32 %v9062_v6, %v893_v38 }
 0x182   :  { %v1115_v28 = vpop.f32.mrf.mxu0  ;;  %16311 = vst [vmem:[#allocation29_spill] sm:$0xff] %v11723_v37  ;;  %v917_v62 = vadd.f32 %v9004_v50, %v11548_v27  ;;  %v909_v61 = vadd.f32 %v8998_v47, %v11548_v27  ;;  %v9074_v14 = vadd.f32 %v11625_v9, %v11597_v31  ;;  %v1019_v12 = vadd.f32 %v9071_v13, %v906_v56 }
 0x183   :  { %16308 = vst [vmem:[#allocation20_spill] sm:$0xff] %v11713_v44  ;;  %v11719_v33 = vadd.f32 %v11705_v16, %v1155_v52  ;;  %v1116_v34 = vadd.f32 %v1115_v28, %v1003_v54  ;;  %v1201_v48 = vpack.c.bf16 %v11713_v44, %v11723_v37  ;;  %v1160_v39 = vmul.f32 4.0, %v1124_v21 }
 0x184   :  { %v9371_v42 = vpop.f32.mrf.mxu0  ;;  %v1027_v53 = vadd.f32 %v9077_v20, %v914_v15  ;;  %v1030_v60 = vadd.f32 %v9080_v40, %v917_v62  ;;  %v1022_v19 = vadd.f32 %v9074_v14, %v909_v61 }
 0x185   :  { %16310 = vst [vmem:[#allocation24_spill] sm:$0xff] %v11719_v33  ;;  %v1200_v5 = vpack.c.bf16 %v11719_v33, %v11716_v46  ;;  %v1127_v7 = vadd.f32 %v9371_v42, %v1014_v36  ;;  %v1158_v4 = vmul.f32 4.0, %v1116_v34  ;;  %v11751_v27 = vadd.f32 %v11653_v63, %v1160_v39 }
 0x186   :  { %v1118_v38 = vpop.f32.mrf.mxu0 }
 0x187   :  { %v1161_v49 = vmul.f32 4.0, %v1127_v7  ;;  %v1119_v6 = vadd.f32 %v1118_v38, %v1006_v32  ;;  %9386 = vmatprep.mubr.msk.bf16.mxu1 %vm1221_vm3, %v1200_v5  ;;  %v11745_v54 = vadd.f32 %v11608_v2, %v1158_v4  ;;  %16318 = vst [vmem:[#allocation25_spill] sm:$0xff] %v11751_v27 }
 0x188   :  { %v9374_v57 = vpop.f32.mrf.mxu0  ;;  %9387 = vmatmul.mubr.msk.bf16.gmra.mxu1 %vm1221_vm3, %v1201_v48 }
 0x189   :  { %v1159_v25 = vmul.f32 4.0, %v1119_v6  ;;  %v11742_v18 = vadd.f32 %v11656_v51, %v1161_v49  ;;  %16316 = vst [vmem:[#allocation22_spill] sm:$0xff] %v11745_v54  ;;  %v1140_v41 = vadd.f32 %v9374_v57, %v1027_v53 }
 0x18a   :  { %v1131_v52 = vpop.f32.mrf.mxu0 }
 0x18b   :  { %16315 = vst [vmem:[#allocation32_spill] sm:$0xff] %v11742_v18  ;;  %v11748_v8 = vadd.f32 %v11592_v24, %v1159_v25  ;;  %v1132_v10 = vadd.f32 %v1131_v52, %v1019_v12  ;;  %v1203_v50 = vpack.c.bf16 %v11742_v18, %v11751_v27  ;;  %v1164_v34 = vmul.f32 4.0, %v1140_v41 }
 0x18c   :  { %v9375_v31 = vpop.f32.mrf.mxu0 }
 0x18d   :  { %16317 = vst [vmem:[#allocation23_spill] sm:$0xff] %v11748_v8  ;;  %v1202_v9 = vpack.c.bf16 %v11748_v8, %v11745_v54  ;;  %v1143_v51 = vadd.f32 %v9375_v31, %v1030_v60  ;;  %v1162_v29 = vmul.f32 4.0, %v1132_v10  ;;  %v11769_v21 = vadd.f32 %v11702_v55, %v1164_v34 }
 0x18e   :  { %v1134_v2 = vpop.f32.mrf.mxu0 }
 0x18f   :  { %v1165_v24 = vmul.f32 4.0, %v1143_v51  ;;  %v1135_v28 = vadd.f32 %v1134_v2, %v1022_v19  ;;  %9390 = vmatprep.mubr.msk.bf16.mxu1 %vm1221_vm3, %v1202_v9  ;;  %v11763_v56 = vadd.f32 %v11662_v22, %v1162_v29  ;;  %16322 = vst [vmem:[#allocation33_spill] sm:$0xff] %v11769_v21 }
 0x190   :  { %9391 = vmatmul.mubr.msk.bf16.gmra.mxu1 %vm1221_vm3, %v1203_v50 }
 0x191   :  { %v1163_v63 = vmul.f32 4.0, %v1135_v28  ;;  %v11760_v36 = vadd.f32 %v11705_v16, %v1165_v24  ;;  %16320 = vst [vmem:[#allocation30_spill] sm:$0xff] %v11763_v56 }
 0x193   :  { %16319 = vst [vmem:[#allocation26_spill] sm:$0xff] %v11760_v36  ;;  %v11766_v3 = vadd.f32 %v11644_v59, %v1163_v63  ;;  %v1205_v32 = vpack.c.bf16 %v11760_v36, %v11769_v21 }
 0x195   :  { %16321 = vst [vmem:[#allocation31_spill] sm:$0xff] %v11766_v3  ;;  %v1204_v42 = vpack.c.bf16 %v11766_v3, %v11763_v56 }
 0x197   :  { %9394 = vmatprep.mubr.msk.bf16.mxu1 %vm1221_vm3, %v1204_v42 }
 0x198   :  { %9395 = vmatmul.mubr.msk.bf16.gmra.mxu1 %vm1221_vm3, %v1205_v32 }
 0x238   :  { %v9380_v16 = vpop.f32.mrf.mxu1 }
 0x239   :  { %v1295_v59 = vadd.f32 %v9380_v16, %v11778_v43 }
 0x23a   :  { %v1286_v22 = vpop.f32.mrf.mxu1 }
 0x23b   :  { %v1287_v45 = vadd.f32 %v11778_v43, %v1286_v22 }
 0x23c   :  { %v9381_v13 = vpop.f32.mrf.mxu1 }
 0x23d   :  { %v1298_v55 = vadd.f32 %v9381_v13, %v11778_v43 }
 0x23e   :  { %v1289_v23 = vpop.f32.mrf.mxu1 }
 0x23f   :  { %v11783_v47 = vpack.c.bf16 %v1298_v55, %v1295_v59  ;;  %v1290_v5 = vadd.f32 %v11778_v43, %v1289_v23  ;;  %v11786_v7 = vpack.i.bf16 %v1298_v55, %v1295_v59 }
 0x240   :  { %v9384_v15 = vpop.f32.mrf.mxu1 }
 0x241   :  { %v11788_v20 = vpack.c.bf16 %v1290_v5, %v1287_v45  ;;  %10064 = vrot.lane.b32.xlu0 %v11786_v7, %s11145_s0  ;;  %v10068_v48 = vpack.i.bf16 %v1290_v5, %v1287_v45  ;;  %v1311_v40 = vadd.f32 %v9384_v15, %v11778_v43 }
 0x242   :  { %v1302_v62 = vpop.f32.mrf.mxu1 }
 0x243   :  { %v1303_v6 = vadd.f32 %v11778_v43, %v1302_v62 }
 0x244   :  { %v9385_v38 = vpop.f32.mrf.mxu1 }
 0x245   :  { %v1314_v4 = vadd.f32 %v9385_v38, %v11778_v43  ;;  %10069 = vrot.lane.b32.xlu0 %v10068_v48, %s11145_s0 }
 0x246   :  { %v1305_v49 = vpop.f32.mrf.mxu1 }
 0x247   :  { %v11796_v39 = vpack.c.bf16 %v1314_v4, %v1311_v40  ;;  %v1306_v57 = vadd.f32 %v11778_v43, %v1305_v49  ;;  %v10078_v60 = vpack.i.bf16 %v1314_v4, %v1311_v40 }
 0x248   :  { %v9388_v61 = vpop.f32.mrf.mxu1 }
 0x249   :  { %v11799_v14 = vpack.c.bf16 %v1306_v57, %v1303_v6  ;;  %v10073_v25 = vpack.i.bf16 %v1306_v57, %v1303_v6  ;;  %v1327_v52 = vadd.f32 %v9388_v61, %v11778_v43 }
 0x24a   :  { %v1318_v12 = vpop.f32.mrf.mxu1 }
 0x24b   :  { %10074 = vrot.lane.b32.xlu1 %v10073_v25, %s11145_s0  ;;  %v1319_v31 = vadd.f32 %v11778_v43, %v1318_v12 }
 0x24c   :  { %v9389_v53 = vpop.f32.mrf.mxu1 }
 0x24d   :  { %v1330_v10 = vadd.f32 %v9389_v53, %v11778_v43 }
 0x24e   :  { %v1321_v41 = vpop.f32.mrf.mxu1 }
 0x24f   :  { %v11805_v9 = vpack.c.bf16 %v1330_v10, %v1327_v52  ;;  %v1322_v51 = vadd.f32 %v11778_v43, %v1321_v41  ;;  %10079 = vrot.lane.b32.xlu1 %v10078_v60, %s11145_s0  ;;  %v10083_v2 = vpack.i.bf16 %v1330_v10, %v1327_v52 }
 0x250   :  { %v9392_v19 = vpop.f32.mrf.mxu1 }
 0x251   :  { %v11809_v50 = vpack.c.bf16 %v1322_v51, %v1319_v31  ;;  %v10088_v29 = vpack.i.bf16 %v1322_v51, %v1319_v31  ;;  %v1343_v34 = vadd.f32 %v9392_v19, %v11778_v43  ;;  %v16146_v51 = vmov 0.0  }
 0x252   :  { %v1334_v24 = vpop.f32.mrf.mxu1  ;;  %9398 = vmatprep.subr.bf16.mxu0 %v16146_v51  ;;  %9420 = vmatprep.subr.bf16.mxu1 %v16146_v51 }
 0x253   :  { %10084 = vrot.lane.b32.xlu1 %v10083_v2, %s11145_s0  ;;  %10089 = vrot.lane.b32.xlu0 %v10088_v29, %s11145_s0  ;;  %v1335_v32 = vadd.f32 %v11778_v43, %v1334_v24 }
 0x254   :  { %v9393_v28 = vpop.f32.mrf.mxu1  ;;  %9400 = vmatprep.mubr.msk.bf16.mxu0 %vm11149_vm4, %v16146_v51  ;;  %9430 = vmatprep.mubr.msk.bf16.mxu1 %vm11149_vm4, %v16146_v51 }
 0x255   :  { %v1346_v63 = vadd.f32 %v9393_v28, %v11778_v43 }
 0x256   :  { %v1337_v42 = vpop.f32.mrf.mxu1 }
 0x257   :  { %v11816_v16 = vpack.c.bf16 %v1346_v63, %v1343_v34  ;;  %v1338_v22 = vadd.f32 %v11778_v43, %v1337_v42  ;;  %v10093_v13 = vpack.i.bf16 %v1346_v63, %v1343_v34 }
 0x258   :  { %v9396_v59 = vpop.f32.mrf.mxu1 }
 0x259   :  { %v11819_v55 = vpack.c.bf16 %v1338_v22, %v1335_v32  ;;  %10094 = vrot.lane.b32.xlu1 %v10093_v13, %s11145_s0  ;;  %v10098_v23 = vpack.i.bf16 %v1338_v22, %v1335_v32  ;;  %v1359_v15 = vadd.f32 %v9396_v59, %v11778_v43 }
 0x25a   :  { %v1350_v45 = vpop.f32.mrf.mxu1 }
 0x25b   :  { %10099 = vrot.lane.b32.xlu0 %v10098_v23, %s11145_s0  ;;  %v1351_v40 = vadd.f32 %v11778_v43, %v1350_v45 }
 0x25c   :  { %v9397_v5 = vpop.f32.mrf.mxu1 }
 0x25d   :  { %v1362_v62 = vadd.f32 %v9397_v5, %v11778_v43 }
 0x25e   :  { %v1353_v38 = vpop.f32.mrf.mxu1 }
 0x25f   :  { %v11826_v4 = vpack.c.bf16 %v1362_v62, %v1359_v15  ;;  %v1354_v49 = vadd.f32 %v11778_v43, %v1353_v38  ;;  %v10103_v6 = vpack.i.bf16 %v1362_v62, %v1359_v15 }
 0x261   :  { %v11829_v57 = vpack.c.bf16 %v1354_v49, %v1351_v40  ;;  %10104 = vrot.lane.b32.xlu1 %v10103_v6, %s11145_s0  ;;  %v10108_v61 = vpack.i.bf16 %v1354_v49, %v1351_v40 }
 0x263   :  { %10109 = vrot.lane.b32.xlu0 %v10108_v61, %s11145_s0 }
 0x265   :  { %10139 = vrot.lane.b32.xlu1 %v10068_v48, %s11146_s5 }
 0x269   :  { %10144 = vrot.lane.b32.xlu1 %v11786_v7, %s11146_s5 }
 0x26d   :  { %10149 = vrot.lane.b32.xlu1 %v10073_v25, %s11146_s5 }
 0x271   :  { %10154 = vrot.lane.b32.xlu1 %v10078_v60, %s11146_s5 }
 0x275   :  { %10159 = vrot.lane.b32.xlu1 %v10088_v29, %s11146_s5 }
 0x279   :  { %10164 = vrot.lane.b32.xlu1 %v10083_v2, %s11146_s5 }
 0x27d   :  { %10169 = vrot.lane.b32.xlu1 %v10098_v23, %s11146_s5 }
 0x281   :  { %10174 = vrot.lane.b32.xlu1 %v10093_v13, %s11146_s5 }
 0x285   :  { %10179 = vrot.lane.b32.xlu1 %v10108_v61, %s11146_s5 }
 0x289   :  { %10184 = vrot.lane.b32.xlu1 %v10103_v6, %s11146_s5 }
 0x28d   :  { %2234 = vrot.lane.b32.xlu1 %v11788_v20, %s11147_s9 }
 0x291   :  { %2236 = vrot.lane.b32.xlu1 %v11783_v47, %s11147_s9 }
 0x295   :  { %2238 = vrot.lane.b32.xlu1 %v11799_v14, %s11147_s9 }
 0x2b3   :  { %v10065_v43 = vpop.permute.xlu0 %10064 }
 0x2b4   :  { %v10066_v29 = vunpack.i.l.bf16 %v10065_v43  ;;  %v10067_v42 = vunpack.i.h.bf16 %v10065_v43 }
 0x2b7   :  { %v10070_v25 = vpop.permute.xlu0 %10069 }
 0x2b8   :  { %v10071_v52 = vunpack.i.l.bf16 %v10070_v25  ;;  %v10072_v31 = vunpack.i.h.bf16 %v10070_v25 }
 0x2bd   :  { %v10075_v7 = vpop.permute.xlu1 %10074 }
 0x2be   :  { %v10076_v59 = vunpack.i.l.bf16 %v10075_v7  ;;  %v10077_v62 = vunpack.i.h.bf16 %v10075_v7 }
 0x2c1   :  { %v10080_v48 = vpop.permute.xlu1 %10079 }
 0x2c2   :  { %v10081_v6 = vunpack.i.l.bf16 %v10080_v48 }
 0x2c5   :  { %v10085_v12 = vpop.permute.xlu1 %10084  ;;  %v10090_v41 = vpop.permute.xlu0 %10089 }
 0x2c6   :  { %v10086_v53 = vunpack.i.l.bf16 %v10085_v12  ;;  %v10087_v10 = vunpack.i.h.bf16 %v10085_v12  ;;  %v10082_v12 = vunpack.i.h.bf16 %v10080_v48  ;;  %v10092_v7 = vunpack.i.h.bf16 %v10090_v41 }
 0x2c8   :  { %v10113_v60 = vpack.i.bf16 %v10086_v53, %v10071_v52  ;;  %v10115_v19 = vpack.i.bf16 %v10087_v10, %v10072_v31 }
 0x2ca   :  { %10114 = vxpose.xlu0.b32.start [1/10] (short) (narrow) %v10113_v60, 8  ;;  %v10091_v60 = vunpack.i.l.bf16 %v10090_v41 }
 0x2cb   :  { %v10095_v28 = vpop.permute.xlu1 %10094 }
 0x2cc   :  { %v10096_v22 = vunpack.i.l.bf16 %v10095_v28  ;;  %v10097_v45 = vunpack.i.h.bf16 %v10095_v28 }
 0x2cd   :  { %v10100_v2 = vpop.permute.xlu0 %10099 }
 0x2ce   :  { %v10101_v24 = vunpack.i.l.bf16 %v10100_v2  ;;  %10116 = vxpose.xlu0.b32.cont [2/10] (short) (narrow) %v10115_v19, 8  ;;  %v10102_v34 = vunpack.i.h.bf16 %v10100_v2  ;;  %v10121_v5 = vpack.i.bf16 %v10096_v22, %v10076_v59  ;;  %v10123_v49 = vpack.i.bf16 %v10097_v45, %v10077_v62 }
 0x2d0   :  { %v10117_v63 = vpack.i.bf16 %v10101_v24, %v10066_v29  ;;  %v10119_v13 = vpack.i.bf16 %v10102_v34, %v10067_v42 }
 0x2d2   :  { %10118 = vxpose.xlu0.b32.cont [3/10] (short) (narrow) %v10117_v63, 8 }
 0x2d3   :  { %v10105_v32 = vpop.permute.xlu1 %10104 }
 0x2d4   :  { %v10106_v52 = vunpack.i.l.bf16 %v10105_v32  ;;  %v10107_v19 = vunpack.i.h.bf16 %v10105_v32 }
 0x2d5   :  { %v10110_v15 = vpop.permute.xlu0 %10109 }
 0x2d6   :  { %10120 = vxpose.xlu0.b32.cont [4/10] (short) (narrow) %v10119_v13, 8  ;;  %v10111_v40 = vunpack.i.l.bf16 %v10110_v15  ;;  %v10112_v25 = vunpack.i.h.bf16 %v10110_v15  ;;  %v10129_v2 = vpack.i.bf16 %v10106_v52, %v10091_v60  ;;  %v10131_v24 = vpack.i.bf16 %v10107_v19, %v10092_v7 }
 0x2d7   :  { %v10140_v23 = vpop.permute.xlu1 %10139 }
 0x2d8   :  { %v10125_v43 = vpack.i.bf16 %v10111_v40, %v10081_v6  ;;  %v10127_v10 = vpack.i.bf16 %v10112_v25, %v10082_v12  ;;  %v10141_v34 = vunpack.i.l.bf16 %v10140_v23  ;;  %v10142_v48 = vunpack.i.h.bf16 %v10140_v23 }
 0x2da   :  { %10122 = vxpose.xlu0.b32.cont [5/10] (short) (narrow) %v10121_v5, 8 }
 0x2db   :  { %v10145_v38 = vpop.permute.xlu1 %10144 }
 0x2dc   :  { %v10146_v45 = vunpack.i.l.bf16 %v10145_v38  ;;  %v10147_v62 = vunpack.i.h.bf16 %v10145_v38 }
 0x2de   :  { %10124 = vxpose.xlu0.b32.cont [6/10] (short) (narrow) %v10123_v49, 8 }
 0x2df   :  { %v10150_v61 = vpop.permute.xlu1 %10149 }
 0x2e0   :  { %v10151_v49 = vunpack.i.l.bf16 %v10150_v61  ;;  %v10152_v12 = vunpack.i.h.bf16 %v10150_v61 }
 0x2e2   :  { %10126 = vxpose.xlu0.b32.cont [7/10] (short) (narrow) %v10125_v43, 8 }
 0x2e3   :  { %v10155_v53 = vpop.permute.xlu1 %10154 }
 0x2e4   :  { %v10157_v7 = vunpack.i.h.bf16 %v10155_v53 }
 0x2e6   :  { %10128 = vxpose.xlu0.b32.cont [8/10] (short) (narrow) %v10127_v10, 8  ;;  %v10156_v10 = vunpack.i.l.bf16 %v10155_v53 }
 0x2e7   :  { %v10160_v31 = vpop.permute.xlu1 %10159 }
 0x2ea   :  { %10130 = vxpose.xlu0.b32.cont [9/10] (short) (narrow) %v10129_v2, 8 }
 0x2eb   :  { %v10165_v29 = vpop.permute.xlu1 %10164 }
 0x2ec   :  { %v10166_v28 = vunpack.i.l.bf16 %v10165_v29  ;;  %v10167_v63 = vunpack.i.h.bf16 %v10165_v29 }
 0x2ee   :  { %10132 = vxpose.xlu0.b32.end [10/10] (short) (narrow) %v10131_v24, 8  ;;  %v10188_v42 = vpack.i.bf16 %v10166_v28, %v10141_v34  ;;  %v10190_v59 = vpack.i.bf16 %v10167_v63, %v10142_v48  ;;  %v10161_v24 = vunpack.i.l.bf16 %v10160_v31  ;;  %v10162_v63 = vunpack.i.h.bf16 %v10160_v31 }
 0x2ef   :  { %v10170_v22 = vpop.permute.xlu1 %10169 }
 0x2f0   :  { %10189 = vxpose.xlu1.b32.start [1/10] (short) (narrow) %v10188_v42, 8  ;;  %v10171_v13 = vunpack.i.l.bf16 %v10170_v22  ;;  %v10172_v5 = vunpack.i.h.bf16 %v10170_v22 }
 0x2f2   :  { %v10192_v15 = vpack.i.bf16 %v10171_v13, %v10146_v45  ;;  %v10194_v40 = vpack.i.bf16 %v10172_v5, %v10147_v62 }
 0x2f3   :  { %v10175_v32 = vpop.permute.xlu1 %10174 }
 0x2f4   :  { %10191 = vxpose.xlu1.b32.cont [2/10] (short) (narrow) %v10190_v59, 8  ;;  %v10176_v41 = vunpack.i.l.bf16 %v10175_v32  ;;  %v10177_v6 = vunpack.i.h.bf16 %v10175_v32 }
 0x2f6   :  { %v10196_v25 = vpack.i.bf16 %v10176_v41, %v10151_v49  ;;  %v10198_v52 = vpack.i.bf16 %v10177_v6, %v10152_v12 }
 0x2f7   :  { %v10180_v43 = vpop.permute.xlu1 %10179 }
 0x2f8   :  { %10193 = vxpose.xlu1.b32.cont [3/10] (short) (narrow) %v10192_v15, 8  ;;  %v10181_v23 = vunpack.i.l.bf16 %v10180_v43  ;;  %v10182_v60 = vunpack.i.h.bf16 %v10180_v43 }
 0x2fa   :  { %v10200_v19 = vpack.i.bf16 %v10181_v23, %v10156_v10  ;;  %v10202_v29 = vpack.i.bf16 %v10182_v60, %v10157_v7 }
 0x2fb   :  { %v10185_v2 = vpop.permute.xlu1 %10184 }
 0x2fc   :  { %10195 = vxpose.xlu1.b32.cont [4/10] (short) (narrow) %v10194_v40, 8  ;;  %v10186_v38 = vunpack.i.l.bf16 %v10185_v2  ;;  %v10187_v28 = vunpack.i.h.bf16 %v10185_v2 }
 0x2fe   :  { %v10204_v34 = vpack.i.bf16 %v10186_v38, %v10161_v24  ;;  %v10206_v42 = vpack.i.bf16 %v10187_v28, %v10162_v63 }
 0x2ff   :  { %v2235_v45 = vpop.permute.xlu1 %2234 }
 0x300   :  { %10197 = vxpose.xlu1.b32.cont [5/10] (short) (narrow) %v10196_v25, 8 }
 0x304   :  { %10199 = vxpose.xlu1.b32.cont [6/10] (short) (narrow) %v10198_v52, 8 }
 0x308   :  { %10201 = vxpose.xlu1.b32.cont [7/10] (short) (narrow) %v10200_v19, 8 }
 0x30c   :  { %10203 = vxpose.xlu1.b32.cont [8/10] (short) (narrow) %v10202_v29, 8 }
 0x310   :  { %10205 = vxpose.xlu1.b32.cont [9/10] (short) (narrow) %v10204_v34, 8 }
 0x314   :  { %10207 = vxpose.xlu1.b32.end [10/10] (short) (narrow) %v10206_v42, 8 }
 0x317   :  { %2240 = vrot.lane.b32.xlu0 %v11796_v39, %s11147_s9 }
 0x31b   :  { %2242 = vrot.lane.b32.xlu0 %v11809_v50, %s11147_s9 }
 0x31f   :  { %2626 = vrot.lane.b32.xlu0 %v11805_v9, %s11147_s9 }
 0x323   :  { %2628 = vrot.lane.b32.xlu0 %v11819_v55, %s11147_s9 }
 0x327   :  { %2630 = vrot.lane.b32.xlu0 %v11816_v16, %s11147_s9 }
 0x32b   :  { %2632 = vrot.lane.b32.xlu0 %v11829_v57, %s11147_s9 }
 0x32f   :  { %2634 = vrot.lane.b32.xlu0 %v11826_v4, %s11147_s9 }
 0x332   :  { %1674 = vrot.lane.b32.xlu1 %v11809_v50, %s11150_s13 }
 0x333   :  { %1672 = vrot.lane.b32.xlu0 %v11796_v39, %s11150_s13 }
 0x336   :  { %1670 = vrot.lane.b32.xlu1 %v11799_v14, %s11150_s13 }
 0x337   :  { %1668 = vrot.lane.b32.xlu0 %v11783_v47, %s11150_s13 }
 0x33a   :  { %1666 = vrot.lane.b32.xlu1 %v11788_v20, %s11150_s13 }
 0x33b   :  { %2076 = vrot.lane.b32.xlu0 %v11826_v4, %s11150_s13 }
 0x33e   :  { %2072 = vrot.lane.b32.xlu1 %v11816_v16, %s11150_s13 }
 0x33f   :  { %2074 = vrot.lane.b32.xlu0 %v11829_v57, %s11150_s13 }
 0x342   :  { %2068 = vrot.lane.b32.xlu1 %v11805_v9, %s11150_s13 }
 0x343   :  { %2070 = vrot.lane.b32.xlu0 %v11819_v55, %s11150_s13 }
 0x346   :  { %v10133_v61 = vpop.trf.xlu0  ;;  %2466 = vrot.lane.b32.xlu1 %v11796_v39, %s11151_s17 }
 0x347   :  { %2468 = vrot.lane.b32.xlu0 %v11809_v50, %s11151_s17  ;;  %v10134_v53 = vunpack.i.l.bf16 %v10133_v61  ;;  %v10137_v31 = vunpack.i.h.bf16 %v10133_v61 }
 0x349   :  { %v1442_v22 = vpack.c.bf16 %v10134_v53, %v10134_v53  ;;  %v1846_v13 = vpack.c.bf16 %v10137_v31, %v10137_v31 }
 0x34a   :  { %2462 = vrot.lane.b32.xlu1 %v11783_v47, %s11151_s17 }
 0x34b   :  { %2464 = vrot.lane.b32.xlu0 %v11799_v14, %s11151_s17  ;;  %v1460_v48 = vsel %vm801_vm1, %v1442_v22, 0  ;;  %v1863_v59 = vsel %vm801_vm1, %v1846_v13, 0 }
 0x34c   :  { %9399 = vmatpush3.bf16.msra.mxu0 %v1460_v48 }
 0x34d   :  { %9450 = vmatprep.subr.bf16.mxu0 %v16146_v51 }
 0x34f   :  { %2460 = vrot.lane.b32.xlu0 %v11788_v20, %s11151_s17  ;;  %9401 = vmatmul.mubr.msk.bf16.vlgmr.msra.gmra.mxu0 %vm1443_vm5, %v11788_v20  ;;  %v2237_v20 = vpop.permute.xlu1 %2236 }
 0x350   :  { %9451 = vmatpush3.bf16.msra.mxu0 %v1863_v59  ;;  %9404 = vmatprep.mubr.msk.bf16.mxu0 %vm11149_vm4, %v16146_v51 }
 0x351   :  { %9502 = vmatprep.subr.bf16.mxu0 %v16146_v51 }
 0x353   :  { %v2239_v5 = vpop.permute.xlu1 %2238 }
 0x357   :  { %9405 = vmatmul.mubr.msk.bf16.gmra.mxu0 %vm1443_vm5, %v11783_v47 }
 0x358   :  { %9408 = vmatprep.mubr.msk.bf16.mxu0 %vm11149_vm4, %v16146_v51 }
 0x35f   :  { %9409 = vmatmul.mubr.msk.bf16.gmra.mxu0 %vm1443_vm5, %v11799_v14 }
 0x360   :  { %9412 = vmatprep.mubr.msk.bf16.mxu0 %vm11149_vm4, %v16146_v51 }
 0x367   :  { %9413 = vmatmul.mubr.msk.bf16.gmra.mxu0 %vm1443_vm5, %v11796_v39 }
 0x368   :  { %9416 = vmatprep.mubr.msk.bf16.mxu0 %vm11149_vm4, %v16146_v51 }
 0x36c   :  { %v10208_v15 = vpop.trf.xlu1 }
 0x36d   :  { %v10209_v47 = vunpack.i.l.bf16 %v10208_v15  ;;  %v10212_v40 = vunpack.i.h.bf16 %v10208_v15 }
 0x36f   :  { %9417 = vmatmul.mubr.msk.bf16.gmra.mxu0 %vm1443_vm5, %v11809_v50  ;;  %v2233_v14 = vpack.c.bf16 %v10209_v47, %v10209_v47  ;;  %v2625_v6 = vpack.c.bf16 %v10212_v40, %v10212_v40 }
 0x370   :  { %9452 = vmatprep.mubr.msk.bf16.mxu0 %vm11149_vm4, %v16146_v51 }
 0x371   :  { %v2260_v32 = vsel %vm801_vm1, %v2233_v14, 0  ;;  %v2652_v43 = vsel %vm801_vm1, %v2625_v6, 0 }
 0x377   :  { %9453 = vmatmul.mubr.msk.bf16.vlgmr.msra.gmra.mxu0 %vm1443_vm5, %v11805_v9 }
 0x378   :  { %9456 = vmatprep.mubr.msk.bf16.mxu0 %vm11149_vm4, %v16146_v51  ;;  %9503 = vmatpush3.bf16.msra.mxu0 %v2260_v32 }
 0x379   :  { %9554 = vmatprep.subr.bf16.mxu0 %v16146_v51 }
 0x37f   :  { %9457 = vmatmul.mubr.msk.bf16.gmra.mxu0 %vm1443_vm5, %v11819_v55 }
 0x380   :  { %9460 = vmatprep.mubr.msk.bf16.mxu0 %vm11149_vm4, %v16146_v51 }
 0x387   :  { %9461 = vmatmul.mubr.msk.bf16.gmra.mxu0 %vm1443_vm5, %v11816_v16 }
 0x388   :  { %9464 = vmatprep.mubr.msk.bf16.mxu0 %vm11149_vm4, %v16146_v51 }
 0x389   :  { %v2241_v39 = vpop.permute.xlu0 %2240 }
 0x38d   :  { %v2243_v50 = vpop.permute.xlu0 %2242 }
 0x38f   :  { %9465 = vmatmul.mubr.msk.bf16.gmra.mxu0 %vm1443_vm5, %v11829_v57 }
 0x390   :  { %9468 = vmatprep.mubr.msk.bf16.mxu0 %vm11149_vm4, %v16146_v51 }
 0x391   :  { %v2627_v62 = vpop.permute.xlu0 %2626 }
 0x395   :  { %v2629_v41 = vpop.permute.xlu0 %2628 }
 0x397   :  { %9469 = vmatmul.mubr.msk.bf16.gmra.mxu0 %vm1443_vm5, %v11826_v4 }
 0x398   :  { %9504 = vmatprep.mubr.msk.bf16.mxu0 %vm11149_vm4, %v16146_v51 }
 0x399   :  { %v2631_v49 = vpop.permute.xlu0 %2630 }
 0x39d   :  { %v2633_v25 = vpop.permute.xlu0 %2632 }
 0x39f   :  { %9505 = vmatmul.mubr.msk.bf16.vlgmr.msra.gmra.mxu0 %vm1443_vm5, %v2235_v45 }
 0x3a0   :  { %9508 = vmatprep.mubr.msk.bf16.mxu0 %vm11149_vm4, %v16146_v51  ;;  %9555 = vmatpush3.bf16.msra.mxu0 %v2652_v43 }
 0x3a1   :  { %v2635_v12 = vpop.permute.xlu0 %2634 }
 0x3a4   :  { %v1675_v23 = vpop.permute.xlu1 %1674 }
 0x3a5   :  { %9421 = vmatpush3.bf16.msra.mxu1 %v1675_v23  ;;  %v1673_v52 = vpop.permute.xlu0 %1672 }
 0x3a6   :  { %9422 = vmatprep.subr.bf16.mxu1 %v16146_v51 }
 0x3a7   :  { %9509 = vmatmul.mubr.msk.bf16.gmra.mxu0 %vm1443_vm5, %v2237_v20 }
 0x3a8   :  { %9512 = vmatprep.mubr.msk.bf16.mxu0 %vm11149_vm4, %v16146_v51  ;;  %v1671_v10 = vpop.permute.xlu1 %1670 }
 0x3a9   :  { %9423 = vmatpush3.bf16.msra.mxu1 %v1673_v52  ;;  %v1669_v60 = vpop.permute.xlu0 %1668 }
 0x3aa   :  { %9424 = vmatprep.subr.bf16.mxu1 %v16146_v51 }
 0x3ac   :  { %v1667_v19 = vpop.permute.xlu1 %1666 }
 0x3ad   :  { %9425 = vmatpush3.bf16.msra.mxu1 %v1671_v10 }
 0x3ae   :  { %9426 = vmatprep.subr.bf16.mxu1 %v16146_v51 }
 0x3af   :  { %9513 = vmatmul.mubr.msk.bf16.gmra.mxu0 %vm1443_vm5, %v2239_v5 }
 0x3b0   :  { %9516 = vmatprep.mubr.msk.bf16.mxu0 %vm11149_vm4, %v16146_v51 }
 0x3b1   :  { %9427 = vmatpush3.bf16.msra.mxu1 %v1669_v60 }
 0x3b2   :  { %9428 = vmatprep.subr.bf16.mxu1 %v16146_v51 }
 0x3b5   :  { %9429 = vmatpush3.bf16.msra.mxu1 %v1667_v19 }
 0x3b6   :  { %9472 = vmatprep.subr.bf16.mxu1 %v16146_v51 }
 0x3b7   :  { %9517 = vmatmul.mubr.msk.bf16.gmra.mxu0 %vm1443_vm5, %v2241_v39 }
 0x3b8   :  { %9520 = vmatprep.mubr.msk.bf16.mxu0 %vm11149_vm4, %v16146_v51 }
 0x3bf   :  { %9521 = vmatmul.mubr.msk.bf16.gmra.mxu0 %vm1443_vm5, %v2243_v50 }
 0x3c0   :  { %9556 = vmatprep.mubr.msk.bf16.mxu0 %vm11149_vm4, %v16146_v51 }
 0x3c7   :  { %9557 = vmatmul.mubr.msk.bf16.vlgmr.msra.gmra.mxu0 %vm1443_vm5, %v2627_v62 }
 0x3c8   :  { %9560 = vmatprep.mubr.msk.bf16.mxu0 %vm11149_vm4, %v16146_v51 }
 0x3cf   :  { %9561 = vmatmul.mubr.msk.bf16.gmra.mxu0 %vm1443_vm5, %v2629_v41 }
 0x3d0   :  { %9564 = vmatprep.mubr.msk.bf16.mxu0 %vm11149_vm4, %v16146_v51 }
 0x3d7   :  { %9565 = vmatmul.mubr.msk.bf16.gmra.mxu0 %vm1443_vm5, %v2631_v49 }
 0x3d8   :  { %9568 = vmatprep.mubr.msk.bf16.mxu0 %vm11149_vm4, %v16146_v51 }
 0x3df   :  { %9569 = vmatmul.mubr.msk.bf16.gmra.mxu0 %vm1443_vm5, %v2633_v25 }
 0x3e0   :  { %9572 = vmatprep.mubr.msk.bf16.mxu0 %vm11149_vm4, %v16146_v51 }
 0x3e7   :  { %9573 = vmatmul.mubr.msk.bf16.gmra.mxu0 %vm1443_vm5, %v2635_v12 }
 0x40f   :  { %v1496_v2 = vpop.f32.mrf.mxu0 }
 0x410   :  { %v11980_v7 = vmul.f32 0.35355338, %v1496_v2 }
 0x411   :  { %v9402_v38 = vpop.f32.mrf.mxu0 }
 0x412   :  { %v1546_v29 = vsel %vm1545_vm6, %v11980_v7, -inf }
 0x413   :  { %1547 = vmax.xlane.f32.xlu1 %v1546_v29  ;;  %v1499_v24 = vpop.f32.mrf.mxu0 }
 0x414   :  { %v11984_v28 = vmul.f32 0.35355338, %v1499_v24 }
 0x415   :  { %v9403_v34 = vpop.f32.mrf.mxu0 }
 0x416   :  { %v1549_v63 = vsel %vm1545_vm6, %v11984_v28, -inf }
 0x417   :  { %1550 = vmax.xlane.f32.xlu0 %v1549_v63  ;;  %v1504_v42 = vpop.f32.mrf.mxu0 }
 0x418   :  { %v11988_v61 = vmul.f32 0.35355338, %v1504_v42 }
 0x419   :  { %v9406_v53 = vpop.f32.mrf.mxu0 }
 0x41a   :  { %v1552_v31 = vsel %vm1545_vm6, %v11988_v61, -inf }
 0x41b   :  { %1553 = vmax.xlane.f32.xlu0 %v1552_v31  ;;  %v1507_v22 = vpop.f32.mrf.mxu0 }
 0x41c   :  { %v11992_v48 = vmul.f32 0.35355338, %v1507_v22 }
 0x41d   :  { %v9407_v13 = vpop.f32.mrf.mxu0 }
 0x41e   :  { %v1555_v59 = vsel %vm1545_vm6, %v11992_v48, -inf }
 0x41f   :  { %1556 = vmax.xlane.f32.xlu0 %v1555_v59  ;;  %v1512_v45 = vpop.f32.mrf.mxu0 }
 0x420   :  { %v12014_v24 = vmul.f32 0.35355338, %v1512_v45 }
 0x421   :  { %v9410_v20 = vpop.f32.mrf.mxu0 }
 0x422   :  { %v1558_v13 = vsel %vm1545_vm6, %v12014_v24, -inf }
 0x423   :  { %v1515_v5 = vpop.f32.mrf.mxu0 }
 0x424   :  { %v11996_v15 = vmul.f32 0.35355338, %v1515_v5  ;;  %2860 = vrot.lane.b32.xlu1 %v11826_v4, %s11151_s17 }
 0x425   :  { %v9411_v47 = vpop.f32.mrf.mxu0 }
 0x426   :  { %v1561_v14 = vsel %vm1545_vm6, %v11996_v15, -inf }
 0x427   :  { %1562 = vmax.xlane.f32.xlu0 %v1561_v14  ;;  %v1520_v32 = vpop.f32.mrf.mxu0 }
 0x428   :  { %v12020_v31 = vmul.f32 0.35355338, %v1520_v32 }
 0x429   :  { %v9414_v39 = vpop.f32.mrf.mxu0 }
 0x42a   :  { %v1564_v5 = vsel %vm1545_vm6, %v12020_v31, -inf }
 0x42b   :  { %v1523_v50 = vpop.f32.mrf.mxu0 }
 0x42c   :  { %v12002_v62 = vmul.f32 0.35355338, %v1523_v50 }
 0x42d   :  { %v9415_v41 = vpop.f32.mrf.mxu0 }
 0x42e   :  { %v1567_v40 = vsel %vm1545_vm6, %v12002_v62, -inf }
 0x42f   :  { %1568 = vmax.xlane.f32.xlu0 %v1567_v40  ;;  %v1528_v49 = vpop.f32.mrf.mxu0 }
 0x430   :  { %v12024_v20 = vmul.f32 0.35355338, %v1528_v49 }
 0x431   :  { %v9418_v6 = vpop.f32.mrf.mxu0 }
 0x432   :  { %v1570_v41 = vsel %vm1545_vm6, %v12024_v20, -inf }
 0x433   :  { %v1531_v25 = vpop.f32.mrf.mxu0 }
 0x434   :  { %v12006_v43 = vmul.f32 0.35355338, %v1531_v25 }
 0x435   :  { %v9419_v4 = vpop.f32.mrf.mxu0 }
 0x436   :  { %v1573_v12 = vsel %vm1545_vm6, %v12006_v43, -inf }
 0x437   :  { %1574 = vmax.xlane.f32.xlu0 %v1573_v12  ;;  %v1899_v23 = vpop.f32.mrf.mxu0 }
 0x438   :  { %v12032_v39 = vmul.f32 0.35355338, %v1899_v23 }
 0x439   :  { %v9454_v52 = vpop.f32.mrf.mxu0 }
 0x43a   :  { %v1948_v25 = vsel %vm1545_vm6, %v12032_v39, -inf }
 0x43b   :  { %v1902_v10 = vpop.f32.mrf.mxu0 }
 0x43c   :  { %v12010_v60 = vmul.f32 0.35355338, %v1902_v10 }
 0x43d   :  { %v9455_v19 = vpop.f32.mrf.mxu0 }
 0x43e   :  { %v1951_v2 = vsel %vm1545_vm6, %v12010_v60, -inf }
 0x43f   :  { %1952 = vmax.xlane.f32.xlu0 %v1951_v2  ;;  %v1907_v38 = vpop.f32.mrf.mxu0 }
 0x440   :  { %v12036_v49 = vmul.f32 0.35355338, %v1907_v38 }
 0x441   :  { %v9458_v29 = vpop.f32.mrf.mxu0 }
 0x442   :  { %v1954_v19 = vsel %vm1545_vm6, %v12036_v49, -inf }
 0x443   :  { %v1910_v34 = vpop.f32.mrf.mxu0 }
 0x444   :  { %v12016_v63 = vmul.f32 0.35355338, %v1910_v34 }
 0x445   :  { %v9459_v42 = vpop.f32.mrf.mxu0 }
 0x446   :  { %v1957_v53 = vsel %vm1545_vm6, %v12016_v63, -inf }
 0x447   :  { %1958 = vmax.xlane.f32.xlu0 %v1957_v53  ;;  %v1915_v22 = vpop.f32.mrf.mxu0 }
 0x448   :  { %1559 = vmax.xlane.f32.xlu1 %v1558_v13  ;;  %v12044_v52 = vmul.f32 0.35355338, %v1915_v22 }
 0x449   :  { %v9462_v59 = vpop.f32.mrf.mxu0 }
 0x44a   :  { %v1960_v34 = vsel %vm1545_vm6, %v12044_v52, -inf }
 0x44b   :  { %v1918_v45 = vpop.f32.mrf.mxu0 }
 0x44c   :  { %v12028_v47 = vmul.f32 0.35355338, %v1918_v45  ;;  %1565 = vmax.xlane.f32.xlu1 %v1564_v5 }
 0x44d   :  { %v9463_v14 = vpop.f32.mrf.mxu0 }
 0x44e   :  { %v1963_v32 = vsel %vm1545_vm6, %v12028_v47, -inf }
 0x44f   :  { %1964 = vmax.xlane.f32.xlu0 %v1963_v32  ;;  %v1923_v50 = vpop.f32.mrf.mxu0 }
 0x450   :  { %1571 = vmax.xlane.f32.xlu1 %v1570_v41  ;;  %v12048_v38 = vmul.f32 0.35355338, %v1923_v50 }
 0x451   :  { %v9466_v40 = vpop.f32.mrf.mxu0 }
 0x452   :  { %v1966_v45 = vsel %vm1545_vm6, %v12048_v38, -inf }
 0x453   :  { %v1926_v6 = vpop.f32.mrf.mxu0 }
 0x454   :  { %v12040_v4 = vmul.f32 0.35355338, %v1926_v6  ;;  %1949 = vmax.xlane.f32.xlu1 %v1948_v25 }
 0x455   :  { %v9467_v12 = vpop.f32.mrf.mxu0 }
 0x456   :  { %v1969_v23 = vsel %vm1545_vm6, %v12040_v4, -inf }
 0x457   :  { %1970 = vmax.xlane.f32.xlu0 %v1969_v23  ;;  %v1931_v10 = vpop.f32.mrf.mxu0 }
 0x458   :  { %1955 = vmax.xlane.f32.xlu1 %v1954_v19  ;;  %v12056_v13 = vmul.f32 0.35355338, %v1931_v10 }
 0x459   :  { %v9470_v2 = vpop.f32.mrf.mxu0 }
 0x45a   :  { %v1972_v50 = vsel %vm1545_vm6, %v12056_v13, -inf }
 0x45b   :  { %v1934_v29 = vpop.f32.mrf.mxu0 }
 0x45c   :  { %v12052_v42 = vmul.f32 0.35355338, %v1934_v29  ;;  %1961 = vmax.xlane.f32.xlu1 %v1960_v34 }
 0x45d   :  { %v9471_v53 = vpop.f32.mrf.mxu0 }
 0x45e   :  { %v1975_v22 = vsel %vm1545_vm6, %v12052_v42, -inf }
 0x45f   :  { %1976 = vmax.xlane.f32.xlu0 %v1975_v22  ;;  %v2296_v59 = vpop.f32.mrf.mxu0 }
 0x460   :  { %1967 = vmax.xlane.f32.xlu1 %v1966_v45  ;;  %v12060_v14 = vmul.f32 0.35355338, %v2296_v59 }
 0x461   :  { %v9506_v5 = vpop.f32.mrf.mxu0 }
 0x462   :  { %v2345_v12 = vsel %vm1545_vm6, %v12060_v14, -inf }
 0x463   :  { %v2299_v32 = vpop.f32.mrf.mxu0 }
 0x464   :  { %v12064_v41 = vmul.f32 0.35355338, %v2299_v32  ;;  %1973 = vmax.xlane.f32.xlu1 %v1972_v50 }
 0x465   :  { %v9507_v40 = vpop.f32.mrf.mxu0 }
 0x466   :  { %v2348_v6 = vsel %vm1545_vm6, %v12064_v41, -inf }
 0x467   :  { %2349 = vmax.xlane.f32.xlu0 %v2348_v6  ;;  %v2304_v25 = vpop.f32.mrf.mxu0 }
 0x468   :  { %v12070_v23 = vmul.f32 0.35355338, %v2304_v25  ;;  %2346 = vmax.xlane.f32.xlu1 %v2345_v12 }
 0x469   :  { %v9510_v10 = vpop.f32.mrf.mxu0 }
 0x46a   :  { %v2351_v19 = vsel %vm1545_vm6, %v12070_v23, -inf }
 0x46b   :  { %v2307_v2 = vpop.f32.mrf.mxu0 }
 0x46c   :  { %v12074_v29 = vmul.f32 0.35355338, %v2307_v2  ;;  %2352 = vmax.xlane.f32.xlu1 %v2351_v19 }
 0x46d   :  { %v9511_v34 = vpop.f32.mrf.mxu0 }
 0x46e   :  { %v2354_v53 = vsel %vm1545_vm6, %v12074_v29, -inf }
 0x46f   :  { %2355 = vmax.xlane.f32.xlu0 %v2354_v53  ;;  %v2312_v22 = vpop.f32.mrf.mxu0 }
 0x470   :  { %v12078_v59 = vmul.f32 0.35355338, %v2312_v22  ;;  %v12092_v22 = vpop.permute.xlu0 %2076 }
 0x471   :  { %v9514_v45 = vpop.f32.mrf.mxu0 }
 0x472   :  { %v2357_v5 = vsel %vm1545_vm6, %v12078_v59, -inf }
 0x473   :  { %2358 = vmax.xlane.f32.xlu1 %v2357_v5  ;;  %v2315_v32 = vpop.f32.mrf.mxu0 }
 0x474   :  { %v12082_v50 = vmul.f32 0.35355338, %v2315_v32 }
 0x475   :  { %v9515_v40 = vpop.f32.mrf.mxu0 }
 0x476   :  { %v2360_v6 = vsel %vm1545_vm6, %v12082_v50, -inf }
 0x477   :  { %2361 = vmax.xlane.f32.xlu0 %v2360_v6  ;;  %v2320_v25 = vpop.f32.mrf.mxu0 }
 0x478   :  { %v12086_v12 = vmul.f32 0.35355338, %v2320_v25 }
 0x479   :  { %v9518_v10 = vpop.f32.mrf.mxu0 }
 0x47a   :  { %v2363_v19 = vsel %vm1545_vm6, %v12086_v12, -inf  ;;  %v12100_v10 = vpop.permute.xlu0 %2074 }
 0x47b   :  { %2364 = vmax.xlane.f32.xlu1 %v2363_v19  ;;  %v2323_v2 = vpop.f32.mrf.mxu0 }
 0x47c   :  { %v12090_v34 = vmul.f32 0.35355338, %v2323_v2 }
 0x47d   :  { %v9519_v53 = vpop.f32.mrf.mxu0 }
 0x47e   :  { %v2366_v45 = vsel %vm1545_vm6, %v12090_v34, -inf  ;;  %v12104_v53 = vpop.permute.xlu1 %2072  ;;  %v12110_v36 = vpop.permute.xlu0 %2070 }
 0x47f   :  { %2367 = vmax.xlane.f32.xlu0 %v2366_v45  ;;  %v2328_v5 = vpop.f32.mrf.mxu0 }
 0x480   :  { %v12096_v32 = vmul.f32 0.35355338, %v2328_v5 }
 0x481   :  { %v9522_v40 = vpop.f32.mrf.mxu0 }
 0x482   :  { %v2369_v6 = vsel %vm1545_vm6, %v12096_v32, -inf }
 0x483   :  { %2370 = vmax.xlane.f32.xlu1 %v2369_v6  ;;  %v2331_v25 = vpop.f32.mrf.mxu0 }
 0x484   :  { %v12102_v19 = vmul.f32 0.35355338, %v2331_v25  ;;  %v12114_v25 = vpop.permute.xlu1 %2068 }
 0x485   :  { %v9523_v2 = vpop.f32.mrf.mxu0 }
 0x486   :  { %v2372_v51 = vsel %vm1545_vm6, %v12102_v19, -inf }
 0x487   :  { %2373 = vmax.xlane.f32.xlu0 %v2372_v51  ;;  %v2688_v45 = vpop.f32.mrf.mxu0 }
 0x488   :  { %v12108_v5 = vmul.f32 0.35355338, %v2688_v45  ;;  %v12120_v45 = vpop.permute.xlu0 %2468  ;;  %v12124_v8 = vpop.permute.xlu1 %2466 }
 0x489   :  { %v9558_v40 = vpop.f32.mrf.mxu0  ;;  %16323 = vst [vmem:[#allocation34_spill] sm:$0xff] %v12120_v45  ;;  %16324 = vst [vmem:[#allocation35_spill] sm:$0xff] %v12124_v8 }
 0x48a   :  { %v2737_v6 = vsel %vm1545_vm6, %v12108_v5, -inf }
 0x48b   :  { %2738 = vmax.xlane.f32.xlu0 %v2737_v6  ;;  %v2691_v3 = vpop.f32.mrf.mxu0 }
 0x48c   :  { %v12116_v2 = vmul.f32 0.35355338, %v2691_v3  ;;  %v12130_v54 = vpop.permute.xlu0 %2464 }
 0x48d   :  { %v9559_v21 = vpop.f32.mrf.mxu0  ;;  %16325 = vst [vmem:[#allocation27_spill] sm:$0xff] %v12130_v54 }
 0x48e   :  { %v2740_v56 = vsel %vm1545_vm6, %v12116_v2, -inf }
 0x48f   :  { %2741 = vmax.xlane.f32.xlu0 %v2740_v56  ;;  %v2696_v51 = vpop.f32.mrf.mxu0 }
 0x490   :  { %v12122_v40 = vmul.f32 0.35355338, %v2696_v51  ;;  %v12134_v51 = vpop.permute.xlu1 %2462 }
 0x491   :  { %v9562_v18 = vpop.f32.mrf.mxu0  ;;  %16326 = vst [vmem:[#allocation28_spill] sm:$0xff] %v12134_v51 }
 0x492   :  { %v2743_v6 = vsel %vm1545_vm6, %v12122_v40, -inf }
 0x493   :  { %2744 = vmax.xlane.f32.xlu0 %v2743_v6  ;;  %v2699_v27 = vpop.f32.mrf.mxu0 }
 0x494   :  { %v12128_v3 = vmul.f32 0.35355338, %v2699_v27  ;;  %v12140_v27 = vpop.permute.xlu0 %2460 }
 0x495   :  { %v9563_v21 = vpop.f32.mrf.mxu0  ;;  %16327 = vst [vmem:[#allocation44_spill] sm:$0xff] %v12140_v27 }
 0x496   :  { %v2746_v56 = vsel %vm1545_vm6, %v12128_v3, -inf }
 0x497   :  { %2747 = vmax.xlane.f32.xlu0 %v2746_v56  ;;  %v2704_v44 = vpop.f32.mrf.mxu0 }
 0x498   :  { %v12136_v18 = vmul.f32 0.35355338, %v2704_v44 }
 0x499   :  { %v9566_v33 = vpop.f32.mrf.mxu0 }
 0x49a   :  { %v2749_v37 = vsel %vm1545_vm6, %v12136_v18, -inf }
 0x49b   :  { %2750 = vmax.xlane.f32.xlu1 %v2749_v37  ;;  %v2707_v6 = vpop.f32.mrf.mxu0 }
 0x49c   :  { %v12142_v21 = vmul.f32 0.35355338, %v2707_v6  ;;  %v1548_v46 = vpop.xlane.xlu1 %1547 }
 0x49d   :  { %v1576_v30 = vsub.f32 %v11980_v7, %v1548_v46  ;;  %v9567_v17 = vpop.f32.mrf.mxu0 }
 0x49e   :  { %v2752_v56 = vsel %vm1545_vm6, %v12142_v21, -inf }
 0x49f   :  { %v1586_v26 = vmul.f32 1.442695, %v1576_v30  ;;  %2753 = vmax.xlane.f32.xlu1 %v2752_v56  ;;  %v2712_v44 = vpop.f32.mrf.mxu0 }
 0x4a0   :  { %v12147_v33 = vmul.f32 0.35355338, %v2712_v44  ;;  %v1551_v0 = vpop.xlane.xlu0 %1550 }
 0x4a1   :  { %10602 = vpow2.f32 %v1586_v26  ;;  %v1577_v37 = vsub.f32 %v11984_v28, %v1551_v0  ;;  %v9570_v11 = vpop.f32.mrf.mxu0 }
 0x4a2   :  { %v2755_v6 = vsel %vm1545_vm6, %v12147_v33, -inf }
 0x4a3   :  { %v1588_v1 = vmul.f32 1.442695, %v1577_v37  ;;  %2756 = vmax.xlane.f32.xlu1 %v2755_v6  ;;  %v2715_v46 = vpop.f32.mrf.mxu0 }
 0x4a4   :  { %v12152_v17 = vmul.f32 0.35355338, %v2715_v46  ;;  %v1554_v7 = vpop.xlane.xlu0 %1553 }
 0x4a5   :  { %10604 = vpow2.f32 %v1588_v1  ;;  %v1578_v30 = vsub.f32 %v11988_v61, %v1554_v7  ;;  %v9571_v56 = vpop.f32.mrf.mxu0 }
 0x4a6   :  { %v2758_v44 = vsel %vm1545_vm6, %v12152_v17, -inf }
 0x4a7   :  { %v1590_v26 = vmul.f32 1.442695, %v1578_v30  ;;  %2759 = vmax.xlane.f32.xlu0 %v2758_v44  ;;  %v2720_v0 = vpop.f32.mrf.mxu0 }
 0x4a8   :  { %v12157_v11 = vmul.f32 0.35355338, %v2720_v0  ;;  %v1557_v28 = vpop.xlane.xlu0 %1556 }
 0x4a9   :  { %10606 = vpow2.f32 %v1590_v26  ;;  %v1579_v37 = vsub.f32 %v11992_v48, %v1557_v28  ;;  %v9574_v6 = vpop.f32.mrf.mxu0 }
 0x4aa   :  { %v2761_v46 = vsel %vm1545_vm6, %v12157_v11, -inf }
 0x4ab   :  { %v1592_v1 = vmul.f32 1.442695, %v1579_v37  ;;  %2762 = vmax.xlane.f32.xlu1 %v2761_v46  ;;  %v2723_v61 = vpop.f32.mrf.mxu0 }
 0x4ac   :  { %v12162_v7 = vmul.f32 0.35355338, %v2723_v61 }
 0x4ad   :  { %10608 = vpow2.f32 %v1592_v1  ;;  %v9575_v56 = vpop.f32.mrf.mxu0 }
 0x4ae   :  { %v12164_v30 = vpop.eup %10602  ;;  %v2764_v44 = vsel %vm1545_vm6, %v12162_v7, -inf }
 0x4af   :  { %2765 = vmax.xlane.f32.xlu0 %v2764_v44  ;;  %v1606_v48 = vsel %vm1545_vm6, %v12164_v30, 0.0 }
 0x4b0   :  { %v1563_v26 = vpop.xlane.xlu0 %1562  ;;  %1607 = vadd.xlane.f32.xlu1 %v1606_v48 }
 0x4b1   :  { %v1581_v0 = vsub.f32 %v11996_v15, %v1563_v26 }
 0x4b2   :  { %v12171_v28 = vpop.eup %10604 }
 0x4b3   :  { %v1596_v37 = vmul.f32 1.442695, %v1581_v0  ;;  %v1609_v6 = vsel %vm1545_vm6, %v12171_v28, 0.0 }
 0x4b4   :  { %1610 = vadd.xlane.f32.xlu0 %v1609_v6 }
 0x4b5   :  { %10610 = vpow2.f32 %v1596_v37 }
 0x4b6   :  { %v12175_v46 = vpop.eup %10606 }
 0x4b7   :  { %v1612_v1 = vsel %vm1545_vm6, %v12175_v46, 0.0 }
 0x4b8   :  { %v1569_v61 = vpop.xlane.xlu0 %1568  ;;  %1613 = vadd.xlane.f32.xlu1 %v1612_v1 }
 0x4b9   :  { %v1583_v56 = vsub.f32 %v12002_v62, %v1569_v61  ;;  %v12192_v62 = vpop.permute.xlu1 %2860 }
 0x4ba   :  { %v12180_v44 = vpop.eup %10608  ;;  %16328 = vst [vmem:[#allocation45_spill] sm:$0xff] %v12192_v62 }
 0x4bb   :  { %v1600_v15 = vmul.f32 1.442695, %v1583_v56  ;;  %v1615_v48 = vsel %vm1545_vm6, %v12180_v44, 0.0 }
 0x4bc   :  { %1616 = vadd.xlane.f32.xlu0 %v1615_v48 }
 0x4bd   :  { %10612 = vpow2.f32 %v1600_v15 }
 0x4c0   :  { %v1575_v48 = vpop.xlane.xlu0 %1574 }
 0x4c1   :  { %v1585_v35 = vsub.f32 %v12006_v43, %v1575_v48 }
 0x4c2   :  { %v12184_v26 = vpop.eup %10610 }
 0x4c3   :  { %v1621_v0 = vsel %vm1545_vm6, %v12184_v26, 0.0 }
 0x4c4   :  { %1622 = vadd.xlane.f32.xlu0 %v1621_v0 }
 0x4c8   :  { %v1953_v27 = vpop.xlane.xlu0 %1952 }
 0x4c9   :  { %v1979_v62 = vsub.f32 %v12010_v60, %v1953_v27 }
 0x4ca   :  { %v12188_v37 = vpop.eup %10612 }
 0x4cb   :  { %v1627_v6 = vsel %vm1545_vm6, %v12188_v37, 0.0 }
 0x4cc   :  { %1628 = vadd.xlane.f32.xlu0 %v1627_v6  ;;  %v1604_v6 = vmul.f32 1.442695, %v1585_v35 }
 0x4d1   :  { %v1560_v1 = vpop.xlane.xlu1 %1559 }
 0x4d2   :  { %v1580_v61 = vsub.f32 %v12014_v24, %v1560_v1  ;;  %v1990_v1 = vmul.f32 1.442695, %v1979_v62 }
 0x4d4   :  { %v1594_v56 = vmul.f32 1.442695, %v1580_v61 }
 0x4d5   :  { %v1566_v15 = vpop.xlane.xlu1 %1565 }
 0x4d6   :  { %10614 = vpow2.f32 %v1594_v56  ;;  %v1582_v58 = vsub.f32 %v12020_v31, %v1566_v15  ;;  %v1959_v31 = vpop.xlane.xlu0 %1958 }
 0x4d7   :  { %v1981_v35 = vsub.f32 %v12016_v63, %v1959_v31 }
 0x4d8   :  { %v1598_v0 = vmul.f32 1.442695, %v1582_v58 }
 0x4d9   :  { %v1572_v51 = vpop.xlane.xlu1 %1571  ;;  %v1994_v60 = vmul.f32 1.442695, %v1981_v35 }
 0x4da   :  { %10616 = vpow2.f32 %v1598_v0  ;;  %v1584_v54 = vsub.f32 %v12024_v20, %v1572_v51 }
 0x4dc   :  { %v1602_v8 = vmul.f32 1.442695, %v1584_v54 }
 0x4dd   :  { %v1950_v45 = vpop.xlane.xlu1 %1949 }
 0x4de   :  { %10618 = vpow2.f32 %v1602_v8  ;;  %v1978_v24 = vsub.f32 %v12032_v39, %v1950_v45 }
 0x4df   :  { %10620 = vpow2.f32 %v1604_v6 }
 0x4e0   :  { %v1988_v61 = vmul.f32 1.442695, %v1978_v24 }
 0x4e1   :  { %v1956_v56 = vpop.xlane.xlu1 %1955 }
 0x4e2   :  { %10622 = vpow2.f32 %v1988_v61  ;;  %v1980_v58 = vsub.f32 %v12036_v49, %v1956_v56 }
 0x4e3   :  { %v12201_v43 = vpop.eup %10614  ;;  %10624 = vpow2.f32 %v1990_v1  ;;  %v1965_v1 = vpop.xlane.xlu0 %1964 }
 0x4e4   :  { %v1992_v20 = vmul.f32 1.442695, %v1980_v58  ;;  %v1618_v54 = vsel %vm1545_vm6, %v12201_v43, 0.0 }
 0x4e5   :  { %1619 = vadd.xlane.f32.xlu1 %v1618_v54  ;;  %v1962_v61 = vpop.xlane.xlu1 %1961 }
 0x4e6   :  { %10626 = vpow2.f32 %v1992_v20 }
 0x4e7   :  { %v12206_v8 = vpop.eup %10616  ;;  %10628 = vpow2.f32 %v1994_v60  ;;  %v1971_v56 = vpop.xlane.xlu0 %1970 }
 0x4e8   :  { %v1624_v39 = vsel %vm1545_vm6, %v12206_v8, 0.0 }
 0x4e9   :  { %1625 = vadd.xlane.f32.xlu1 %v1624_v39  ;;  %v1968_v58 = vpop.xlane.xlu1 %1967 }
 0x4eb   :  { %v12210_v45 = vpop.eup %10618  ;;  %v1977_v35 = vpop.xlane.xlu0 %1976 }
 0x4ec   :  { %16329 = vst [vmem:[#allocation46_spill] sm:$0xff] %v12210_v45  ;;  %v1630_v49 = vsel %vm1545_vm6, %v12210_v45, 0.0  ;;  %v12214_v63 = vpop.eup %10620 }
 0x4ed   :  { %16330 = vst [vmem:[#allocation47_spill] sm:$0xff] %v12214_v63  ;;  %1631 = vadd.xlane.f32.xlu0 %v1630_v49  ;;  %v1633_v62 = vsel %vm1545_vm6, %v12214_v63, 0.0  ;;  %v1974_v20 = vpop.xlane.xlu1 %1973  ;;  %v1982_v49 = vsub.f32 %v12044_v52, %v1962_v61  ;;  %v1983_v52 = vsub.f32 %v12028_v47, %v1965_v1 }
 0x4ef   :  { %v12216_v51 = vpop.eup %10622 }
 0x4f0   :  { %16331 = vst [vmem:[#allocation48_spill] sm:$0xff] %v12216_v51  ;;  %v2008_v27 = vsel %vm1545_vm6, %v12216_v51, 0.0  ;;  %v12222_v48 = vpop.eup %10624  ;;  %v12236_v54 = vpop.xlane.xlu0 %2349 }
 0x4f1   :  { %16332 = vst [vmem:[#allocation49_spill] sm:$0xff] %v12222_v48  ;;  %2009 = vadd.xlane.f32.xlu1 %v2008_v27  ;;  %1634 = vadd.xlane.f32.xlu0 %v1633_v62  ;;  %v2011_v15 = vsel %vm1545_vm6, %v12222_v48, 0.0  ;;  %v2347_v39 = vpop.xlane.xlu1 %2346  ;;  %v1996_v62 = vmul.f32 1.442695, %v1982_v49  ;;  %v1985_v48 = vsub.f32 %v12040_v4, %v1971_v56  ;;  %v1987_v4 = vsub.f32 %v12052_v42, %v1977_v35 }
 0x4f3   :  { %v12226_v0 = vpop.eup %10626  ;;  %10630 = vpow2.f32 %v1996_v62 }
 0x4f4   :  { %16333 = vst [vmem:[#allocation50_spill] sm:$0xff] %v12226_v0  ;;  %v2014_v6 = vsel %vm1545_vm6, %v12226_v0, 0.0  ;;  %v12230_v24 = vpop.eup %10628 }
 0x4f5   :  { %2012 = vadd.xlane.f32.xlu0 %v2011_v15  ;;  %16334 = vst [vmem:[#allocation51_spill] sm:$0xff] %v12230_v24  ;;  %v2017_v31 = vsel %vm1545_vm6, %v12230_v24, 0.0  ;;  %v1984_v15 = vsub.f32 %v12048_v38, %v1968_v58  ;;  %v1998_v58 = vmul.f32 1.442695, %v1983_v52  ;;  %v2376_v52 = vsub.f32 %v12064_v41, %v12236_v54 }
 0x4f8   :  { %v2356_v60 = vpop.xlane.xlu0 %2355 }
 0x4f9   :  { %2015 = vadd.xlane.f32.xlu0 %v2014_v6  ;;  %v12242_v6 = vpop.xlane.xlu1 %2352  ;;  %v2378_v0 = vsub.f32 %v12074_v29, %v2356_v60  ;;  %v2002_v29 = vmul.f32 1.442695, %v1985_v48  ;;  %v1986_v60 = vsub.f32 %v12056_v13, %v1974_v20  ;;  %v2375_v48 = vsub.f32 %v12060_v14, %v2347_v39 }
 0x4fb   :  { %v2391_v61 = vmul.f32 1.442695, %v2378_v0 }
 0x4fd   :  { %2018 = vadd.xlane.f32.xlu0 %v2017_v31  ;;  %v2359_v24 = vpop.xlane.xlu1 %2358 }
 0x4fe   :  { %v2379_v49 = vsub.f32 %v12078_v59, %v2359_v24  ;;  %v2004_v24 = vmul.f32 1.442695, %v1986_v60 }
 0x500   :  { %v12239_v27 = vpop.xlane.xlu0 %2361  ;;  %v2393_v63 = vmul.f32 1.442695, %v2379_v49  ;;  %v12255_v1 = vpop.eup %10630 }
 0x501   :  { %v2020_v13 = vsel %vm1545_vm6, %v12255_v1, 0.0 }
 0x502   :  { %2856 = vrot.lane.b32.xlu1 %v11816_v16, %s11151_s17  ;;  %v2000_v16 = vmul.f32 1.442695, %v1984_v15 }
 0x504   :  { %10632 = vpow2.f32 %v2000_v16  ;;  %v2365_v38 = vpop.xlane.xlu1 %2364 }
 0x505   :  { %10634 = vpow2.f32 %v2391_v61  ;;  %v2385_v61 = vmul.f32 1.442695, %v2375_v48 }
 0x506   :  { %10636 = vpow2.f32 %v1998_v58  ;;  %v2387_v58 = vmul.f32 1.442695, %v2376_v52 }
 0x507   :  { %10638 = vpow2.f32 %v2393_v63 }
 0x508   :  { %v12244_v31 = vpop.xlane.xlu0 %2367  ;;  %10640 = vpow2.f32 %v2002_v29 }
 0x50c   :  { %v2371_v62 = vpop.xlane.xlu1 %2370 }
 0x50d   :  { %v2383_v0 = vsub.f32 %v12096_v32, %v2371_v62  ;;  %v2006_v32 = vmul.f32 1.442695, %v1987_v4 }
 0x510   :  { %v2374_v51 = vpop.xlane.xlu0 %2373 }
 0x511   :  { %v2384_v15 = vsub.f32 %v12102_v19, %v2374_v51  ;;  %v12263_v63 = vpop.eup %10632 }
 0x512   :  { %v2026_v16 = vsel %vm1545_vm6, %v12263_v63, 0.0  ;;  %v12271_v19 = vpop.eup %10634 }
 0x513   :  { %2858 = vrot.lane.b32.xlu0 %v11829_v57, %s11151_s17  ;;  %v2381_v57 = vsub.f32 %v12086_v12, %v2365_v38  ;;  %v2401_v12 = vmul.f32 1.442695, %v2383_v0  ;;  %v2403_v42 = vmul.f32 1.442695, %v2384_v15  ;;  %v12275_v49 = vpop.eup %10636 }
 0x514   :  { %v2739_v45 = vpop.xlane.xlu0 %2738  ;;  %v2023_v54 = vsel %vm1545_vm6, %v12275_v49, 0.0 }
 0x515   :  { %v2397_v47 = vmul.f32 1.442695, %v2381_v57  ;;  %v2767_v35 = vsub.f32 %v12108_v5, %v2739_v45  ;;  %v2414_v5 = vsel %vm1545_vm6, %v12271_v19, 0.0  ;;  %v12280_v45 = vpop.eup %10638  ;;  %v2377_v57 = vsub.f32 %v12070_v23, %v12242_v6 }
 0x516   :  { %v12288_v62 = vpop.eup %10640  ;;  %v2417_v60 = vsel %vm1545_vm6, %v12280_v45, 0.0  ;;  %v2380_v23 = vsub.f32 %v12082_v50, %v12239_v27 }
 0x517   :  { %10642 = vpow2.f32 %v2397_v47  ;;  %v2777_v14 = vmul.f32 1.442695, %v2767_v35  ;;  %v2389_v6 = vmul.f32 1.442695, %v2377_v57  ;;  %v2029_v4 = vsel %vm1545_vm6, %v12288_v62, 0.0 }
 0x518   :  { %v2742_v59 = vpop.xlane.xlu0 %2741  ;;  %10644 = vpow2.f32 %v2004_v24  ;;  %v2395_v50 = vmul.f32 1.442695, %v2380_v23 }
 0x519   :  { %10646 = vpow2.f32 %v2401_v12  ;;  %v2768_v39 = vsub.f32 %v12116_v2, %v2742_v59 }
 0x51a   :  { %10648 = vpow2.f32 %v2006_v32 }
 0x51b   :  { %10650 = vpow2.f32 %v2403_v42  ;;  %v2779_v2 = vmul.f32 1.442695, %v2768_v39  ;;  %v2382_v42 = vsub.f32 %v12090_v34, %v12244_v31 }
 0x51c   :  { %v12266_v20 = vpop.xlane.xlu0 %2744  ;;  %10652 = vpow2.f32 %v2385_v61 }
 0x51d   :  { %10654 = vpow2.f32 %v2777_v14  ;;  %v2399_v14 = vmul.f32 1.442695, %v2382_v42  ;;  %v2769_v34 = vsub.f32 %v12122_v40, %v12266_v20 }
 0x51e   :  { %10656 = vpow2.f32 %v2387_v58 }
 0x51f   :  { %10658 = vpow2.f32 %v2779_v2  ;;  %v2781_v57 = vmul.f32 1.442695, %v2769_v34 }
 0x520   :  { %v2748_v38 = vpop.xlane.xlu0 %2747  ;;  %10660 = vpow2.f32 %v2389_v6 }
 0x521   :  { %v2770_v29 = vsub.f32 %v12128_v3, %v2748_v38 }
 0x523   :  { %v2783_v24 = vmul.f32 1.442695, %v2770_v29 }
 0x524   :  { %v12258_v56 = vpop.xlane.xlu1 %2750  ;;  %v12293_v47 = vpop.eup %10642 }
 0x525   :  { %v12303_v3 = vpop.eup %10644  ;;  %v2423_v15 = vsel %vm1545_vm6, %v12293_v47, 0.0  ;;  %10662 = vpow2.f32 %v2783_v24  ;;  %v2771_v40 = vsub.f32 %v12136_v18, %v12258_v56 }
 0x526   :  { %2021 = vadd.xlane.f32.xlu1 %v2020_v13  ;;  %v12308_v13 = vpop.eup %10646  ;;  %v2032_v32 = vsel %vm1545_vm6, %v12303_v3, 0.0  ;;  %10664 = vpow2.f32 %v2395_v50 }
 0x527   :  { %v12314_v48 = vpop.eup %10648 }
 0x528   :  { %v2754_v51 = vpop.xlane.xlu1 %2753  ;;  %v2035_v52 = vsel %vm1545_vm6, %v12314_v48, 0.0 }
 0x529   :  { %v2772_v12 = vsub.f32 %v12142_v21, %v2754_v51  ;;  %v12320_v51 = vpop.eup %10650 }
 0x52a   :  { %2027 = vadd.xlane.f32.xlu1 %v2026_v16  ;;  %v2429_v16 = vsel %vm1545_vm6, %v12308_v13, 0.0  ;;  %v12324_v61 = vpop.eup %10652  ;;  %v2432_v39 = vsel %vm1545_vm6, %v12320_v51, 0.0 }
 0x52b   :  { %v2787_v21 = vmul.f32 1.442695, %v2772_v12  ;;  %v2405_v38 = vsel %vm1545_vm6, %v12324_v61, 0.0 }
 0x52c   :  { %v12284_v41 = vpop.xlane.xlu1 %2756 }
 0x52e   :  { %2415 = vadd.xlane.f32.xlu1 %v2414_v5  ;;  %v12330_v5 = vpop.eup %10654 }
 0x52f   :  { %v12334_v58 = vpop.eup %10656 }
 0x530   :  { %v12297_v0 = vpop.xlane.xlu0 %2759  ;;  %v12340_v2 = vpop.eup %10658  ;;  %v2408_v18 = vsel %vm1545_vm6, %v12334_v58, 0.0 }
 0x531   :  { %v12342_v29 = vpop.eup %10660  ;;  %v2800_v6 = vsel %vm1545_vm6, %v12340_v2, 0.0 }
 0x532   :  { %2418 = vadd.xlane.f32.xlu1 %v2417_v60  ;;  %2024 = vadd.xlane.f32.xlu0 %v2023_v54  ;;  %v2797_v54 = vsel %vm1545_vm6, %v12330_v5, 0.0  ;;  %v2785_v60 = vmul.f32 1.442695, %v2771_v40  ;;  %v12348_v56 = vpop.eup %10662 }
 0x533   :  { %v2806_v12 = vsel %vm1545_vm6, %v12348_v56, 0.0 }
 0x534   :  { %v12299_v59 = vpop.xlane.xlu1 %2762 }
 0x536   :  { %2424 = vadd.xlane.f32.xlu1 %v2423_v15  ;;  %2030 = vadd.xlane.f32.xlu0 %v2029_v4  ;;  %v12350_v4 = vpop.eup %10664  ;;  %v2411_v15 = vsel %vm1545_vm6, %v12342_v29, 0.0 }
 0x538   :  { %v12310_v27 = vpop.xlane.xlu0 %2765 }
 0x539   :  { %v1608_v35 = vpop.xlane.xlu1 %1607 }
 0x53a   :  { %2430 = vadd.xlane.f32.xlu1 %v2429_v16  ;;  %2033 = vadd.xlane.f32.xlu0 %v2032_v32  ;;  %10666 = vrcp.f32 %v1608_v35  ;;  %v2420_v16 = vsel %vm1545_vm6, %v12350_v4, 0.0 }
 0x53b   :  { %10668 = vpow2.f32 %v2787_v21 }
 0x53d   :  { %v1611_v31 = vpop.xlane.xlu0 %1610 }
 0x53e   :  { %10670 = vrcp.f32 %v1611_v31  ;;  %2433 = vadd.xlane.f32.xlu1 %v2432_v39  ;;  %2036 = vadd.xlane.f32.xlu0 %v2035_v52 }
 0x53f   :  { %10672 = vpow2.f32 %v2399_v14 }
 0x541   :  { %v1614_v20 = vpop.xlane.xlu1 %1613 }
 0x542   :  { %2798 = vadd.xlane.f32.xlu1 %v2797_v54  ;;  %2406 = vadd.xlane.f32.xlu0 %v2405_v38  ;;  %10674 = vrcp.f32 %v1614_v20 }
 0x543   :  { %10676 = vpow2.f32 %v2781_v57 }
 0x545   :  { %v1617_v23 = vpop.xlane.xlu0 %1616 }
 0x546   :  { %10678 = vrcp.f32 %v1617_v23  ;;  %2801 = vadd.xlane.f32.xlu1 %v2800_v6  ;;  %2409 = vadd.xlane.f32.xlu0 %v2408_v18 }
 0x547   :  { %v10667_v24 = vpop.eup %10666  ;;  %10680 = vpow2.f32 %v2785_v60 }
 0x548   :  { %v12356_v50 = vpop.eup %10668  ;;  %v1646_v42 = vmul.f32 %v10667_v24, %v12164_v30 }
 0x549   :  { %v2812_v35 = vsel %vm1545_vm6, %v12356_v50, 0.0 }
 0x54a   :  { %2807 = vadd.xlane.f32.xlu1 %v2806_v12  ;;  %2412 = vadd.xlane.f32.xlu0 %v2411_v15  ;;  %v2776_v15 = vsub.f32 %v12162_v7, %v12310_v27 }
 0x54b   :  { %v10671_v32 = vpop.eup %10670 }
 0x54c   :  { %v1647_v21 = vmul.f32 %v10671_v32, %v12171_v28  ;;  %v12364_v52 = vpop.eup %10672  ;;  %v16335_v28 = vmov 0.0  }
 0x54d   :  { %v2426_v30 = vsel %vm1545_vm6, %v12364_v52, 0.0 }
 0x54e   :  { %2813 = vadd.xlane.f32.xlu1 %v2812_v35  ;;  %2421 = vadd.xlane.f32.xlu0 %v2420_v16  ;;  %v1656_v14 = vpack.c.bf16 %v1647_v21, %v1646_v42 }
 0x54f   :  { %v10675_v34 = vpop.eup %10674 }
 0x550   :  { %9431 = vmatmul.mubr.msk.bf16.vlgmr.msra.gmra.mxu1 %vm1545_vm6, %v1656_v14  ;;  %v12372_v31 = vpop.eup %10676  ;;  %v1648_v38 = vmul.f32 %v10675_v34, %v12175_v46 }
 0x551   :  { %9473 = vmatpush3.bf16.msra.mxu1 %v12092_v22  ;;  %9434 = vmatprep.mubr.msk.bf16.mxu1 %vm11149_vm4, %v16335_v28  ;;  %v2803_v22 = vsel %vm1545_vm6, %v12372_v31, 0.0 }
 0x552   :  { %2427 = vadd.xlane.f32.xlu0 %v2426_v30  ;;  %9474 = vmatprep.subr.bf16.mxu1 %v16335_v28 }
 0x553   :  { %v10679_v39 = vpop.eup %10678 }
 0x554   :  { %v1649_v57 = vmul.f32 %v10679_v39, %v12180_v44  ;;  %v12380_v40 = vpop.eup %10680  ;;  %v16336_v39 = vld [vmem:[#allocation47_spill] sm:$0xff] }
 0x555   :  { %9475 = vmatpush3.bf16.msra.mxu1 %v12100_v10  ;;  %v2809_v46 = vsel %vm1545_vm6, %v12380_v40, 0.0  ;;  %v2774_v10 = vsub.f32 %v12152_v17, %v12297_v0  ;;  %v2775_v17 = vsub.f32 %v12157_v11, %v12299_v59  ;;  %v2795_v59 = vmul.f32 1.442695, %v2776_v15  ;;  %v16343_v15 = vld [vmem:[#allocation35_spill] sm:$0xff] }
 0x556   :  { %2804 = vadd.xlane.f32.xlu0 %v2803_v22  ;;  %9476 = vmatprep.subr.bf16.mxu1 %v16335_v28  ;;  %v1657_v20 = vpack.c.bf16 %v1649_v57, %v1648_v38 }
 0x557   :  { %v2791_v44 = vmul.f32 1.442695, %v2774_v10  ;;  %v2793_v12 = vmul.f32 1.442695, %v2775_v17 }
 0x558   :  { %9435 = vmatmul.mubr.msk.bf16.gmra.mxu1 %vm1545_vm6, %v1657_v20 }
 0x559   :  { %9477 = vmatpush3.bf16.msra.mxu1 %v12104_v53  ;;  %9438 = vmatprep.mubr.msk.bf16.mxu1 %vm11149_vm4, %v16335_v28  ;;  %v1623_v53 = vpop.xlane.xlu0 %1622 }
 0x55a   :  { %2810 = vadd.xlane.f32.xlu0 %v2809_v46  ;;  %9478 = vmatprep.subr.bf16.mxu1 %v16335_v28  ;;  %10682 = vrcp.f32 %v1623_v53 }
 0x55d   :  { %9479 = vmatpush3.bf16.msra.mxu1 %v12110_v36  ;;  %v1629_v36 = vpop.xlane.xlu0 %1628 }
 0x55e   :  { %9480 = vmatprep.subr.bf16.mxu1 %v16335_v28 }
 0x55f   :  { %2852 = vrot.lane.b32.xlu1 %v11805_v9, %s11151_s17  ;;  %v2773_v9 = vsub.f32 %v12147_v33, %v12284_v41 }
 0x561   :  { %9481 = vmatpush3.bf16.msra.mxu1 %v12114_v25  ;;  %v2789_v6 = vmul.f32 1.442695, %v2773_v9 }
 0x562   :  { %9524 = vmatprep.subr.bf16.mxu1 %v16335_v28 }
 0x567   :  { %v10683_v23 = vpop.eup %10682 }
 0x568   :  { %v1651_v24 = vmul.f32 %v10683_v23, %v12184_v26 }
 0x56e   :  { %v1620_v54 = vpop.xlane.xlu1 %1619 }
 0x56f   :  { %10684 = vrcp.f32 %v1620_v54  ;;  %v16338_v54 = vld [vmem:[#allocation49_spill] sm:$0xff] }
 0x570   :  { %2854 = vrot.lane.b32.xlu0 %v11819_v55, %s11151_s17  ;;  %10686 = vpow2.f32 %v2791_v44 }
 0x572   :  { %v1626_v60 = vpop.xlane.xlu1 %1625 }
 0x573   :  { %10688 = vrcp.f32 %v1626_v60  ;;  %v16339_v60 = vld [vmem:[#allocation48_spill] sm:$0xff] }
 0x574   :  { %10690 = vrcp.f32 %v1629_v36 }
 0x576   :  { %v1632_v25 = vpop.xlane.xlu0 %1631 }
 0x57a   :  { %v1635_v0 = vpop.xlane.xlu0 %1634  ;;  %v2010_v21 = vpop.xlane.xlu1 %2009 }
 0x57b   :  { %10692 = vrcp.f32 %v1635_v0  ;;  %v16340_v0 = vld [vmem:[#allocation34_spill] sm:$0xff] }
 0x57c   :  { %v10685_v18 = vpop.eup %10684  ;;  %10694 = vrcp.f32 %v1632_v25 }
 0x57d   :  { %v1650_v55 = vmul.f32 %v10685_v18, %v12201_v43  ;;  %10696 = vpow2.f32 %v2789_v6  ;;  %v12408_v41 = vpop.eup %10686  ;;  %v16341_v18 = vld [vmem:[#allocation51_spill] sm:$0xff] }
 0x57e   :  { %v2013_v33 = vpop.xlane.xlu0 %2012  ;;  %10698 = vpow2.f32 %v2793_v12  ;;  %v2818_v26 = vsel %vm1545_vm6, %v12408_v41, 0.0 }
 0x57f   :  { %v1658_v32 = vpack.c.bf16 %v1651_v24, %v1650_v55  ;;  %10700 = vrcp.f32 %v2013_v33  ;;  %v16342_v24 = vld [vmem:[#allocation50_spill] sm:$0xff] }
 0x580   :  { %v10689_v42 = vpop.eup %10688  ;;  %10702 = vrcp.f32 %v2010_v21 }
 0x581   :  { %9439 = vmatmul.mubr.msk.bf16.gmra.mxu1 %vm1545_vm6, %v1658_v32  ;;  %v10691_v11 = vpop.eup %10690  ;;  %v1652_v7 = vmul.f32 %v10689_v42, %v12206_v8  ;;  %10704 = vpow2.f32 %v2795_v59  ;;  %v16337_v8 = vld [vmem:[#allocation46_spill] sm:$0xff]  ;;  %v16344_v32 = vld [vmem:[#allocation27_spill] sm:$0xff]  ;;  %v16345_v42 = vld [vmem:[#allocation28_spill] sm:$0xff]  ;;  %v12457_v59 = vpop.permute.xlu1 %2856 }
 0x582   :  { %v2016_v35 = vpop.xlane.xlu0 %2015  ;;  %9442 = vmatprep.mubr.msk.bf16.mxu1 %vm11149_vm4, %v16335_v28  ;;  %v1653_v43 = vmul.f32 %v10691_v11, %v12188_v37  ;;  %v16346_v11 = vld [vmem:[#allocation44_spill] sm:$0xff] }
 0x583   :  { %2819 = vadd.xlane.f32.xlu1 %v2818_v26 }
 0x584   :  { %v1659_v27 = vpack.c.bf16 %v1653_v43, %v1652_v7 }
 0x586   :  { %v2019_v16 = vpop.xlane.xlu0 %2018 }
 0x587   :  { %10706 = vrcp.f32 %v2019_v16 }
 0x588   :  { %v10693_v14 = vpop.eup %10692  ;;  %10708 = vrcp.f32 %v2016_v35 }
 0x589   :  { %9443 = vmatmul.mubr.msk.bf16.gmra.mxu1 %vm1545_vm6, %v1659_v27  ;;  %v10695_v34 = vpop.eup %10694  ;;  %v1655_v38 = vmul.f32 %v10693_v14, %v16336_v39 }
 0x58a   :  { %9446 = vmatprep.mubr.msk.bf16.mxu1 %vm11149_vm4, %v16335_v28  ;;  %v12420_v30 = vpop.eup %10696  ;;  %v1654_v57 = vmul.f32 %v10695_v34, %v16337_v8  ;;  %v12459_v35 = vpop.permute.xlu0 %2858 }
 0x58b   :  { %v2815_v37 = vsel %vm1545_vm6, %v12420_v30, 0.0  ;;  %v12426_v22 = vpop.eup %10698 }
 0x58c   :  { %v1660_v20 = vpack.c.bf16 %v1655_v38, %v1654_v57  ;;  %v10701_v46 = vpop.eup %10700  ;;  %v2821_v53 = vsel %vm1545_vm6, %v12426_v22, 0.0 }
 0x58d   :  { %v10703_v10 = vpop.eup %10702  ;;  %v2049_v36 = vmul.f32 %v10701_v46, %v16338_v54 }
 0x58e   :  { %v12433_v44 = vpop.eup %10704  ;;  %v2048_v9 = vmul.f32 %v10703_v10, %v16339_v60 }
 0x58f   :  { %2816 = vadd.xlane.f32.xlu0 %v2815_v37  ;;  %v2824_v25 = vsel %vm1545_vm6, %v12433_v44, 0.0 }
 0x590   :  { %v2058_v23 = vpack.c.bf16 %v2049_v36, %v2048_v9 }
 0x591   :  { %9447 = vmatmul.mubr.msk.bf16.gmra.mxu1 %vm1545_vm6, %v1660_v20 }
 0x592   :  { %9482 = vmatprep.mubr.msk.bf16.mxu1 %vm11149_vm4, %v16335_v28 }
 0x593   :  { %2822 = vadd.xlane.f32.xlu0 %v2821_v53 }
 0x594   :  { %v10707_v6 = vpop.eup %10706 }
 0x595   :  { %v10709_v17 = vpop.eup %10708  ;;  %v2051_v55 = vmul.f32 %v10707_v6, %v16341_v18 }
 0x596   :  { %v2050_v12 = vmul.f32 %v10709_v17, %v16342_v24 }
 0x597   :  { %2825 = vadd.xlane.f32.xlu0 %v2824_v25 }
 0x598   :  { %v2059_v33 = vpack.c.bf16 %v2051_v55, %v2050_v12 }
 0x599   :  { %9483 = vmatmul.mubr.msk.bf16.vlgmr.msra.gmra.mxu1 %vm1545_vm6, %v2058_v23 }
 0x59a   :  { %9525 = vmatpush3.bf16.msra.mxu1 %v16340_v0  ;;  %9486 = vmatprep.mubr.msk.bf16.mxu1 %vm11149_vm4, %v16335_v28 }
 0x59b   :  { %9526 = vmatprep.subr.bf16.mxu1 %v16335_v28 }
 0x59e   :  { %9527 = vmatpush3.bf16.msra.mxu1 %v16343_v15 }
 0x59f   :  { %9528 = vmatprep.subr.bf16.mxu1 %v16335_v28 }
 0x5a1   :  { %9487 = vmatmul.mubr.msk.bf16.gmra.mxu1 %vm1545_vm6, %v2059_v33 }
 0x5a2   :  { %9529 = vmatpush3.bf16.msra.mxu1 %v16344_v32  ;;  %9490 = vmatprep.mubr.msk.bf16.mxu1 %vm11149_vm4, %v16335_v28 }
 0x5a3   :  { %9530 = vmatprep.subr.bf16.mxu1 %v16335_v28 }
 0x5a6   :  { %9531 = vmatpush3.bf16.msra.mxu1 %v16345_v42 }
 0x5a7   :  { %9532 = vmatprep.subr.bf16.mxu1 %v16335_v28 }
 0x5aa   :  { %9533 = vmatpush3.bf16.msra.mxu1 %v16346_v11 }
 0x5ab   :  { %9576 = vmatprep.subr.bf16.mxu1 %v16335_v28 }
 0x5af   :  { %v2022_v21 = vpop.xlane.xlu1 %2021 }
 0x5b0   :  { %10710 = vrcp.f32 %v2022_v21  ;;  %v16347_v21 = vld [vmem:[#allocation45_spill] sm:$0xff] }
 0x5b3   :  { %v2028_v26 = vpop.xlane.xlu1 %2027 }
 0x5b7   :  { %v2416_v27 = vpop.xlane.xlu1 %2415 }
 0x5bb   :  { %v2025_v7 = vpop.xlane.xlu0 %2024  ;;  %v2419_v14 = vpop.xlane.xlu1 %2418 }
 0x5bc   :  { %10712 = vrcp.f32 %v2025_v7 }
 0x5bd   :  { %v10711_v39 = vpop.eup %10710 }
 0x5be   :  { %v2052_v57 = vmul.f32 %v10711_v39, %v12255_v1 }
 0x5bf   :  { %v2031_v43 = vpop.xlane.xlu0 %2030  ;;  %v2425_v20 = vpop.xlane.xlu1 %2424 }
 0x5c0   :  { %10714 = vrcp.f32 %v2031_v43 }
 0x5c1   :  { %10716 = vrcp.f32 %v2028_v26 }
 0x5c3   :  { %v2034_v16 = vpop.xlane.xlu0 %2033  ;;  %v2431_v60 = vpop.xlane.xlu1 %2430 }
 0x5c7   :  { %v2037_v34 = vpop.xlane.xlu0 %2036  ;;  %v2434_v6 = vpop.xlane.xlu1 %2433 }
 0x5c8   :  { %10718 = vrcp.f32 %v2037_v34 }
 0x5c9   :  { %v10713_v38 = vpop.eup %10712  ;;  %10720 = vrcp.f32 %v2034_v16 }
 0x5ca   :  { %v2053_v37 = vmul.f32 %v10713_v38, %v12275_v49 }
 0x5cb   :  { %v2407_v8 = vpop.xlane.xlu0 %2406 }
 0x5cc   :  { %v2060_v46 = vpack.c.bf16 %v2053_v37, %v2052_v57 }
 0x5cd   :  { %v10715_v10 = vpop.eup %10714 }
 0x5ce   :  { %9491 = vmatmul.mubr.msk.bf16.gmra.mxu1 %vm1545_vm6, %v2060_v46  ;;  %v10717_v54 = vpop.eup %10716  ;;  %v2055_v36 = vmul.f32 %v10715_v10, %v12288_v62 }
 0x5cf   :  { %v2410_v53 = vpop.xlane.xlu0 %2409  ;;  %9494 = vmatprep.mubr.msk.bf16.mxu1 %vm11149_vm4, %v16335_v28  ;;  %v2054_v9 = vmul.f32 %v10717_v54, %v12263_v63  ;;  %v2799_v63 = vpop.xlane.xlu1 %2798 }
 0x5d0   :  { %10722 = vrcp.f32 %v2410_v53 }
 0x5d1   :  { %10724 = vrcp.f32 %v2407_v8  ;;  %v2061_v25 = vpack.c.bf16 %v2055_v36, %v2054_v9 }
 0x5d3   :  { %v2413_v1 = vpop.xlane.xlu0 %2412  ;;  %v2802_v33 = vpop.xlane.xlu1 %2801 }
 0x5d4   :  { %10726 = vrcp.f32 %v2413_v1 }
 0x5d5   :  { %v10719_v49 = vpop.eup %10718  ;;  %10728 = vrcp.f32 %v2416_v27 }
 0x5d6   :  { %9495 = vmatmul.mubr.msk.bf16.gmra.mxu1 %vm1545_vm6, %v2061_v25  ;;  %v10721_v23 = vpop.eup %10720  ;;  %v2057_v17 = vmul.f32 %v10719_v49, %v12314_v48 }
 0x5d7   :  { %9498 = vmatprep.mubr.msk.bf16.mxu1 %vm11149_vm4, %v16335_v28  ;;  %v2422_v0 = vpop.xlane.xlu0 %2421  ;;  %v2056_v62 = vmul.f32 %v10721_v23, %v12303_v3  ;;  %v2808_v26 = vpop.xlane.xlu1 %2807 }
 0x5d8   :  { %10730 = vrcp.f32 %v2422_v0 }
 0x5d9   :  { %v2062_v18 = vpack.c.bf16 %v2057_v17, %v2056_v62  ;;  %10732 = vrcp.f32 %v2419_v14 }
 0x5db   :  { %v2428_v15 = vpop.xlane.xlu0 %2427 }
 0x5dc   :  { %10734 = vrcp.f32 %v2428_v15 }
 0x5dd   :  { %v10723_v55 = vpop.eup %10722  ;;  %10736 = vrcp.f32 %v2425_v20 }
 0x5de   :  { %9499 = vmatmul.mubr.msk.bf16.gmra.mxu1 %vm1545_vm6, %v2062_v18  ;;  %v10725_v24 = vpop.eup %10724  ;;  %v2446_v12 = vmul.f32 %v10723_v55, %v12334_v58  ;;  %10738 = vrcp.f32 %v2434_v6 }
 0x5df   :  { %9534 = vmatprep.mubr.msk.bf16.mxu1 %vm11149_vm4, %v16335_v28  ;;  %v2445_v48 = vmul.f32 %v10725_v24, %v12324_v61  ;;  %v2805_v3 = vpop.xlane.xlu0 %2804  ;;  %10740 = vrcp.f32 %v2431_v60 }
 0x5e0   :  { %10742 = vrcp.f32 %v2802_v33 }
 0x5e1   :  { %v2455_v32 = vpack.c.bf16 %v2446_v12, %v2445_v48  ;;  %v10727_v42 = vpop.eup %10726  ;;  %10744 = vrcp.f32 %v2799_v63 }
 0x5e2   :  { %v10729_v11 = vpop.eup %10728  ;;  %v2447_v58 = vmul.f32 %v10727_v42, %v12342_v29  ;;  %v2814_v29 = vpop.xlane.xlu1 %2813  ;;  %10746 = vrcp.f32 %v2805_v3 }
 0x5e3   :  { %v2448_v61 = vmul.f32 %v10729_v11, %v12271_v19  ;;  %v2811_v7 = vpop.xlane.xlu0 %2810  ;;  %10748 = vrcp.f32 %v2808_v26 }
 0x5e4   :  { %10750 = vrcp.f32 %v2811_v7 }
 0x5e5   :  { %v2456_v43 = vpack.c.bf16 %v2448_v61, %v2447_v58  ;;  %v10731_v27 = vpop.eup %10730  ;;  %10752 = vrcp.f32 %v2814_v29 }
 0x5e6   :  { %9535 = vmatmul.mubr.msk.bf16.vlgmr.msra.gmra.mxu1 %vm1545_vm6, %v2455_v32  ;;  %v10733_v16 = vpop.eup %10732  ;;  %v2450_v19 = vmul.f32 %v10731_v27, %v12350_v4  ;;  %v2853_v38 = vpop.permute.xlu1 %2852 }
 0x5e7   :  { %9577 = vmatpush3.bf16.msra.mxu1 %v16347_v21  ;;  %9538 = vmatprep.mubr.msk.bf16.mxu1 %vm11149_vm4, %v16335_v28  ;;  %v2449_v14 = vmul.f32 %v10733_v16, %v12280_v45 }
 0x5e8   :  { %9578 = vmatprep.subr.bf16.mxu1 %v16335_v28 }
 0x5e9   :  { %v2457_v34 = vpack.c.bf16 %v2450_v19, %v2449_v14  ;;  %v10735_v39 = vpop.eup %10734 }
 0x5ea   :  { %v2452_v4 = vmul.f32 %v10735_v39, %v12364_v52 }
 0x5eb   :  { %9579 = vmatpush3.bf16.msra.mxu1 %v12459_v35  ;;  %v2855_v35 = vpop.permute.xlu0 %2854 }
 0x5ec   :  { %9580 = vmatprep.subr.bf16.mxu1 %v16335_v28 }
 0x5ee   :  { %9539 = vmatmul.mubr.msk.bf16.gmra.mxu1 %vm1545_vm6, %v2456_v43 }
 0x5ef   :  { %9581 = vmatpush3.bf16.msra.mxu1 %v12457_v59  ;;  %9542 = vmatprep.mubr.msk.bf16.mxu1 %vm11149_vm4, %v16335_v28  ;;  %v10737_v59 = vpop.eup %10736 }
 0x5f0   :  { %9582 = vmatprep.subr.bf16.mxu1 %v16335_v28  ;;  %v2451_v8 = vmul.f32 %v10737_v59, %v12293_v47  ;;  %v10739_v57 = vpop.eup %10738 }
 0x5f1   :  { %v10741_v37 = vpop.eup %10740  ;;  %v2454_v20 = vmul.f32 %v10739_v57, %v12320_v51 }
 0x5f2   :  { %v2458_v45 = vpack.c.bf16 %v2452_v4, %v2451_v8  ;;  %v2453_v46 = vmul.f32 %v10741_v37, %v12308_v13  ;;  %v10743_v53 = vpop.eup %10742 }
 0x5f3   :  { %9583 = vmatpush3.bf16.msra.mxu1 %v2855_v35  ;;  %v10745_v52 = vpop.eup %10744  ;;  %v2838_v47 = vmul.f32 %v10743_v53, %v12340_v2 }
 0x5f4   :  { %9584 = vmatprep.subr.bf16.mxu1 %v16335_v28  ;;  %v2459_v10 = vpack.c.bf16 %v2454_v20, %v2453_v46  ;;  %v2837_v54 = vmul.f32 %v10745_v52, %v12330_v5  ;;  %v10747_v60 = vpop.eup %10746 }
 0x5f5   :  { %v10749_v51 = vpop.eup %10748  ;;  %v2839_v9 = vmul.f32 %v10747_v60, %v12372_v31 }
 0x5f6   :  { %9543 = vmatmul.mubr.msk.bf16.gmra.mxu1 %vm1545_vm6, %v2457_v34  ;;  %v2847_v36 = vpack.c.bf16 %v2838_v47, %v2837_v54  ;;  %v2840_v25 = vmul.f32 %v10749_v51, %v12348_v56  ;;  %v10751_v23 = vpop.eup %10750 }
 0x5f7   :  { %9585 = vmatpush3.bf16.msra.mxu1 %v2853_v38  ;;  %9546 = vmatprep.mubr.msk.bf16.mxu1 %vm11149_vm4, %v16335_v28  ;;  %v10753_v17 = vpop.eup %10752  ;;  %v2841_v31 = vmul.f32 %v10751_v23, %v12380_v40 }
 0x5f8   :  { %v2848_v5 = vpack.c.bf16 %v2840_v25, %v2839_v9  ;;  %v2842_v18 = vmul.f32 %v10753_v17, %v12356_v50 }
 0x5fa   :  { %v2849_v24 = vpack.c.bf16 %v2842_v18, %v2841_v31 }
 0x5fe   :  { %9547 = vmatmul.mubr.msk.bf16.gmra.mxu1 %vm1545_vm6, %v2458_v45 }
 0x5ff   :  { %9550 = vmatprep.mubr.msk.bf16.mxu1 %vm11149_vm4, %v16335_v28 }
 0x606   :  { %9551 = vmatmul.mubr.msk.bf16.gmra.mxu1 %vm1545_vm6, %v2459_v10 }
 0x607   :  { %9586 = vmatprep.mubr.msk.bf16.mxu1 %vm11149_vm4, %v16335_v28 }
 0x60c   :  { %v2820_v2 = vpop.xlane.xlu1 %2819 }
 0x60d   :  { %10754 = vrcp.f32 %v2820_v2 }
 0x60e   :  { %9587 = vmatmul.mubr.msk.bf16.vlgmr.msra.gmra.mxu1 %vm1545_vm6, %v2847_v36 }
 0x60f   :  { %9590 = vmatprep.mubr.msk.bf16.mxu1 %vm11149_vm4, %v16335_v28 }
 0x610   :  { %v12511_v13 = vpop.f32.mrf.mxu1 }
 0x612   :  { %v9432_v1 = vpop.f32.mrf.mxu1 }
 0x613   :  { %v10574_v1 = vld [vmem:[%s11213_s19] sm:$0xff]   ;;  %s16369_s19 = sld [smem:[#allocation9_spill]] }
 0x614   :  { %v12517_v49 = vpop.f32.mrf.mxu1  ;;  %9606 = vmatprep.subr.bf16.mxu0 %v10574_v1 }
 0x615   :  { %9607 = vmatpush3.bf16.msra.mxu0 %v10574_v1 }
 0x616   :  { %v9433_v6 = vpop.f32.mrf.mxu1  ;;  %9591 = vmatmul.mubr.msk.bf16.gmra.mxu1 %vm1545_vm6, %v2848_v5 }
 0x617   :  { %9594 = vmatprep.mubr.msk.bf16.mxu1 %vm11149_vm4, %v16335_v28 }
 0x618   :  { %v12520_v0 = vpop.f32.mrf.mxu1  ;;  %v2817_v62 = vpop.xlane.xlu0 %2816 }
 0x619   :  { %10756 = vrcp.f32 %v2817_v62 }
 0x61a   :  { %v9436_v56 = vpop.f32.mrf.mxu1  ;;  %v10755_v48 = vpop.eup %10754 }
 0x61b   :  { %v2844_v32 = vmul.f32 %v10755_v48, %v12408_v41 }
 0x61c   :  { %v12526_v55 = vpop.f32.mrf.mxu1  ;;  %v2823_v63 = vpop.xlane.xlu0 %2822 }
 0x61d   :  { %10758 = vrcp.f32 %v2823_v63 }
 0x61e   :  { %v9437_v12 = vpop.f32.mrf.mxu1  ;;  %9595 = vmatmul.mubr.msk.bf16.gmra.mxu1 %vm1545_vm6, %v2849_v24 }
 0x61f   :  { %9598 = vmatprep.mubr.msk.bf16.mxu1 %vm11149_vm4, %v16335_v28 }
 0x620   :  { %v2826_v15 = vpop.xlane.xlu0 %2825 }
 0x621   :  { %10760 = vrcp.f32 %v2826_v15 }
 0x626   :  { %v10757_v33 = vpop.eup %10756 }
 0x627   :  { %v2843_v40 = vmul.f32 %v10757_v33, %v12420_v30 }
 0x629   :  { %v2850_v50 = vpack.c.bf16 %v2844_v32, %v2843_v40 }
 0x62a   :  { %v10759_v42 = vpop.eup %10758 }
 0x62b   :  { %9599 = vmatmul.mubr.msk.bf16.gmra.mxu1 %vm1545_vm6, %v2850_v50  ;;  %v2845_v11 = vmul.f32 %v10759_v42, %v12426_v22 }
 0x62c   :  { %9602 = vmatprep.mubr.msk.bf16.mxu1 %vm11149_vm4, %v16335_v28 }
 0x62e   :  { %v10761_v3 = vpop.eup %10760 }
 0x62f   :  { %v2846_v21 = vmul.f32 %v10761_v3, %v12433_v44 }
 0x631   :  { %v2851_v58 = vpack.c.bf16 %v2846_v21, %v2845_v11 }
 0x633   :  { %9603 = vmatmul.mubr.msk.bf16.gmra.mxu1 %vm1545_vm6, %v2851_v58 }
 0x641   :  { %v12539_v26 = vpop.f32.mrf.mxu1 }
 0x643   :  { %v9440_v30 = vpop.f32.mrf.mxu1 }
 0x645   :  { %v12541_v61 = vpop.f32.mrf.mxu1 }
 0x647   :  { %v9441_v41 = vpop.f32.mrf.mxu1 }
 0x649   :  { %v12543_v7 = vpop.f32.mrf.mxu1 }
 0x64b   :  { %v9444_v43 = vpop.f32.mrf.mxu1 }
 0x64d   :  { %v12545_v27 = vpop.f32.mrf.mxu1 }
 0x64f   :  { %v9445_v16 = vpop.f32.mrf.mxu1 }
 0x651   :  { %v12547_v29 = vpop.f32.mrf.mxu1 }
 0x653   :  { %v9448_v22 = vpop.f32.mrf.mxu1 }
 0x655   :  { %v12549_v19 = vpop.f32.mrf.mxu1 }
 0x657   :  { %v9449_v44 = vpop.f32.mrf.mxu1 }
 0x659   :  { %v12551_v35 = vpop.f32.mrf.mxu1 }
 0x65b   :  { %v9484_v14 = vpop.f32.mrf.mxu1 }
 0x65d   :  { %v12553_v34 = vpop.f32.mrf.mxu1 }
 0x65f   :  { %v9485_v39 = vpop.f32.mrf.mxu1 }
 0x661   :  { %v12555_v38 = vpop.f32.mrf.mxu1 }
 0x663   :  { %v9488_v59 = vpop.f32.mrf.mxu1 }
 0x665   :  { %v12557_v4 = vpop.f32.mrf.mxu1 }
 0x667   :  { %v9489_v8 = vpop.f32.mrf.mxu1 }
 0x68e   :  { %v12559_v45 = vpop.f32.mrf.mxu1 }
 0x690   :  { %v9492_v57 = vpop.f32.mrf.mxu1 }
 0x692   :  { %v12561_v37 = vpop.f32.mrf.mxu1 }
 0x694   :  { %v9493_v20 = vpop.f32.mrf.mxu1 }
 0x696   :  { %v12563_v46 = vpop.f32.mrf.mxu1 }
 0x698   :  { %v9496_v10 = vpop.f32.mrf.mxu1 }
 0x69a   :  { %v12565_v53 = vpop.f32.mrf.mxu1 }
 0x69c   :  { %v9497_v52 = vpop.f32.mrf.mxu1 }
 0x69e   :  { %v12567_v47 = vpop.f32.mrf.mxu1 }
 0x6a0   :  { %v9500_v54 = vpop.f32.mrf.mxu1 }
 0x6a2   :  { %v12569_v36 = vpop.f32.mrf.mxu1 }
 0x6a4   :  { %v9501_v60 = vpop.f32.mrf.mxu1 }
 0x6a6   :  { %v2524_v51 = vpop.f32.mrf.mxu1 }
 0x6a8   :  { %v9536_v9 = vpop.f32.mrf.mxu1 }
 0x6aa   :  { %v2527_v25 = vpop.f32.mrf.mxu1 }
 0x6ab   :  { %v10213_v2 = vpack.i.bf16 %v2527_v25, %v2524_v51 }
 0x6ac   :  { %v9537_v5 = vpop.f32.mrf.mxu1 }
 0x6ad   :  { %10214 = vrot.lane.b32.xlu0 %v10213_v2, %s11152_s8 }
 0x6ae   :  { %v2532_v23 = vpop.f32.mrf.mxu1 }
 0x6b0   :  { %v9540_v6 = vpop.f32.mrf.mxu1 }
 0x6b2   :  { %v2535_v17 = vpop.f32.mrf.mxu1 }
 0x6b3   :  { %v10218_v62 = vpack.i.bf16 %v2535_v17, %v2532_v23 }
 0x6b4   :  { %v9541_v31 = vpop.f32.mrf.mxu1 }
 0x6b5   :  { %10219 = vrot.lane.b32.xlu1 %v10218_v62, %s11152_s8 }
 0x6b6   :  { %v2540_v56 = vpop.f32.mrf.mxu1 }
 0x6b8   :  { %v9544_v18 = vpop.f32.mrf.mxu1 }
 0x6ba   :  { %v2543_v63 = vpop.f32.mrf.mxu1 }
 0x6bb   :  { %v10223_v24 = vpack.i.bf16 %v2543_v63, %v2540_v56 }
 0x6bc   :  { %v9545_v12 = vpop.f32.mrf.mxu1 }
 0x6bd   :  { %10224 = vrot.lane.b32.xlu0 %v10223_v24, %s11152_s8 }
 0x6be   :  { %v2548_v15 = vpop.f32.mrf.mxu1 }
 0x6c0   :  { %v9548_v48 = vpop.f32.mrf.mxu1 }
 0x6c2   :  { %v2551_v33 = vpop.f32.mrf.mxu1 }
 0x6c3   :  { %v10228_v40 = vpack.i.bf16 %v2551_v33, %v2548_v15 }
 0x6c4   :  { %v9549_v32 = vpop.f32.mrf.mxu1 }
 0x6c5   :  { %10229 = vrot.lane.b32.xlu0 %v10228_v40, %s11152_s8 }
 0x6c6   :  { %v2556_v50 = vpop.f32.mrf.mxu1 }
 0x6c8   :  { %v9552_v42 = vpop.f32.mrf.mxu1 }
 0x6ca   :  { %v2559_v3 = vpop.f32.mrf.mxu1 }
 0x6cb   :  { %v10233_v11 = vpack.i.bf16 %v2559_v3, %v2556_v50 }
 0x6cc   :  { %v9553_v21 = vpop.f32.mrf.mxu1 }
 0x6cd   :  { %10234 = vrot.lane.b32.xlu1 %v10233_v11, %s11152_s8 }
 0x6ce   :  { %v2916_v58 = vpop.f32.mrf.mxu1 }
 0x6d0   :  { %v9588_v30 = vpop.f32.mrf.mxu1 }
 0x6d2   :  { %v2919_v41 = vpop.f32.mrf.mxu1 }
 0x6d3   :  { %v10238_v43 = vpack.i.bf16 %v2919_v41, %v2916_v58 }
 0x6d4   :  { %v9589_v16 = vpop.f32.mrf.mxu1 }
 0x6d5   :  { %10239 = vrot.lane.b32.xlu0 %v10238_v43, %s11152_s8 }
 0x6d6   :  { %v2924_v22 = vpop.f32.mrf.mxu1 }
 0x6d8   :  { %v9592_v44 = vpop.f32.mrf.mxu1 }
 0x6da   :  { %v2927_v14 = vpop.f32.mrf.mxu1 }
 0x6db   :  { %v10243_v39 = vpack.i.bf16 %v2927_v14, %v2924_v22 }
 0x6dc   :  { %v9593_v59 = vpop.f32.mrf.mxu1 }
 0x6dd   :  { %10244 = vrot.lane.b32.xlu1 %v10243_v39, %s11152_s8 }
 0x6de   :  { %v2932_v8 = vpop.f32.mrf.mxu1 }
 0x6e0   :  { %v9596_v57 = vpop.f32.mrf.mxu1 }
 0x6e2   :  { %v2935_v20 = vpop.f32.mrf.mxu1 }
 0x6e3   :  { %v10248_v10 = vpack.i.bf16 %v2935_v20, %v2932_v8 }
 0x6e4   :  { %v9597_v52 = vpop.f32.mrf.mxu1 }
 0x6e5   :  { %10249 = vrot.lane.b32.xlu0 %v10248_v10, %s11152_s8 }
 0x6eb   :  { %v2940_v54 = vpop.f32.mrf.mxu1 }
 0x6ed   :  { %v9600_v60 = vpop.f32.mrf.mxu1 }
 0x6ef   :  { %v2943_v51 = vpop.f32.mrf.mxu1 }
 0x6f0   :  { %v10253_v9 = vpack.i.bf16 %v2943_v51, %v2940_v54 }
 0x6f1   :  { %v9601_v1 = vpop.f32.mrf.mxu1 }
 0x6f2   :  { %10254 = vrot.lane.b32.xlu1 %v10253_v9, %s11152_s8 }
 0x6f3   :  { %v2948_v25 = vpop.f32.mrf.mxu1 }
 0x6f5   :  { %v9604_v2 = vpop.f32.mrf.mxu1 }
 0x6f7   :  { %v2951_v5 = vpop.f32.mrf.mxu1 }
 0x6f8   :  { %v10258_v23 = vpack.i.bf16 %v2951_v5, %v2948_v25 }
 0x6f9   :  { %v9605_v6 = vpop.f32.mrf.mxu1 }
 0x6fa   :  { %10259 = vrot.lane.b32.xlu0 %v10258_v23, %s11152_s8 }
 0x71f   :  { %v10215_v17 = vpop.permute.xlu0 %10214 }
 0x720   :  { %v10217_v62 = vunpack.i.h.bf16 %v10215_v17  ;;  %v10216_v31 = vunpack.i.l.bf16 %v10215_v17 }
 0x722   :  { %v3036_v56 = vsel %vm1443_vm5, %v12517_v49, %v10217_v62  ;;  %v3035_v18 = vsel %vm1443_vm5, %v12511_v13, %v10216_v31 }
 0x723   :  { %v3055_v63 = vpack.c.bf16 %v3036_v56, %v3035_v18  ;;  %v16348_v18 = vld [vmem:[#allocation37_spill] sm:$0xff] }
 0x725   :  { %9608 = vmatprep.mubr.msk.bf16.mxu0 %vm1221_vm3, %v3055_v63 }
 0x727   :  { %v10220_v24 = vpop.permute.xlu1 %10219 }
 0x728   :  { %v10222_v12 = vunpack.i.h.bf16 %v10220_v24  ;;  %v10221_v15 = vunpack.i.l.bf16 %v10220_v24 }
 0x72a   :  { %v3038_v48 = vsel %vm1443_vm5, %v12526_v55, %v10222_v12  ;;  %v3037_v33 = vsel %vm1443_vm5, %v12520_v0, %v10221_v15  ;;  %v16349_v15 = vld [vmem:[#allocation36_spill] sm:$0xff] }
 0x72b   :  { %v3056_v40 = vpack.c.bf16 %v3038_v48, %v3037_v33 }
 0x72d   :  { %9609 = vmatmul.mubr.msk.bf16.vlgmr.msra.gmra.mxu0 %vm1221_vm3, %v3056_v40  ;;  %v16350_v40 = vld [vmem:[#allocation38_spill] sm:$0xff] }
 0x72f   :  { %v10225_v32 = vpop.permute.xlu0 %10224 }
 0x730   :  { %v10227_v49 = vunpack.i.h.bf16 %v10225_v32  ;;  %v10226_v50 = vunpack.i.l.bf16 %v10225_v32 }
 0x732   :  { %v3040_v13 = vsel %vm1443_vm5, %v12541_v61, %v10227_v49  ;;  %v3039_v42 = vsel %vm1443_vm5, %v12539_v26, %v10226_v50  ;;  %v16351_v49 = vld [vmem:[#allocation39_spill] sm:$0xff] }
 0x733   :  { %v3057_v3 = vpack.c.bf16 %v3040_v13, %v3039_v42 }
 0x735   :  { %9612 = vmatprep.mubr.msk.bf16.mxu0 %vm1221_vm3, %v3057_v3 }
 0x737   :  { %v10230_v11 = vpop.permute.xlu0 %10229 }
 0x738   :  { %v10232_v55 = vunpack.i.h.bf16 %v10230_v11  ;;  %v10231_v21 = vunpack.i.l.bf16 %v10230_v11 }
 0x73a   :  { %v3042_v0 = vsel %vm1443_vm5, %v12545_v27, %v10232_v55  ;;  %v3041_v58 = vsel %vm1443_vm5, %v12543_v7, %v10231_v21 }
 0x73b   :  { %v3058_v30 = vpack.c.bf16 %v3042_v0, %v3041_v58 }
 0x73d   :  { %9613 = vmatmul.mubr.msk.bf16.gmra.mxu0 %vm1221_vm3, %v3058_v30  ;;  %v16352_v30 = vld [vmem:[#allocation41_spill] sm:$0xff] }
 0x73f   :  { %v10235_v41 = vpop.permute.xlu1 %10234 }
 0x740   :  { %v10237_v61 = vunpack.i.h.bf16 %v10235_v41  ;;  %v10236_v43 = vunpack.i.l.bf16 %v10235_v41 }
 0x742   :  { %v3044_v26 = vsel %vm1443_vm5, %v12549_v19, %v10237_v61  ;;  %v3043_v16 = vsel %vm1443_vm5, %v12547_v29, %v10236_v43  ;;  %v16353_v43 = vld [vmem:[#allocation43_spill] sm:$0xff] }
 0x743   :  { %v3059_v22 = vpack.c.bf16 %v3044_v26, %v3043_v16 }
 0x745   :  { %9616 = vmatprep.mubr.msk.bf16.mxu0 %vm1221_vm3, %v3059_v22 }
 0x747   :  { %v10240_v44 = vpop.permute.xlu0 %10239 }
 0x748   :  { %v10242_v27 = vunpack.i.h.bf16 %v10240_v44  ;;  %v10241_v14 = vunpack.i.l.bf16 %v10240_v44 }
 0x74a   :  { %v3046_v7 = vsel %vm1443_vm5, %v12553_v34, %v10242_v27  ;;  %v3045_v39 = vsel %vm1443_vm5, %v12551_v35, %v10241_v14  ;;  %v16354_v27 = vld [vmem:[#allocation42_spill] sm:$0xff] }
 0x74b   :  { %v3060_v59 = vpack.c.bf16 %v3046_v7, %v3045_v39  ;;  %v16355_v7 = vld [vmem:[#allocation40_spill] sm:$0xff] }
 0x74d   :  { %9617 = vmatmul.mubr.msk.bf16.gmra.mxu0 %vm1221_vm3, %v3060_v59 }
 0x74f   :  { %v10245_v8 = vpop.permute.xlu1 %10244 }
 0x750   :  { %v10247_v19 = vunpack.i.h.bf16 %v10245_v8  ;;  %v10246_v57 = vunpack.i.l.bf16 %v10245_v8 }
 0x752   :  { %v3048_v29 = vsel %vm1443_vm5, %v12557_v4, %v10247_v19  ;;  %v3047_v20 = vsel %vm1443_vm5, %v12555_v38, %v10246_v57 }
 0x753   :  { %v3061_v10 = vpack.c.bf16 %v3048_v29, %v3047_v20 }
 0x755   :  { %9620 = vmatprep.mubr.msk.bf16.mxu0 %vm1221_vm3, %v3061_v10 }
 0x757   :  { %v10250_v52 = vpop.permute.xlu0 %10249 }
 0x758   :  { %v10252_v34 = vunpack.i.h.bf16 %v10250_v52  ;;  %v10251_v54 = vunpack.i.l.bf16 %v10250_v52 }
 0x75a   :  { %v3050_v35 = vsel %vm1443_vm5, %v12561_v37, %v10252_v34  ;;  %v3049_v60 = vsel %vm1443_vm5, %v12559_v45, %v10251_v54  ;;  %v16356_v34 = vld [vmem:[#allocation21_spill] sm:$0xff] }
 0x75b   :  { %v3062_v51 = vpack.c.bf16 %v3050_v35, %v3049_v60  ;;  %v16357_v60 = vld [vmem:[#allocation29_spill] sm:$0xff] }
 0x75d   :  { %9621 = vmatmul.mubr.msk.bf16.gmra.mxu0 %vm1221_vm3, %v3062_v51 }
 0x764   :  { %v10255_v4 = vpop.permute.xlu1 %10254 }
 0x765   :  { %v10257_v9 = vunpack.i.h.bf16 %v10255_v4  ;;  %v10256_v1 = vunpack.i.l.bf16 %v10255_v4 }
 0x767   :  { %v3052_v38 = vsel %vm1443_vm5, %v12565_v53, %v10257_v9  ;;  %v3051_v25 = vsel %vm1443_vm5, %v12563_v46, %v10256_v1  ;;  %v12633_v53 = vld [vmem:[%s11218_s24] ss:$0 sm:$0xff]  ;;  %s16370_s24 = sld [smem:[#allocation10_spill]] }
 0x768   :  { %v3063_v2 = vpack.c.bf16 %v3052_v38, %v3051_v25  ;;  %v16358_v38 = vld [vmem:[#allocation24_spill] sm:$0xff] }
 0x76a   :  { %9624 = vmatprep.mubr.msk.bf16.mxu0 %vm1221_vm3, %v3063_v2  ;;  %v16359_v2 = vld [vmem:[#allocation20_spill] sm:$0xff] }
 0x76c   :  { %v10260_v37 = vpop.permute.xlu0 %10259 }
 0x76d   :  { %v10262_v5 = vunpack.i.h.bf16 %v10260_v37  ;;  %v10261_v23 = vunpack.i.l.bf16 %v10260_v37 }
 0x76f   :  { %v3054_v45 = vsel %vm1443_vm5, %v12569_v36, %v10262_v5  ;;  %v3053_v6 = vsel %vm1443_vm5, %v12567_v47, %v10261_v23 }
 0x770   :  { %v3064_v17 = vpack.c.bf16 %v3054_v45, %v3053_v6 }
 0x772   :  { %9625 = vmatmul.mubr.msk.bf16.gmra.mxu0 %vm1221_vm3, %v3064_v17 }
 0x7ed   :  { %v9610_v62 = vpop.f32.mrf.mxu0 }
 0x7ee   :  { %v3153_v36 = vadd.f32 %v9610_v62, %v12633_v53 }
 0x7ef   :  { %v3144_v31 = vpop.f32.mrf.mxu0 }
 0x7f0   :  { %v3145_v46 = vadd.f32 %v12633_v53, %v3144_v31  ;;  %v12651_v50 = vadd.f32 %v3153_v36, %v16351_v49 }
 0x7f1   :  { %v9611_v56 = vpop.f32.mrf.mxu0 }
 0x7f2   :  { %v12637_v63 = vadd.f32 %v3145_v46, %v16348_v18  ;;  %v3156_v24 = vadd.f32 %v9611_v56, %v12633_v53  ;;  %v3249_v3 = vsel %vm1221_vm3, %v12651_v50, 0.0  ;;  %v16360_v56 = vld [vmem:[#allocation22_spill] sm:$0xff] }
 0x7f3   :  { %v3147_v12 = vpop.f32.mrf.mxu0 }
 0x7f4   :  { %v12642_v47 = vadd.f32 %v3156_v24, %v16349_v15  ;;  %v3148_v48 = vadd.f32 %v12633_v53, %v3147_v12  ;;  %v3243_v33 = vsel %vm1221_vm3, %v12637_v63, 0.0  ;;  %v16361_v12 = vld [vmem:[#allocation25_spill] sm:$0xff] }
 0x7f5   :  { %3244 = vadd.xlane.f32.xlu1 %v3243_v33 }
 0x7f6   :  { %v12648_v32 = vadd.f32 %v3148_v48, %v16350_v40  ;;  %v3252_v42 = vsel %vm1221_vm3, %v12642_v47, 0.0  ;;  %v16362_v40 = vld [vmem:[#allocation23_spill] sm:$0xff] }
 0x7f8   :  { %v3246_v13 = vsel %vm1221_vm3, %v12648_v32, 0.0 }
 0x7f9   :  { %3247 = vadd.xlane.f32.xlu0 %v3246_v13  ;;  %3253 = vadd.xlane.f32.xlu1 %v3252_v42  ;;  %v16363_v13 = vld [vmem:[#allocation32_spill] sm:$0xff] }
 0x7fd   :  { %v9614_v11 = vpop.f32.mrf.mxu0  ;;  %3250 = vadd.xlane.f32.xlu0 %v3249_v3 }
 0x7fe   :  { %v3169_v21 = vadd.f32 %v9614_v11, %v12633_v53 }
 0x7ff   :  { %v3160_v55 = vpop.f32.mrf.mxu0 }
 0x800   :  { %v3161_v0 = vadd.f32 %v12633_v53, %v3160_v55  ;;  %v12665_v26 = vadd.f32 %v3169_v21, %v16353_v43  ;;  %v16364_v43 = vld [vmem:[#allocation30_spill] sm:$0xff] }
 0x801   :  { %v9615_v58 = vpop.f32.mrf.mxu0 }
 0x802   :  { %v12662_v41 = vadd.f32 %v3161_v0, %v16352_v30  ;;  %v3172_v16 = vadd.f32 %v9615_v58, %v12633_v53  ;;  %v3261_v59 = vsel %vm1221_vm3, %v12665_v26, 0.0 }
 0x803   :  { %v3163_v61 = vpop.f32.mrf.mxu0 }
 0x804   :  { %v3164_v22 = vadd.f32 %v12633_v53, %v3163_v61  ;;  %v3255_v44 = vsel %vm1221_vm3, %v12662_v41, 0.0  ;;  %v12675_v39 = vadd.f32 %v3172_v16, %v16355_v7 }
 0x805   :  { %3256 = vadd.xlane.f32.xlu0 %v3255_v44  ;;  %v16365_v44 = vld [vmem:[#allocation33_spill] sm:$0xff] }
 0x806   :  { %v12672_v14 = vadd.f32 %v3164_v22, %v16354_v27  ;;  %v3264_v19 = vsel %vm1221_vm3, %v12675_v39, 0.0 }
 0x808   :  { %v3258_v8 = vsel %vm1221_vm3, %v12672_v14, 0.0 }
 0x809   :  { %3262 = vadd.xlane.f32.xlu0 %v3261_v59  ;;  %3259 = vadd.xlane.f32.xlu1 %v3258_v8 }
 0x80d   :  { %v9618_v57 = vpop.f32.mrf.mxu0  ;;  %3265 = vadd.xlane.f32.xlu1 %v3264_v19  ;;  %v16366_v19 = vld [vmem:[#allocation31_spill] sm:$0xff] }
 0x80e   :  { %v3185_v20 = vadd.f32 %v9618_v57, %v12633_v53 }
 0x80f   :  { %v3176_v29 = vpop.f32.mrf.mxu0 }
 0x810   :  { %v3177_v10 = vadd.f32 %v12633_v53, %v3176_v29  ;;  %v12689_v51 = vadd.f32 %v3185_v20, %v16357_v60  ;;  %v16367_v29 = vld [vmem:[#allocation26_spill] sm:$0xff] }
 0x811   :  { %v9619_v52 = vpop.f32.mrf.mxu0 }
 0x812   :  { %v12686_v54 = vadd.f32 %v3177_v10, %v16356_v34  ;;  %v3188_v4 = vadd.f32 %v9619_v52, %v12633_v53  ;;  %v3273_v5 = vsel %vm1221_vm3, %v12689_v51, 0.0 }
 0x813   :  { %v3179_v35 = vpop.f32.mrf.mxu0 }
 0x814   :  { %v3180_v9 = vadd.f32 %v12633_v53, %v3179_v35  ;;  %v3267_v1 = vsel %vm1221_vm3, %v12686_v54, 0.0  ;;  %v12699_v37 = vadd.f32 %v3188_v4, %v16359_v2 }
 0x815   :  { %3268 = vadd.xlane.f32.xlu0 %v3267_v1 }
 0x816   :  { %v12696_v25 = vadd.f32 %v3180_v9, %v16358_v38  ;;  %v3276_v45 = vsel %vm1221_vm3, %v12699_v37, 0.0 }
 0x818   :  { %v3270_v23 = vsel %vm1221_vm3, %v12696_v25, 0.0 }
 0x819   :  { %3274 = vadd.xlane.f32.xlu0 %v3273_v5  ;;  %3271 = vadd.xlane.f32.xlu1 %v3270_v23 }
 0x81d   :  { %v9622_v6 = vpop.f32.mrf.mxu0  ;;  %3277 = vadd.xlane.f32.xlu1 %v3276_v45 }
 0x81e   :  { %v3201_v62 = vadd.f32 %v9622_v6, %v12633_v53 }
 0x81f   :  { %v3192_v17 = vpop.f32.mrf.mxu0 }
 0x820   :  { %v3193_v31 = vadd.f32 %v12633_v53, %v3192_v17  ;;  %v12713_v36 = vadd.f32 %v3201_v62, %v16361_v12 }
 0x821   :  { %v9623_v46 = vpop.f32.mrf.mxu0 }
 0x822   :  { %v12710_v18 = vadd.f32 %v3193_v31, %v16360_v56  ;;  %v3204_v15 = vadd.f32 %v9623_v46, %v12633_v53  ;;  %v3285_v3 = vsel %vm1221_vm3, %v12713_v36, 0.0 }
 0x823   :  { %v3195_v24 = vpop.f32.mrf.mxu0 }
 0x824   :  { %v3196_v48 = vadd.f32 %v12633_v53, %v3195_v24  ;;  %v3279_v33 = vsel %vm1221_vm3, %v12710_v18, 0.0  ;;  %v12723_v42 = vadd.f32 %v3204_v15, %v16363_v13 }
 0x825   :  { %3280 = vadd.xlane.f32.xlu0 %v3279_v33 }
 0x826   :  { %v12720_v49 = vadd.f32 %v3196_v48, %v16362_v40  ;;  %v3288_v55 = vsel %vm1221_vm3, %v12723_v42, 0.0 }
 0x828   :  { %v3282_v11 = vsel %vm1221_vm3, %v12720_v49, 0.0 }
 0x829   :  { %3286 = vadd.xlane.f32.xlu0 %v3285_v3  ;;  %3283 = vadd.xlane.f32.xlu1 %v3282_v11 }
 0x82d   :  { %3289 = vadd.xlane.f32.xlu1 %v3288_v55 }
 0x832   :  { %v9626_v21 = vpop.f32.mrf.mxu0 }
 0x833   :  { %v3217_v58 = vadd.f32 %v9626_v21, %v12633_v53 }
 0x834   :  { %v3208_v0 = vpop.f32.mrf.mxu0 }
 0x835   :  { %v3209_v30 = vadd.f32 %v12633_v53, %v3208_v0  ;;  %v12737_v27 = vadd.f32 %v3217_v58, %v16365_v44 }
 0x836   :  { %v9627_v61 = vpop.f32.mrf.mxu0 }
 0x837   :  { %v12734_v16 = vadd.f32 %v3209_v30, %v16364_v43  ;;  %v3220_v7 = vadd.f32 %v9627_v61, %v12633_v53  ;;  %v3297_v10 = vsel %vm1221_vm3, %v12737_v27, 0.0 }
 0x838   :  { %v3211_v22 = vpop.f32.mrf.mxu0 }
 0x839   :  { %v3212_v59 = vadd.f32 %v12633_v53, %v3211_v22  ;;  %v3291_v8 = vsel %vm1221_vm3, %v12734_v16, 0.0  ;;  %v12747_v20 = vadd.f32 %v3220_v7, %v16367_v29 }
 0x83a   :  { %3292 = vadd.xlane.f32.xlu0 %v3291_v8 }
 0x83b   :  { %v12744_v57 = vadd.f32 %v3212_v59, %v16366_v19  ;;  %v3300_v53 = vsel %vm1221_vm3, %v12747_v20, 0.0 }
 0x83d   :  { %v3294_v52 = vsel %vm1221_vm3, %v12744_v57, 0.0 }
 0x83e   :  { %3298 = vadd.xlane.f32.xlu0 %v3297_v10  ;;  %3295 = vadd.xlane.f32.xlu1 %v3294_v52 }
 0x842   :  { %3301 = vadd.xlane.f32.xlu1 %v3300_v53 }
 0x87e   :  { %v3245_v34 = vpop.xlane.xlu1 %3244 }
 0x87f   :  { %v3304_v35 = vmul.f32 0.0625, %v3245_v34 }
 0x881   :  { %v12756_v60 = vsub.f32 %v12637_v63, %v3304_v35 }
 0x882   :  { %v3248_v4 = vpop.xlane.xlu0 %3247  ;;  %v3254_v9 = vpop.xlane.xlu1 %3253 }
 0x883   :  { %v3305_v1 = vmul.f32 0.0625, %v3248_v4  ;;  %v3307_v38 = vmul.f32 0.0625, %v3254_v9  ;;  %v3344_v2 = vmul.f32 %v12756_v60, %v12756_v60 }
 0x885   :  { %v12761_v5 = vsub.f32 %v12648_v32, %v3305_v1  ;;  %v12764_v23 = vsub.f32 %v12642_v47, %v3307_v38  ;;  %v3364_v45 = vsel %vm1221_vm3, %v3344_v2, 0.0  ;;  %v10575_v2 = vld [vmem:[%s11233_s12] sm:$0xff]   ;;  %s16409_s12 = sld [smem:[#allocation14_spill]] }
 0x886   :  { %v3251_v6 = vpop.xlane.xlu0 %3250  ;;  %3365 = vadd.xlane.f32.xlu0 %v3364_v45  ;;  %9628 = vmatprep.subr.bf16.mxu1 %v10575_v2 }
 0x887   :  { %v3306_v17 = vmul.f32 0.0625, %v3251_v6  ;;  %v3345_v63 = vmul.f32 %v12761_v5, %v12761_v5  ;;  %v3347_v32 = vmul.f32 %v12764_v23, %v12764_v23  ;;  %9629 = vmatpush3.bf16.msra.mxu1 %v10575_v2 }
 0x889   :  { %v12770_v62 = vsub.f32 %v12651_v50, %v3306_v17  ;;  %v3367_v31 = vsel %vm1221_vm3, %v3345_v63, 0.0  ;;  %v3373_v56 = vsel %vm1221_vm3, %v3347_v32, 0.0 }
 0x88a   :  { %3368 = vadd.xlane.f32.xlu1 %v3367_v31 }
 0x88b   :  { %v3346_v47 = vmul.f32 %v12770_v62, %v12770_v62 }
 0x88d   :  { %v3370_v46 = vsel %vm1221_vm3, %v3346_v47, 0.0 }
 0x88e   :  { %v3257_v24 = vpop.xlane.xlu0 %3256  ;;  %3371 = vadd.xlane.f32.xlu0 %v3370_v46  ;;  %3374 = vadd.xlane.f32.xlu1 %v3373_v56 }
 0x88f   :  { %v3308_v12 = vmul.f32 0.0625, %v3257_v24 }
 0x891   :  { %v12780_v50 = vsub.f32 %v12662_v41, %v3308_v12 }
 0x892   :  { %v3263_v15 = vpop.xlane.xlu0 %3262  ;;  %v3260_v48 = vpop.xlane.xlu1 %3259 }
 0x893   :  { %v3310_v33 = vmul.f32 0.0625, %v3263_v15  ;;  %v3309_v40 = vmul.f32 0.0625, %v3260_v48  ;;  %v3348_v13 = vmul.f32 %v12780_v50, %v12780_v50 }
 0x895   :  { %v12785_v3 = vsub.f32 %v12665_v26, %v3310_v33  ;;  %v12788_v11 = vsub.f32 %v12672_v14, %v3309_v40  ;;  %v3376_v55 = vsel %vm1221_vm3, %v3348_v13, 0.0 }
 0x896   :  { %3377 = vadd.xlane.f32.xlu0 %v3376_v55  ;;  %v3266_v21 = vpop.xlane.xlu1 %3265 }
 0x897   :  { %v3311_v0 = vmul.f32 0.0625, %v3266_v21  ;;  %v3350_v41 = vmul.f32 %v12785_v3, %v12785_v3  ;;  %v3349_v58 = vmul.f32 %v12788_v11, %v12788_v11 }
 0x899   :  { %v12796_v30 = vsub.f32 %v12675_v39, %v3311_v0  ;;  %v3382_v26 = vsel %vm1221_vm3, %v3350_v41, 0.0  ;;  %v3379_v61 = vsel %vm1221_vm3, %v3349_v58, 0.0 }
 0x89a   :  { %3383 = vadd.xlane.f32.xlu0 %v3382_v26  ;;  %3380 = vadd.xlane.f32.xlu1 %v3379_v61 }
 0x89b   :  { %v3351_v14 = vmul.f32 %v12796_v30, %v12796_v30 }
 0x89d   :  { %v3385_v43 = vsel %vm1221_vm3, %v3351_v14, 0.0 }
 0x89e   :  { %v3269_v22 = vpop.xlane.xlu0 %3268  ;;  %3386 = vadd.xlane.f32.xlu1 %v3385_v43 }
 0x89f   :  { %v3312_v44 = vmul.f32 0.0625, %v3269_v22 }
 0x8a1   :  { %v12804_v7 = vsub.f32 %v12686_v54, %v3312_v44 }
 0x8a2   :  { %v3275_v59 = vpop.xlane.xlu0 %3274  ;;  %v3272_v39 = vpop.xlane.xlu1 %3271 }
 0x8a3   :  { %v3314_v8 = vmul.f32 0.0625, %v3275_v59  ;;  %v3313_v19 = vmul.f32 0.0625, %v3272_v39  ;;  %v3352_v29 = vmul.f32 %v12804_v7, %v12804_v7 }
 0x8a5   :  { %v12809_v10 = vsub.f32 %v12689_v51, %v3314_v8  ;;  %v12812_v52 = vsub.f32 %v12696_v25, %v3313_v19  ;;  %v3388_v53 = vsel %vm1221_vm3, %v3352_v29, 0.0 }
 0x8a6   :  { %3389 = vadd.xlane.f32.xlu0 %v3388_v53  ;;  %v3278_v34 = vpop.xlane.xlu1 %3277  ;;  %v10576_v53 = vld [vmem:[%s11243_s27 + $0x38] ss:$0 sps:$4 sm:$0xff]  }
 0x8a7   :  { %v3315_v54 = vmul.f32 0.0625, %v3278_v34  ;;  %v3354_v35 = vmul.f32 %v12809_v10, %v12809_v10  ;;  %v3353_v4 = vmul.f32 %v12812_v52, %v12812_v52  ;;  %v10577_v34 = vld [vmem:[%s11243_s27 + $0x30] sm:$0xff]   ;;  %10018 = vmatprep.subr.msk.bf16.mxu0 %vm801_vm1, %v10576_v53 }
 0x8a9   :  { %v12820_v9 = vsub.f32 %v12699_v37, %v3315_v54  ;;  %v3394_v51 = vsel %vm1221_vm3, %v3354_v35, 0.0  ;;  %v3391_v1 = vsel %vm1221_vm3, %v3353_v4, 0.0  ;;  %v10578_v54 = vld [vmem:[%s11243_s27 + $0x28] sm:$0xff]   ;;  %v10579_v35 = vld [vmem:[%s11243_s27 + $0x20] sm:$0xff]   ;;  %v10580_v4 = vld [vmem:[%s11243_s27 + $0x18] sm:$0xff]  }
 0x8aa   :  { %3395 = vadd.xlane.f32.xlu0 %v3394_v51  ;;  %3392 = vadd.xlane.f32.xlu1 %v3391_v1 }
 0x8ab   :  { %v3355_v25 = vmul.f32 %v12820_v9, %v12820_v9 }
 0x8ad   :  { %v3397_v38 = vsel %vm1221_vm3, %v3355_v25, 0.0 }
 0x8ae   :  { %v3281_v45 = vpop.xlane.xlu0 %3280  ;;  %3398 = vadd.xlane.f32.xlu1 %v3397_v38 }
 0x8af   :  { %v3316_v6 = vmul.f32 0.0625, %v3281_v45 }
 0x8b1   :  { %v12829_v37 = vsub.f32 %v12710_v18, %v3316_v6 }
 0x8b2   :  { %v3287_v17 = vpop.xlane.xlu0 %3286  ;;  %v3284_v63 = vpop.xlane.xlu1 %3283 }
 0x8b3   :  { %v3318_v31 = vmul.f32 0.0625, %v3287_v17  ;;  %v3317_v32 = vmul.f32 0.0625, %v3284_v63  ;;  %v3356_v47 = vmul.f32 %v12829_v37, %v12829_v37 }
 0x8b5   :  { %v12834_v46 = vsub.f32 %v12713_v36, %v3318_v31  ;;  %v12837_v56 = vsub.f32 %v12720_v49, %v3317_v32  ;;  %v3400_v24 = vsel %vm1221_vm3, %v3356_v47, 0.0 }
 0x8b6   :  { %3401 = vadd.xlane.f32.xlu0 %v3400_v24  ;;  %v3290_v12 = vpop.xlane.xlu1 %3289 }
 0x8b7   :  { %v3319_v15 = vmul.f32 0.0625, %v3290_v12  ;;  %v3358_v18 = vmul.f32 %v12834_v46, %v12834_v46  ;;  %v3357_v48 = vmul.f32 %v12837_v56, %v12837_v56 }
 0x8b9   :  { %v12845_v33 = vsub.f32 %v12723_v42, %v3319_v15  ;;  %v3406_v36 = vsel %vm1221_vm3, %v3358_v18, 0.0  ;;  %v3403_v40 = vsel %vm1221_vm3, %v3357_v48, 0.0 }
 0x8ba   :  { %3407 = vadd.xlane.f32.xlu0 %v3406_v36  ;;  %3404 = vadd.xlane.f32.xlu1 %v3403_v40  ;;  %v12885_v36 = vld [vmem:[%s11223_s30] ss:$0 sm:$0xff]  ;;  %s16387_s30 = sld [smem:[#allocation12_spill]] }
 0x8bb   :  { %v3359_v49 = vmul.f32 %v12845_v33, %v12845_v33 }
 0x8bd   :  { %v3409_v13 = vsel %vm1221_vm3, %v3359_v49, 0.0 }
 0x8be   :  { %3410 = vadd.xlane.f32.xlu1 %v3409_v13 }
 0x8c3   :  { %v3293_v55 = vpop.xlane.xlu0 %3292 }
 0x8c4   :  { %v3320_v21 = vmul.f32 0.0625, %v3293_v55 }
 0x8c6   :  { %v12853_v0 = vsub.f32 %v12734_v16, %v3320_v21 }
 0x8c7   :  { %v3299_v41 = vpop.xlane.xlu0 %3298  ;;  %v3296_v42 = vpop.xlane.xlu1 %3295 }
 0x8c8   :  { %v3322_v58 = vmul.f32 0.0625, %v3299_v41  ;;  %v3321_v26 = vmul.f32 0.0625, %v3296_v42  ;;  %v3360_v61 = vmul.f32 %v12853_v0, %v12853_v0 }
 0x8ca   :  { %v12858_v14 = vsub.f32 %v12737_v27, %v3322_v58  ;;  %v12861_v43 = vsub.f32 %v12744_v57, %v3321_v26  ;;  %v3412_v22 = vsel %vm1221_vm3, %v3360_v61, 0.0  ;;  %v12890_v61 = vld [vmem:[%s11228_s6] ss:$0 sm:$0xff]  ;;  %s16408_s6 = sld [smem:[#allocation13_spill]] }
 0x8cb   :  { %3413 = vadd.xlane.f32.xlu0 %v3412_v22  ;;  %v3302_v16 = vpop.xlane.xlu1 %3301 }
 0x8cc   :  { %v3323_v44 = vmul.f32 0.0625, %v3302_v16  ;;  %v3362_v59 = vmul.f32 %v12858_v14, %v12858_v14  ;;  %v3361_v39 = vmul.f32 %v12861_v43, %v12861_v43 }
 0x8ce   :  { %v12869_v27 = vsub.f32 %v12747_v20, %v3323_v44  ;;  %v3418_v8 = vsel %vm1221_vm3, %v3362_v59, 0.0  ;;  %v3415_v57 = vsel %vm1221_vm3, %v3361_v39, 0.0  ;;  %v3855_v20 = vsel %vm801_vm1, %v10576_v53, 0 }
 0x8cf   :  { %3419 = vadd.xlane.f32.xlu0 %v3418_v8  ;;  %3416 = vadd.xlane.f32.xlu1 %v3415_v57 }
 0x8d0   :  { %v3363_v19 = vmul.f32 %v12869_v27, %v12869_v27  ;;  %9651 = vmatpush3.bf16.msra.mxu0 %v3855_v20 }
 0x8d1   :  { %9652 = vmatprep.subr.bf16.mxu0 %v10577_v34 }
 0x8d2   :  { %v3421_v29 = vsel %vm1221_vm3, %v3363_v19, 0.0 }
 0x8d3   :  { %3422 = vadd.xlane.f32.xlu1 %v3421_v29 }
 0x8d4   :  { %9653 = vmatpush3.bf16.msra.mxu0 %v10577_v34 }
 0x8d5   :  { %9654 = vmatprep.subr.bf16.mxu0 %v10578_v54 }
 0x8d8   :  { %9655 = vmatpush3.bf16.msra.mxu0 %v10578_v54 }
 0x8d9   :  { %9656 = vmatprep.subr.bf16.mxu0 %v10579_v35 }
 0x8dc   :  { %9657 = vmatpush3.bf16.msra.mxu0 %v10579_v35 }
 0x8dd   :  { %9658 = vmatprep.subr.bf16.mxu0 %v10580_v4 }
 0x8e0   :  { %9659 = vmatpush3.bf16.msra.mxu0 %v10580_v4 }
 0x90f   :  { %v3366_v51 = vpop.xlane.xlu0 %3365 }
 0x910   :  { %v3424_v1 = vmul.f32 0.0625, %v3366_v51 }
 0x912   :  { %v3444_v25 = vadd.f32 1e-05, %v3424_v1 }
 0x913   :  { %v3369_v38 = vpop.xlane.xlu1 %3368 }
 0x914   :  { %10762 = vrsqrt.f32 %v3444_v25  ;;  %v3425_v2 = vmul.f32 0.0625, %v3369_v38 }
 0x916   :  { %v3445_v45 = vadd.f32 1e-05, %v3425_v2 }
 0x917   :  { %v3372_v6 = vpop.xlane.xlu0 %3371  ;;  %v3375_v17 = vpop.xlane.xlu1 %3374 }
 0x918   :  { %10764 = vrsqrt.f32 %v3445_v45  ;;  %v3426_v63 = vmul.f32 0.0625, %v3372_v6  ;;  %v3427_v31 = vmul.f32 0.0625, %v3375_v17 }
 0x91a   :  { %v3446_v32 = vadd.f32 1e-05, %v3426_v63  ;;  %v3447_v47 = vadd.f32 1e-05, %v3427_v31 }
 0x91c   :  { %10766 = vrsqrt.f32 %v3446_v32 }
 0x91d   :  { %10768 = vrsqrt.f32 %v3447_v47 }
 0x91f   :  { %v3378_v24 = vpop.xlane.xlu0 %3377 }
 0x920   :  { %v3428_v12 = vmul.f32 0.0625, %v3378_v24 }
 0x921   :  { %v10763_v15 = vpop.eup %10762 }
 0x922   :  { %v3448_v18 = vadd.f32 1e-05, %v3428_v12  ;;  %v3484_v48 = vmul.f32 %v10763_v15, %v12756_v60 }
 0x923   :  { %v3384_v40 = vpop.xlane.xlu0 %3383  ;;  %v3381_v49 = vpop.xlane.xlu1 %3380 }
 0x924   :  { %10770 = vrsqrt.f32 %v3448_v18  ;;  %v3430_v13 = vmul.f32 0.0625, %v3384_v40  ;;  %v3429_v55 = vmul.f32 0.0625, %v3381_v49  ;;  %v3511_v26 = vmul.f32 %v12885_v36, %v3484_v48 }
 0x925   :  { %v10765_v21 = vpop.eup %10764 }
 0x926   :  { %v3450_v41 = vadd.f32 1e-05, %v3430_v13  ;;  %v3449_v42 = vadd.f32 1e-05, %v3429_v55  ;;  %v3485_v58 = vmul.f32 %v10765_v21, %v12761_v5  ;;  %v12895_v57 = vadd.f32 %v12890_v61, %v3511_v26 }
 0x927   :  { %v3387_v22 = vpop.xlane.xlu1 %3386 }
 0x928   :  { %10772 = vrsqrt.f32 %v3450_v41  ;;  %v3431_v16 = vmul.f32 0.0625, %v3387_v22  ;;  %v3512_v60 = vmul.f32 %v12885_v36, %v3485_v58 }
 0x929   :  { %v10767_v44 = vpop.eup %10766  ;;  %10774 = vrsqrt.f32 %v3449_v42 }
 0x92a   :  { %v10769_v59 = vpop.eup %10768  ;;  %v3486_v39 = vmul.f32 %v10767_v44, %v12770_v62  ;;  %v3451_v8 = vadd.f32 1e-05, %v3431_v16  ;;  %v12898_v5 = vadd.f32 %v12890_v61, %v3512_v60 }
 0x92b   :  { %v3487_v19 = vmul.f32 %v10769_v59, %v12764_v23 }
 0x92c   :  { %v3513_v29 = vmul.f32 %v12885_v36, %v3486_v39  ;;  %10776 = vrsqrt.f32 %v3451_v8  ;;  %v3558_v53 = vpack.c.bf16 %v12898_v5, %v12895_v57 }
 0x92d   :  { %v3514_v34 = vmul.f32 %v12885_v36, %v3487_v19 }
 0x92e   :  { %v12906_v20 = vadd.f32 %v12890_v61, %v3513_v29  ;;  %9630 = vmatprep.mubr.msk.bf16.mxu1 %vm1221_vm3, %v3558_v53 }
 0x92f   :  { %v12910_v62 = vadd.f32 %v12890_v61, %v3514_v34  ;;  %v3390_v54 = vpop.xlane.xlu0 %3389 }
 0x930   :  { %v3432_v35 = vmul.f32 0.0625, %v3390_v54 }
 0x931   :  { %v10771_v4 = vpop.eup %10770  ;;  %v3559_v23 = vpack.c.bf16 %v12910_v62, %v12906_v20 }
 0x932   :  { %v3452_v51 = vadd.f32 1e-05, %v3432_v35  ;;  %v3488_v38 = vmul.f32 %v10771_v4, %v12780_v50 }
 0x933   :  { %9631 = vmatmul.mubr.msk.bf16.vlgmr.msra.gmra.mxu1 %vm1221_vm3, %v3559_v23  ;;  %v3396_v1 = vpop.xlane.xlu0 %3395  ;;  %v3393_v25 = vpop.xlane.xlu1 %3392 }
 0x934   :  { %10778 = vrsqrt.f32 %v3452_v51  ;;  %v3434_v2 = vmul.f32 0.0625, %v3396_v1  ;;  %v3433_v45 = vmul.f32 0.0625, %v3393_v25  ;;  %v3515_v12 = vmul.f32 %v12885_v36, %v3488_v38 }
 0x935   :  { %v10773_v6 = vpop.eup %10772 }
 0x936   :  { %v10775_v17 = vpop.eup %10774  ;;  %v3490_v63 = vmul.f32 %v10773_v6, %v12785_v3  ;;  %v3454_v31 = vadd.f32 1e-05, %v3434_v2  ;;  %v3453_v32 = vadd.f32 1e-05, %v3433_v45  ;;  %v12923_v3 = vadd.f32 %v12890_v61, %v3515_v12 }
 0x937   :  { %v3399_v47 = vpop.xlane.xlu1 %3398  ;;  %v3489_v24 = vmul.f32 %v10775_v17, %v12788_v11 }
 0x938   :  { %10780 = vrsqrt.f32 %v3454_v31  ;;  %v3435_v15 = vmul.f32 0.0625, %v3399_v47  ;;  %v3517_v49 = vmul.f32 %v12885_v36, %v3490_v63 }
 0x939   :  { %v10777_v18 = vpop.eup %10776  ;;  %10782 = vrsqrt.f32 %v3453_v32  ;;  %v3516_v50 = vmul.f32 %v12885_v36, %v3489_v24 }
 0x93a   :  { %v3491_v48 = vmul.f32 %v10777_v18, %v12796_v30  ;;  %v3455_v40 = vadd.f32 1e-05, %v3435_v15  ;;  %v12932_v21 = vadd.f32 %v12890_v61, %v3517_v49 }
 0x93b   :  { %v12926_v13 = vadd.f32 %v12890_v61, %v3516_v50 }
 0x93c   :  { %10784 = vrsqrt.f32 %v3455_v40  ;;  %v3518_v11 = vmul.f32 %v12885_v36, %v3491_v48 }
 0x93d   :  { %v3560_v55 = vpack.c.bf16 %v12926_v13, %v12923_v3 }
 0x93e   :  { %v12935_v30 = vadd.f32 %v12890_v61, %v3518_v11 }
 0x93f   :  { %9634 = vmatprep.mubr.msk.bf16.mxu1 %vm1221_vm3, %v3560_v55  ;;  %v3402_v41 = vpop.xlane.xlu0 %3401 }
 0x940   :  { %v3436_v42 = vmul.f32 0.0625, %v3402_v41  ;;  %v3561_v58 = vpack.c.bf16 %v12935_v30, %v12932_v21 }
 0x941   :  { %v10779_v26 = vpop.eup %10778 }
 0x942   :  { %v3456_v22 = vadd.f32 1e-05, %v3436_v42  ;;  %9635 = vmatmul.mubr.msk.bf16.gmra.mxu1 %vm1221_vm3, %v3561_v58  ;;  %v3492_v44 = vmul.f32 %v10779_v26, %v12804_v7 }
 0x943   :  { %v3408_v16 = vpop.xlane.xlu0 %3407  ;;  %v3405_v60 = vpop.xlane.xlu1 %3404 }
 0x944   :  { %10786 = vrsqrt.f32 %v3456_v22  ;;  %v3438_v59 = vmul.f32 0.0625, %v3408_v16  ;;  %v3437_v39 = vmul.f32 0.0625, %v3405_v60  ;;  %v3519_v4 = vmul.f32 %v12885_v36, %v3492_v44 }
 0x945   :  { %v10781_v8 = vpop.eup %10780 }
 0x946   :  { %v10783_v19 = vpop.eup %10782  ;;  %v3494_v29 = vmul.f32 %v10781_v8, %v12809_v10  ;;  %v3458_v53 = vadd.f32 1e-05, %v3438_v59  ;;  %v3457_v34 = vadd.f32 1e-05, %v3437_v39  ;;  %v12949_v10 = vadd.f32 %v12890_v61, %v3519_v4 }
 0x947   :  { %v3411_v54 = vpop.xlane.xlu1 %3410  ;;  %v3493_v35 = vmul.f32 %v10783_v19, %v12812_v52 }
 0x948   :  { %10788 = vrsqrt.f32 %v3458_v53  ;;  %v3439_v23 = vmul.f32 0.0625, %v3411_v54  ;;  %v3521_v38 = vmul.f32 %v12885_v36, %v3494_v29 }
 0x949   :  { %v10785_v51 = vpop.eup %10784  ;;  %10790 = vrsqrt.f32 %v3457_v34  ;;  %v3520_v7 = vmul.f32 %v12885_v36, %v3493_v35 }
 0x94a   :  { %v3495_v1 = vmul.f32 %v10785_v51, %v12820_v9  ;;  %v3459_v25 = vadd.f32 1e-05, %v3439_v23  ;;  %v12958_v6 = vadd.f32 %v12890_v61, %v3521_v38 }
 0x94b   :  { %v12952_v2 = vadd.f32 %v12890_v61, %v3520_v7 }
 0x94c   :  { %10792 = vrsqrt.f32 %v3459_v25  ;;  %v3522_v52 = vmul.f32 %v12885_v36, %v3495_v1 }
 0x94d   :  { %v3562_v45 = vpack.c.bf16 %v12952_v2, %v12949_v10 }
 0x94e   :  { %v12961_v9 = vadd.f32 %v12890_v61, %v3522_v52 }
 0x94f   :  { %9638 = vmatprep.mubr.msk.bf16.mxu1 %vm1221_vm3, %v3562_v45 }
 0x950   :  { %v3563_v17 = vpack.c.bf16 %v12961_v9, %v12958_v6 }
 0x951   :  { %v10787_v63 = vpop.eup %10786 }
 0x952   :  { %9639 = vmatmul.mubr.msk.bf16.gmra.mxu1 %vm1221_vm3, %v3563_v17  ;;  %v3496_v32 = vmul.f32 %v10787_v63, %v12829_v37  ;;  %v10583_v63 = vld [vmem:[%s11243_s27] sm:$0xff]  }
 0x954   :  { %v3414_v31 = vpop.xlane.xlu0 %3413  ;;  %v3523_v49 = vmul.f32 %v12885_v36, %v3496_v32  ;;  %v13024_v32 = vld [vmem:[%s11238_s20] ss:$0 sm:$0xff]  ;;  %s16430_s20 = sld [smem:[#allocation17_spill]] }
 0x955   :  { %v3440_v47 = vmul.f32 0.0625, %v3414_v31  ;;  %v10789_v24 = vpop.eup %10788 }
 0x956   :  { %v10791_v12 = vpop.eup %10790  ;;  %v3498_v15 = vmul.f32 %v10789_v24, %v12834_v46  ;;  %v12975_v16 = vadd.f32 %v12890_v61, %v3523_v49 }
 0x957   :  { %v3460_v18 = vadd.f32 1e-05, %v3440_v47  ;;  %v3497_v40 = vmul.f32 %v10791_v12, %v12837_v56 }
 0x958   :  { %v3420_v50 = vpop.xlane.xlu0 %3419  ;;  %v3417_v48 = vpop.xlane.xlu1 %3416  ;;  %v3525_v22 = vmul.f32 %v12885_v36, %v3498_v15 }
 0x959   :  { %10794 = vrsqrt.f32 %v3460_v18  ;;  %v3442_v11 = vmul.f32 0.0625, %v3420_v50  ;;  %v3441_v55 = vmul.f32 0.0625, %v3417_v48  ;;  %v10793_v41 = vpop.eup %10792  ;;  %v3524_v42 = vmul.f32 %v12885_v36, %v3497_v40 }
 0x95a   :  { %v3499_v37 = vmul.f32 %v10793_v41, %v12845_v33  ;;  %v12984_v39 = vadd.f32 %v12890_v61, %v3525_v22 }
 0x95b   :  { %v3462_v58 = vadd.f32 1e-05, %v3442_v11  ;;  %v3461_v26 = vadd.f32 1e-05, %v3441_v55  ;;  %v12978_v56 = vadd.f32 %v12890_v61, %v3524_v42 }
 0x95c   :  { %v3423_v46 = vpop.xlane.xlu1 %3422  ;;  %v3526_v44 = vmul.f32 %v12885_v36, %v3499_v37 }
 0x95d   :  { %10796 = vrsqrt.f32 %v3462_v58  ;;  %v3443_v60 = vmul.f32 0.0625, %v3423_v46  ;;  %v3564_v59 = vpack.c.bf16 %v12978_v56, %v12975_v16 }
 0x95e   :  { %10798 = vrsqrt.f32 %v3461_v26  ;;  %v12987_v8 = vadd.f32 %v12890_v61, %v3526_v44 }
 0x95f   :  { %v3463_v33 = vadd.f32 1e-05, %v3443_v60  ;;  %9642 = vmatprep.mubr.msk.bf16.mxu1 %vm1221_vm3, %v3564_v59 }
 0x960   :  { %v3565_v19 = vpack.c.bf16 %v12987_v8, %v12984_v39 }
 0x961   :  { %10800 = vrsqrt.f32 %v3463_v33 }
 0x962   :  { %9643 = vmatmul.mubr.msk.bf16.gmra.mxu1 %vm1221_vm3, %v3565_v19 }
 0x966   :  { %v10795_v29 = vpop.eup %10794 }
 0x967   :  { %v3500_v53 = vmul.f32 %v10795_v29, %v12853_v0 }
 0x969   :  { %v3527_v23 = vmul.f32 %v12885_v36, %v3500_v53 }
 0x96a   :  { %v10797_v34 = vpop.eup %10796 }
 0x96b   :  { %v10799_v54 = vpop.eup %10798  ;;  %v3502_v35 = vmul.f32 %v10797_v34, %v12858_v14  ;;  %v13001_v0 = vadd.f32 %v12890_v61, %v3527_v23 }
 0x96c   :  { %v3501_v4 = vmul.f32 %v10799_v54, %v12861_v43 }
 0x96d   :  { %v3529_v25 = vmul.f32 %v12885_v36, %v3502_v35 }
 0x96e   :  { %v10801_v51 = vpop.eup %10800  ;;  %v3528_v7 = vmul.f32 %v12885_v36, %v3501_v4 }
 0x96f   :  { %v3503_v1 = vmul.f32 %v10801_v51, %v12869_v27  ;;  %v13010_v52 = vadd.f32 %v12890_v61, %v3529_v25  ;;  %v10581_v27 = vld [vmem:[%s11243_s27 + $0x10] sm:$0xff]  }
 0x970   :  { %v13004_v38 = vadd.f32 %v12890_v61, %v3528_v7  ;;  %9660 = vmatprep.subr.bf16.mxu0 %v10581_v27 }
 0x971   :  { %v3530_v14 = vmul.f32 %v12885_v36, %v3503_v1  ;;  %9661 = vmatpush3.bf16.msra.mxu0 %v10581_v27  ;;  %v10582_v36 = vld [vmem:[%s11243_s27 + $0x8] sm:$0xff]   ;;  %s16431_s27 = sld [smem:[#allocation19_spill]] }
 0x972   :  { %v3566_v43 = vpack.c.bf16 %v13004_v38, %v13001_v0  ;;  %9662 = vmatprep.subr.bf16.mxu0 %v10582_v36 }
 0x973   :  { %v13013_v45 = vadd.f32 %v12890_v61, %v3530_v14 }
 0x974   :  { %9646 = vmatprep.mubr.msk.bf16.mxu1 %vm1221_vm3, %v3566_v43 }
 0x975   :  { %v3567_v17 = vpack.c.bf16 %v13013_v45, %v13010_v52  ;;  %9663 = vmatpush3.bf16.msra.mxu0 %v10582_v36 }
 0x976   :  { %9664 = vmatprep.subr.bf16.mxu0 %v10583_v63 }
 0x977   :  { %9647 = vmatmul.mubr.msk.bf16.gmra.mxu1 %vm1221_vm3, %v3567_v17 }
 0x979   :  { %9665 = vmatpush3.bf16.msra.mxu0 %v10583_v63 }
 0x97a   :  { %9708 = vmatprep.subr.bf16.mxu0 %v16335_v28 }
 0x9f3   :  { %v9632_v61 = vpop.f32.mrf.mxu1 }
 0x9f4   :  { %v3656_v15 = vadd.f32 %v9632_v61, %v13024_v32 }
 0x9f5   :  { %v3647_v31 = vpop.f32.mrf.mxu1 }
 0x9f6   :  { %v3648_v24 = vadd.f32 %v13024_v32, %v3647_v31  ;;  %v3728_v11 = vmax.f32 %v3656_v15, 0.0 }
 0x9f7   :  { %v9633_v47 = vpop.f32.mrf.mxu1 }
 0x9f8   :  { %v3659_v12 = vadd.f32 %v9633_v47, %v13024_v32  ;;  %v3726_v40 = vmax.f32 %v3648_v24, 0.0 }
 0x9f9   :  { %v3650_v18 = vpop.f32.mrf.mxu1 }
 0x9fa   :  { %v3651_v50 = vadd.f32 %v13024_v32, %v3650_v18  ;;  %v3729_v48 = vmax.f32 %v3659_v12, 0.0 }
 0x9fc   :  { %v3727_v49 = vmax.f32 %v3651_v50, 0.0  ;;  %v3747_v41 = vpack.c.bf16 %v3729_v48, %v3728_v11 }
 0x9fe   :  { %v3746_v55 = vpack.c.bf16 %v3727_v49, %v3726_v40 }
 0xa00   :  { %9666 = vmatprep.mubr.msk.bf16.mxu0 %vm3823_vm7, %v3746_v55 }
 0xa01   :  { %9667 = vmatmul.mubr.msk.bf16.vlgmr.msra.gmra.mxu0 %vm3823_vm7, %v3747_v41 }
 0xa02   :  { %v9636_v42 = vpop.f32.mrf.mxu1 }
 0xa03   :  { %v3672_v46 = vadd.f32 %v9636_v42, %v13024_v32 }
 0xa04   :  { %v3663_v37 = vpop.f32.mrf.mxu1 }
 0xa05   :  { %v3664_v26 = vadd.f32 %v13024_v32, %v3663_v37  ;;  %v3732_v29 = vmax.f32 %v3672_v46, 0.0 }
 0xa06   :  { %v9637_v58 = vpop.f32.mrf.mxu1 }
 0xa07   :  { %v3675_v22 = vadd.f32 %v9637_v58, %v13024_v32  ;;  %v3730_v33 = vmax.f32 %v3664_v26, 0.0 }
 0xa08   :  { %v3666_v60 = vpop.f32.mrf.mxu1 }
 0xa09   :  { %v3667_v44 = vadd.f32 %v13024_v32, %v3666_v60  ;;  %v3733_v59 = vmax.f32 %v3675_v22, 0.0 }
 0xa0b   :  { %v3731_v19 = vmax.f32 %v3667_v44, 0.0  ;;  %v3749_v34 = vpack.c.bf16 %v3733_v59, %v3732_v29 }
 0xa0d   :  { %v3748_v53 = vpack.c.bf16 %v3731_v19, %v3730_v33 }
 0xa0f   :  { %9670 = vmatprep.mubr.msk.bf16.mxu0 %vm3823_vm7, %v3748_v53 }
 0xa10   :  { %9671 = vmatmul.mubr.msk.bf16.gmra.mxu0 %vm3823_vm7, %v3749_v34 }
 0xa12   :  { %v9640_v54 = vpop.f32.mrf.mxu1 }
 0xa13   :  { %v3688_v7 = vadd.f32 %v9640_v54, %v13024_v32 }
 0xa14   :  { %v3679_v35 = vpop.f32.mrf.mxu1 }
 0xa15   :  { %v3680_v23 = vadd.f32 %v13024_v32, %v3679_v35  ;;  %v3736_v17 = vmax.f32 %v3688_v7, 0.0  ;;  %v13059_v35 = vld [vmem:[%s11248_s4] ss:$0 sm:$0xff]  ;;  %s16432_s4 = sld [smem:[#allocation15_spill]] }
 0xa16   :  { %v9641_v4 = vpop.f32.mrf.mxu1 }
 0xa17   :  { %v3691_v51 = vadd.f32 %v9641_v4, %v13024_v32  ;;  %v3734_v43 = vmax.f32 %v3680_v23, 0.0 }
 0xa18   :  { %v3682_v1 = vpop.f32.mrf.mxu1 }
 0xa19   :  { %v3683_v25 = vadd.f32 %v13024_v32, %v3682_v1  ;;  %v3737_v14 = vmax.f32 %v3691_v51, 0.0 }
 0xa1b   :  { %v3735_v27 = vmax.f32 %v3683_v25, 0.0  ;;  %v3751_v63 = vpack.c.bf16 %v3737_v14, %v3736_v17 }
 0xa1d   :  { %v3750_v36 = vpack.c.bf16 %v3735_v27, %v3734_v43 }
 0xa1f   :  { %9674 = vmatprep.mubr.msk.bf16.mxu0 %vm3823_vm7, %v3750_v36 }
 0xa20   :  { %9675 = vmatmul.mubr.msk.bf16.gmra.mxu0 %vm3823_vm7, %v3751_v63 }
 0xa22   :  { %v9644_v61 = vpop.f32.mrf.mxu1 }
 0xa23   :  { %v3704_v15 = vadd.f32 %v9644_v61, %v13024_v32 }
 0xa24   :  { %v3695_v31 = vpop.f32.mrf.mxu1 }
 0xa25   :  { %v3696_v24 = vadd.f32 %v13024_v32, %v3695_v31  ;;  %v3740_v11 = vmax.f32 %v3704_v15, 0.0 }
 0xa26   :  { %v9645_v47 = vpop.f32.mrf.mxu1 }
 0xa27   :  { %v3707_v12 = vadd.f32 %v9645_v47, %v13024_v32  ;;  %v3738_v40 = vmax.f32 %v3696_v24, 0.0 }
 0xa28   :  { %v3698_v18 = vpop.f32.mrf.mxu1 }
 0xa29   :  { %v3699_v50 = vadd.f32 %v13024_v32, %v3698_v18  ;;  %v3741_v48 = vmax.f32 %v3707_v12, 0.0 }
 0xa2b   :  { %v3739_v49 = vmax.f32 %v3699_v50, 0.0  ;;  %v3753_v41 = vpack.c.bf16 %v3741_v48, %v3740_v11 }
 0xa2d   :  { %v3752_v55 = vpack.c.bf16 %v3739_v49, %v3738_v40 }
 0xa2f   :  { %9678 = vmatprep.mubr.msk.bf16.mxu0 %vm3823_vm7, %v3752_v55 }
 0xa30   :  { %9679 = vmatmul.mubr.msk.bf16.gmra.mxu0 %vm3823_vm7, %v3753_v41 }
 0xa37   :  { %v9648_v42 = vpop.f32.mrf.mxu1 }
 0xa38   :  { %v3720_v46 = vadd.f32 %v9648_v42, %v13024_v32 }
 0xa39   :  { %v3711_v37 = vpop.f32.mrf.mxu1 }
 0xa3a   :  { %v3712_v26 = vadd.f32 %v13024_v32, %v3711_v37  ;;  %v3744_v29 = vmax.f32 %v3720_v46, 0.0 }
 0xa3b   :  { %v9649_v58 = vpop.f32.mrf.mxu1 }
 0xa3c   :  { %v3723_v22 = vadd.f32 %v9649_v58, %v13024_v32  ;;  %v3742_v33 = vmax.f32 %v3712_v26, 0.0 }
 0xa3d   :  { %v3714_v60 = vpop.f32.mrf.mxu1 }
 0xa3e   :  { %v3715_v44 = vadd.f32 %v13024_v32, %v3714_v60  ;;  %v3745_v59 = vmax.f32 %v3723_v22, 0.0 }
 0xa40   :  { %v3743_v19 = vmax.f32 %v3715_v44, 0.0  ;;  %v3755_v34 = vpack.c.bf16 %v3745_v59, %v3744_v29 }
 0xa42   :  { %v3754_v53 = vpack.c.bf16 %v3743_v19, %v3742_v33 }
 0xa44   :  { %9682 = vmatprep.mubr.msk.bf16.mxu0 %vm3823_vm7, %v3754_v53 }
 0xa45   :  { %9683 = vmatmul.mubr.msk.bf16.gmra.mxu0 %vm3823_vm7, %v3755_v34 }
 0xa46   :  { %9710 = vmatprep.mubr.msk.bf16.mxu0 %vm11149_vm4, %v16335_v28 }
 0xac1   :  { %v9668_v54 = vpop.f32.mrf.mxu0 }
 0xac2   :  { %v3900_v23 = vadd.f32 %v9668_v54, %v13059_v35 }
 0xac3   :  { %v3891_v4 = vpop.f32.mrf.mxu0 }
 0xac4   :  { %v3892_v32 = vadd.f32 %v13059_v35, %v3891_v4  ;;  %v13067_v25 = vadd.f32 %v3900_v23, %v12906_v20 }
 0xac5   :  { %v9669_v51 = vpop.f32.mrf.mxu0 }
 0xac6   :  { %v13064_v7 = vadd.f32 %v3892_v32, %v12895_v57  ;;  %v3903_v14 = vadd.f32 %v9669_v51, %v13059_v35  ;;  %v3996_v20 = vsel %vm1221_vm3, %v13067_v25, 0.0 }
 0xac7   :  { %v3894_v1 = vpop.f32.mrf.mxu0 }
 0xac8   :  { %v3895_v43 = vadd.f32 %v13059_v35, %v3894_v1  ;;  %v3990_v27 = vsel %vm1221_vm3, %v13064_v7, 0.0  ;;  %v13077_v36 = vadd.f32 %v3903_v14, %v12910_v62 }
 0xac9   :  { %3991 = vadd.xlane.f32.xlu0 %v3990_v27 }
 0xaca   :  { %v13074_v17 = vadd.f32 %v3895_v43, %v12898_v5  ;;  %v3999_v63 = vsel %vm1221_vm3, %v13077_v36, 0.0 }
 0xacc   :  { %v3993_v57 = vsel %vm1221_vm3, %v13074_v17, 0.0 }
 0xacd   :  { %3994 = vadd.xlane.f32.xlu1 %v3993_v57  ;;  %3997 = vadd.xlane.f32.xlu0 %v3996_v20 }
 0xad0   :  { %v9672_v61 = vpop.f32.mrf.mxu0 }
 0xad1   :  { %4000 = vadd.xlane.f32.xlu1 %v3999_v63  ;;  %v3916_v5 = vadd.f32 %v9672_v61, %v13059_v35 }
 0xad2   :  { %v3907_v31 = vpop.f32.mrf.mxu0 }
 0xad3   :  { %v3908_v47 = vadd.f32 %v13059_v35, %v3907_v31  ;;  %v13091_v15 = vadd.f32 %v3916_v5, %v12932_v21 }
 0xad4   :  { %v9673_v62 = vpop.f32.mrf.mxu0 }
 0xad5   :  { %v13088_v24 = vadd.f32 %v3908_v47, %v12923_v3  ;;  %v3919_v18 = vadd.f32 %v9673_v62, %v13059_v35  ;;  %v4008_v21 = vsel %vm1221_vm3, %v13091_v15, 0.0 }
 0xad6   :  { %v3910_v12 = vpop.f32.mrf.mxu0 }
 0xad7   :  { %v3911_v50 = vadd.f32 %v13059_v35, %v3910_v12  ;;  %v4002_v48 = vsel %vm1221_vm3, %v13088_v24, 0.0  ;;  %v13101_v49 = vadd.f32 %v3919_v18, %v12935_v30 }
 0xad8   :  { %4003 = vadd.xlane.f32.xlu0 %v4002_v48 }
 0xad9   :  { %v13098_v40 = vadd.f32 %v3911_v50, %v12926_v13  ;;  %v4011_v11 = vsel %vm1221_vm3, %v13101_v49, 0.0 }
 0xadb   :  { %v4005_v3 = vsel %vm1221_vm3, %v13098_v40, 0.0 }
 0xadc   :  { %4006 = vadd.xlane.f32.xlu1 %v4005_v3  ;;  %4009 = vadd.xlane.f32.xlu0 %v4008_v21 }
 0xae0   :  { %4012 = vadd.xlane.f32.xlu1 %v4011_v11  ;;  %v9676_v55 = vpop.f32.mrf.mxu0 }
 0xae1   :  { %v3932_v13 = vadd.f32 %v9676_v55, %v13059_v35 }
 0xae2   :  { %v3923_v41 = vpop.f32.mrf.mxu0 }
 0xae3   :  { %v3924_v42 = vadd.f32 %v13059_v35, %v3923_v41  ;;  %v13115_v26 = vadd.f32 %v3932_v13, %v12958_v6 }
 0xae4   :  { %v9677_v30 = vpop.f32.mrf.mxu0 }
 0xae5   :  { %v13112_v37 = vadd.f32 %v3924_v42, %v12949_v10  ;;  %v3935_v22 = vadd.f32 %v9677_v30, %v13059_v35  ;;  %v4020_v6 = vsel %vm1221_vm3, %v13115_v26, 0.0 }
 0xae6   :  { %v3926_v58 = vpop.f32.mrf.mxu0 }
 0xae7   :  { %v3927_v46 = vadd.f32 %v13059_v35, %v3926_v58  ;;  %v4014_v60 = vsel %vm1221_vm3, %v13112_v37, 0.0  ;;  %v13125_v59 = vadd.f32 %v3935_v22, %v12961_v9 }
 0xae8   :  { %4015 = vadd.xlane.f32.xlu0 %v4014_v60 }
 0xae9   :  { %v13122_v44 = vadd.f32 %v3927_v46, %v12952_v2  ;;  %v4023_v33 = vsel %vm1221_vm3, %v13125_v59, 0.0 }
 0xaeb   :  { %v4017_v10 = vsel %vm1221_vm3, %v13122_v44, 0.0 }
 0xaec   :  { %4018 = vadd.xlane.f32.xlu1 %v4017_v10  ;;  %4021 = vadd.xlane.f32.xlu0 %v4020_v6 }
 0xaf0   :  { %4024 = vadd.xlane.f32.xlu1 %v4023_v33  ;;  %v9680_v19 = vpop.f32.mrf.mxu0 }
 0xaf1   :  { %v3948_v2 = vadd.f32 %v9680_v19, %v13059_v35 }
 0xaf2   :  { %v3939_v29 = vpop.f32.mrf.mxu0 }
 0xaf3   :  { %v3940_v53 = vadd.f32 %v13059_v35, %v3939_v29  ;;  %v13139_v4 = vadd.f32 %v3948_v2, %v12984_v39 }
 0xaf4   :  { %v9681_v9 = vpop.f32.mrf.mxu0 }
 0xaf5   :  { %v13136_v34 = vadd.f32 %v3940_v53, %v12975_v16  ;;  %v3951_v23 = vadd.f32 %v9681_v9, %v13059_v35  ;;  %v4032_v39 = vsel %vm1221_vm3, %v13139_v4, 0.0 }
 0xaf6   :  { %v3942_v54 = vpop.f32.mrf.mxu0 }
 0xaf7   :  { %v3943_v32 = vadd.f32 %v13059_v35, %v3942_v54  ;;  %v4026_v51 = vsel %vm1221_vm3, %v13136_v34, 0.0  ;;  %v13149_v14 = vadd.f32 %v3951_v23, %v12987_v8 }
 0xaf8   :  { %4027 = vadd.xlane.f32.xlu0 %v4026_v51 }
 0xaf9   :  { %v13146_v1 = vadd.f32 %v3943_v32, %v12978_v56  ;;  %v4035_v43 = vsel %vm1221_vm3, %v13149_v14, 0.0 }
 0xafb   :  { %v4029_v16 = vsel %vm1221_vm3, %v13146_v1, 0.0 }
 0xafc   :  { %4030 = vadd.xlane.f32.xlu1 %v4029_v16  ;;  %4033 = vadd.xlane.f32.xlu0 %v4032_v39 }
 0xb00   :  { %4036 = vadd.xlane.f32.xlu1 %v4035_v43 }
 0xb05   :  { %v9684_v27 = vpop.f32.mrf.mxu0 }
 0xb06   :  { %v3964_v56 = vadd.f32 %v9684_v27, %v13059_v35 }
 0xb07   :  { %v3955_v57 = vpop.f32.mrf.mxu0 }
 0xb08   :  { %v3956_v20 = vadd.f32 %v13059_v35, %v3955_v57  ;;  %v13163_v31 = vadd.f32 %v3964_v56, %v13010_v52 }
 0xb09   :  { %v9685_v8 = vpop.f32.mrf.mxu0 }
 0xb0a   :  { %v13160_v63 = vadd.f32 %v3956_v20, %v13001_v0  ;;  %v3967_v5 = vadd.f32 %v9685_v8, %v13059_v35  ;;  %v4044_v52 = vsel %vm1221_vm3, %v13163_v31, 0.0 }
 0xb0b   :  { %v3958_v61 = vpop.f32.mrf.mxu0 }
 0xb0c   :  { %v3959_v47 = vadd.f32 %v13059_v35, %v3958_v61  ;;  %v4038_v62 = vsel %vm1221_vm3, %v13160_v63, 0.0  ;;  %v13173_v18 = vadd.f32 %v3967_v5, %v13013_v45 }
 0xb0d   :  { %4039 = vadd.xlane.f32.xlu0 %v4038_v62 }
 0xb0e   :  { %v13170_v12 = vadd.f32 %v3959_v47, %v13004_v38  ;;  %v4047_v35 = vsel %vm1221_vm3, %v13173_v18, 0.0 }
 0xb10   :  { %v4041_v0 = vsel %vm1221_vm3, %v13170_v12, 0.0 }
 0xb11   :  { %4042 = vadd.xlane.f32.xlu1 %v4041_v0  ;;  %4045 = vadd.xlane.f32.xlu0 %v4044_v52 }
 0xb15   :  { %4048 = vadd.xlane.f32.xlu1 %v4047_v35 }
 0xb52   :  { %v3992_v50 = vpop.xlane.xlu0 %3991 }
 0xb53   :  { %v4050_v48 = vmul.f32 0.0625, %v3992_v50 }
 0xb55   :  { %v13182_v38 = vsub.f32 %v13064_v7, %v4050_v48 }
 0xb56   :  { %v3998_v3 = vpop.xlane.xlu0 %3997  ;;  %v3995_v45 = vpop.xlane.xlu1 %3994 }
 0xb57   :  { %v4052_v21 = vmul.f32 0.0625, %v3998_v3  ;;  %v4051_v11 = vmul.f32 0.0625, %v3995_v45  ;;  %v4090_v55 = vmul.f32 %v13182_v38, %v13182_v38 }
 0xb59   :  { %v13187_v41 = vsub.f32 %v13067_v25, %v4052_v21  ;;  %v13190_v13 = vsub.f32 %v13074_v17, %v4051_v11  ;;  %v4110_v42 = vsel %vm1221_vm3, %v4090_v55, 0.0 }
 0xb5a   :  { %4111 = vadd.xlane.f32.xlu0 %v4110_v42  ;;  %v4001_v30 = vpop.xlane.xlu1 %4000  ;;  %v10584_v42 = vld [vmem:[%s16368_s14] sm:$0xff]  }
 0xb5b   :  { %v4053_v58 = vmul.f32 0.0625, %v4001_v30  ;;  %v4092_v7 = vmul.f32 %v13187_v41, %v13187_v41  ;;  %v4091_v22 = vmul.f32 %v13190_v13, %v13190_v13  ;;  %9686 = vmatprep.subr.bf16.mxu1 %v10584_v42 }
 0xb5c   :  { %9687 = vmatpush3.bf16.msra.mxu1 %v10584_v42 }
 0xb5d   :  { %v13198_v46 = vsub.f32 %v13077_v36, %v4053_v58  ;;  %v4116_v25 = vsel %vm1221_vm3, %v4092_v7, 0.0  ;;  %v4113_v60 = vsel %vm1221_vm3, %v4091_v22, 0.0  ;;  %9730 = vmatprep.subr.bf16.mxu1 %v16335_v28 }
 0xb5e   :  { %4117 = vadd.xlane.f32.xlu0 %v4116_v25  ;;  %4114 = vadd.xlane.f32.xlu1 %v4113_v60 }
 0xb5f   :  { %v4093_v17 = vmul.f32 %v13198_v46, %v13198_v46 }
 0xb61   :  { %v4004_v10 = vpop.xlane.xlu0 %4003  ;;  %v4119_v6 = vsel %vm1221_vm3, %v4093_v17, 0.0 }
 0xb62   :  { %v4054_v33 = vmul.f32 0.0625, %v4004_v10  ;;  %4120 = vadd.xlane.f32.xlu1 %v4119_v6 }
 0xb64   :  { %v13206_v19 = vsub.f32 %v13088_v24, %v4054_v33 }
 0xb65   :  { %v4010_v29 = vpop.xlane.xlu0 %4009  ;;  %v4007_v36 = vpop.xlane.xlu1 %4006 }
 0xb66   :  { %v4056_v2 = vmul.f32 0.0625, %v4010_v29  ;;  %v4055_v53 = vmul.f32 0.0625, %v4007_v36  ;;  %v4094_v9 = vmul.f32 %v13206_v19, %v13206_v19 }
 0xb68   :  { %v13211_v54 = vsub.f32 %v13091_v15, %v4056_v2  ;;  %v13214_v23 = vsub.f32 %v13098_v40, %v4055_v53  ;;  %v4122_v32 = vsel %vm1221_vm3, %v4094_v9, 0.0 }
 0xb69   :  { %4123 = vadd.xlane.f32.xlu0 %v4122_v32  ;;  %v4013_v51 = vpop.xlane.xlu1 %4012 }
 0xb6a   :  { %v4057_v16 = vmul.f32 0.0625, %v4013_v51  ;;  %v4096_v24 = vmul.f32 %v13211_v54, %v13211_v54  ;;  %v4095_v39 = vmul.f32 %v13214_v23, %v13214_v23 }
 0xb6c   :  { %v13222_v43 = vsub.f32 %v13101_v49, %v4057_v16  ;;  %v4128_v15 = vsel %vm1221_vm3, %v4096_v24, 0.0  ;;  %v4125_v27 = vsel %vm1221_vm3, %v4095_v39, 0.0 }
 0xb6d   :  { %4129 = vadd.xlane.f32.xlu0 %v4128_v15  ;;  %4126 = vadd.xlane.f32.xlu1 %v4125_v27 }
 0xb6e   :  { %v4097_v40 = vmul.f32 %v13222_v43, %v13222_v43 }
 0xb70   :  { %v4131_v57 = vsel %vm1221_vm3, %v4097_v40, 0.0 }
 0xb71   :  { %v4016_v56 = vpop.xlane.xlu0 %4015  ;;  %4132 = vadd.xlane.f32.xlu1 %v4131_v57 }
 0xb72   :  { %v4058_v20 = vmul.f32 0.0625, %v4016_v56 }
 0xb74   :  { %v13230_v8 = vsub.f32 %v13112_v37, %v4058_v20 }
 0xb75   :  { %v4022_v61 = vpop.xlane.xlu0 %4021  ;;  %v4019_v49 = vpop.xlane.xlu1 %4018 }
 0xb76   :  { %v4060_v5 = vmul.f32 0.0625, %v4022_v61  ;;  %v4059_v47 = vmul.f32 0.0625, %v4019_v49  ;;  %v4098_v62 = vmul.f32 %v13230_v8, %v13230_v8 }
 0xb78   :  { %v13235_v0 = vsub.f32 %v13115_v26, %v4060_v5  ;;  %v13238_v52 = vsub.f32 %v13122_v44, %v4059_v47  ;;  %v4134_v35 = vsel %vm1221_vm3, %v4098_v62, 0.0 }
 0xb79   :  { %4135 = vadd.xlane.f32.xlu0 %v4134_v35  ;;  %v4025_v50 = vpop.xlane.xlu1 %4024 }
 0xb7a   :  { %v4061_v37 = vmul.f32 0.0625, %v4025_v50  ;;  %v4100_v48 = vmul.f32 %v13235_v0, %v13235_v0  ;;  %v4099_v3 = vmul.f32 %v13238_v52, %v13238_v52 }
 0xb7c   :  { %v13246_v45 = vsub.f32 %v13125_v59, %v4061_v37  ;;  %v4140_v26 = vsel %vm1221_vm3, %v4100_v48, 0.0  ;;  %v4137_v44 = vsel %vm1221_vm3, %v4099_v3, 0.0 }
 0xb7d   :  { %4141 = vadd.xlane.f32.xlu0 %v4140_v26  ;;  %4138 = vadd.xlane.f32.xlu1 %v4137_v44 }
 0xb7e   :  { %v4101_v21 = vmul.f32 %v13246_v45, %v13246_v45 }
 0xb80   :  { %v4143_v11 = vsel %vm1221_vm3, %v4101_v21, 0.0 }
 0xb81   :  { %v4028_v55 = vpop.xlane.xlu0 %4027  ;;  %4144 = vadd.xlane.f32.xlu1 %v4143_v11 }
 0xb82   :  { %v4062_v30 = vmul.f32 0.0625, %v4028_v55 }
 0xb84   :  { %v13255_v58 = vsub.f32 %v13136_v34, %v4062_v30 }
 0xb85   :  { %v4034_v59 = vpop.xlane.xlu0 %4033  ;;  %v4031_v7 = vpop.xlane.xlu1 %4030 }
 0xb86   :  { %v4064_v22 = vmul.f32 0.0625, %v4034_v59  ;;  %v4063_v25 = vmul.f32 0.0625, %v4031_v7  ;;  %v4102_v60 = vmul.f32 %v13255_v58, %v13255_v58 }
 0xb88   :  { %v13261_v17 = vsub.f32 %v13139_v4, %v4064_v22  ;;  %v13264_v10 = vsub.f32 %v13146_v1, %v4063_v25  ;;  %v4146_v6 = vsel %vm1221_vm3, %v4102_v60, 0.0 }
 0xb89   :  { %4147 = vadd.xlane.f32.xlu0 %v4146_v6  ;;  %v4037_v34 = vpop.xlane.xlu1 %4036 }
 0xb8a   :  { %v4065_v33 = vmul.f32 0.0625, %v4037_v34  ;;  %v4104_v29 = vmul.f32 %v13261_v17, %v13261_v17  ;;  %v4103_v36 = vmul.f32 %v13264_v10, %v13264_v10 }
 0xb8c   :  { %v13272_v2 = vsub.f32 %v13149_v14, %v4065_v33  ;;  %v4152_v4 = vsel %vm1221_vm3, %v4104_v29, 0.0  ;;  %v4149_v53 = vsel %vm1221_vm3, %v4103_v36, 0.0  ;;  %v13305_v29 = vld [vmem:[%s16369_s19] ss:$0 sm:$0xff] }
 0xb8d   :  { %4153 = vadd.xlane.f32.xlu0 %v4152_v4  ;;  %4150 = vadd.xlane.f32.xlu1 %v4149_v53 }
 0xb8e   :  { %v4105_v1 = vmul.f32 %v13272_v2, %v13272_v2 }
 0xb90   :  { %v4155_v9 = vsel %vm1221_vm3, %v4105_v1, 0.0 }
 0xb91   :  { %4156 = vadd.xlane.f32.xlu1 %v4155_v9 }
 0xb96   :  { %v4040_v32 = vpop.xlane.xlu0 %4039 }
 0xb97   :  { %v4066_v51 = vmul.f32 0.0625, %v4040_v32 }
 0xb99   :  { %v13280_v16 = vsub.f32 %v13160_v63, %v4066_v51 }
 0xb9a   :  { %v4046_v24 = vpop.xlane.xlu0 %4045  ;;  %v4043_v14 = vpop.xlane.xlu1 %4042 }
 0xb9b   :  { %v4068_v39 = vmul.f32 0.0625, %v4046_v24  ;;  %v4067_v15 = vmul.f32 0.0625, %v4043_v14  ;;  %v4106_v27 = vmul.f32 %v13280_v16, %v13280_v16 }
 0xb9d   :  { %v13285_v40 = vsub.f32 %v13163_v31, %v4068_v39  ;;  %v13288_v57 = vsub.f32 %v13170_v12, %v4067_v15  ;;  %v4158_v56 = vsel %vm1221_vm3, %v4106_v27, 0.0  ;;  %v13311_v39 = vld [vmem:[%s16370_s24] ss:$0 sm:$0xff] }
 0xb9e   :  { %4159 = vadd.xlane.f32.xlu0 %v4158_v56  ;;  %v4049_v20 = vpop.xlane.xlu1 %4048 }
 0xb9f   :  { %v4069_v61 = vmul.f32 0.0625, %v4049_v20  ;;  %v4108_v63 = vmul.f32 %v13285_v40, %v13285_v40  ;;  %v4107_v49 = vmul.f32 %v13288_v57, %v13288_v57 }
 0xba1   :  { %v13296_v5 = vsub.f32 %v13173_v18, %v4069_v61  ;;  %v4164_v31 = vsel %vm1221_vm3, %v4108_v63, 0.0  ;;  %v4161_v47 = vsel %vm1221_vm3, %v4107_v49, 0.0 }
 0xba2   :  { %4165 = vadd.xlane.f32.xlu0 %v4164_v31  ;;  %4162 = vadd.xlane.f32.xlu1 %v4161_v47 }
 0xba3   :  { %v4109_v12 = vmul.f32 %v13296_v5, %v13296_v5 }
 0xba5   :  { %v4167_v62 = vsel %vm1221_vm3, %v4109_v12, 0.0 }
 0xba6   :  { %4168 = vadd.xlane.f32.xlu1 %v4167_v62 }
 0xbe3   :  { %v4112_v35 = vpop.xlane.xlu0 %4111 }
 0xbe4   :  { %v4170_v50 = vmul.f32 0.0625, %v4112_v35 }
 0xbe6   :  { %v4190_v37 = vadd.f32 1e-05, %v4170_v50 }
 0xbe7   :  { %v4118_v48 = vpop.xlane.xlu0 %4117  ;;  %v4115_v3 = vpop.xlane.xlu1 %4114 }
 0xbe8   :  { %10802 = vrsqrt.f32 %v4190_v37  ;;  %v4172_v18 = vmul.f32 0.0625, %v4118_v48  ;;  %v4171_v26 = vmul.f32 0.0625, %v4115_v3 }
 0xbea   :  { %v4192_v44 = vadd.f32 1e-05, %v4172_v18  ;;  %v4191_v21 = vadd.f32 1e-05, %v4171_v26 }
 0xbeb   :  { %v4121_v11 = vpop.xlane.xlu1 %4120 }
 0xbec   :  { %10804 = vrsqrt.f32 %v4192_v44  ;;  %v4173_v55 = vmul.f32 0.0625, %v4121_v11 }
 0xbed   :  { %10806 = vrsqrt.f32 %v4191_v21 }
 0xbee   :  { %v4193_v42 = vadd.f32 1e-05, %v4173_v55 }
 0xbf0   :  { %10808 = vrsqrt.f32 %v4193_v42 }
 0xbf2   :  { %v4124_v30 = vpop.xlane.xlu0 %4123 }
 0xbf3   :  { %v4174_v59 = vmul.f32 0.0625, %v4124_v30 }
 0xbf5   :  { %v10803_v7 = vpop.eup %10802  ;;  %v4194_v22 = vadd.f32 1e-05, %v4174_v59 }
 0xbf6   :  { %v4130_v25 = vpop.xlane.xlu0 %4129  ;;  %v4127_v60 = vpop.xlane.xlu1 %4126  ;;  %v4230_v33 = vmul.f32 %v10803_v7, %v13182_v38 }
 0xbf7   :  { %10810 = vrsqrt.f32 %v4194_v22  ;;  %v4176_v6 = vmul.f32 0.0625, %v4130_v25  ;;  %v4175_v34 = vmul.f32 0.0625, %v4127_v60 }
 0xbf8   :  { %v4257_v14 = vmul.f32 %v13305_v29, %v4230_v33 }
 0xbf9   :  { %v10805_v36 = vpop.eup %10804  ;;  %v4196_v4 = vadd.f32 1e-05, %v4176_v6  ;;  %v4195_v53 = vadd.f32 1e-05, %v4175_v34 }
 0xbfa   :  { %v10807_v1 = vpop.eup %10806  ;;  %v4232_v9 = vmul.f32 %v10805_v36, %v13187_v41  ;;  %v4133_v32 = vpop.xlane.xlu1 %4132  ;;  %v13317_v41 = vadd.f32 %v13311_v39, %v4257_v14 }
 0xbfb   :  { %10812 = vrsqrt.f32 %v4196_v4  ;;  %v4177_v51 = vmul.f32 0.0625, %v4133_v32  ;;  %v4231_v24 = vmul.f32 %v10807_v1, %v13190_v13 }
 0xbfc   :  { %10814 = vrsqrt.f32 %v4195_v53  ;;  %v4259_v56 = vmul.f32 %v13305_v29, %v4232_v9  ;;  %16371 = vst [vmem:[#allocation47_spill] sm:$0xff] %v13317_v41 }
 0xbfd   :  { %v10809_v15 = vpop.eup %10808  ;;  %v4197_v38 = vadd.f32 1e-05, %v4177_v51  ;;  %v4258_v27 = vmul.f32 %v13305_v29, %v4231_v24 }
 0xbfe   :  { %v4233_v20 = vmul.f32 %v10809_v15, %v13198_v46  ;;  %v13326_v49 = vadd.f32 %v13311_v39, %v4259_v56 }
 0xbff   :  { %10816 = vrsqrt.f32 %v4197_v38  ;;  %v13320_v61 = vadd.f32 %v13311_v39, %v4258_v27 }
 0xc00   :  { %v4260_v13 = vmul.f32 %v13305_v29, %v4233_v20  ;;  %16373 = vst [vmem:[#allocation49_spill] sm:$0xff] %v13326_v49 }
 0xc01   :  { %16372 = vst [vmem:[#allocation46_spill] sm:$0xff] %v13320_v61  ;;  %v4304_v63 = vpack.c.bf16 %v13320_v61, %v13317_v41 }
 0xc02   :  { %v13329_v31 = vadd.f32 %v13311_v39, %v4260_v13  ;;  %v4136_v47 = vpop.xlane.xlu0 %4135 }
 0xc03   :  { %9688 = vmatprep.mubr.msk.bf16.mxu1 %vm1221_vm3, %v4304_v63  ;;  %v4178_v46 = vmul.f32 0.0625, %v4136_v47 }
 0xc04   :  { %16374 = vst [vmem:[#allocation48_spill] sm:$0xff] %v13329_v31  ;;  %v10811_v12 = vpop.eup %10810  ;;  %v4305_v62 = vpack.c.bf16 %v13329_v31, %v13326_v49 }
 0xc05   :  { %v4198_v35 = vadd.f32 1e-05, %v4178_v46  ;;  %v4234_v48 = vmul.f32 %v10811_v12, %v13206_v19 }
 0xc06   :  { %9689 = vmatmul.mubr.msk.bf16.vlgmr.msra.gmra.mxu1 %vm1221_vm3, %v4305_v62  ;;  %v4142_v50 = vpop.xlane.xlu0 %4141  ;;  %v4139_v37 = vpop.xlane.xlu1 %4138 }
 0xc07   :  { %10818 = vrsqrt.f32 %v4198_v35  ;;  %v4180_v3 = vmul.f32 0.0625, %v4142_v50  ;;  %v4179_v18 = vmul.f32 0.0625, %v4139_v37  ;;  %v4261_v59 = vmul.f32 %v13305_v29, %v4234_v48 }
 0xc08   :  { %v10813_v26 = vpop.eup %10812 }
 0xc09   :  { %v10815_v44 = vpop.eup %10814  ;;  %v4236_v21 = vmul.f32 %v10813_v26, %v13211_v54  ;;  %v4200_v11 = vadd.f32 1e-05, %v4180_v3  ;;  %v4199_v55 = vadd.f32 1e-05, %v4179_v18  ;;  %v13343_v54 = vadd.f32 %v13311_v39, %v4261_v59 }
 0xc0a   :  { %v4145_v42 = vpop.xlane.xlu1 %4144  ;;  %v4235_v30 = vmul.f32 %v10815_v44, %v13214_v23 }
 0xc0b   :  { %10820 = vrsqrt.f32 %v4200_v11  ;;  %v4181_v7 = vmul.f32 0.0625, %v4145_v42  ;;  %v4263_v6 = vmul.f32 %v13305_v29, %v4236_v21  ;;  %16375 = vst [vmem:[#allocation34_spill] sm:$0xff] %v13343_v54 }
 0xc0c   :  { %v10817_v22 = vpop.eup %10816  ;;  %10822 = vrsqrt.f32 %v4199_v55  ;;  %v4262_v19 = vmul.f32 %v13305_v29, %v4235_v30 }
 0xc0d   :  { %v4237_v25 = vmul.f32 %v10817_v22, %v13222_v43  ;;  %v4201_v60 = vadd.f32 1e-05, %v4181_v7  ;;  %v13352_v36 = vadd.f32 %v13311_v39, %v4263_v6 }
 0xc0e   :  { %v13346_v34 = vadd.f32 %v13311_v39, %v4262_v19 }
 0xc0f   :  { %10824 = vrsqrt.f32 %v4201_v60  ;;  %v4264_v23 = vmul.f32 %v13305_v29, %v4237_v25  ;;  %16377 = vst [vmem:[#allocation50_spill] sm:$0xff] %v13352_v36 }
 0xc10   :  { %16376 = vst [vmem:[#allocation51_spill] sm:$0xff] %v13346_v34  ;;  %v4306_v33 = vpack.c.bf16 %v13346_v34, %v13343_v54 }
 0xc11   :  { %v13355_v43 = vadd.f32 %v13311_v39, %v4264_v23 }
 0xc12   :  { %9692 = vmatprep.mubr.msk.bf16.mxu1 %vm1221_vm3, %v4306_v33  ;;  %v4148_v4 = vpop.xlane.xlu0 %4147 }
 0xc13   :  { %16378 = vst [vmem:[#allocation35_spill] sm:$0xff] %v13355_v43  ;;  %v4182_v53 = vmul.f32 0.0625, %v4148_v4  ;;  %v4307_v1 = vpack.c.bf16 %v13355_v43, %v13352_v36 }
 0xc14   :  { %v10819_v9 = vpop.eup %10818 }
 0xc15   :  { %v4202_v32 = vadd.f32 1e-05, %v4182_v53  ;;  %9693 = vmatmul.mubr.msk.bf16.gmra.mxu1 %vm1221_vm3, %v4307_v1  ;;  %v4238_v14 = vmul.f32 %v10819_v9, %v13230_v8 }
 0xc16   :  { %v4154_v51 = vpop.xlane.xlu0 %4153  ;;  %v4151_v24 = vpop.xlane.xlu1 %4150 }
 0xc17   :  { %10826 = vrsqrt.f32 %v4202_v32  ;;  %v4184_v15 = vmul.f32 0.0625, %v4154_v51  ;;  %v4183_v38 = vmul.f32 0.0625, %v4151_v24  ;;  %v4265_v12 = vmul.f32 %v13305_v29, %v4238_v14 }
 0xc18   :  { %v10821_v27 = vpop.eup %10820 }
 0xc19   :  { %v10823_v56 = vpop.eup %10822  ;;  %v4240_v20 = vmul.f32 %v10821_v27, %v13235_v0  ;;  %v4204_v13 = vadd.f32 1e-05, %v4184_v15  ;;  %v4203_v63 = vadd.f32 1e-05, %v4183_v38  ;;  %v13369_v0 = vadd.f32 %v13311_v39, %v4265_v12 }
 0xc1a   :  { %v4157_v47 = vpop.xlane.xlu1 %4156  ;;  %v4239_v46 = vmul.f32 %v10823_v56, %v13238_v52 }
 0xc1b   :  { %10828 = vrsqrt.f32 %v4204_v13  ;;  %v4185_v62 = vmul.f32 0.0625, %v4157_v47  ;;  %v4267_v48 = vmul.f32 %v13305_v29, %v4240_v20  ;;  %16379 = vst [vmem:[#allocation27_spill] sm:$0xff] %v13369_v0 }
 0xc1c   :  { %v10825_v35 = vpop.eup %10824  ;;  %10830 = vrsqrt.f32 %v4203_v63  ;;  %v4266_v8 = vmul.f32 %v13305_v29, %v4239_v46 }
 0xc1d   :  { %v4241_v50 = vmul.f32 %v10825_v35, %v13246_v45  ;;  %v4205_v37 = vadd.f32 1e-05, %v4185_v62  ;;  %v13378_v26 = vadd.f32 %v13311_v39, %v4267_v48 }
 0xc1e   :  { %v13372_v3 = vadd.f32 %v13311_v39, %v4266_v8 }
 0xc1f   :  { %10832 = vrsqrt.f32 %v4205_v37  ;;  %v4268_v52 = vmul.f32 %v13305_v29, %v4241_v50  ;;  %16381 = vst [vmem:[#allocation44_spill] sm:$0xff] %v13378_v26 }
 0xc20   :  { %16380 = vst [vmem:[#allocation28_spill] sm:$0xff] %v13372_v3  ;;  %v4308_v18 = vpack.c.bf16 %v13372_v3, %v13369_v0 }
 0xc21   :  { %v13381_v45 = vadd.f32 %v13311_v39, %v4268_v52 }
 0xc22   :  { %9696 = vmatprep.mubr.msk.bf16.mxu1 %vm1221_vm3, %v4308_v18 }
 0xc23   :  { %16382 = vst [vmem:[#allocation45_spill] sm:$0xff] %v13381_v45  ;;  %v4309_v44 = vpack.c.bf16 %v13381_v45, %v13378_v26 }
 0xc24   :  { %v10827_v21 = vpop.eup %10826 }
 0xc25   :  { %9697 = vmatmul.mubr.msk.bf16.gmra.mxu1 %vm1221_vm3, %v4309_v44  ;;  %v4242_v55 = vmul.f32 %v10827_v21, %v13255_v58  ;;  %v13442_v44 = vld [vmem:[%s16387_s30] ss:$0 sm:$0xff] }
 0xc27   :  { %v4160_v11 = vpop.xlane.xlu0 %4159  ;;  %v4269_v6 = vmul.f32 %v13305_v29, %v4242_v55 }
 0xc28   :  { %v4186_v42 = vmul.f32 0.0625, %v4160_v11  ;;  %v10829_v30 = vpop.eup %10828 }
 0xc29   :  { %v10831_v59 = vpop.eup %10830  ;;  %v4244_v7 = vmul.f32 %v10829_v30, %v13261_v17  ;;  %v13395_v51 = vadd.f32 %v13311_v39, %v4269_v6 }
 0xc2a   :  { %v4206_v22 = vadd.f32 1e-05, %v4186_v42  ;;  %v4243_v60 = vmul.f32 %v10831_v59, %v13264_v10 }
 0xc2b   :  { %v4166_v19 = vpop.xlane.xlu0 %4165  ;;  %v4163_v25 = vpop.xlane.xlu1 %4162  ;;  %v4271_v32 = vmul.f32 %v13305_v29, %v4244_v7  ;;  %16383 = vst [vmem:[#allocation37_spill] sm:$0xff] %v13395_v51 }
 0xc2c   :  { %10834 = vrsqrt.f32 %v4206_v22  ;;  %v4188_v23 = vmul.f32 0.0625, %v4166_v19  ;;  %v4187_v33 = vmul.f32 0.0625, %v4163_v25  ;;  %v10833_v4 = vpop.eup %10832  ;;  %v4270_v53 = vmul.f32 %v13305_v29, %v4243_v60 }
 0xc2d   :  { %v4245_v58 = vmul.f32 %v10833_v4, %v13272_v2  ;;  %v13404_v38 = vadd.f32 %v13311_v39, %v4271_v32 }
 0xc2e   :  { %v4208_v1 = vadd.f32 1e-05, %v4188_v23  ;;  %v4207_v9 = vadd.f32 1e-05, %v4187_v33  ;;  %v13398_v10 = vadd.f32 %v13311_v39, %v4270_v53 }
 0xc2f   :  { %v4169_v17 = vpop.xlane.xlu1 %4168  ;;  %v4272_v14 = vmul.f32 %v13305_v29, %v4245_v58  ;;  %16385 = vst [vmem:[#allocation38_spill] sm:$0xff] %v13404_v38 }
 0xc30   :  { %16384 = vst [vmem:[#allocation36_spill] sm:$0xff] %v13398_v10  ;;  %10836 = vrsqrt.f32 %v4208_v1  ;;  %v4189_v24 = vmul.f32 0.0625, %v4169_v17  ;;  %v4310_v15 = vpack.c.bf16 %v13398_v10, %v13395_v51 }
 0xc31   :  { %10838 = vrsqrt.f32 %v4207_v9  ;;  %v13407_v27 = vadd.f32 %v13311_v39, %v4272_v14 }
 0xc32   :  { %v4209_v2 = vadd.f32 1e-05, %v4189_v24  ;;  %9700 = vmatprep.mubr.msk.bf16.mxu1 %vm1221_vm3, %v4310_v15 }
 0xc33   :  { %16386 = vst [vmem:[#allocation39_spill] sm:$0xff] %v13407_v27  ;;  %v4311_v56 = vpack.c.bf16 %v13407_v27, %v13404_v38 }
 0xc34   :  { %10840 = vrsqrt.f32 %v4209_v2 }
 0xc35   :  { %9701 = vmatmul.mubr.msk.bf16.gmra.mxu1 %vm1221_vm3, %v4311_v56 }
 0xc39   :  { %v10835_v20 = vpop.eup %10834 }
 0xc3a   :  { %v4246_v13 = vmul.f32 %v10835_v20, %v13280_v16 }
 0xc3c   :  { %v4273_v62 = vmul.f32 %v13305_v29, %v4246_v13 }
 0xc3d   :  { %v10837_v63 = vpop.eup %10836 }
 0xc3e   :  { %v10839_v47 = vpop.eup %10838  ;;  %v4248_v46 = vmul.f32 %v10837_v63, %v13285_v40  ;;  %v13421_v48 = vadd.f32 %v13311_v39, %v4273_v62 }
 0xc3f   :  { %v4247_v12 = vmul.f32 %v10839_v47, %v13288_v57 }
 0xc40   :  { %v4275_v37 = vmul.f32 %v13305_v29, %v4248_v46  ;;  %16388 = vst [vmem:[#allocation41_spill] sm:$0xff] %v13421_v48 }
 0xc41   :  { %v10841_v35 = vpop.eup %10840  ;;  %v4274_v8 = vmul.f32 %v13305_v29, %v4247_v12 }
 0xc42   :  { %v4249_v50 = vmul.f32 %v10841_v35, %v13296_v5  ;;  %v13430_v52 = vadd.f32 %v13311_v39, %v4275_v37 }
 0xc43   :  { %v13424_v16 = vadd.f32 %v13311_v39, %v4274_v8 }
 0xc44   :  { %v4276_v40 = vmul.f32 %v13305_v29, %v4249_v50  ;;  %16390 = vst [vmem:[#allocation42_spill] sm:$0xff] %v13430_v52 }
 0xc45   :  { %16389 = vst [vmem:[#allocation43_spill] sm:$0xff] %v13424_v16  ;;  %v4312_v57 = vpack.c.bf16 %v13424_v16, %v13421_v48 }
 0xc46   :  { %v13433_v18 = vadd.f32 %v13311_v39, %v4276_v40 }
 0xc47   :  { %9704 = vmatprep.mubr.msk.bf16.mxu1 %vm1221_vm3, %v4312_v57 }
 0xc48   :  { %16391 = vst [vmem:[#allocation40_spill] sm:$0xff] %v13433_v18  ;;  %v4313_v5 = vpack.c.bf16 %v13433_v18, %v13430_v52 }
 0xc4a   :  { %9705 = vmatmul.mubr.msk.bf16.gmra.mxu1 %vm1221_vm3, %v4313_v5 }
 0xc4b   :  { %9740 = vmatprep.mubr.msk.bf16.mxu1 %vm11149_vm4, %v16335_v28 }
 0xcc6   :  { %v9690_v29 = vpop.f32.mrf.mxu1 }
 0xcc7   :  { %v4402_v55 = vadd.f32 %v9690_v29, %v13442_v44 }
 0xcc8   :  { %v4393_v21 = vpop.f32.mrf.mxu1 }
 0xcc9   :  { %v4394_v42 = vadd.f32 %v13442_v44, %v4393_v21 }
 0xcca   :  { %v9691_v11 = vpop.f32.mrf.mxu1 }
 0xccb   :  { %v4405_v39 = vadd.f32 %v9691_v11, %v13442_v44 }
 0xccc   :  { %v4396_v30 = vpop.f32.mrf.mxu1 }
 0xccd   :  { %v13447_v59 = vpack.i.bf16 %v4405_v39, %v4402_v55  ;;  %v13449_v7 = vpack.c.bf16 %v4405_v39, %v4402_v55  ;;  %v4397_v22 = vadd.f32 %v13442_v44, %v4396_v30 }
 0xccf   :  { %v10338_v19 = vpack.i.bf16 %v4397_v22, %v4394_v42  ;;  %v13452_v25 = vpack.c.bf16 %v4397_v22, %v4394_v42  ;;  %10269 = vrot.lane.b32.xlu1 %v13447_v59, %s11145_s0 }
 0xcd1   :  { %10264 = vrot.lane.b32.xlu0 %v10338_v19, %s11145_s0 }
 0xcd5   :  { %v9694_v60 = vpop.f32.mrf.mxu1 }
 0xcd6   :  { %v4418_v33 = vadd.f32 %v9694_v60, %v13442_v44 }
 0xcd7   :  { %v4409_v6 = vpop.f32.mrf.mxu1 }
 0xcd8   :  { %v4410_v53 = vadd.f32 %v13442_v44, %v4409_v6 }
 0xcd9   :  { %v9695_v23 = vpop.f32.mrf.mxu1 }
 0xcda   :  { %v4421_v4 = vadd.f32 %v9695_v23, %v13442_v44 }
 0xcdb   :  { %v4412_v58 = vpop.f32.mrf.mxu1 }
 0xcdc   :  { %v10353_v1 = vpack.i.bf16 %v4421_v4, %v4418_v33  ;;  %v13460_v9 = vpack.c.bf16 %v4421_v4, %v4418_v33  ;;  %v4413_v32 = vadd.f32 %v13442_v44, %v4412_v58 }
 0xcde   :  { %v10278_v17 = vpack.i.bf16 %v4413_v32, %v4410_v53  ;;  %v13463_v24 = vpack.c.bf16 %v4413_v32, %v4410_v53  ;;  %10274 = vrot.lane.b32.xlu0 %v10353_v1, %s11145_s0 }
 0xce0   :  { %10279 = vrot.lane.b32.xlu1 %v10278_v17, %s11145_s0 }
 0xce5   :  { %v9698_v14 = vpop.f32.mrf.mxu1 }
 0xce6   :  { %v4434_v56 = vadd.f32 %v9698_v14, %v13442_v44 }
 0xce7   :  { %v4425_v15 = vpop.f32.mrf.mxu1 }
 0xce8   :  { %v4426_v63 = vadd.f32 %v13442_v44, %v4425_v15 }
 0xce9   :  { %v9699_v2 = vpop.f32.mrf.mxu1 }
 0xcea   :  { %v4437_v20 = vadd.f32 %v9699_v2, %v13442_v44 }
 0xceb   :  { %v4428_v13 = vpop.f32.mrf.mxu1 }
 0xcec   :  { %v10283_v47 = vpack.i.bf16 %v4437_v20, %v4434_v56  ;;  %v13470_v46 = vpack.c.bf16 %v4437_v20, %v4434_v56  ;;  %v4429_v12 = vadd.f32 %v13442_v44, %v4428_v13 }
 0xcee   :  { %16392 = vst [vmem:[#allocation21_spill] sm:$0xff] %v13470_v46  ;;  %v10288_v62 = vpack.i.bf16 %v4429_v12, %v4426_v63  ;;  %v13473_v35 = vpack.c.bf16 %v4429_v12, %v4426_v63  ;;  %10284 = vrot.lane.b32.xlu0 %v10283_v47, %s11145_s0 }
 0xcf0   :  { %10289 = vrot.lane.b32.xlu1 %v10288_v62, %s11145_s0 }
 0xcf5   :  { %v9702_v8 = vpop.f32.mrf.mxu1 }
 0xcf6   :  { %v4450_v40 = vadd.f32 %v9702_v8, %v13442_v44 }
 0xcf7   :  { %v4441_v50 = vpop.f32.mrf.mxu1 }
 0xcf8   :  { %v4442_v29 = vadd.f32 %v13442_v44, %v4441_v50 }
 0xcf9   :  { %v9703_v37 = vpop.f32.mrf.mxu1 }
 0xcfa   :  { %v4453_v57 = vadd.f32 %v9703_v37, %v13442_v44 }
 0xcfb   :  { %v4444_v5 = vpop.f32.mrf.mxu1 }
 0xcfc   :  { %v10293_v21 = vpack.i.bf16 %v4453_v57, %v4450_v40  ;;  %v13480_v11 = vpack.c.bf16 %v4453_v57, %v4450_v40  ;;  %v4445_v55 = vadd.f32 %v13442_v44, %v4444_v5 }
 0xcfe   :  { %v10298_v39 = vpack.i.bf16 %v4445_v55, %v4442_v29  ;;  %v13483_v42 = vpack.c.bf16 %v4445_v55, %v4442_v29  ;;  %10294 = vrot.lane.b32.xlu0 %v10293_v21, %s11145_s0 }
 0xd00   :  { %10299 = vrot.lane.b32.xlu1 %v10298_v39, %s11145_s0 }
 0xd0a   :  { %v9706_v30 = vpop.f32.mrf.mxu1 }
 0xd0b   :  { %v4466_v6 = vadd.f32 %v9706_v30, %v13442_v44 }
 0xd0c   :  { %v4457_v22 = vpop.f32.mrf.mxu1 }
 0xd0d   :  { %v4458_v4 = vadd.f32 %v13442_v44, %v4457_v22 }
 0xd0e   :  { %v9707_v60 = vpop.f32.mrf.mxu1 }
 0xd0f   :  { %v4469_v23 = vadd.f32 %v9707_v60, %v13442_v44 }
 0xd10   :  { %v4460_v33 = vpop.f32.mrf.mxu1 }
 0xd11   :  { %v10303_v53 = vpack.i.bf16 %v4469_v23, %v4466_v6  ;;  %v13490_v58 = vpack.c.bf16 %v4469_v23, %v4466_v6  ;;  %v4461_v32 = vadd.f32 %v13442_v44, %v4460_v33 }
 0xd13   :  { %v10308_v14 = vpack.i.bf16 %v4461_v32, %v4458_v4  ;;  %v13493_v15 = vpack.c.bf16 %v4461_v32, %v4458_v4  ;;  %10304 = vrot.lane.b32.xlu0 %v10303_v53, %s11145_s0 }
 0xd15   :  { %10309 = vrot.lane.b32.xlu1 %v10308_v14, %s11145_s0 }
 0xd17   :  { %10339 = vrot.lane.b32.xlu0 %v10338_v19, %s11146_s5 }
 0xd1b   :  { %10344 = vrot.lane.b32.xlu0 %v13447_v59, %s11146_s5 }
 0xd1f   :  { %10349 = vrot.lane.b32.xlu0 %v10278_v17, %s11146_s5 }
 0xd23   :  { %10354 = vrot.lane.b32.xlu0 %v10353_v1, %s11146_s5 }
 0xd27   :  { %10359 = vrot.lane.b32.xlu0 %v10288_v62, %s11146_s5 }
 0xd2b   :  { %10364 = vrot.lane.b32.xlu0 %v10283_v47, %s11146_s5 }
 0xd2f   :  { %10369 = vrot.lane.b32.xlu0 %v10298_v39, %s11146_s5 }
 0xd33   :  { %10374 = vrot.lane.b32.xlu0 %v10293_v21, %s11146_s5 }
 0xd37   :  { %10379 = vrot.lane.b32.xlu0 %v10308_v14, %s11146_s5 }
 0xd3b   :  { %10384 = vrot.lane.b32.xlu0 %v10303_v53, %s11146_s5 }
 0xd3f   :  { %5339 = vrot.lane.b32.xlu0 %v13452_v25, %s11147_s9 }
 0xd41   :  { %v10270_v13 = vpop.permute.xlu1 %10269 }
 0xd42   :  { %v10271_v8 = vunpack.i.l.bf16 %v10270_v13  ;;  %v10272_v5 = vunpack.i.h.bf16 %v10270_v13 }
 0xd43   :  { %5341 = vrot.lane.b32.xlu0 %v13449_v7, %s11147_s9  ;;  %v10265_v44 = vpop.permute.xlu0 %10264 }
 0xd44   :  { %v10266_v1 = vunpack.i.l.bf16 %v10265_v44  ;;  %v10267_v20 = vunpack.i.h.bf16 %v10265_v44 }
 0xd47   :  { %5343 = vrot.lane.b32.xlu0 %v13463_v24, %s11147_s9 }
 0xd50   :  { %v10275_v59 = vpop.permute.xlu0 %10274 }
 0xd51   :  { %v10276_v33 = vunpack.i.l.bf16 %v10275_v59  ;;  %v10277_v44 = vunpack.i.h.bf16 %v10275_v59 }
 0xd52   :  { %v10280_v47 = vpop.permute.xlu1 %10279 }
 0xd53   :  { %v10281_v55 = vunpack.i.l.bf16 %v10280_v47  ;;  %v10282_v22 = vunpack.i.h.bf16 %v10280_v47 }
 0xd60   :  { %v10285_v19 = vpop.permute.xlu0 %10284 }
 0xd61   :  { %v10286_v17 = vunpack.i.l.bf16 %v10285_v19  ;;  %v10287_v2 = vunpack.i.h.bf16 %v10285_v19 }
 0xd62   :  { %v10290_v12 = vpop.permute.xlu1 %10289 }
 0xd63   :  { %v10313_v56 = vpack.i.bf16 %v10286_v17, %v10266_v1  ;;  %v10315_v63 = vpack.i.bf16 %v10287_v2, %v10267_v20  ;;  %v10291_v2 = vunpack.i.l.bf16 %v10290_v12 }
 0xd65   :  { %10314 = vxpose.xlu1.b32.start [1/10] (short) (narrow) %v10313_v56, 8 }
 0xd69   :  { %10316 = vxpose.xlu1.b32.cont [2/10] (short) (narrow) %v10315_v63, 8  ;;  %v10292_v63 = vunpack.i.h.bf16 %v10290_v12 }
 0xd70   :  { %v10295_v57 = vpop.permute.xlu0 %10294 }
 0xd71   :  { %v10296_v29 = vunpack.i.l.bf16 %v10295_v57  ;;  %v10297_v39 = vunpack.i.h.bf16 %v10295_v57 }
 0xd72   :  { %v10300_v62 = vpop.permute.xlu1 %10299 }
 0xd73   :  { %v10301_v50 = vunpack.i.l.bf16 %v10300_v62  ;;  %v10302_v37 = vunpack.i.h.bf16 %v10300_v62  ;;  %v10321_v30 = vpack.i.bf16 %v10296_v29, %v10281_v55  ;;  %v10323_v60 = vpack.i.bf16 %v10297_v39, %v10282_v22 }
 0xd75   :  { %v10317_v40 = vpack.i.bf16 %v10301_v50, %v10271_v8  ;;  %v10319_v21 = vpack.i.bf16 %v10302_v37, %v10272_v5 }
 0xd77   :  { %10318 = vxpose.xlu1.b32.cont [3/10] (short) (narrow) %v10317_v40, 8 }
 0xd7b   :  { %10320 = vxpose.xlu1.b32.cont [4/10] (short) (narrow) %v10319_v21, 8 }
 0xd7f   :  { %10322 = vxpose.xlu1.b32.cont [5/10] (short) (narrow) %v10321_v30, 8 }
 0xd83   :  { %10324 = vxpose.xlu1.b32.cont [6/10] (short) (narrow) %v10323_v60, 8 }
 0xd85   :  { %v10305_v6 = vpop.permute.xlu0 %10304 }
 0xd86   :  { %v10306_v1 = vunpack.i.l.bf16 %v10305_v6  ;;  %v10307_v20 = vunpack.i.h.bf16 %v10305_v6 }
 0xd87   :  { %v10310_v23 = vpop.permute.xlu1 %10309 }
 0xd88   :  { %v10311_v4 = vunpack.i.l.bf16 %v10310_v23  ;;  %v10312_v32 = vunpack.i.h.bf16 %v10310_v23  ;;  %v10329_v13 = vpack.i.bf16 %v10306_v1, %v10291_v2  ;;  %v10331_v62 = vpack.i.bf16 %v10307_v20, %v10292_v63 }
 0xd89   :  { %v10340_v53 = vpop.permute.xlu0 %10339 }
 0xd8a   :  { %v10325_v14 = vpack.i.bf16 %v10311_v4, %v10276_v33  ;;  %v10327_v17 = vpack.i.bf16 %v10312_v32, %v10277_v44  ;;  %v10341_v37 = vunpack.i.l.bf16 %v10340_v53  ;;  %v10342_v29 = vunpack.i.h.bf16 %v10340_v53 }
 0xd8c   :  { %10326 = vxpose.xlu1.b32.cont [7/10] (short) (narrow) %v10325_v14, 8 }
 0xd8d   :  { %v10345_v19 = vpop.permute.xlu0 %10344 }
 0xd8e   :  { %v10346_v39 = vunpack.i.l.bf16 %v10345_v19  ;;  %v10347_v60 = vunpack.i.h.bf16 %v10345_v19 }
 0xd90   :  { %10328 = vxpose.xlu1.b32.cont [8/10] (short) (narrow) %v10327_v17, 8 }
 0xd91   :  { %v10350_v56 = vpop.permute.xlu0 %10349 }
 0xd92   :  { %v10351_v33 = vunpack.i.l.bf16 %v10350_v56  ;;  %v10352_v44 = vunpack.i.h.bf16 %v10350_v56 }
 0xd94   :  { %10330 = vxpose.xlu1.b32.cont [9/10] (short) (narrow) %v10329_v13, 8 }
 0xd95   :  { %v10355_v47 = vpop.permute.xlu0 %10354 }
 0xd96   :  { %v10356_v17 = vunpack.i.l.bf16 %v10355_v47  ;;  %v10357_v13 = vunpack.i.h.bf16 %v10355_v47 }
 0xd98   :  { %10332 = vxpose.xlu1.b32.end [10/10] (short) (narrow) %v10331_v62, 8 }
 0xd99   :  { %v10360_v8 = vpop.permute.xlu0 %10359 }
 0xd9d   :  { %v10365_v50 = vpop.permute.xlu0 %10364 }
 0xd9e   :  { %v10366_v40 = vunpack.i.l.bf16 %v10365_v50  ;;  %v10367_v57 = vunpack.i.h.bf16 %v10365_v50  ;;  %v10361_v50 = vunpack.i.l.bf16 %v10360_v8 }
 0xda0   :  { %v10388_v59 = vpack.i.bf16 %v10366_v40, %v10341_v37  ;;  %v10390_v21 = vpack.i.bf16 %v10367_v57, %v10342_v29  ;;  %v10362_v40 = vunpack.i.h.bf16 %v10360_v8 }
 0xda1   :  { %v10370_v5 = vpop.permute.xlu0 %10369 }
 0xda2   :  { %10389 = vxpose.xlu0.b32.start [1/10] (short) (narrow) %v10388_v59, 8  ;;  %v10371_v55 = vunpack.i.l.bf16 %v10370_v5  ;;  %v10372_v30 = vunpack.i.h.bf16 %v10370_v5 }
 0xda4   :  { %v10392_v22 = vpack.i.bf16 %v10371_v55, %v10346_v39  ;;  %v10394_v6 = vpack.i.bf16 %v10372_v30, %v10347_v60 }
 0xda5   :  { %v10375_v12 = vpop.permute.xlu0 %10374 }
 0xda6   :  { %10391 = vxpose.xlu0.b32.cont [2/10] (short) (narrow) %v10390_v21, 8  ;;  %v10376_v23 = vunpack.i.l.bf16 %v10375_v12  ;;  %v10377_v4 = vunpack.i.h.bf16 %v10375_v12 }
 0xda8   :  { %v10396_v32 = vpack.i.bf16 %v10376_v23, %v10351_v33  ;;  %v10398_v53 = vpack.i.bf16 %v10377_v4, %v10352_v44 }
 0xda9   :  { %v10380_v14 = vpop.permute.xlu0 %10379 }
 0xdaa   :  { %10393 = vxpose.xlu0.b32.cont [3/10] (short) (narrow) %v10392_v22, 8  ;;  %v10381_v1 = vunpack.i.l.bf16 %v10380_v14  ;;  %v10382_v2 = vunpack.i.h.bf16 %v10380_v14 }
 0xdac   :  { %v10400_v20 = vpack.i.bf16 %v10381_v1, %v10356_v17  ;;  %v10402_v63 = vpack.i.bf16 %v10382_v2, %v10357_v13 }
 0xdad   :  { %v10385_v19 = vpop.permute.xlu0 %10384 }
 0xdae   :  { %10395 = vxpose.xlu0.b32.cont [4/10] (short) (narrow) %v10394_v6, 8  ;;  %v10386_v62 = vunpack.i.l.bf16 %v10385_v19  ;;  %v10387_v56 = vunpack.i.h.bf16 %v10385_v19 }
 0xdb0   :  { %v10404_v37 = vpack.i.bf16 %v10386_v62, %v10361_v50  ;;  %v10406_v57 = vpack.i.bf16 %v10387_v56, %v10362_v40 }
 0xdb2   :  { %10397 = vxpose.xlu0.b32.cont [5/10] (short) (narrow) %v10396_v32, 8 }
 0xdb6   :  { %10399 = vxpose.xlu0.b32.cont [6/10] (short) (narrow) %v10398_v53, 8  ;;  %5345 = vrot.lane.b32.xlu1 %v13460_v9, %s11147_s9 }
 0xdba   :  { %10401 = vxpose.xlu0.b32.cont [7/10] (short) (narrow) %v10400_v20, 8  ;;  %5347 = vrot.lane.b32.xlu1 %v13473_v35, %s11147_s9 }
 0xdbe   :  { %10403 = vxpose.xlu0.b32.cont [8/10] (short) (narrow) %v10402_v63, 8  ;;  %5731 = vrot.lane.b32.xlu1 %v13470_v46, %s11147_s9 }
 0xdc2   :  { %10405 = vxpose.xlu0.b32.cont [9/10] (short) (narrow) %v10404_v37, 8  ;;  %5733 = vrot.lane.b32.xlu1 %v13483_v42, %s11147_s9 }
 0xdc6   :  { %10407 = vxpose.xlu0.b32.end [10/10] (short) (narrow) %v10406_v57, 8  ;;  %5735 = vrot.lane.b32.xlu1 %v13480_v11, %s11147_s9 }
 0xdca   :  { %5739 = vrot.lane.b32.xlu1 %v13490_v58, %s11147_s9 }
 0xdce   :  { %4777 = vrot.lane.b32.xlu1 %v13460_v9, %s11150_s13 }
 0xdd2   :  { %4773 = vrot.lane.b32.xlu1 %v13449_v7, %s11150_s13 }
 0xdd6   :  { %5181 = vrot.lane.b32.xlu1 %v13490_v58, %s11150_s13 }
 0xdda   :  { %5175 = vrot.lane.b32.xlu1 %v13483_v42, %s11150_s13 }
 0xdde   :  { %5573 = vrot.lane.b32.xlu1 %v13473_v35, %s11151_s17 }
 0xde2   :  { %5571 = vrot.lane.b32.xlu1 %v13460_v9, %s11151_s17 }
 0xde6   :  { %5565 = vrot.lane.b32.xlu1 %v13452_v25, %s11151_s17 }
 0xdef   :  { %5737 = vrot.lane.b32.xlu0 %v13493_v15, %s11147_s9 }
 0xdf0   :  { %v10333_v47 = vpop.trf.xlu1 }
 0xdf1   :  { %v10334_v8 = vunpack.i.l.bf16 %v10333_v47  ;;  %v10337_v59 = vunpack.i.h.bf16 %v10333_v47 }
 0xdf3   :  { %4779 = vrot.lane.b32.xlu0 %v13473_v35, %s11150_s13  ;;  %v4549_v5 = vpack.c.bf16 %v10334_v8, %v10334_v8  ;;  %v4951_v21 = vpack.c.bf16 %v10337_v59, %v10337_v59 }
 0xdf5   :  { %v4566_v29 = vsel %vm801_vm1, %v4549_v5, 0  ;;  %v4968_v55 = vsel %vm801_vm1, %v4951_v21, 0 }
 0xdf6   :  { %9709 = vmatpush3.bf16.msra.mxu0 %v4566_v29 }
 0xdf7   :  { %4775 = vrot.lane.b32.xlu0 %v13463_v24, %s11150_s13  ;;  %9760 = vmatprep.subr.bf16.mxu0 %v16335_v28 }
 0xdf9   :  { %9711 = vmatmul.mubr.msk.bf16.vlgmr.msra.gmra.mxu0 %vm1443_vm5, %v13452_v25 }
 0xdfa   :  { %9761 = vmatpush3.bf16.msra.mxu0 %v4968_v55  ;;  %9714 = vmatprep.mubr.msk.bf16.mxu0 %vm11149_vm4, %v16335_v28 }
 0xdfb   :  { %4771 = vrot.lane.b32.xlu0 %v13452_v25, %s11150_s13  ;;  %9812 = vmatprep.subr.bf16.mxu0 %v16335_v28  ;;  %v5340_v25 = vpop.permute.xlu0 %5339 }
 0xdff   :  { %5179 = vrot.lane.b32.xlu0 %v13493_v15, %s11150_s13  ;;  %v5342_v39 = vpop.permute.xlu0 %5341 }
 0xe01   :  { %9715 = vmatmul.mubr.msk.bf16.gmra.mxu0 %vm1443_vm5, %v13449_v7 }
 0xe02   :  { %9718 = vmatprep.mubr.msk.bf16.mxu0 %vm11149_vm4, %v16335_v28 }
 0xe03   :  { %5177 = vrot.lane.b32.xlu0 %v13480_v11, %s11150_s13  ;;  %v5344_v30 = vpop.permute.xlu0 %5343 }
 0xe07   :  { %5173 = vrot.lane.b32.xlu0 %v13470_v46, %s11150_s13 }
 0xe09   :  { %9719 = vmatmul.mubr.msk.bf16.gmra.mxu0 %vm1443_vm5, %v13463_v24 }
 0xe0a   :  { %9722 = vmatprep.mubr.msk.bf16.mxu0 %vm11149_vm4, %v16335_v28 }
 0xe0b   :  { %5569 = vrot.lane.b32.xlu0 %v13463_v24, %s11151_s17 }
 0xe0f   :  { %5567 = vrot.lane.b32.xlu0 %v13449_v7, %s11151_s17 }
 0xe11   :  { %9723 = vmatmul.mubr.msk.bf16.gmra.mxu0 %vm1443_vm5, %v13460_v9 }
 0xe12   :  { %9726 = vmatprep.mubr.msk.bf16.mxu0 %vm11149_vm4, %v16335_v28 }
 0xe19   :  { %9727 = vmatmul.mubr.msk.bf16.gmra.mxu0 %vm1443_vm5, %v13473_v35 }
 0xe1a   :  { %9762 = vmatprep.mubr.msk.bf16.mxu0 %vm11149_vm4, %v16335_v28 }
 0xe1e   :  { %v10408_v22 = vpop.trf.xlu0 }
 0xe1f   :  { %v10409_v24 = vunpack.i.l.bf16 %v10408_v22  ;;  %v10412_v35 = vunpack.i.h.bf16 %v10408_v22 }
 0xe21   :  { %9763 = vmatmul.mubr.msk.bf16.vlgmr.msra.gmra.mxu0 %vm1443_vm5, %v13470_v46  ;;  %v5338_v7 = vpack.c.bf16 %v10409_v24, %v10409_v24  ;;  %v5730_v12 = vpack.c.bf16 %v10412_v35, %v10412_v35 }
 0xe22   :  { %9766 = vmatprep.mubr.msk.bf16.mxu0 %vm11149_vm4, %v16335_v28 }
 0xe23   :  { %v5365_v9 = vsel %vm801_vm1, %v5338_v7, 0  ;;  %v5757_v6 = vsel %vm801_vm1, %v5730_v12, 0 }
 0xe24   :  { %9813 = vmatpush3.bf16.msra.mxu0 %v5365_v9 }
 0xe25   :  { %9864 = vmatprep.subr.bf16.mxu0 %v16335_v28 }
 0xe28   :  { %v5346_v60 = vpop.permute.xlu1 %5345 }
 0xe29   :  { %9767 = vmatmul.mubr.msk.bf16.gmra.mxu0 %vm1443_vm5, %v13483_v42 }
 0xe2a   :  { %9770 = vmatprep.mubr.msk.bf16.mxu0 %vm11149_vm4, %v16335_v28 }
 0xe2c   :  { %v5348_v23 = vpop.permute.xlu1 %5347 }
 0xe30   :  { %v5732_v33 = vpop.permute.xlu1 %5731 }
 0xe31   :  { %9771 = vmatmul.mubr.msk.bf16.gmra.mxu0 %vm1443_vm5, %v13480_v11 }
 0xe32   :  { %9774 = vmatprep.mubr.msk.bf16.mxu0 %vm11149_vm4, %v16335_v28 }
 0xe34   :  { %v5734_v4 = vpop.permute.xlu1 %5733 }
 0xe38   :  { %v5736_v32 = vpop.permute.xlu1 %5735 }
 0xe39   :  { %9775 = vmatmul.mubr.msk.bf16.gmra.mxu0 %vm1443_vm5, %v13493_v15 }
 0xe3a   :  { %9778 = vmatprep.mubr.msk.bf16.mxu0 %vm11149_vm4, %v16335_v28 }
 0xe3c   :  { %v5740_v44 = vpop.permute.xlu1 %5739 }
 0xe40   :  { %v4778_v1 = vpop.permute.xlu1 %4777 }
 0xe41   :  { %9779 = vmatmul.mubr.msk.bf16.gmra.mxu0 %vm1443_vm5, %v13490_v58 }
 0xe42   :  { %9814 = vmatprep.mubr.msk.bf16.mxu0 %vm11149_vm4, %v16335_v28 }
 0xe44   :  { %v4774_v2 = vpop.permute.xlu1 %4773 }
 0xe49   :  { %9815 = vmatmul.mubr.msk.bf16.vlgmr.msra.gmra.mxu0 %vm1443_vm5, %v5340_v25 }
 0xe4a   :  { %9865 = vmatpush3.bf16.msra.mxu0 %v5757_v6  ;;  %9818 = vmatprep.mubr.msk.bf16.mxu0 %vm11149_vm4, %v16335_v28 }
 0xe51   :  { %9819 = vmatmul.mubr.msk.bf16.gmra.mxu0 %vm1443_vm5, %v5342_v39 }
 0xe52   :  { %9822 = vmatprep.mubr.msk.bf16.mxu0 %vm11149_vm4, %v16335_v28 }
 0xe59   :  { %9823 = vmatmul.mubr.msk.bf16.gmra.mxu0 %vm1443_vm5, %v5344_v30 }
 0xe5a   :  { %9826 = vmatprep.mubr.msk.bf16.mxu0 %vm11149_vm4, %v16335_v28 }
 0xe61   :  { %v5738_v14 = vpop.permute.xlu0 %5737  ;;  %9827 = vmatmul.mubr.msk.bf16.gmra.mxu0 %vm1443_vm5, %v5346_v60 }
 0xe62   :  { %9830 = vmatprep.mubr.msk.bf16.mxu0 %vm11149_vm4, %v16335_v28 }
 0xe65   :  { %v4780_v53 = vpop.permute.xlu0 %4779 }
 0xe66   :  { %9731 = vmatpush3.bf16.msra.mxu1 %v4780_v53 }
 0xe67   :  { %9732 = vmatprep.subr.bf16.mxu1 %v16335_v28 }
 0xe69   :  { %9831 = vmatmul.mubr.msk.bf16.gmra.mxu0 %vm1443_vm5, %v5348_v23  ;;  %v4776_v17 = vpop.permute.xlu0 %4775 }
 0xe6a   :  { %9733 = vmatpush3.bf16.msra.mxu1 %v4778_v1  ;;  %9866 = vmatprep.mubr.msk.bf16.mxu0 %vm11149_vm4, %v16335_v28 }
 0xe6b   :  { %9734 = vmatprep.subr.bf16.mxu1 %v16335_v28 }
 0xe6d   :  { %v4772_v20 = vpop.permute.xlu0 %4771 }
 0xe6e   :  { %9735 = vmatpush3.bf16.msra.mxu1 %v4776_v17 }
 0xe6f   :  { %9736 = vmatprep.subr.bf16.mxu1 %v16335_v28 }
 0xe71   :  { %9867 = vmatmul.mubr.msk.bf16.vlgmr.msra.gmra.mxu0 %vm1443_vm5, %v5732_v33 }
 0xe72   :  { %9737 = vmatpush3.bf16.msra.mxu1 %v4774_v2  ;;  %9870 = vmatprep.mubr.msk.bf16.mxu0 %vm11149_vm4, %v16335_v28 }
 0xe73   :  { %9738 = vmatprep.subr.bf16.mxu1 %v16335_v28 }
 0xe76   :  { %9739 = vmatpush3.bf16.msra.mxu1 %v4772_v20 }
 0xe77   :  { %9782 = vmatprep.subr.bf16.mxu1 %v16335_v28 }
 0xe79   :  { %9871 = vmatmul.mubr.msk.bf16.gmra.mxu0 %vm1443_vm5, %v5734_v4 }
 0xe7a   :  { %9874 = vmatprep.mubr.msk.bf16.mxu0 %vm11149_vm4, %v16335_v28 }
 0xe81   :  { %9875 = vmatmul.mubr.msk.bf16.gmra.mxu0 %vm1443_vm5, %v5736_v32 }
 0xe82   :  { %9878 = vmatprep.mubr.msk.bf16.mxu0 %vm11149_vm4, %v16335_v28 }
 0xe89   :  { %9879 = vmatmul.mubr.msk.bf16.gmra.mxu0 %vm1443_vm5, %v5738_v14 }
 0xe8a   :  { %9882 = vmatprep.mubr.msk.bf16.mxu0 %vm11149_vm4, %v16335_v28 }
 0xe91   :  { %9883 = vmatmul.mubr.msk.bf16.gmra.mxu0 %vm1443_vm5, %v5740_v44 }
 0xeb9   :  { %v4602_v19 = vpop.f32.mrf.mxu0 }
 0xeba   :  { %v13638_v13 = vmul.f32 0.35355338, %v4602_v19 }
 0xebb   :  { %v9712_v63 = vpop.f32.mrf.mxu0 }
 0xebc   :  { %v4651_v62 = vsel %vm1545_vm6, %v13638_v13, -inf }
 0xebd   :  { %4652 = vmax.xlane.f32.xlu1 %v4651_v62  ;;  %v4605_v50 = vpop.f32.mrf.mxu0 }
 0xebe   :  { %v13642_v56 = vmul.f32 0.35355338, %v4605_v50 }
 0xebf   :  { %v9713_v37 = vpop.f32.mrf.mxu0 }
 0xec0   :  { %v4654_v40 = vsel %vm1545_vm6, %v13642_v56, -inf }
 0xec1   :  { %4655 = vmax.xlane.f32.xlu0 %v4654_v40  ;;  %v4610_v57 = vpop.f32.mrf.mxu0 }
 0xec2   :  { %v13646_v47 = vmul.f32 0.35355338, %v4610_v57 }
 0xec3   :  { %v9716_v8 = vpop.f32.mrf.mxu0 }
 0xec4   :  { %v4657_v59 = vsel %vm1545_vm6, %v13646_v47, -inf }
 0xec5   :  { %4658 = vmax.xlane.f32.xlu1 %v4657_v59  ;;  %v4613_v5 = vpop.f32.mrf.mxu0 }
 0xec6   :  { %v13650_v29 = vmul.f32 0.35355338, %v4613_v5 }
 0xec7   :  { %v9717_v21 = vpop.f32.mrf.mxu0 }
 0xec8   :  { %v4660_v55 = vsel %vm1545_vm6, %v13650_v29, -inf }
 0xec9   :  { %4661 = vmax.xlane.f32.xlu1 %v4660_v55  ;;  %v4618_v25 = vpop.f32.mrf.mxu0 }
 0xeca   :  { %v13654_v39 = vmul.f32 0.35355338, %v4618_v25 }
 0xecb   :  { %v9720_v30 = vpop.f32.mrf.mxu0 }
 0xecc   :  { %v4663_v22 = vsel %vm1545_vm6, %v13654_v39, -inf }
 0xecd   :  { %4664 = vmax.xlane.f32.xlu1 %v4663_v22  ;;  %v4621_v24 = vpop.f32.mrf.mxu0 }
 0xece   :  { %v13658_v7 = vmul.f32 0.35355338, %v4621_v24 }
 0xecf   :  { %v9721_v9 = vpop.f32.mrf.mxu0 }
 0xed0   :  { %v4666_v35 = vsel %vm1545_vm6, %v13658_v7, -inf }
 0xed1   :  { %4667 = vmax.xlane.f32.xlu1 %v4666_v35  ;;  %v4626_v12 = vpop.f32.mrf.mxu0 }
 0xed2   :  { %v13662_v60 = vmul.f32 0.35355338, %v4626_v12 }
 0xed3   :  { %v9724_v6 = vpop.f32.mrf.mxu0 }
 0xed4   :  { %v4669_v23 = vsel %vm1545_vm6, %v13662_v60, -inf }
 0xed5   :  { %4670 = vmax.xlane.f32.xlu1 %v4669_v23  ;;  %v4629_v33 = vpop.f32.mrf.mxu0 }
 0xed6   :  { %v13666_v4 = vmul.f32 0.35355338, %v4629_v33 }
 0xed7   :  { %v9725_v32 = vpop.f32.mrf.mxu0 }
 0xed8   :  { %v4672_v14 = vsel %vm1545_vm6, %v13666_v4, -inf }
 0xed9   :  { %4673 = vmax.xlane.f32.xlu1 %v4672_v14  ;;  %v4634_v44 = vpop.f32.mrf.mxu0 }
 0xeda   :  { %v13670_v53 = vmul.f32 0.35355338, %v4634_v44 }
 0xedb   :  { %v9728_v1 = vpop.f32.mrf.mxu0 }
 0xedc   :  { %v4675_v17 = vsel %vm1545_vm6, %v13670_v53, -inf }
 0xedd   :  { %4676 = vmax.xlane.f32.xlu1 %v4675_v17  ;;  %v4637_v2 = vpop.f32.mrf.mxu0 }
 0xede   :  { %v13674_v20 = vmul.f32 0.35355338, %v4637_v2 }
 0xedf   :  { %v9729_v19 = vpop.f32.mrf.mxu0 }
 0xee0   :  { %v4678_v63 = vsel %vm1545_vm6, %v13674_v20, -inf }
 0xee1   :  { %4679 = vmax.xlane.f32.xlu1 %v4678_v63  ;;  %v5004_v62 = vpop.f32.mrf.mxu0 }
 0xee2   :  { %v13678_v50 = vmul.f32 0.35355338, %v5004_v62 }
 0xee3   :  { %v9764_v37 = vpop.f32.mrf.mxu0 }
 0xee4   :  { %v5053_v40 = vsel %vm1545_vm6, %v13678_v50, -inf }
 0xee5   :  { %5054 = vmax.xlane.f32.xlu0 %v5053_v40  ;;  %v5007_v57 = vpop.f32.mrf.mxu0 }
 0xee6   :  { %v13682_v8 = vmul.f32 0.35355338, %v5007_v57 }
 0xee7   :  { %v9765_v59 = vpop.f32.mrf.mxu0 }
 0xee8   :  { %v5056_v5 = vsel %vm1545_vm6, %v13682_v8, -inf }
 0xee9   :  { %5057 = vmax.xlane.f32.xlu1 %v5056_v5  ;;  %v5012_v21 = vpop.f32.mrf.mxu0 }
 0xeea   :  { %v13686_v55 = vmul.f32 0.35355338, %v5012_v21 }
 0xeeb   :  { %v9768_v25 = vpop.f32.mrf.mxu0 }
 0xeec   :  { %v5059_v30 = vsel %vm1545_vm6, %v13686_v55, -inf }
 0xeed   :  { %5060 = vmax.xlane.f32.xlu0 %v5059_v30  ;;  %v5015_v22 = vpop.f32.mrf.mxu0 }
 0xeee   :  { %v13690_v24 = vmul.f32 0.35355338, %v5015_v22 }
 0xeef   :  { %v9769_v9 = vpop.f32.mrf.mxu0 }
 0xef0   :  { %v5062_v35 = vsel %vm1545_vm6, %v13690_v24, -inf }
 0xef1   :  { %5063 = vmax.xlane.f32.xlu1 %v5062_v35  ;;  %v5020_v12 = vpop.f32.mrf.mxu0 }
 0xef2   :  { %v13694_v6 = vmul.f32 0.35355338, %v5020_v12 }
 0xef3   :  { %v9772_v23 = vpop.f32.mrf.mxu0 }
 0xef4   :  { %v5065_v33 = vsel %vm1545_vm6, %v13694_v6, -inf }
 0xef5   :  { %5066 = vmax.xlane.f32.xlu0 %v5065_v33  ;;  %v5023_v32 = vpop.f32.mrf.mxu0 }
 0xef6   :  { %v13698_v14 = vmul.f32 0.35355338, %v5023_v32 }
 0xef7   :  { %v9773_v44 = vpop.f32.mrf.mxu0 }
 0xef8   :  { %v5068_v1 = vsel %vm1545_vm6, %v13698_v14, -inf }
 0xef9   :  { %5069 = vmax.xlane.f32.xlu1 %v5068_v1  ;;  %v5028_v17 = vpop.f32.mrf.mxu0 }
 0xefa   :  { %v13702_v2 = vmul.f32 0.35355338, %v5028_v17 }
 0xefb   :  { %v9776_v19 = vpop.f32.mrf.mxu0 }
 0xefc   :  { %v5071_v63 = vsel %vm1545_vm6, %v13702_v2, -inf }
 0xefd   :  { %5072 = vmax.xlane.f32.xlu0 %v5071_v63  ;;  %v5031_v62 = vpop.f32.mrf.mxu0 }
 0xefe   :  { %v13706_v37 = vmul.f32 0.35355338, %v5031_v62 }
 0xeff   :  { %v9777_v40 = vpop.f32.mrf.mxu0 }
 0xf00   :  { %v5074_v57 = vsel %vm1545_vm6, %v13706_v37, -inf }
 0xf01   :  { %5075 = vmax.xlane.f32.xlu1 %v5074_v57  ;;  %v5036_v59 = vpop.f32.mrf.mxu0 }
 0xf02   :  { %v13710_v5 = vmul.f32 0.35355338, %v5036_v59 }
 0xf03   :  { %v9780_v21 = vpop.f32.mrf.mxu0 }
 0xf04   :  { %v5077_v25 = vsel %vm1545_vm6, %v13710_v5, -inf }
 0xf05   :  { %5078 = vmax.xlane.f32.xlu0 %v5077_v25  ;;  %v5039_v30 = vpop.f32.mrf.mxu0 }
 0xf06   :  { %v13714_v22 = vmul.f32 0.35355338, %v5039_v30 }
 0xf07   :  { %v9781_v9 = vpop.f32.mrf.mxu0 }
 0xf08   :  { %v5080_v35 = vsel %vm1545_vm6, %v13714_v22, -inf }
 0xf09   :  { %5081 = vmax.xlane.f32.xlu1 %v5080_v35  ;;  %v5401_v12 = vpop.f32.mrf.mxu0 }
 0xf0a   :  { %v13718_v23 = vmul.f32 0.35355338, %v5401_v12 }
 0xf0b   :  { %v9816_v33 = vpop.f32.mrf.mxu0 }
 0xf0c   :  { %v5450_v32 = vsel %vm1545_vm6, %v13718_v23, -inf }
 0xf0d   :  { %5451 = vmax.xlane.f32.xlu0 %v5450_v32  ;;  %v5404_v44 = vpop.f32.mrf.mxu0 }
 0xf0e   :  { %v13722_v1 = vmul.f32 0.35355338, %v5404_v44 }
 0xf0f   :  { %v9817_v17 = vpop.f32.mrf.mxu0 }
 0xf10   :  { %v5453_v19 = vsel %vm1545_vm6, %v13722_v1, -inf }
 0xf11   :  { %5454 = vmax.xlane.f32.xlu1 %v5453_v19  ;;  %v5409_v63 = vpop.f32.mrf.mxu0 }
 0xf12   :  { %v13726_v62 = vmul.f32 0.35355338, %v5409_v63 }
 0xf13   :  { %v9820_v40 = vpop.f32.mrf.mxu0 }
 0xf14   :  { %v5456_v57 = vsel %vm1545_vm6, %v13726_v62, -inf }
 0xf15   :  { %5457 = vmax.xlane.f32.xlu0 %v5456_v57  ;;  %v5412_v59 = vpop.f32.mrf.mxu0 }
 0xf16   :  { %v13730_v21 = vmul.f32 0.35355338, %v5412_v59 }
 0xf17   :  { %v9821_v25 = vpop.f32.mrf.mxu0 }
 0xf18   :  { %v5459_v30 = vsel %vm1545_vm6, %v13730_v21, -inf }
 0xf19   :  { %5460 = vmax.xlane.f32.xlu1 %v5459_v30  ;;  %v5417_v9 = vpop.f32.mrf.mxu0 }
 0xf1a   :  { %v13734_v35 = vmul.f32 0.35355338, %v5417_v9 }
 0xf1b   :  { %v9824_v12 = vpop.f32.mrf.mxu0 }
 0xf1c   :  { %v5462_v33 = vsel %vm1545_vm6, %v13734_v35, -inf }
 0xf1d   :  { %5463 = vmax.xlane.f32.xlu0 %v5462_v33  ;;  %v5420_v32 = vpop.f32.mrf.mxu0 }
 0xf1e   :  { %v13738_v44 = vmul.f32 0.35355338, %v5420_v32  ;;  %v13750_v32 = vpop.permute.xlu1 %5181 }
 0xf1f   :  { %v9825_v17 = vpop.f32.mrf.mxu0 }
 0xf20   :  { %v5465_v19 = vsel %vm1545_vm6, %v13738_v44, -inf }
 0xf21   :  { %5466 = vmax.xlane.f32.xlu1 %v5465_v19  ;;  %v5425_v63 = vpop.f32.mrf.mxu0 }
 0xf22   :  { %v13742_v40 = vmul.f32 0.35355338, %v5425_v63  ;;  %v13760_v18 = vpop.permute.xlu1 %5175 }
 0xf23   :  { %v9828_v57 = vpop.f32.mrf.mxu0 }
 0xf24   :  { %v5468_v59 = vsel %vm1545_vm6, %v13742_v40, -inf }
 0xf25   :  { %5469 = vmax.xlane.f32.xlu1 %v5468_v59  ;;  %v5428_v25 = vpop.f32.mrf.mxu0  ;;  %v13756_v59 = vpop.permute.xlu0 %5179 }
 0xf26   :  { %v13746_v30 = vmul.f32 0.35355338, %v5428_v25 }
 0xf27   :  { %v9829_v9 = vpop.f32.mrf.mxu0 }
 0xf28   :  { %v5471_v12 = vsel %vm1545_vm6, %v13746_v30, -inf }
 0xf29   :  { %5472 = vmax.xlane.f32.xlu0 %v5471_v12  ;;  %v5433_v33 = vpop.f32.mrf.mxu0  ;;  %v13766_v52 = vpop.permute.xlu0 %5177 }
 0xf2a   :  { %v13752_v17 = vmul.f32 0.35355338, %v5433_v33 }
 0xf2b   :  { %v9832_v19 = vpop.f32.mrf.mxu0 }
 0xf2c   :  { %v5474_v63 = vsel %vm1545_vm6, %v13752_v17, -inf }
 0xf2d   :  { %5475 = vmax.xlane.f32.xlu1 %v5474_v63  ;;  %v5436_v57 = vpop.f32.mrf.mxu0 }
 0xf2e   :  { %v13758_v25 = vmul.f32 0.35355338, %v5436_v57  ;;  %v13770_v57 = vpop.permute.xlu1 %5573 }
 0xf2f   :  { %v9833_v9 = vpop.f32.mrf.mxu0  ;;  %16393 = vst [vmem:[#allocation29_spill] sm:$0xff] %v13770_v57 }
 0xf30   :  { %v5477_v12 = vsel %vm1545_vm6, %v13758_v25, -inf }
 0xf31   :  { %5478 = vmax.xlane.f32.xlu0 %v5477_v12  ;;  %v5793_v16 = vpop.f32.mrf.mxu0 }
 0xf32   :  { %v13764_v33 = vmul.f32 0.35355338, %v5793_v16  ;;  %v13776_v16 = vpop.permute.xlu0 %5173  ;;  %v13780_v51 = vpop.permute.xlu1 %5571 }
 0xf33   :  { %v9868_v19 = vpop.f32.mrf.mxu0  ;;  %16394 = vst [vmem:[#allocation24_spill] sm:$0xff] %v13776_v16  ;;  %16395 = vst [vmem:[#allocation20_spill] sm:$0xff] %v13780_v51 }
 0xf34   :  { %v5842_v63 = vsel %vm1545_vm6, %v13764_v33, -inf }
 0xf35   :  { %5843 = vmax.xlane.f32.xlu1 %v5842_v63  ;;  %v5796_v48 = vpop.f32.mrf.mxu0 }
 0xf36   :  { %v13772_v9 = vmul.f32 0.35355338, %v5796_v48  ;;  %v13786_v3 = vpop.permute.xlu0 %5569 }
 0xf37   :  { %v9869_v27 = vpop.f32.mrf.mxu0  ;;  %16396 = vst [vmem:[#allocation22_spill] sm:$0xff] %v13786_v3 }
 0xf38   :  { %v5845_v10 = vsel %vm1545_vm6, %v13772_v9, -inf }
 0xf39   :  { %5846 = vmax.xlane.f32.xlu1 %v5845_v10  ;;  %v5801_v12 = vpop.f32.mrf.mxu0 }
 0xf3a   :  { %v13778_v19 = vmul.f32 0.35355338, %v5801_v12  ;;  %v13790_v12 = vpop.permute.xlu1 %5565 }
 0xf3b   :  { %v9872_v38 = vpop.f32.mrf.mxu0  ;;  %16397 = vst [vmem:[#allocation25_spill] sm:$0xff] %v13790_v12 }
 0xf3c   :  { %v5848_v63 = vsel %vm1545_vm6, %v13778_v19, -inf }
 0xf3d   :  { %5849 = vmax.xlane.f32.xlu1 %v5848_v63  ;;  %v5804_v45 = vpop.f32.mrf.mxu0 }
 0xf3e   :  { %v13784_v48 = vmul.f32 0.35355338, %v5804_v45  ;;  %v13796_v45 = vpop.permute.xlu0 %5567 }
 0xf3f   :  { %v9873_v27 = vpop.f32.mrf.mxu0  ;;  %16398 = vst [vmem:[#allocation23_spill] sm:$0xff] %v13796_v45 }
 0xf40   :  { %v5851_v10 = vsel %vm1545_vm6, %v13784_v48, -inf }
 0xf41   :  { %5852 = vmax.xlane.f32.xlu0 %v5851_v10  ;;  %v5809_v26 = vpop.f32.mrf.mxu0 }
 0xf42   :  { %v13792_v38 = vmul.f32 0.35355338, %v5809_v26 }
 0xf43   :  { %v9876_v0 = vpop.f32.mrf.mxu0 }
 0xf44   :  { %v5854_v43 = vsel %vm1545_vm6, %v13792_v38, -inf }
 0xf45   :  { %5855 = vmax.xlane.f32.xlu1 %v5854_v43  ;;  %v5812_v63 = vpop.f32.mrf.mxu0 }
 0xf46   :  { %v13798_v27 = vmul.f32 0.35355338, %v5812_v63  ;;  %v4653_v34 = vpop.xlane.xlu1 %4652 }
 0xf47   :  { %v4681_v36 = vsub.f32 %v13638_v13, %v4653_v34  ;;  %v9877_v54 = vpop.f32.mrf.mxu0 }
 0xf48   :  { %v5857_v10 = vsel %vm1545_vm6, %v13798_v27, -inf }
 0xf49   :  { %v4691_v31 = vmul.f32 1.442695, %v4681_v36  ;;  %5858 = vmax.xlane.f32.xlu1 %v5857_v10  ;;  %v5817_v26 = vpop.f32.mrf.mxu0 }
 0xf4a   :  { %v13803_v0 = vmul.f32 0.35355338, %v5817_v26  ;;  %v4656_v61 = vpop.xlane.xlu0 %4655 }
 0xf4b   :  { %v4682_v43 = vsub.f32 %v13642_v56, %v4656_v61  ;;  %v9880_v49 = vpop.f32.mrf.mxu0  ;;  %10842 = vpow2.f32 %v4691_v31 }
 0xf4c   :  { %v5860_v63 = vsel %vm1545_vm6, %v13803_v0, -inf }
 0xf4d   :  { %v4693_v41 = vmul.f32 1.442695, %v4682_v43  ;;  %5861 = vmax.xlane.f32.xlu1 %v5860_v63  ;;  %v5820_v34 = vpop.f32.mrf.mxu0 }
 0xf4e   :  { %v13808_v54 = vmul.f32 0.35355338, %v5820_v34  ;;  %v4659_v13 = vpop.xlane.xlu1 %4658 }
 0xf4f   :  { %10844 = vpow2.f32 %v4693_v41  ;;  %v4683_v36 = vsub.f32 %v13646_v47, %v4659_v13  ;;  %v9881_v10 = vpop.f32.mrf.mxu0 }
 0xf50   :  { %v5863_v26 = vsel %vm1545_vm6, %v13808_v54, -inf }
 0xf51   :  { %v4695_v12 = vmul.f32 1.442695, %v4683_v36  ;;  %5864 = vmax.xlane.f32.xlu0 %v5863_v26  ;;  %v5825_v61 = vpop.f32.mrf.mxu0 }
 0xf52   :  { %v13813_v49 = vmul.f32 0.35355338, %v5825_v61  ;;  %v4662_v31 = vpop.xlane.xlu1 %4661 }
 0xf53   :  { %10846 = vpow2.f32 %v4695_v12  ;;  %v4684_v56 = vsub.f32 %v13650_v29, %v4662_v31  ;;  %v9884_v43 = vpop.f32.mrf.mxu0 }
 0xf54   :  { %v5866_v63 = vsel %vm1545_vm6, %v13813_v49, -inf }
 0xf55   :  { %v4697_v41 = vmul.f32 1.442695, %v4684_v56  ;;  %5867 = vmax.xlane.f32.xlu1 %v5866_v63  ;;  %v5828_v47 = vpop.f32.mrf.mxu0 }
 0xf56   :  { %v13818_v34 = vmul.f32 0.35355338, %v5828_v47  ;;  %v4665_v13 = vpop.xlane.xlu1 %4664 }
 0xf57   :  { %10848 = vpow2.f32 %v4697_v41  ;;  %v4685_v36 = vsub.f32 %v13654_v39, %v4665_v13  ;;  %v9885_v10 = vpop.f32.mrf.mxu0 }
 0xf58   :  { %v5869_v26 = vsel %vm1545_vm6, %v13818_v34, -inf  ;;  %v13823_v12 = vpop.eup %10842 }
 0xf59   :  { %v4699_v29 = vmul.f32 1.442695, %v4685_v36  ;;  %5870 = vmax.xlane.f32.xlu0 %v5869_v26  ;;  %v4711_v31 = vsel %vm1545_vm6, %v13823_v12, 0.0 }
 0xf5a   :  { %v4668_v36 = vpop.xlane.xlu1 %4667 }
 0xf5b   :  { %10850 = vpow2.f32 %v4699_v29 }
 0xf5c   :  { %v13825_v61 = vpop.eup %10844 }
 0xf5d   :  { %4712 = vadd.xlane.f32.xlu0 %v4711_v31  ;;  %v4714_v56 = vsel %vm1545_vm6, %v13825_v61, 0.0 }
 0xf5e   :  { %4715 = vadd.xlane.f32.xlu1 %v4714_v56  ;;  %v4671_v10 = vpop.xlane.xlu1 %4670  ;;  %v4686_v56 = vsub.f32 %v13658_v7, %v4668_v36 }
 0xf60   :  { %v13831_v39 = vpop.eup %10846  ;;  %v4701_v3 = vmul.f32 1.442695, %v4686_v56 }
 0xf61   :  { %v4717_v43 = vsel %vm1545_vm6, %v13831_v39, 0.0 }
 0xf62   :  { %4718 = vadd.xlane.f32.xlu0 %v4717_v43  ;;  %v4674_v29 = vpop.xlane.xlu1 %4673  ;;  %10852 = vpow2.f32 %v4701_v3 }
 0xf64   :  { %v13835_v63 = vpop.eup %10848 }
 0xf65   :  { %v4720_v41 = vsel %vm1545_vm6, %v13835_v63, 0.0 }
 0xf66   :  { %4721 = vadd.xlane.f32.xlu1 %v4720_v41  ;;  %v4687_v41 = vsub.f32 %v13662_v60, %v4671_v10  ;;  %v4677_v45 = vpop.xlane.xlu1 %4676 }
 0xf68   :  { %v13839_v47 = vpop.eup %10850  ;;  %v4703_v57 = vmul.f32 1.442695, %v4687_v41 }
 0xf69   :  { %16399 = vst [vmem:[#allocation32_spill] sm:$0xff] %v13839_v47  ;;  %v4723_v13 = vsel %vm1545_vm6, %v13839_v47, 0.0 }
 0xf6a   :  { %4724 = vadd.xlane.f32.xlu0 %v4723_v13  ;;  %v4688_v13 = vsub.f32 %v13666_v4, %v4674_v29  ;;  %v4680_v16 = vpop.xlane.xlu1 %4679  ;;  %10854 = vpow2.f32 %v4703_v57 }
 0xf6b   :  { %v4690_v7 = vsub.f32 %v13674_v20, %v4680_v16 }
 0xf6c   :  { %v4705_v47 = vmul.f32 1.442695, %v4688_v13 }
 0xf6d   :  { %v4709_v60 = vmul.f32 1.442695, %v4690_v7 }
 0xf6e   :  { %v5055_v26 = vpop.xlane.xlu0 %5054  ;;  %10856 = vpow2.f32 %v4705_v47 }
 0xf6f   :  { %v5083_v10 = vsub.f32 %v13678_v50, %v5055_v26 }
 0xf71   :  { %v5093_v29 = vmul.f32 1.442695, %v5083_v10 }
 0xf72   :  { %v5058_v4 = vpop.xlane.xlu1 %5057 }
 0xf73   :  { %v5084_v3 = vsub.f32 %v13682_v8, %v5058_v4 }
 0xf75   :  { %v5095_v57 = vmul.f32 1.442695, %v5084_v3 }
 0xf76   :  { %v5061_v31 = vpop.xlane.xlu0 %5060 }
 0xf77   :  { %5963 = vrot.lane.b32.xlu1 %v13493_v15, %s11151_s17  ;;  %v4689_v15 = vsub.f32 %v13670_v53, %v4677_v45  ;;  %v13855_v53 = vpop.eup %10852  ;;  %v5085_v20 = vsub.f32 %v13686_v55, %v5061_v31 }
 0xf79   :  { %v5097_v47 = vmul.f32 1.442695, %v5085_v20 }
 0xf7e   :  { %v5067_v43 = vpop.xlane.xlu0 %5066 }
 0xf80   :  { %5965 = vrot.lane.b32.xlu0 %v13490_v58, %s11151_s17  ;;  %v4707_v58 = vmul.f32 1.442695, %v4689_v15  ;;  %v5087_v15 = vsub.f32 %v13694_v6, %v5067_v43 }
 0xf82   :  { %10858 = vpow2.f32 %v4707_v58 }
 0xf86   :  { %v5073_v51 = vpop.xlane.xlu0 %5072 }
 0xf87   :  { %v5089_v46 = vsub.f32 %v13702_v2, %v5073_v51  ;;  %v5064_v51 = vpop.xlane.xlu1 %5063  ;;  %v13857_v2 = vpop.eup %10854 }
 0xf88   :  { %v13862_v16 = vpop.eup %10856  ;;  %v4729_v45 = vsel %vm1545_vm6, %v13857_v2, 0.0  ;;  %v5086_v26 = vsub.f32 %v13690_v24, %v5064_v51 }
 0xf89   :  { %v5105_v36 = vmul.f32 1.442695, %v5089_v46  ;;  %v4726_v46 = vsel %vm1545_vm6, %v13855_v53, 0.0  ;;  %v4732_v56 = vsel %vm1545_vm6, %v13862_v16, 0.0 }
 0xf8a   :  { %v5099_v13 = vmul.f32 1.442695, %v5086_v26 }
 0xf8b   :  { %10860 = vpow2.f32 %v5105_v36  ;;  %v5070_v50 = vpop.xlane.xlu1 %5069  ;;  %v5101_v36 = vmul.f32 1.442695, %v5087_v15 }
 0xf8c   :  { %10862 = vpow2.f32 %v4709_v60  ;;  %v5088_v60 = vsub.f32 %v13698_v14, %v5070_v50 }
 0xf8d   :  { %10864 = vpow2.f32 %v5093_v29 }
 0xf8e   :  { %10866 = vpow2.f32 %v5095_v57  ;;  %v5103_v6 = vmul.f32 1.442695, %v5088_v60  ;;  %v5079_v57 = vpop.xlane.xlu0 %5078 }
 0xf8f   :  { %v13866_v8 = vpop.eup %10858  ;;  %v5076_v31 = vpop.xlane.xlu1 %5075  ;;  %10868 = vpow2.f32 %v5097_v47 }
 0xf90   :  { %v4735_v41 = vsel %vm1545_vm6, %v13866_v8, 0.0  ;;  %10870 = vpow2.f32 %v5099_v13  ;;  %v5090_v43 = vsub.f32 %v13706_v37, %v5076_v31 }
 0xf91   :  { %10872 = vpow2.f32 %v5101_v36 }
 0xf92   :  { %10874 = vpow2.f32 %v5103_v6  ;;  %v5107_v14 = vmul.f32 1.442695, %v5090_v43 }
 0xf93   :  { %v5082_v24 = vpop.xlane.xlu1 %5081 }
 0xf94   :  { %10876 = vpow2.f32 %v5107_v14  ;;  %v5092_v26 = vsub.f32 %v13714_v22, %v5082_v24 }
 0xf98   :  { %v13871_v55 = vpop.eup %10860 }
 0xf99   :  { %v5131_v58 = vsel %vm1545_vm6, %v13871_v55, 0.0  ;;  %v13878_v7 = vpop.eup %10862 }
 0xf9a   :  { %v4738_v10 = vsel %vm1545_vm6, %v13878_v7, 0.0  ;;  %v13883_v4 = vpop.eup %10864  ;;  %v5455_v29 = vpop.xlane.xlu1 %5454 }
 0xf9b   :  { %4727 = vadd.xlane.f32.xlu1 %v4726_v46  ;;  %v5113_v3 = vsel %vm1545_vm6, %v13883_v4, 0.0  ;;  %v13888_v51 = vpop.eup %10866  ;;  %v5091_v46 = vsub.f32 %v13710_v5, %v5079_v57  ;;  %v5111_v5 = vmul.f32 1.442695, %v5092_v26  ;;  %v5481_v24 = vsub.f32 %v13722_v1, %v5455_v29 }
 0xf9c   :  { %v5116_v50 = vsel %vm1545_vm6, %v13888_v51, 0.0 }
 0xf9d   :  { %v5109_v37 = vmul.f32 1.442695, %v5091_v46  ;;  %v5492_v43 = vmul.f32 1.442695, %v5481_v24 }
 0xf9f   :  { %4733 = vadd.xlane.f32.xlu1 %v4732_v56  ;;  %4730 = vadd.xlane.f32.xlu0 %v4729_v45  ;;  %v13893_v45 = vpop.eup %10868  ;;  %10878 = vpow2.f32 %v5109_v37 }
 0xfa0   :  { %v5119_v56 = vsel %vm1545_vm6, %v13893_v45, 0.0  ;;  %v13898_v31 = vpop.eup %10870  ;;  %10880 = vpow2.f32 %v5111_v5 }
 0xfa1   :  { %v13903_v36 = vpop.eup %10872 }
 0xfa2   :  { %v5461_v20 = vpop.xlane.xlu1 %5460  ;;  %v13910_v6 = vpop.eup %10874 }
 0xfa3   :  { %4736 = vadd.xlane.f32.xlu1 %v4735_v41  ;;  %5132 = vadd.xlane.f32.xlu0 %v5131_v58  ;;  %v5452_v41 = vpop.xlane.xlu0 %5451  ;;  %v5122_v58 = vsel %vm1545_vm6, %v13898_v31, 0.0  ;;  %v13915_v14 = vpop.eup %10876  ;;  %v5483_v1 = vsub.f32 %v13730_v21, %v5461_v20 }
 0xfa4   :  { %v5480_v13 = vsub.f32 %v13718_v23, %v5452_v41  ;;  %v5134_v37 = vsel %vm1545_vm6, %v13915_v14, 0.0 }
 0xfa6   :  { %v5490_v22 = vmul.f32 1.442695, %v5480_v13 }
 0xfa7   :  { %4739 = vadd.xlane.f32.xlu1 %v4738_v10  ;;  %v5125_v10 = vsel %vm1545_vm6, %v13903_v36, 0.0  ;;  %v5458_v23 = vpop.xlane.xlu0 %5457 }
 0xfa8   :  { %10882 = vpow2.f32 %v5490_v22 }
 0xfa9   :  { %10884 = vpow2.f32 %v5492_v43 }
 0xfaa   :  { %v5467_v47 = vpop.xlane.xlu1 %5466 }
 0xfab   :  { %5114 = vadd.xlane.f32.xlu1 %v5113_v3  ;;  %v5482_v3 = vsub.f32 %v13726_v62, %v5458_v23  ;;  %v5464_v29 = vpop.xlane.xlu0 %5463  ;;  %v5496_v62 = vmul.f32 1.442695, %v5483_v1 }
 0xfac   :  { %v13921_v26 = vpop.eup %10878 }
 0xfad   :  { %v5494_v46 = vmul.f32 1.442695, %v5482_v3  ;;  %v5137_v20 = vsel %vm1545_vm6, %v13921_v26, 0.0 }
 0xfae   :  { %v5470_v15 = vpop.xlane.xlu1 %5469 }
 0xfaf   :  { %5117 = vadd.xlane.f32.xlu1 %v5116_v50  ;;  %v5484_v50 = vsub.f32 %v13734_v35, %v5464_v29  ;;  %10886 = vpow2.f32 %v5494_v46  ;;  %v5486_v21 = vsub.f32 %v13742_v40, %v5470_v15 }
 0xfb0   :  { %10888 = vpow2.f32 %v5496_v62 }
 0xfb1   :  { %v5498_v13 = vmul.f32 1.442695, %v5484_v50 }
 0xfb2   :  { %v5473_v41 = vpop.xlane.xlu0 %5472 }
 0xfb3   :  { %5120 = vadd.xlane.f32.xlu1 %v5119_v56  ;;  %v5485_v56 = vsub.f32 %v13738_v44, %v5467_v47  ;;  %v5487_v22 = vsub.f32 %v13746_v30, %v5473_v41  ;;  %10890 = vpow2.f32 %v5498_v13  ;;  %v5502_v44 = vmul.f32 1.442695, %v5486_v21 }
 0xfb5   :  { %v5500_v35 = vmul.f32 1.442695, %v5485_v56  ;;  %v5504_v15 = vmul.f32 1.442695, %v5487_v22 }
 0xfb6   :  { %v5476_v60 = vpop.xlane.xlu1 %5475 }
 0xfb7   :  { %5123 = vadd.xlane.f32.xlu1 %v5122_v58  ;;  %v13927_v58 = vpop.eup %10880  ;;  %v5488_v47 = vsub.f32 %v13752_v17, %v5476_v60  ;;  %10892 = vpow2.f32 %v5500_v35 }
 0xfb8   :  { %v5140_v23 = vsel %vm1545_vm6, %v13927_v58, 0.0  ;;  %v13933_v40 = vpop.eup %10882  ;;  %10894 = vpow2.f32 %v5502_v44 }
 0xfb9   :  { %5961 = vrot.lane.b32.xlu0 %v13480_v11, %s11151_s17  ;;  %v5128_v11 = vsel %vm1545_vm6, %v13910_v6, 0.0  ;;  %v5506_v3 = vmul.f32 1.442695, %v5488_v47  ;;  %v13938_v1 = vpop.eup %10884  ;;  %10896 = vpow2.f32 %v5504_v15 }
 0xfba   :  { %v5479_v24 = vpop.xlane.xlu0 %5478 }
 0xfbb   :  { %5126 = vadd.xlane.f32.xlu1 %v5125_v10  ;;  %v5489_v43 = vsub.f32 %v13758_v25, %v5479_v24  ;;  %10898 = vpow2.f32 %v5506_v3  ;;  %v5513_v25 = vsel %vm1545_vm6, %v13938_v1, 0.0 }
 0xfbc   :  { %v13944_v50 = vpop.eup %10886 }
 0xfbd   :  { %v5508_v17 = vmul.f32 1.442695, %v5489_v43  ;;  %v13947_v56 = vpop.eup %10888 }
 0xfbe   :  { %v5844_v57 = vpop.xlane.xlu1 %5843  ;;  %v5519_v13 = vsel %vm1545_vm6, %v13947_v56, 0.0 }
 0xfbf   :  { %5129 = vadd.xlane.f32.xlu1 %v5128_v11  ;;  %v5510_v11 = vsel %vm1545_vm6, %v13933_v40, 0.0  ;;  %v5872_v60 = vsub.f32 %v13764_v33, %v5844_v57  ;;  %10900 = vpow2.f32 %v5508_v17  ;;  %v5516_v33 = vsel %vm1545_vm6, %v13944_v50, 0.0 }
 0xfc2   :  { %v5847_v5 = vpop.xlane.xlu1 %5846 }
 0xfc3   :  { %5135 = vadd.xlane.f32.xlu1 %v5134_v37  ;;  %v5882_v37 = vmul.f32 1.442695, %v5872_v60  ;;  %v5873_v62 = vsub.f32 %v13772_v9, %v5847_v5 }
 0xfc5   :  { %v5884_v57 = vmul.f32 1.442695, %v5873_v62 }
 0xfc6   :  { %v5850_v10 = vpop.xlane.xlu1 %5849 }
 0xfc7   :  { %5138 = vadd.xlane.f32.xlu1 %v5137_v20  ;;  %v5874_v41 = vsub.f32 %v13778_v19, %v5850_v10 }
 0xfc9   :  { %v5886_v22 = vmul.f32 1.442695, %v5874_v41 }
 0xfca   :  { %v5853_v9 = vpop.xlane.xlu0 %5852 }
 0xfcb   :  { %5141 = vadd.xlane.f32.xlu1 %v5140_v23  ;;  %v5875_v24 = vsub.f32 %v13784_v48, %v5853_v9 }
 0xfcd   :  { %v5888_v15 = vmul.f32 1.442695, %v5875_v24 }
 0xfce   :  { %v5856_v30 = vpop.xlane.xlu1 %5855 }
 0xfcf   :  { %v5876_v29 = vsub.f32 %v13792_v38, %v5856_v30  ;;  %5511 = vadd.xlane.f32.xlu1 %v5510_v11  ;;  %v13951_v38 = vpop.eup %10890 }
 0xfd0   :  { %v13956_v21 = vpop.eup %10892  ;;  %v5522_v20 = vsel %vm1545_vm6, %v13951_v38, 0.0 }
 0xfd1   :  { %v5890_v46 = vmul.f32 1.442695, %v5876_v29  ;;  %v13960_v35 = vpop.eup %10894  ;;  %v5525_v19 = vsel %vm1545_vm6, %v13956_v21, 0.0 }
 0xfd2   :  { %v5859_v5 = vpop.xlane.xlu1 %5858  ;;  %v13965_v44 = vpop.eup %10896  ;;  %v5528_v10 = vsel %vm1545_vm6, %v13960_v35, 0.0 }
 0xfd3   :  { %5514 = vadd.xlane.f32.xlu1 %v5513_v25  ;;  %10902 = vpow2.f32 %v5890_v46  ;;  %v13969_v23 = vpop.eup %10898  ;;  %v5877_v43 = vsub.f32 %v13798_v27, %v5859_v5  ;;  %v5531_v48 = vsel %vm1545_vm6, %v13965_v44, 0.0 }
 0xfd4   :  { %10904 = vpow2.f32 %v5882_v37  ;;  %v13976_v30 = vpop.eup %10900  ;;  %v5534_v17 = vsel %vm1545_vm6, %v13969_v23, 0.0 }
 0xfd5   :  { %10906 = vpow2.f32 %v5884_v57  ;;  %v5892_v29 = vmul.f32 1.442695, %v5877_v43  ;;  %v5537_v25 = vsel %vm1545_vm6, %v13976_v30, 0.0 }
 0xfd6   :  { %10908 = vpow2.f32 %v5886_v22  ;;  %v13972_v3 = vpop.xlane.xlu1 %5861 }
 0xfd7   :  { %5517 = vadd.xlane.f32.xlu1 %v5516_v33  ;;  %10910 = vpow2.f32 %v5888_v15 }
 0xfd8   :  { %5520 = vadd.xlane.f32.xlu0 %v5519_v13  ;;  %10912 = vpow2.f32 %v5892_v29 }
 0xfda   :  { %v5865_v47 = vpop.xlane.xlu0 %5864 }
 0xfdb   :  { %5523 = vadd.xlane.f32.xlu1 %v5522_v20  ;;  %v5879_v27 = vsub.f32 %v13808_v54, %v5865_v47 }
 0xfdc   :  { %5526 = vadd.xlane.f32.xlu0 %v5525_v19 }
 0xfdd   :  { %v5896_v57 = vmul.f32 1.442695, %v5879_v27 }
 0xfde   :  { %v5868_v46 = vpop.xlane.xlu1 %5867 }
 0xfdf   :  { %5529 = vadd.xlane.f32.xlu1 %v5528_v10 }
 0xfe0   :  { %5532 = vadd.xlane.f32.xlu0 %v5531_v48  ;;  %v13982_v60 = vpop.eup %10902 }
 0xfe1   :  { %v13987_v37 = vpop.eup %10904  ;;  %v5914_v33 = vsel %vm1545_vm6, %v13982_v60, 0.0 }
 0xfe2   :  { %v13978_v11 = vpop.xlane.xlu0 %5870  ;;  %v5902_v13 = vsel %vm1545_vm6, %v13987_v37, 0.0  ;;  %v13993_v54 = vpop.eup %10906 }
 0xfe3   :  { %5535 = vadd.xlane.f32.xlu1 %v5534_v17  ;;  %v5905_v5 = vsel %vm1545_vm6, %v13993_v54, 0.0  ;;  %v13997_v20 = vpop.eup %10908 }
 0xfe4   :  { %5538 = vadd.xlane.f32.xlu0 %v5537_v25  ;;  %v5908_v24 = vsel %vm1545_vm6, %v13997_v20, 0.0  ;;  %v14001_v19 = vpop.eup %10910 }
 0xfe5   :  { %v5911_v47 = vsel %vm1545_vm6, %v14001_v19, 0.0  ;;  %v14005_v10 = vpop.eup %10912 }
 0xfe6   :  { %v4713_v62 = vpop.xlane.xlu0 %4712  ;;  %v5917_v29 = vsel %vm1545_vm6, %v14005_v10, 0.0 }
 0xfe7   :  { %5915 = vadd.xlane.f32.xlu1 %v5914_v33  ;;  %v4716_v41 = vpop.xlane.xlu1 %4715  ;;  %10914 = vrcp.f32 %v4713_v62 }
 0xfe8   :  { %5903 = vadd.xlane.f32.xlu0 %v5902_v13  ;;  %10916 = vrcp.f32 %v4716_v41  ;;  %v5878_v41 = vsub.f32 %v13803_v0, %v13972_v3  ;;  %v5881_v0 = vsub.f32 %v13818_v34, %v13978_v11  ;;  %v16401_v3 = vld [vmem:[#allocation21_spill] sm:$0xff] }
 0xfe9   :  { %10918 = vpow2.f32 %v5896_v57 }
 0xfeb   :  { %v4719_v9 = vpop.xlane.xlu0 %4718 }
 0xfec   :  { %5906 = vadd.xlane.f32.xlu0 %v5905_v5  ;;  %10920 = vrcp.f32 %v4719_v9 }
 0xfef   :  { %v4722_v22 = vpop.xlane.xlu1 %4721 }
 0xff0   :  { %10922 = vrcp.f32 %v4722_v22  ;;  %5909 = vadd.xlane.f32.xlu0 %v5908_v24 }
 0xff3   :  { %v4725_v13 = vpop.xlane.xlu0 %4724  ;;  %v14052_v9 = vpop.permute.xlu1 %5963 }
 0xff4   :  { %5912 = vadd.xlane.f32.xlu0 %v5911_v47  ;;  %v10915_v15 = vpop.eup %10914 }
 0xff5   :  { %v10917_v43 = vpop.eup %10916  ;;  %v4751_v48 = vmul.f32 %v10915_v15, %v13823_v12 }
 0xff6   :  { %v4752_v17 = vmul.f32 %v10917_v43, %v13825_v61  ;;  %v14011_v27 = vpop.eup %10918 }
 0xff7   :  { %v5923_v33 = vsel %vm1545_vm6, %v14011_v27, 0.0  ;;  %v14056_v22 = vpop.permute.xlu0 %5965 }
 0xff8   :  { %5959 = vrot.lane.b32.xlu1 %v13483_v42, %s11151_s17  ;;  %5918 = vadd.xlane.f32.xlu0 %v5917_v29  ;;  %v4761_v25 = vpack.c.bf16 %v4752_v17, %v4751_v48 }
 0xff9   :  { %v10921_v62 = vpop.eup %10920 }
 0xffa   :  { %9741 = vmatmul.mubr.msk.bf16.vlgmr.msra.gmra.mxu1 %vm1545_vm6, %v4761_v25  ;;  %v4753_v61 = vmul.f32 %v10921_v62, %v13831_v39  ;;  %v5880_v39 = vsub.f32 %v13813_v49, %v5868_v46  ;;  %v16402_v25 = vld [vmem:[#allocation32_spill] sm:$0xff] }
 0xffb   :  { %9783 = vmatpush3.bf16.msra.mxu1 %v13750_v32  ;;  %9744 = vmatprep.mubr.msk.bf16.mxu1 %vm11149_vm4, %v16335_v28  ;;  %v5894_v32 = vmul.f32 1.442695, %v5878_v41 }
 0xffc   :  { %5924 = vadd.xlane.f32.xlu0 %v5923_v33  ;;  %9784 = vmatprep.subr.bf16.mxu1 %v16335_v28 }
 0xffd   :  { %v10923_v12 = vpop.eup %10922  ;;  %10924 = vpow2.f32 %v5894_v32 }
 0xffe   :  { %v4754_v42 = vmul.f32 %v10923_v12, %v13835_v63  ;;  %v16400_v63 = vld [vmem:[#allocation24_spill] sm:$0xff] }
 0xfff   :  { %9785 = vmatpush3.bf16.msra.mxu1 %v13756_v59  ;;  %v5898_v59 = vmul.f32 1.442695, %v5880_v39 }
0x1000   :  { %v4762_v57 = vpack.c.bf16 %v4754_v42, %v4753_v61  ;;  %9786 = vmatprep.subr.bf16.mxu1 %v16335_v28 }
0x1001   :  { %10926 = vpow2.f32 %v5898_v59 }
0x1002   :  { %9745 = vmatmul.mubr.msk.bf16.gmra.mxu1 %vm1545_vm6, %v4762_v57 }
0x1003   :  { %9787 = vmatpush3.bf16.msra.mxu1 %v13766_v52  ;;  %9748 = vmatprep.mubr.msk.bf16.mxu1 %vm11149_vm4, %v16335_v28  ;;  %v5900_v52 = vmul.f32 1.442695, %v5881_v0 }
0x1004   :  { %9788 = vmatprep.subr.bf16.mxu1 %v16335_v28 }
0x1005   :  { %10928 = vpow2.f32 %v5900_v52 }
0x1006   :  { %10930 = vrcp.f32 %v4725_v13 }
0x1007   :  { %9789 = vmatpush3.bf16.msra.mxu1 %v13760_v18 }
0x1008   :  { %9790 = vmatprep.subr.bf16.mxu1 %v16335_v28 }
0x100a   :  { %v14042_v49 = vpop.eup %10924 }
0x100b   :  { %9791 = vmatpush3.bf16.msra.mxu1 %v16400_v63  ;;  %v5920_v18 = vsel %vm1545_vm6, %v14042_v49, 0.0 }
0x100c   :  { %9834 = vmatprep.subr.bf16.mxu1 %v16335_v28 }
0x100e   :  { %v14046_v46 = vpop.eup %10926 }
0x100f   :  { %v5926_v34 = vsel %vm1545_vm6, %v14046_v46, 0.0 }
0x1012   :  { %5957 = vrot.lane.b32.xlu0 %v16401_v3, %s11151_s17  ;;  %v14050_v11 = vpop.eup %10928 }
0x1013   :  { %v5929_v5 = vsel %vm1545_vm6, %v14050_v11, 0.0  ;;  %v10931_v48 = vpop.eup %10930 }
0x1014   :  { %v4755_v62 = vmul.f32 %v10931_v48, %v16402_v25  ;;  %v16404_v25 = vld [vmem:[#allocation20_spill] sm:$0xff] }
0x101c   :  { %5921 = vadd.xlane.f32.xlu1 %v5920_v18 }
0x1020   :  { %5927 = vadd.xlane.f32.xlu1 %v5926_v34 }
0x1024   :  { %v4728_v24 = vpop.xlane.xlu1 %4727  ;;  %5930 = vadd.xlane.f32.xlu1 %v5929_v5 }
0x1025   :  { %10932 = vrcp.f32 %v4728_v24 }
0x1028   :  { %v4734_v47 = vpop.xlane.xlu1 %4733  ;;  %v4731_v15 = vpop.xlane.xlu0 %4730 }
0x1029   :  { %10934 = vrcp.f32 %v4734_v47 }
0x102a   :  { %10936 = vrcp.f32 %v4731_v15 }
0x102c   :  { %v4737_v43 = vpop.xlane.xlu1 %4736  ;;  %v5133_v48 = vpop.xlane.xlu0 %5132 }
0x1030   :  { %v4740_v17 = vpop.xlane.xlu1 %4739 }
0x1031   :  { %10938 = vrcp.f32 %v4740_v17  ;;  %v16403_v17 = vld [vmem:[#allocation29_spill] sm:$0xff] }
0x1032   :  { %v10933_v29 = vpop.eup %10932  ;;  %10940 = vrcp.f32 %v4737_v43 }
0x1033   :  { %v4756_v33 = vmul.f32 %v10933_v29, %v13855_v53 }
0x1034   :  { %v5115_v12 = vpop.xlane.xlu1 %5114 }
0x1035   :  { %v4763_v61 = vpack.c.bf16 %v4756_v33, %v4755_v62 }
0x1036   :  { %v10935_v42 = vpop.eup %10934 }
0x1037   :  { %v10937_v57 = vpop.eup %10936  ;;  %9749 = vmatmul.mubr.msk.bf16.gmra.mxu1 %vm1545_vm6, %v4763_v61  ;;  %v4758_v39 = vmul.f32 %v10935_v42, %v13862_v16  ;;  %v16405_v42 = vld [vmem:[#allocation22_spill] sm:$0xff] }
0x1038   :  { %v5118_v41 = vpop.xlane.xlu1 %5117  ;;  %9752 = vmatprep.mubr.msk.bf16.mxu1 %vm11149_vm4, %v16335_v28  ;;  %v4757_v32 = vmul.f32 %v10937_v57, %v13857_v2 }
0x1039   :  { %10942 = vrcp.f32 %v5118_v41  ;;  %v16406_v41 = vld [vmem:[#allocation23_spill] sm:$0xff] }
0x103a   :  { %10944 = vrcp.f32 %v5115_v12  ;;  %v4764_v0 = vpack.c.bf16 %v4758_v39, %v4757_v32  ;;  %v5962_v32 = vpop.permute.xlu0 %5961 }
0x103c   :  { %v5121_v59 = vpop.xlane.xlu1 %5120 }
0x103e   :  { %v10939_v63 = vpop.eup %10938 }
0x103f   :  { %9753 = vmatmul.mubr.msk.bf16.gmra.mxu1 %vm1545_vm6, %v4764_v0  ;;  %v10941_v53 = vpop.eup %10940  ;;  %v4760_v3 = vmul.f32 %v10939_v63, %v13878_v7 }
0x1040   :  { %v5124_v52 = vpop.xlane.xlu1 %5123  ;;  %9756 = vmatprep.mubr.msk.bf16.mxu1 %vm11149_vm4, %v16335_v28  ;;  %v4759_v18 = vmul.f32 %v10941_v53, %v13866_v8  ;;  %v16407_v53 = vld [vmem:[#allocation25_spill] sm:$0xff] }
0x1041   :  { %10946 = vrcp.f32 %v5124_v52 }
0x1042   :  { %10948 = vrcp.f32 %v5121_v59  ;;  %v4765_v13 = vpack.c.bf16 %v4760_v3, %v4759_v18 }
0x1044   :  { %v5127_v2 = vpop.xlane.xlu1 %5126 }
0x1046   :  { %v10943_v16 = vpop.eup %10942 }
0x1047   :  { %9757 = vmatmul.mubr.msk.bf16.gmra.mxu1 %vm1545_vm6, %v4765_v13  ;;  %v10945_v34 = vpop.eup %10944  ;;  %v5154_v24 = vmul.f32 %v10943_v16, %v13888_v51 }
0x1048   :  { %v5130_v5 = vpop.xlane.xlu1 %5129  ;;  %9792 = vmatprep.mubr.msk.bf16.mxu1 %vm11149_vm4, %v16335_v28  ;;  %v5153_v47 = vmul.f32 %v10945_v34, %v13883_v4 }
0x1049   :  { %10950 = vrcp.f32 %v5130_v5 }
0x104a   :  { %10952 = vrcp.f32 %v5127_v2  ;;  %v5163_v15 = vpack.c.bf16 %v5154_v24, %v5153_v47 }
0x104c   :  { %v5136_v7 = vpop.xlane.xlu1 %5135 }
0x104d   :  { %10954 = vrcp.f32 %v5136_v7 }
0x104e   :  { %v10947_v43 = vpop.eup %10946  ;;  %10956 = vrcp.f32 %v5133_v48 }
0x104f   :  { %9793 = vmatmul.mubr.msk.bf16.vlgmr.msra.gmra.mxu1 %vm1545_vm6, %v5163_v15  ;;  %v10949_v8 = vpop.eup %10948  ;;  %v5156_v51 = vmul.f32 %v10947_v43, %v13898_v31 }
0x1050   :  { %9835 = vmatpush3.bf16.msra.mxu1 %v16403_v17  ;;  %v5139_v29 = vpop.xlane.xlu1 %5138  ;;  %9796 = vmatprep.mubr.msk.bf16.mxu1 %vm11149_vm4, %v16335_v28  ;;  %v5155_v4 = vmul.f32 %v10949_v8, %v13893_v45 }
0x1051   :  { %9836 = vmatprep.subr.bf16.mxu1 %v16335_v28 }
0x1052   :  { %v5164_v33 = vpack.c.bf16 %v5156_v51, %v5155_v4 }
0x1054   :  { %9837 = vmatpush3.bf16.msra.mxu1 %v16404_v25  ;;  %v5142_v62 = vpop.xlane.xlu1 %5141 }
0x1055   :  { %9838 = vmatprep.subr.bf16.mxu1 %v16335_v28  ;;  %10958 = vrcp.f32 %v5142_v62 }
0x1056   :  { %v10951_v12 = vpop.eup %10950  ;;  %10960 = vrcp.f32 %v5139_v29 }
0x1057   :  { %9797 = vmatmul.mubr.msk.bf16.gmra.mxu1 %vm1545_vm6, %v5164_v33  ;;  %v10953_v61 = vpop.eup %10952  ;;  %v5158_v45 = vmul.f32 %v10951_v12, %v13910_v6 }
0x1058   :  { %9839 = vmatpush3.bf16.msra.mxu1 %v16405_v42  ;;  %v5512_v57 = vpop.xlane.xlu1 %5511  ;;  %9800 = vmatprep.mubr.msk.bf16.mxu1 %vm11149_vm4, %v16335_v28  ;;  %v5157_v31 = vmul.f32 %v10953_v61, %v13903_v36 }
0x1059   :  { %9840 = vmatprep.subr.bf16.mxu1 %v16335_v28 }
0x105a   :  { %v5165_v39 = vpack.c.bf16 %v5158_v45, %v5157_v31  ;;  %v10955_v59 = vpop.eup %10954 }
0x105b   :  { %v10957_v63 = vpop.eup %10956  ;;  %v5160_v36 = vmul.f32 %v10955_v59, %v13915_v14 }
0x105c   :  { %9841 = vmatpush3.bf16.msra.mxu1 %v16406_v41  ;;  %v5515_v0 = vpop.xlane.xlu1 %5514  ;;  %v5159_v52 = vmul.f32 %v10957_v63, %v13871_v55 }
0x105d   :  { %9842 = vmatprep.subr.bf16.mxu1 %v16335_v28  ;;  %10962 = vrcp.f32 %v5515_v0 }
0x105e   :  { %10964 = vrcp.f32 %v5512_v57  ;;  %v5166_v2 = vpack.c.bf16 %v5160_v36, %v5159_v52 }
0x105f   :  { %9801 = vmatmul.mubr.msk.bf16.gmra.mxu1 %vm1545_vm6, %v5165_v39 }
0x1060   :  { %9843 = vmatpush3.bf16.msra.mxu1 %v16407_v53  ;;  %9804 = vmatprep.mubr.msk.bf16.mxu1 %vm11149_vm4, %v16335_v28  ;;  %v5518_v3 = vpop.xlane.xlu1 %5517 }
0x1061   :  { %v5521_v6 = vpop.xlane.xlu0 %5520  ;;  %9886 = vmatprep.subr.bf16.mxu1 %v16335_v28  ;;  %10966 = vrcp.f32 %v5518_v3 }
0x1062   :  { %v10959_v13 = vpop.eup %10958  ;;  %10968 = vrcp.f32 %v5521_v6 }
0x1063   :  { %v10961_v16 = vpop.eup %10960  ;;  %v5162_v14 = vmul.f32 %v10959_v13, %v13927_v58 }
0x1064   :  { %v5524_v5 = vpop.xlane.xlu1 %5523  ;;  %v5161_v24 = vmul.f32 %v10961_v16, %v13921_v26 }
0x1065   :  { %v5527_v18 = vpop.xlane.xlu0 %5526  ;;  %10970 = vrcp.f32 %v5524_v5 }
0x1066   :  { %v5167_v55 = vpack.c.bf16 %v5162_v14, %v5161_v24  ;;  %10972 = vrcp.f32 %v5527_v18 }
0x1067   :  { %9805 = vmatmul.mubr.msk.bf16.gmra.mxu1 %vm1545_vm6, %v5166_v2 }
0x1068   :  { %9808 = vmatprep.mubr.msk.bf16.mxu1 %vm11149_vm4, %v16335_v28  ;;  %v5530_v8 = vpop.xlane.xlu1 %5529 }
0x1069   :  { %v5533_v34 = vpop.xlane.xlu0 %5532  ;;  %10974 = vrcp.f32 %v5530_v8 }
0x106a   :  { %v10963_v7 = vpop.eup %10962  ;;  %10976 = vrcp.f32 %v5533_v34 }
0x106b   :  { %v10965_v15 = vpop.eup %10964  ;;  %v5551_v43 = vmul.f32 %v10963_v7, %v13938_v1 }
0x106c   :  { %v5550_v58 = vmul.f32 %v10965_v15, %v13933_v40  ;;  %v5536_v4 = vpop.xlane.xlu1 %5535 }
0x106d   :  { %v5539_v47 = vpop.xlane.xlu0 %5538  ;;  %10978 = vrcp.f32 %v5536_v4 }
0x106e   :  { %v10967_v17 = vpop.eup %10966  ;;  %v5560_v29 = vpack.c.bf16 %v5551_v43, %v5550_v58  ;;  %10980 = vrcp.f32 %v5539_v47 }
0x106f   :  { %9809 = vmatmul.mubr.msk.bf16.gmra.mxu1 %vm1545_vm6, %v5167_v55  ;;  %v10969_v51 = vpop.eup %10968  ;;  %v5552_v25 = vmul.f32 %v10967_v17, %v13944_v50 }
0x1070   :  { %9844 = vmatprep.mubr.msk.bf16.mxu1 %vm11149_vm4, %v16335_v28  ;;  %v5553_v40 = vmul.f32 %v10969_v51, %v13947_v56  ;;  %v5916_v33 = vpop.xlane.xlu1 %5915 }
0x1071   :  { %v5904_v48 = vpop.xlane.xlu0 %5903 }
0x1072   :  { %v10971_v62 = vpop.eup %10970  ;;  %v5561_v61 = vpack.c.bf16 %v5553_v40, %v5552_v25 }
0x1073   :  { %v5554_v56 = vmul.f32 %v10971_v62, %v13951_v38 }
0x1074   :  { %v5960_v42 = vpop.permute.xlu1 %5959 }
0x1075   :  { %v5907_v26 = vpop.xlane.xlu0 %5906 }
0x1076   :  { %10982 = vrcp.f32 %v5907_v26 }
0x1077   :  { %9845 = vmatmul.mubr.msk.bf16.vlgmr.msra.gmra.mxu1 %vm1545_vm6, %v5560_v29  ;;  %10984 = vrcp.f32 %v5904_v48 }
0x1078   :  { %9887 = vmatpush3.bf16.msra.mxu1 %v14056_v22  ;;  %9848 = vmatprep.mubr.msk.bf16.mxu1 %vm11149_vm4, %v16335_v28  ;;  %v10973_v22 = vpop.eup %10972 }
0x1079   :  { %v5910_v1 = vpop.xlane.xlu0 %5909  ;;  %9888 = vmatprep.subr.bf16.mxu1 %v16335_v28  ;;  %v10975_v57 = vpop.eup %10974 }
0x107a   :  { %v10977_v41 = vpop.eup %10976  ;;  %v5556_v39 = vmul.f32 %v10975_v57, %v13960_v35 }
0x107b   :  { %v5557_v38 = vmul.f32 %v10977_v41, %v13965_v44 }
0x107c   :  { %9889 = vmatpush3.bf16.msra.mxu1 %v14052_v9  ;;  %v5555_v9 = vmul.f32 %v10973_v22, %v13956_v21  ;;  %v10979_v21 = vpop.eup %10978 }
0x107d   :  { %v5913_v12 = vpop.xlane.xlu0 %5912  ;;  %9890 = vmatprep.subr.bf16.mxu1 %v16335_v28  ;;  %v5563_v59 = vpack.c.bf16 %v5557_v38, %v5556_v39  ;;  %v10981_v0 = vpop.eup %10980  ;;  %v5558_v63 = vmul.f32 %v10979_v21, %v13969_v23 }
0x107e   :  { %v5562_v31 = vpack.c.bf16 %v5555_v9, %v5554_v56  ;;  %10986 = vrcp.f32 %v5913_v12  ;;  %v5559_v53 = vmul.f32 %v10981_v0, %v13976_v30 }
0x107f   :  { %9849 = vmatmul.mubr.msk.bf16.gmra.mxu1 %vm1545_vm6, %v5561_v61  ;;  %10988 = vrcp.f32 %v5910_v1 }
0x1080   :  { %9891 = vmatpush3.bf16.msra.mxu1 %v5962_v32  ;;  %9852 = vmatprep.mubr.msk.bf16.mxu1 %vm11149_vm4, %v16335_v28  ;;  %v5564_v6 = vpack.c.bf16 %v5559_v53, %v5558_v63 }
0x1081   :  { %v5919_v50 = vpop.xlane.xlu0 %5918  ;;  %9892 = vmatprep.subr.bf16.mxu1 %v16335_v28 }
0x1082   :  { %10990 = vrcp.f32 %v5919_v50 }
0x1083   :  { %v10983_v35 = vpop.eup %10982  ;;  %10992 = vrcp.f32 %v5916_v33 }
0x1084   :  { %9893 = vmatpush3.bf16.msra.mxu1 %v5960_v42  ;;  %v10985_v44 = vpop.eup %10984  ;;  %v5943_v36 = vmul.f32 %v10983_v35, %v13993_v54 }
0x1085   :  { %v5925_v45 = vpop.xlane.xlu0 %5924  ;;  %9894 = vmatprep.subr.bf16.mxu1 %v16335_v28  ;;  %v5942_v52 = vmul.f32 %v10985_v44, %v13987_v37 }
0x1086   :  { %10994 = vrcp.f32 %v5925_v45 }
0x1087   :  { %9853 = vmatmul.mubr.msk.bf16.gmra.mxu1 %vm1545_vm6, %v5562_v31  ;;  %v5952_v3 = vpack.c.bf16 %v5943_v36, %v5942_v52 }
0x1088   :  { %9856 = vmatprep.mubr.msk.bf16.mxu1 %vm11149_vm4, %v16335_v28 }
0x1089   :  { %v5958_v32 = vpop.permute.xlu0 %5957 }
0x108a   :  { %9895 = vmatpush3.bf16.msra.mxu1 %v5958_v32 }
0x108b   :  { %v10987_v18 = vpop.eup %10986 }
0x108c   :  { %v10989_v23 = vpop.eup %10988  ;;  %v5945_v30 = vmul.f32 %v10987_v18, %v14001_v19 }
0x108d   :  { %v5944_v2 = vmul.f32 %v10989_v23, %v13997_v20 }
0x108f   :  { %9857 = vmatmul.mubr.msk.bf16.gmra.mxu1 %vm1545_vm6, %v5563_v59  ;;  %v5953_v16 = vpack.c.bf16 %v5945_v30, %v5944_v2  ;;  %v10991_v54 = vpop.eup %10990  ;;  %v10585_v30 = vld [vmem:[%s16408_s6] sm:$0xff]  }
0x1090   :  { %9860 = vmatprep.mubr.msk.bf16.mxu1 %vm11149_vm4, %v16335_v28  ;;  %v10993_v37 = vpop.eup %10992  ;;  %v5947_v14 = vmul.f32 %v10991_v54, %v14005_v10  ;;  %9916 = vmatprep.subr.bf16.mxu0 %v10585_v30 }
0x1091   :  { %v5946_v5 = vmul.f32 %v10993_v37, %v13982_v60  ;;  %9917 = vmatpush3.bf16.msra.mxu0 %v10585_v30 }
0x1093   :  { %v5954_v24 = vpack.c.bf16 %v5947_v14, %v5946_v5  ;;  %v10995_v20 = vpop.eup %10994 }
0x1094   :  { %v5949_v7 = vmul.f32 %v10995_v20, %v14011_v27 }
0x1097   :  { %9861 = vmatmul.mubr.msk.bf16.gmra.mxu1 %vm1545_vm6, %v5564_v6 }
0x1098   :  { %9896 = vmatprep.mubr.msk.bf16.mxu1 %vm11149_vm4, %v16335_v28 }
0x109f   :  { %9897 = vmatmul.mubr.msk.bf16.vlgmr.msra.gmra.mxu1 %vm1545_vm6, %v5952_v3 }
0x10a0   :  { %9900 = vmatprep.mubr.msk.bf16.mxu1 %vm11149_vm4, %v16335_v28 }
0x10a5   :  { %v5922_v13 = vpop.xlane.xlu1 %5921 }
0x10a6   :  { %10996 = vrcp.f32 %v5922_v13 }
0x10a7   :  { %9901 = vmatmul.mubr.msk.bf16.gmra.mxu1 %vm1545_vm6, %v5953_v16 }
0x10a8   :  { %9904 = vmatprep.mubr.msk.bf16.mxu1 %vm11149_vm4, %v16335_v28 }
0x10a9   :  { %v5928_v34 = vpop.xlane.xlu1 %5927 }
0x10aa   :  { %10998 = vrcp.f32 %v5928_v34 }
0x10ad   :  { %v5931_v19 = vpop.xlane.xlu1 %5930 }
0x10ae   :  { %11000 = vrcp.f32 %v5931_v19 }
0x10af   :  { %9905 = vmatmul.mubr.msk.bf16.gmra.mxu1 %vm1545_vm6, %v5954_v24 }
0x10b0   :  { %9908 = vmatprep.mubr.msk.bf16.mxu1 %vm11149_vm4, %v16335_v28 }
0x10b3   :  { %v10997_v47 = vpop.eup %10996 }
0x10b4   :  { %v5948_v55 = vmul.f32 %v10997_v47, %v14042_v49 }
0x10b6   :  { %v5955_v15 = vpack.c.bf16 %v5949_v7, %v5948_v55 }
0x10b7   :  { %v10999_v10 = vpop.eup %10998 }
0x10b8   :  { %9909 = vmatmul.mubr.msk.bf16.gmra.mxu1 %vm1545_vm6, %v5955_v15  ;;  %v5950_v8 = vmul.f32 %v10999_v10, %v14046_v46 }
0x10b9   :  { %9912 = vmatprep.mubr.msk.bf16.mxu1 %vm11149_vm4, %v16335_v28 }
0x10ba   :  { %v14159_v43 = vpop.f32.mrf.mxu1 }
0x10bb   :  { %v11001_v60 = vpop.eup %11000 }
0x10bc   :  { %v5951_v48 = vmul.f32 %v11001_v60, %v14050_v11  ;;  %v9742_v58 = vpop.f32.mrf.mxu1 }
0x10be   :  { %v5956_v17 = vpack.c.bf16 %v5951_v48, %v5950_v8  ;;  %v14163_v29 = vpop.f32.mrf.mxu1 }
0x10c0   :  { %9913 = vmatmul.mubr.msk.bf16.gmra.mxu1 %vm1545_vm6, %v5956_v17  ;;  %v9743_v27 = vpop.f32.mrf.mxu1 }
0x10c2   :  { %v14166_v49 = vpop.f32.mrf.mxu1 }
0x10c4   :  { %v9746_v26 = vpop.f32.mrf.mxu1 }
0x10c6   :  { %v14168_v51 = vpop.f32.mrf.mxu1 }
0x10c8   :  { %v9747_v28 = vpop.f32.mrf.mxu1 }
0x10f7   :  { %v14170_v4 = vpop.f32.mrf.mxu1 }
0x10f9   :  { %v9750_v1 = vpop.f32.mrf.mxu1 }
0x10fb   :  { %v14172_v25 = vpop.f32.mrf.mxu1 }
0x10fd   :  { %v9751_v46 = vpop.f32.mrf.mxu1 }
0x10ff   :  { %v14174_v11 = vpop.f32.mrf.mxu1 }
0x1101   :  { %v9754_v40 = vpop.f32.mrf.mxu1 }
0x1103   :  { %v14176_v62 = vpop.f32.mrf.mxu1 }
0x1105   :  { %v9755_v33 = vpop.f32.mrf.mxu1 }
0x1107   :  { %v14178_v12 = vpop.f32.mrf.mxu1 }
0x1109   :  { %v9758_v61 = vpop.f32.mrf.mxu1 }
0x110b   :  { %v14180_v22 = vpop.f32.mrf.mxu1 }
0x110d   :  { %v9759_v50 = vpop.f32.mrf.mxu1 }
0x110f   :  { %v14182_v56 = vpop.f32.mrf.mxu1 }
0x1111   :  { %v9794_v9 = vpop.f32.mrf.mxu1 }
0x1113   :  { %v14184_v42 = vpop.f32.mrf.mxu1 }
0x1115   :  { %v9795_v57 = vpop.f32.mrf.mxu1 }
0x1117   :  { %v14186_v45 = vpop.f32.mrf.mxu1 }
0x1119   :  { %v9798_v31 = vpop.f32.mrf.mxu1 }
0x111b   :  { %v14188_v41 = vpop.f32.mrf.mxu1 }
0x111d   :  { %v9799_v32 = vpop.f32.mrf.mxu1 }
0x111f   :  { %v14190_v39 = vpop.f32.mrf.mxu1 }
0x1121   :  { %v9802_v38 = vpop.f32.mrf.mxu1 }
0x1123   :  { %v14192_v21 = vpop.f32.mrf.mxu1 }
0x1125   :  { %v9803_v59 = vpop.f32.mrf.mxu1 }
0x1127   :  { %v14194_v0 = vpop.f32.mrf.mxu1 }
0x1129   :  { %v9806_v63 = vpop.f32.mrf.mxu1 }
0x112b   :  { %v14196_v53 = vpop.f32.mrf.mxu1 }
0x112d   :  { %v9807_v6 = vpop.f32.mrf.mxu1 }
0x112f   :  { %v14198_v35 = vpop.f32.mrf.mxu1 }
0x1131   :  { %v9810_v44 = vpop.f32.mrf.mxu1 }
0x1133   :  { %v14200_v36 = vpop.f32.mrf.mxu1 }
0x1135   :  { %v9811_v52 = vpop.f32.mrf.mxu1 }
0x1137   :  { %v5629_v3 = vpop.f32.mrf.mxu1 }
0x1139   :  { %v9846_v18 = vpop.f32.mrf.mxu1 }
0x113b   :  { %v5632_v23 = vpop.f32.mrf.mxu1 }
0x113c   :  { %v10413_v2 = vpack.i.bf16 %v5632_v23, %v5629_v3 }
0x113d   :  { %v9847_v13 = vpop.f32.mrf.mxu1 }
0x113e   :  { %10414 = vrot.lane.b32.xlu1 %v10413_v2, %s11152_s8 }
0x113f   :  { %v5637_v16 = vpop.f32.mrf.mxu1 }
0x1141   :  { %v9850_v54 = vpop.f32.mrf.mxu1 }
0x1143   :  { %v5640_v37 = vpop.f32.mrf.mxu1 }
0x1144   :  { %v10418_v34 = vpack.i.bf16 %v5640_v37, %v5637_v16 }
0x1145   :  { %v9851_v14 = vpop.f32.mrf.mxu1 }
0x1146   :  { %10419 = vrot.lane.b32.xlu0 %v10418_v34, %s11152_s8 }
0x1147   :  { %v5645_v5 = vpop.f32.mrf.mxu1 }
0x1149   :  { %v9854_v19 = vpop.f32.mrf.mxu1 }
0x114b   :  { %v5648_v24 = vpop.f32.mrf.mxu1 }
0x114c   :  { %v10423_v20 = vpack.i.bf16 %v5648_v24, %v5645_v5 }
0x114d   :  { %v9855_v47 = vpop.f32.mrf.mxu1 }
0x114e   :  { %10424 = vrot.lane.b32.xlu0 %v10423_v20, %s11152_s8 }
0x114f   :  { %v5653_v55 = vpop.f32.mrf.mxu1 }
0x1151   :  { %v9858_v7 = vpop.f32.mrf.mxu1 }
0x1153   :  { %v5656_v15 = vpop.f32.mrf.mxu1 }
0x1154   :  { %v10428_v10 = vpack.i.bf16 %v5656_v15, %v5653_v55 }
0x1155   :  { %v9859_v60 = vpop.f32.mrf.mxu1 }
0x1156   :  { %10429 = vrot.lane.b32.xlu1 %v10428_v10, %s11152_s8 }
0x1157   :  { %v5661_v8 = vpop.f32.mrf.mxu1 }
0x1159   :  { %v9862_v48 = vpop.f32.mrf.mxu1 }
0x115b   :  { %v5664_v58 = vpop.f32.mrf.mxu1 }
0x115c   :  { %v10433_v17 = vpack.i.bf16 %v5664_v58, %v5661_v8 }
0x115d   :  { %v9863_v27 = vpop.f32.mrf.mxu1 }
0x115e   :  { %10434 = vrot.lane.b32.xlu0 %v10433_v17, %s11152_s8 }
0x115f   :  { %v6021_v26 = vpop.f32.mrf.mxu1 }
0x1161   :  { %v9898_v28 = vpop.f32.mrf.mxu1 }
0x1163   :  { %v6024_v1 = vpop.f32.mrf.mxu1 }
0x1164   :  { %v10438_v46 = vpack.i.bf16 %v6024_v1, %v6021_v26 }
0x1165   :  { %v9899_v40 = vpop.f32.mrf.mxu1 }
0x1166   :  { %10439 = vrot.lane.b32.xlu1 %v10438_v46, %s11152_s8 }
0x1167   :  { %v6029_v33 = vpop.f32.mrf.mxu1 }
0x1169   :  { %v9902_v61 = vpop.f32.mrf.mxu1 }
0x116b   :  { %v6032_v50 = vpop.f32.mrf.mxu1 }
0x116c   :  { %v10443_v9 = vpack.i.bf16 %v6032_v50, %v6029_v33 }
0x116d   :  { %v9903_v57 = vpop.f32.mrf.mxu1 }
0x116e   :  { %10444 = vrot.lane.b32.xlu0 %v10443_v9, %s11152_s8 }
0x116f   :  { %v6037_v31 = vpop.f32.mrf.mxu1 }
0x1171   :  { %v9906_v32 = vpop.f32.mrf.mxu1 }
0x1173   :  { %v6040_v38 = vpop.f32.mrf.mxu1 }
0x1174   :  { %v10448_v59 = vpack.i.bf16 %v6040_v38, %v6037_v31 }
0x1175   :  { %v9907_v63 = vpop.f32.mrf.mxu1 }
0x1176   :  { %10449 = vrot.lane.b32.xlu1 %v10448_v59, %s11152_s8 }
0x1178   :  { %v6045_v6 = vpop.f32.mrf.mxu1 }
0x117a   :  { %v9910_v44 = vpop.f32.mrf.mxu1 }
0x117c   :  { %v6048_v52 = vpop.f32.mrf.mxu1 }
0x117d   :  { %v10453_v3 = vpack.i.bf16 %v6048_v52, %v6045_v6 }
0x117e   :  { %v9911_v18 = vpop.f32.mrf.mxu1 }
0x117f   :  { %10454 = vrot.lane.b32.xlu0 %v10453_v3, %s11152_s8 }
0x1180   :  { %v6053_v23 = vpop.f32.mrf.mxu1 }
0x1182   :  { %v9914_v30 = vpop.f32.mrf.mxu1 }
0x1184   :  { %v6056_v2 = vpop.f32.mrf.mxu1 }
0x1185   :  { %v10458_v13 = vpack.i.bf16 %v6056_v2, %v6053_v23 }
0x1186   :  { %v9915_v16 = vpop.f32.mrf.mxu1 }
0x1187   :  { %10459 = vrot.lane.b32.xlu1 %v10458_v13, %s11152_s8 }
0x11b0   :  { %v10415_v54 = vpop.permute.xlu1 %10414 }
0x11b1   :  { %v10417_v37 = vunpack.i.h.bf16 %v10415_v54  ;;  %v10416_v34 = vunpack.i.l.bf16 %v10415_v54 }
0x11b3   :  { %v6141_v14 = vsel %vm1443_vm5, %v14163_v29, %v10417_v37  ;;  %v6140_v5 = vsel %vm1443_vm5, %v14159_v43, %v10416_v34 }
0x11b4   :  { %v6160_v19 = vpack.c.bf16 %v6141_v14, %v6140_v5  ;;  %v16410_v5 = vld [vmem:[#allocation47_spill] sm:$0xff] }
0x11b6   :  { %9918 = vmatprep.mubr.msk.bf16.mxu0 %vm1221_vm3, %v6160_v19 }
0x11b8   :  { %v10420_v24 = vpop.permute.xlu0 %10419 }
0x11b9   :  { %v10422_v20 = vunpack.i.h.bf16 %v10420_v24  ;;  %v10421_v47 = vunpack.i.l.bf16 %v10420_v24 }
0x11bb   :  { %v6143_v55 = vsel %vm1443_vm5, %v14168_v51, %v10422_v20  ;;  %v6142_v7 = vsel %vm1443_vm5, %v14166_v49, %v10421_v47 }
0x11bc   :  { %v6161_v15 = vpack.c.bf16 %v6143_v55, %v6142_v7  ;;  %v16412_v7 = vld [vmem:[#allocation46_spill] sm:$0xff] }
0x11be   :  { %9919 = vmatmul.mubr.msk.bf16.vlgmr.msra.gmra.mxu0 %vm1221_vm3, %v6161_v15 }
0x11c0   :  { %v10425_v10 = vpop.permute.xlu0 %10424 }
0x11c1   :  { %v10427_v29 = vunpack.i.h.bf16 %v10425_v10  ;;  %v10426_v60 = vunpack.i.l.bf16 %v10425_v10  ;;  %v16413_v10 = vld [vmem:[#allocation48_spill] sm:$0xff] }
0x11c3   :  { %v6145_v43 = vsel %vm1443_vm5, %v14172_v25, %v10427_v29  ;;  %v6144_v8 = vsel %vm1443_vm5, %v14170_v4, %v10426_v60 }
0x11c4   :  { %v6162_v48 = vpack.c.bf16 %v6145_v43, %v6144_v8 }
0x11c6   :  { %9922 = vmatprep.mubr.msk.bf16.mxu0 %vm1221_vm3, %v6162_v48 }
0x11c8   :  { %v10430_v58 = vpop.permute.xlu1 %10429 }
0x11c9   :  { %v10432_v51 = vunpack.i.h.bf16 %v10430_v58  ;;  %v10431_v17 = vunpack.i.l.bf16 %v10430_v58 }
0x11cb   :  { %v6147_v49 = vsel %vm1443_vm5, %v14176_v62, %v10432_v51  ;;  %v6146_v27 = vsel %vm1443_vm5, %v14174_v11, %v10431_v17 }
0x11cc   :  { %v6163_v26 = vpack.c.bf16 %v6147_v49, %v6146_v27  ;;  %v16414_v27 = vld [vmem:[#allocation34_spill] sm:$0xff] }
0x11ce   :  { %9923 = vmatmul.mubr.msk.bf16.gmra.mxu0 %vm1221_vm3, %v6163_v26 }
0x11d0   :  { %v10435_v28 = vpop.permute.xlu0 %10434 }
0x11d1   :  { %v10437_v25 = vunpack.i.h.bf16 %v10435_v28  ;;  %v10436_v1 = vunpack.i.l.bf16 %v10435_v28 }
0x11d3   :  { %v6149_v4 = vsel %vm1443_vm5, %v14180_v22, %v10437_v25  ;;  %v6148_v46 = vsel %vm1443_vm5, %v14178_v12, %v10436_v1  ;;  %v16415_v25 = vld [vmem:[#allocation50_spill] sm:$0xff] }
0x11d4   :  { %v6164_v40 = vpack.c.bf16 %v6149_v4, %v6148_v46 }
0x11d6   :  { %9926 = vmatprep.mubr.msk.bf16.mxu0 %vm1221_vm3, %v6164_v40 }
0x11d8   :  { %v10440_v33 = vpop.permute.xlu1 %10439 }
0x11d9   :  { %v10442_v62 = vunpack.i.h.bf16 %v10440_v33  ;;  %v10441_v61 = vunpack.i.l.bf16 %v10440_v33  ;;  %v16416_v33 = vld [vmem:[#allocation51_spill] sm:$0xff] }
0x11db   :  { %v6151_v11 = vsel %vm1443_vm5, %v14184_v42, %v10442_v62  ;;  %v6150_v50 = vsel %vm1443_vm5, %v14182_v56, %v10441_v61  ;;  %v16417_v61 = vld [vmem:[#allocation35_spill] sm:$0xff] }
0x11dc   :  { %v6165_v9 = vpack.c.bf16 %v6151_v11, %v6150_v50 }
0x11de   :  { %9927 = vmatmul.mubr.msk.bf16.gmra.mxu0 %vm1221_vm3, %v6165_v9 }
0x11e0   :  { %v10445_v57 = vpop.permute.xlu0 %10444 }
0x11e1   :  { %v10447_v22 = vunpack.i.h.bf16 %v10445_v57  ;;  %v10446_v31 = vunpack.i.l.bf16 %v10445_v57 }
0x11e3   :  { %v6153_v12 = vsel %vm1443_vm5, %v14188_v41, %v10447_v22  ;;  %v6152_v32 = vsel %vm1443_vm5, %v14186_v45, %v10446_v31 }
0x11e4   :  { %v6166_v38 = vpack.c.bf16 %v6153_v12, %v6152_v32 }
0x11e6   :  { %9930 = vmatprep.mubr.msk.bf16.mxu0 %vm1221_vm3, %v6166_v38 }
0x11e8   :  { %v10450_v59 = vpop.permute.xlu1 %10449 }
0x11e9   :  { %v10452_v42 = vunpack.i.h.bf16 %v10450_v59  ;;  %v10451_v63 = vunpack.i.l.bf16 %v10450_v59  ;;  %v16418_v59 = vld [vmem:[#allocation27_spill] sm:$0xff] }
0x11eb   :  { %v6155_v56 = vsel %vm1443_vm5, %v14192_v21, %v10452_v42  ;;  %v6154_v6 = vsel %vm1443_vm5, %v14190_v39, %v10451_v63 }
0x11ec   :  { %v6167_v44 = vpack.c.bf16 %v6155_v56, %v6154_v6  ;;  %v16419_v56 = vld [vmem:[#allocation44_spill] sm:$0xff] }
0x11ee   :  { %9931 = vmatmul.mubr.msk.bf16.gmra.mxu0 %vm1221_vm3, %v6167_v44 }
0x11f1   :  { %v10455_v41 = vpop.permute.xlu0 %10454 }
0x11f2   :  { %v10457_v52 = vunpack.i.h.bf16 %v10455_v41  ;;  %v10456_v3 = vunpack.i.l.bf16 %v10455_v41 }
0x11f4   :  { %v6157_v45 = vsel %vm1443_vm5, %v14196_v53, %v10457_v52  ;;  %v6156_v18 = vsel %vm1443_vm5, %v14194_v0, %v10456_v3  ;;  %v14264_v53 = vld [vmem:[%s16409_s12] ss:$0 sm:$0xff]  ;;  %v16420_v3 = vld [vmem:[#allocation28_spill] sm:$0xff] }
0x11f5   :  { %v6168_v23 = vpack.c.bf16 %v6157_v45, %v6156_v18  ;;  %v16421_v18 = vld [vmem:[#allocation45_spill] sm:$0xff] }
0x11f7   :  { %9934 = vmatprep.mubr.msk.bf16.mxu0 %vm1221_vm3, %v6168_v23 }
0x11f9   :  { %v10460_v21 = vpop.permute.xlu1 %10459 }
0x11fa   :  { %v10462_v30 = vunpack.i.h.bf16 %v10460_v21  ;;  %v10461_v2 = vunpack.i.l.bf16 %v10460_v21 }
0x11fc   :  { %v6159_v39 = vsel %vm1443_vm5, %v14200_v36, %v10462_v30  ;;  %v6158_v13 = vsel %vm1443_vm5, %v14198_v35, %v10461_v2  ;;  %v16411_v36 = vld [vmem:[#allocation49_spill] sm:$0xff] }
0x11fd   :  { %v6169_v16 = vpack.c.bf16 %v6159_v39, %v6158_v13 }
0x11ff   :  { %9935 = vmatmul.mubr.msk.bf16.gmra.mxu0 %vm1221_vm3, %v6169_v16 }
0x127e   :  { %v9920_v54 = vpop.f32.mrf.mxu0 }
0x127f   :  { %v6258_v0 = vadd.f32 %v9920_v54, %v14264_v53 }
0x1280   :  { %v6249_v37 = vpop.f32.mrf.mxu0 }
0x1281   :  { %v6250_v34 = vadd.f32 %v14264_v53, %v6249_v37  ;;  %v14272_v20 = vadd.f32 %v6258_v0, %v16411_v36  ;;  %v16422_v0 = vld [vmem:[#allocation37_spill] sm:$0xff] }
0x1282   :  { %v9921_v14 = vpop.f32.mrf.mxu0 }
0x1283   :  { %v14269_v19 = vadd.f32 %v6250_v34, %v16410_v5  ;;  %v6261_v35 = vadd.f32 %v9921_v14, %v14264_v53  ;;  %v6354_v43 = vsel %vm1221_vm3, %v14272_v20, 0.0  ;;  %v16423_v5 = vld [vmem:[#allocation38_spill] sm:$0xff] }
0x1284   :  { %v6252_v24 = vpop.f32.mrf.mxu0 }
0x1285   :  { %v6253_v47 = vadd.f32 %v14264_v53, %v6252_v24  ;;  %v6348_v55 = vsel %vm1221_vm3, %v14269_v19, 0.0  ;;  %v14282_v29 = vadd.f32 %v6261_v35, %v16413_v10  ;;  %v16425_v10 = vld [vmem:[#allocation39_spill] sm:$0xff] }
0x1286   :  { %6349 = vadd.xlane.f32.xlu0 %v6348_v55  ;;  %v16424_v55 = vld [vmem:[#allocation36_spill] sm:$0xff] }
0x1287   :  { %v14279_v15 = vadd.f32 %v6253_v47, %v16412_v7  ;;  %v6357_v8 = vsel %vm1221_vm3, %v14282_v29, 0.0 }
0x1289   :  { %v6351_v60 = vsel %vm1221_vm3, %v14279_v15, 0.0 }
0x128a   :  { %6352 = vadd.xlane.f32.xlu1 %v6351_v60  ;;  %6355 = vadd.xlane.f32.xlu0 %v6354_v43 }
0x128e   :  { %v9924_v48 = vpop.f32.mrf.mxu0  ;;  %6358 = vadd.xlane.f32.xlu0 %v6357_v8 }
0x128f   :  { %v6274_v51 = vadd.f32 %v9924_v48, %v14264_v53 }
0x1290   :  { %v6265_v58 = vpop.f32.mrf.mxu0 }
0x1291   :  { %v6266_v17 = vadd.f32 %v14264_v53, %v6265_v58  ;;  %v14296_v1 = vadd.f32 %v6274_v51, %v16415_v25 }
0x1292   :  { %v9925_v49 = vpop.f32.mrf.mxu0 }
0x1293   :  { %v14293_v26 = vadd.f32 %v6266_v17, %v16414_v27  ;;  %v6277_v4 = vadd.f32 %v9925_v49, %v14264_v53  ;;  %v6366_v50 = vsel %vm1221_vm3, %v14296_v1, 0.0 }
0x1294   :  { %v6268_v28 = vpop.f32.mrf.mxu0 }
0x1295   :  { %v6269_v46 = vadd.f32 %v14264_v53, %v6268_v28  ;;  %v6360_v40 = vsel %vm1221_vm3, %v14293_v26, 0.0  ;;  %v14306_v11 = vadd.f32 %v6277_v4, %v16417_v61  ;;  %v16426_v28 = vld [vmem:[#allocation41_spill] sm:$0xff] }
0x1296   :  { %6361 = vadd.xlane.f32.xlu1 %v6360_v40 }
0x1297   :  { %v14303_v62 = vadd.f32 %v6269_v46, %v16416_v33  ;;  %v6369_v57 = vsel %vm1221_vm3, %v14306_v11, 0.0  ;;  %v16427_v46 = vld [vmem:[#allocation42_spill] sm:$0xff] }
0x1299   :  { %v6363_v9 = vsel %vm1221_vm3, %v14303_v62, 0.0 }
0x129a   :  { %6367 = vadd.xlane.f32.xlu1 %v6366_v50  ;;  %6364 = vadd.xlane.f32.xlu0 %v6363_v9  ;;  %v16428_v9 = vld [vmem:[#allocation43_spill] sm:$0xff] }
0x129e   :  { %v9928_v22 = vpop.f32.mrf.mxu0  ;;  %6370 = vadd.xlane.f32.xlu0 %v6369_v57 }
0x129f   :  { %v6290_v12 = vadd.f32 %v9928_v22, %v14264_v53  ;;  %v16429_v22 = vld [vmem:[#allocation40_spill] sm:$0xff] }
0x12a0   :  { %v6281_v31 = vpop.f32.mrf.mxu0 }
0x12a1   :  { %v6282_v32 = vadd.f32 %v14264_v53, %v6281_v31  ;;  %v14320_v6 = vadd.f32 %v6290_v12, %v16419_v56 }
0x12a2   :  { %v9929_v38 = vpop.f32.mrf.mxu0 }
0x12a3   :  { %v14317_v42 = vadd.f32 %v6282_v32, %v16418_v59  ;;  %v6293_v44 = vadd.f32 %v9929_v38, %v14264_v53  ;;  %v6378_v21 = vsel %vm1221_vm3, %v14320_v6, 0.0 }
0x12a4   :  { %v6284_v63 = vpop.f32.mrf.mxu0 }
0x12a5   :  { %v6285_v41 = vadd.f32 %v14264_v53, %v6284_v63  ;;  %v6372_v52 = vsel %vm1221_vm3, %v14317_v42, 0.0  ;;  %v14330_v23 = vadd.f32 %v6293_v44, %v16421_v18 }
0x12a6   :  { %6373 = vadd.xlane.f32.xlu1 %v6372_v52 }
0x12a7   :  { %v14327_v45 = vadd.f32 %v6285_v41, %v16420_v3  ;;  %v6381_v2 = vsel %vm1221_vm3, %v14330_v23, 0.0 }
0x12a9   :  { %v6375_v30 = vsel %vm1221_vm3, %v14327_v45, 0.0 }
0x12aa   :  { %6379 = vadd.xlane.f32.xlu1 %v6378_v21  ;;  %6376 = vadd.xlane.f32.xlu0 %v6375_v30 }
0x12ae   :  { %v9932_v39 = vpop.f32.mrf.mxu0  ;;  %6382 = vadd.xlane.f32.xlu0 %v6381_v2 }
0x12af   :  { %v6306_v16 = vadd.f32 %v9932_v39, %v14264_v53 }
0x12b0   :  { %v6297_v13 = vpop.f32.mrf.mxu0 }
0x12b1   :  { %v6298_v54 = vadd.f32 %v14264_v53, %v6297_v13  ;;  %v14344_v24 = vadd.f32 %v6306_v16, %v16423_v5 }
0x12b2   :  { %v9933_v37 = vpop.f32.mrf.mxu0 }
0x12b3   :  { %v14341_v34 = vadd.f32 %v6298_v54, %v16422_v0  ;;  %v6309_v36 = vadd.f32 %v9933_v37, %v14264_v53  ;;  %v6390_v43 = vsel %vm1221_vm3, %v14344_v24, 0.0 }
0x12b4   :  { %v6300_v14 = vpop.f32.mrf.mxu0 }
0x12b5   :  { %v6301_v35 = vadd.f32 %v14264_v53, %v6300_v14  ;;  %v6384_v47 = vsel %vm1221_vm3, %v14341_v34, 0.0  ;;  %v14354_v60 = vadd.f32 %v6309_v36, %v16425_v10 }
0x12b6   :  { %6385 = vadd.xlane.f32.xlu1 %v6384_v47 }
0x12b7   :  { %v14351_v7 = vadd.f32 %v6301_v35, %v16424_v55  ;;  %v6393_v48 = vsel %vm1221_vm3, %v14354_v60, 0.0 }
0x12b9   :  { %v6387_v8 = vsel %vm1221_vm3, %v14351_v7, 0.0 }
0x12ba   :  { %6391 = vadd.xlane.f32.xlu1 %v6390_v43  ;;  %6388 = vadd.xlane.f32.xlu0 %v6387_v8 }
0x12be   :  { %6394 = vadd.xlane.f32.xlu0 %v6393_v48 }
0x12bf   :  { %v9936_v58 = vpop.f32.mrf.mxu0 }
0x12c0   :  { %v6322_v17 = vadd.f32 %v9936_v58, %v14264_v53 }
0x12c1   :  { %v6313_v51 = vpop.f32.mrf.mxu0 }
0x12c2   :  { %v6314_v49 = vadd.f32 %v14264_v53, %v6313_v51  ;;  %v14368_v40 = vadd.f32 %v6322_v17, %v16427_v46 }
0x12c3   :  { %v9937_v27 = vpop.f32.mrf.mxu0 }
0x12c4   :  { %v14365_v25 = vadd.f32 %v6314_v49, %v16426_v28  ;;  %v6325_v33 = vadd.f32 %v9937_v27, %v14264_v53  ;;  %v6402_v12 = vsel %vm1221_vm3, %v14368_v40, 0.0 }
0x12c5   :  { %v6316_v4 = vpop.f32.mrf.mxu0 }
0x12c6   :  { %v6317_v61 = vadd.f32 %v14264_v53, %v6316_v4  ;;  %v6396_v50 = vsel %vm1221_vm3, %v14365_v25, 0.0  ;;  %v14378_v31 = vadd.f32 %v6325_v33, %v16429_v22 }
0x12c7   :  { %6397 = vadd.xlane.f32.xlu1 %v6396_v50 }
0x12c8   :  { %v14375_v57 = vadd.f32 %v6317_v61, %v16428_v9  ;;  %v6405_v53 = vsel %vm1221_vm3, %v14378_v31, 0.0 }
0x12ca   :  { %v6399_v32 = vsel %vm1221_vm3, %v14375_v57, 0.0 }
0x12cb   :  { %6403 = vadd.xlane.f32.xlu1 %v6402_v12  ;;  %6400 = vadd.xlane.f32.xlu0 %v6399_v32 }
0x12cf   :  { %6406 = vadd.xlane.f32.xlu0 %v6405_v53 }
0x130f   :  { %v6350_v38 = vpop.xlane.xlu0 %6349 }
0x1310   :  { %v6408_v59 = vmul.f32 0.0625, %v6350_v38 }
0x1312   :  { %v14387_v63 = vsub.f32 %v14269_v19, %v6408_v59 }
0x1313   :  { %v6353_v56 = vpop.xlane.xlu1 %6352  ;;  %v6356_v44 = vpop.xlane.xlu0 %6355 }
0x1314   :  { %v6409_v41 = vmul.f32 0.0625, %v6353_v56  ;;  %v6410_v52 = vmul.f32 0.0625, %v6356_v44  ;;  %v6448_v3 = vmul.f32 %v14387_v63, %v14387_v63 }
0x1316   :  { %v14392_v18 = vsub.f32 %v14279_v15, %v6409_v41  ;;  %v14395_v21 = vsub.f32 %v14272_v20, %v6410_v52  ;;  %v6468_v30 = vsel %vm1221_vm3, %v6448_v3, 0.0 }
0x1317   :  { %6469 = vadd.xlane.f32.xlu1 %v6468_v30  ;;  %v6359_v2 = vpop.xlane.xlu0 %6358  ;;  %v10586_v30 = vld [vmem:[%s16430_s20] sm:$0xff]  }
0x1318   :  { %v6411_v39 = vmul.f32 0.0625, %v6359_v2  ;;  %v6449_v19 = vmul.f32 %v14392_v18, %v14392_v18  ;;  %v6450_v13 = vmul.f32 %v14395_v21, %v14395_v21  ;;  %9938 = vmatprep.subr.bf16.mxu1 %v10586_v30 }
0x1319   :  { %9939 = vmatpush3.bf16.msra.mxu1 %v10586_v30 }
0x131a   :  { %v14403_v16 = vsub.f32 %v14282_v29, %v6411_v39  ;;  %v6471_v15 = vsel %vm1221_vm3, %v6449_v19, 0.0  ;;  %v6474_v54 = vsel %vm1221_vm3, %v6450_v13, 0.0 }
0x131b   :  { %6472 = vadd.xlane.f32.xlu0 %v6471_v15  ;;  %6475 = vadd.xlane.f32.xlu1 %v6474_v54 }
0x131c   :  { %v6451_v20 = vmul.f32 %v14403_v16, %v14403_v16 }
0x131e   :  { %v6477_v37 = vsel %vm1221_vm3, %v6451_v20, 0.0 }
0x131f   :  { %v6362_v0 = vpop.xlane.xlu1 %6361  ;;  %6478 = vadd.xlane.f32.xlu0 %v6477_v37 }
0x1320   :  { %v6412_v14 = vmul.f32 0.0625, %v6362_v0 }
0x1322   :  { %v14411_v5 = vsub.f32 %v14293_v26, %v6412_v14 }
0x1323   :  { %v6368_v36 = vpop.xlane.xlu1 %6367  ;;  %v6365_v29 = vpop.xlane.xlu0 %6364 }
0x1324   :  { %v6414_v35 = vmul.f32 0.0625, %v6368_v36  ;;  %v6413_v47 = vmul.f32 0.0625, %v6365_v29  ;;  %v6452_v55 = vmul.f32 %v14411_v5, %v14411_v5 }
0x1326   :  { %v14416_v10 = vsub.f32 %v14296_v1, %v6414_v35  ;;  %v14419_v43 = vsub.f32 %v14303_v62, %v6413_v47  ;;  %v6480_v8 = vsel %vm1221_vm3, %v6452_v55, 0.0 }
0x1327   :  { %6481 = vadd.xlane.f32.xlu1 %v6480_v8  ;;  %v6371_v48 = vpop.xlane.xlu0 %6370 }
0x1328   :  { %v6415_v58 = vmul.f32 0.0625, %v6371_v48  ;;  %v6454_v26 = vmul.f32 %v14416_v10, %v14416_v10  ;;  %v6453_v51 = vmul.f32 %v14419_v43, %v14419_v43 }
0x132a   :  { %v14427_v17 = vsub.f32 %v14306_v11, %v6415_v58  ;;  %v6486_v1 = vsel %vm1221_vm3, %v6454_v26, 0.0  ;;  %v6483_v49 = vsel %vm1221_vm3, %v6453_v51, 0.0 }
0x132b   :  { %6487 = vadd.xlane.f32.xlu1 %v6486_v1  ;;  %6484 = vadd.xlane.f32.xlu0 %v6483_v49 }
0x132c   :  { %v6455_v62 = vmul.f32 %v14427_v17, %v14427_v17 }
0x132e   :  { %v6489_v27 = vsel %vm1221_vm3, %v6455_v62, 0.0 }
0x132f   :  { %v6374_v28 = vpop.xlane.xlu1 %6373  ;;  %6490 = vadd.xlane.f32.xlu0 %v6489_v27 }
0x1330   :  { %v6416_v4 = vmul.f32 0.0625, %v6374_v28 }
0x1332   :  { %v14435_v46 = vsub.f32 %v14317_v42, %v6416_v4 }
0x1333   :  { %v6380_v33 = vpop.xlane.xlu1 %6379  ;;  %v6377_v11 = vpop.xlane.xlu0 %6376 }
0x1334   :  { %v6418_v61 = vmul.f32 0.0625, %v6380_v33  ;;  %v6417_v50 = vmul.f32 0.0625, %v6377_v11  ;;  %v6456_v9 = vmul.f32 %v14435_v46, %v14435_v46 }
0x1336   :  { %v14440_v22 = vsub.f32 %v14320_v6, %v6418_v61  ;;  %v14443_v12 = vsub.f32 %v14327_v45, %v6417_v50  ;;  %v6492_v32 = vsel %vm1221_vm3, %v6456_v9, 0.0  ;;  %v10587_v9 = vld [vmem:[%s16431_s27 + $0x38] ss:$0 sps:$4 sm:$0xff]  }
0x1337   :  { %6493 = vadd.xlane.f32.xlu1 %v6492_v32  ;;  %v6383_v53 = vpop.xlane.xlu0 %6382  ;;  %v10588_v32 = vld [vmem:[%s16431_s27 + $0x30] sm:$0xff]   ;;  %10019 = vmatprep.subr.msk.bf16.mxu0 %vm801_vm1, %v10587_v9 }
0x1338   :  { %v6419_v42 = vmul.f32 0.0625, %v6383_v53  ;;  %v6458_v38 = vmul.f32 %v14440_v22, %v14440_v22  ;;  %v6457_v59 = vmul.f32 %v14443_v12, %v14443_v12  ;;  %v10589_v53 = vld [vmem:[%s16431_s27 + $0x28] sm:$0xff]  }
0x133a   :  { %v14451_v56 = vsub.f32 %v14330_v23, %v6419_v42  ;;  %v6498_v6 = vsel %vm1221_vm3, %v6458_v38, 0.0  ;;  %v6495_v45 = vsel %vm1221_vm3, %v6457_v59, 0.0  ;;  %v10590_v42 = vld [vmem:[%s16431_s27 + $0x20] sm:$0xff]   ;;  %v10591_v38 = vld [vmem:[%s16431_s27 + $0x18] sm:$0xff]  }
0x133b   :  { %6499 = vadd.xlane.f32.xlu1 %v6498_v6  ;;  %6496 = vadd.xlane.f32.xlu0 %v6495_v45 }
0x133c   :  { %v6459_v44 = vmul.f32 %v14451_v56, %v14451_v56 }
0x133e   :  { %v6501_v41 = vsel %vm1221_vm3, %v6459_v44, 0.0 }
0x133f   :  { %v6386_v52 = vpop.xlane.xlu1 %6385  ;;  %6502 = vadd.xlane.f32.xlu0 %v6501_v41 }
0x1340   :  { %v6420_v3 = vmul.f32 0.0625, %v6386_v52 }
0x1342   :  { %v14460_v2 = vsub.f32 %v14341_v34, %v6420_v3 }
0x1343   :  { %v6392_v23 = vpop.xlane.xlu1 %6391  ;;  %v6389_v39 = vpop.xlane.xlu0 %6388 }
0x1344   :  { %v6422_v19 = vmul.f32 0.0625, %v6392_v23  ;;  %v6421_v13 = vmul.f32 0.0625, %v6389_v39  ;;  %v6460_v15 = vmul.f32 %v14460_v2, %v14460_v2 }
0x1346   :  { %v14465_v54 = vsub.f32 %v14344_v24, %v6422_v19  ;;  %v14468_v20 = vsub.f32 %v14351_v7, %v6421_v13  ;;  %v6504_v37 = vsel %vm1221_vm3, %v6460_v15, 0.0 }
0x1347   :  { %6505 = vadd.xlane.f32.xlu1 %v6504_v37  ;;  %v6395_v34 = vpop.xlane.xlu0 %6394 }
0x1348   :  { %v6423_v0 = vmul.f32 0.0625, %v6395_v34  ;;  %v6462_v14 = vmul.f32 %v14465_v54, %v14465_v54  ;;  %v6461_v36 = vmul.f32 %v14468_v20, %v14468_v20 }
0x134a   :  { %v14476_v29 = vsub.f32 %v14354_v60, %v6423_v0  ;;  %v6510_v24 = vsel %vm1221_vm3, %v6462_v14, 0.0  ;;  %v6507_v35 = vsel %vm1221_vm3, %v6461_v36, 0.0 }
0x134b   :  { %6511 = vadd.xlane.f32.xlu1 %v6510_v24  ;;  %6508 = vadd.xlane.f32.xlu0 %v6507_v35  ;;  %v14516_v35 = vld [vmem:[%s16432_s4] ss:$0 sm:$0xff] }
0x134c   :  { %v6463_v7 = vmul.f32 %v14476_v29, %v14476_v29 }
0x134e   :  { %v6513_v47 = vsel %vm1221_vm3, %v6463_v7, 0.0 }
0x134f   :  { %6514 = vadd.xlane.f32.xlu0 %v6513_v47 }
0x1350   :  { %v6398_v55 = vpop.xlane.xlu1 %6397 }
0x1351   :  { %v6424_v8 = vmul.f32 0.0625, %v6398_v55 }
0x1353   :  { %v14484_v48 = vsub.f32 %v14365_v25, %v6424_v8 }
0x1354   :  { %v6404_v58 = vpop.xlane.xlu1 %6403  ;;  %v6401_v60 = vpop.xlane.xlu0 %6400 }
0x1355   :  { %v6426_v26 = vmul.f32 0.0625, %v6404_v58  ;;  %v6425_v51 = vmul.f32 0.0625, %v6401_v60  ;;  %v6464_v1 = vmul.f32 %v14484_v48, %v14484_v48 }
0x1357   :  { %v14489_v49 = vsub.f32 %v14368_v40, %v6426_v26  ;;  %v14492_v62 = vsub.f32 %v14375_v57, %v6425_v51  ;;  %v6516_v27 = vsel %vm1221_vm3, %v6464_v1, 0.0 }
0x1358   :  { %6517 = vadd.xlane.f32.xlu1 %v6516_v27  ;;  %v6407_v25 = vpop.xlane.xlu0 %6406 }
0x1359   :  { %v6427_v28 = vmul.f32 0.0625, %v6407_v25  ;;  %v6466_v4 = vmul.f32 %v14489_v49, %v14489_v49  ;;  %v6465_v33 = vmul.f32 %v14492_v62, %v14492_v62  ;;  %v14522_v25 = vld [vmem:[%s16433_s28] ss:$0 sm:$0xff] }
0x135b   :  { %v14500_v40 = vsub.f32 %v14378_v31, %v6427_v28  ;;  %v6522_v11 = vsel %vm1221_vm3, %v6466_v4, 0.0  ;;  %v6519_v57 = vsel %vm1221_vm3, %v6465_v33, 0.0  ;;  %v6958_v31 = vsel %vm801_vm1, %v10587_v9, 0 }
0x135c   :  { %6523 = vadd.xlane.f32.xlu1 %v6522_v11  ;;  %6520 = vadd.xlane.f32.xlu0 %v6519_v57 }
0x135d   :  { %v6467_v61 = vmul.f32 %v14500_v40, %v14500_v40  ;;  %9961 = vmatpush3.bf16.msra.mxu0 %v6958_v31 }
0x135e   :  { %9962 = vmatprep.subr.bf16.mxu0 %v10588_v32 }
0x135f   :  { %v6525_v50 = vsel %vm1221_vm3, %v6467_v61, 0.0 }
0x1360   :  { %6526 = vadd.xlane.f32.xlu0 %v6525_v50 }
0x1361   :  { %9963 = vmatpush3.bf16.msra.mxu0 %v10588_v32 }
0x1362   :  { %9964 = vmatprep.subr.bf16.mxu0 %v10589_v53 }
0x1365   :  { %9965 = vmatpush3.bf16.msra.mxu0 %v10589_v53 }
0x1366   :  { %9966 = vmatprep.subr.bf16.mxu0 %v10590_v42 }
0x1369   :  { %9967 = vmatpush3.bf16.msra.mxu0 %v10590_v42 }
0x136a   :  { %9968 = vmatprep.subr.bf16.mxu0 %v10591_v38 }
0x136d   :  { %9969 = vmatpush3.bf16.msra.mxu0 %v10591_v38 }
0x13a0   :  { %v6470_v59 = vpop.xlane.xlu1 %6469 }
0x13a1   :  { %v6528_v6 = vmul.f32 0.0625, %v6470_v59 }
0x13a3   :  { %v6548_v45 = vadd.f32 1e-05, %v6528_v6 }
0x13a4   :  { %v6476_v44 = vpop.xlane.xlu1 %6475  ;;  %v6473_v41 = vpop.xlane.xlu0 %6472 }
0x13a5   :  { %11002 = vrsqrt.f32 %v6548_v45  ;;  %v6530_v52 = vmul.f32 0.0625, %v6476_v44  ;;  %v6529_v3 = vmul.f32 0.0625, %v6473_v41 }
0x13a7   :  { %v6550_v30 = vadd.f32 1e-05, %v6530_v52  ;;  %v6549_v23 = vadd.f32 1e-05, %v6529_v3 }
0x13a8   :  { %v6479_v39 = vpop.xlane.xlu0 %6478 }
0x13a9   :  { %11004 = vrsqrt.f32 %v6550_v30  ;;  %v6531_v19 = vmul.f32 0.0625, %v6479_v39 }
0x13aa   :  { %11006 = vrsqrt.f32 %v6549_v23 }
0x13ab   :  { %v6551_v13 = vadd.f32 1e-05, %v6531_v19 }
0x13ad   :  { %11008 = vrsqrt.f32 %v6551_v13 }
0x13b0   :  { %v6482_v15 = vpop.xlane.xlu1 %6481 }
0x13b1   :  { %v6532_v37 = vmul.f32 0.0625, %v6482_v15 }
0x13b2   :  { %v11003_v34 = vpop.eup %11002 }
0x13b3   :  { %v6552_v0 = vadd.f32 1e-05, %v6532_v37  ;;  %v6588_v24 = vmul.f32 %v11003_v34, %v14387_v63 }
0x13b4   :  { %v6488_v14 = vpop.xlane.xlu1 %6487  ;;  %v6485_v36 = vpop.xlane.xlu0 %6484 }
0x13b5   :  { %11010 = vrsqrt.f32 %v6552_v0  ;;  %v6534_v7 = vmul.f32 0.0625, %v6488_v14  ;;  %v6533_v47 = vmul.f32 0.0625, %v6485_v36  ;;  %v6615_v27 = vmul.f32 %v14516_v35, %v6588_v24 }
0x13b6   :  { %v11005_v55 = vpop.eup %11004 }
0x13b7   :  { %v11007_v8 = vpop.eup %11006  ;;  %v6590_v58 = vmul.f32 %v11005_v55, %v14395_v21  ;;  %v6554_v60 = vadd.f32 1e-05, %v6534_v7  ;;  %v6553_v26 = vadd.f32 1e-05, %v6533_v47  ;;  %v14528_v57 = vadd.f32 %v14522_v25, %v6615_v27 }
0x13b8   :  { %v6491_v51 = vpop.xlane.xlu0 %6490  ;;  %v6589_v1 = vmul.f32 %v11007_v8, %v14392_v18 }
0x13b9   :  { %11012 = vrsqrt.f32 %v6554_v60  ;;  %v6535_v63 = vmul.f32 0.0625, %v6491_v51  ;;  %v6617_v33 = vmul.f32 %v14516_v35, %v6590_v58 }
0x13ba   :  { %v11009_v28 = vpop.eup %11008  ;;  %11014 = vrsqrt.f32 %v6553_v26  ;;  %v6616_v4 = vmul.f32 %v14516_v35, %v6589_v1 }
0x13bb   :  { %v6591_v11 = vmul.f32 %v11009_v28, %v14403_v16  ;;  %v6555_v21 = vadd.f32 1e-05, %v6535_v63  ;;  %v14537_v9 = vadd.f32 %v14522_v25, %v6617_v33 }
0x13bc   :  { %v14531_v18 = vadd.f32 %v14522_v25, %v6616_v4 }
0x13bd   :  { %v6618_v61 = vmul.f32 %v14516_v35, %v6591_v11  ;;  %11016 = vrsqrt.f32 %v6555_v21 }
0x13be   :  { %v6662_v50 = vpack.c.bf16 %v14531_v18, %v14528_v57 }
0x13bf   :  { %v14540_v32 = vadd.f32 %v14522_v25, %v6618_v61 }
0x13c0   :  { %9940 = vmatprep.mubr.msk.bf16.mxu1 %vm1221_vm3, %v6662_v50  ;;  %v6494_v16 = vpop.xlane.xlu1 %6493 }
0x13c1   :  { %v6663_v31 = vpack.c.bf16 %v14540_v32, %v14537_v9  ;;  %v6536_v53 = vmul.f32 0.0625, %v6494_v16 }
0x13c2   :  { %v11011_v42 = vpop.eup %11010 }
0x13c3   :  { %v6556_v38 = vadd.f32 1e-05, %v6536_v53  ;;  %9941 = vmatmul.mubr.msk.bf16.vlgmr.msra.gmra.mxu1 %vm1221_vm3, %v6663_v31  ;;  %v6592_v45 = vmul.f32 %v11011_v42, %v14411_v5 }
0x13c4   :  { %v6500_v59 = vpop.xlane.xlu1 %6499  ;;  %v6497_v6 = vpop.xlane.xlu0 %6496 }
0x13c5   :  { %11018 = vrsqrt.f32 %v6556_v38  ;;  %v6538_v44 = vmul.f32 0.0625, %v6500_v59  ;;  %v6537_v41 = vmul.f32 0.0625, %v6497_v6  ;;  %v6619_v15 = vmul.f32 %v14516_v35, %v6592_v45 }
0x13c6   :  { %v11013_v52 = vpop.eup %11012 }
0x13c7   :  { %v11015_v3 = vpop.eup %11014  ;;  %v6594_v30 = vmul.f32 %v11013_v52, %v14416_v10  ;;  %v6558_v23 = vadd.f32 1e-05, %v6538_v44  ;;  %v6557_v39 = vadd.f32 1e-05, %v6537_v41  ;;  %v14554_v10 = vadd.f32 %v14522_v25, %v6619_v15 }
0x13c8   :  { %v6503_v19 = vpop.xlane.xlu0 %6502  ;;  %v6593_v13 = vmul.f32 %v11015_v3, %v14419_v43 }
0x13c9   :  { %11020 = vrsqrt.f32 %v6558_v23  ;;  %v6539_v37 = vmul.f32 0.0625, %v6503_v19  ;;  %v6621_v36 = vmul.f32 %v14516_v35, %v6594_v30 }
0x13ca   :  { %v11017_v34 = vpop.eup %11016  ;;  %11022 = vrsqrt.f32 %v6557_v39  ;;  %v6620_v5 = vmul.f32 %v14516_v35, %v6593_v13 }
0x13cb   :  { %v6595_v0 = vmul.f32 %v11017_v34, %v14427_v17  ;;  %v6559_v14 = vadd.f32 1e-05, %v6539_v37  ;;  %v14563_v47 = vadd.f32 %v14522_v25, %v6621_v36 }
0x13cc   :  { %v14557_v24 = vadd.f32 %v14522_v25, %v6620_v5 }
0x13cd   :  { %11024 = vrsqrt.f32 %v6559_v14  ;;  %v6622_v43 = vmul.f32 %v14516_v35, %v6595_v0 }
0x13ce   :  { %v6664_v7 = vpack.c.bf16 %v14557_v24, %v14554_v10 }
0x13cf   :  { %v14566_v17 = vadd.f32 %v14522_v25, %v6622_v43 }
0x13d0   :  { %9944 = vmatprep.mubr.msk.bf16.mxu1 %vm1221_vm3, %v6664_v7  ;;  %v6506_v55 = vpop.xlane.xlu1 %6505 }
0x13d1   :  { %v6540_v8 = vmul.f32 0.0625, %v6506_v55  ;;  %v6665_v58 = vpack.c.bf16 %v14566_v17, %v14563_v47 }
0x13d2   :  { %v11019_v60 = vpop.eup %11018 }
0x13d3   :  { %v6560_v26 = vadd.f32 1e-05, %v6540_v8  ;;  %9945 = vmatmul.mubr.msk.bf16.gmra.mxu1 %vm1221_vm3, %v6665_v58  ;;  %v6596_v27 = vmul.f32 %v11019_v60, %v14435_v46 }
0x13d4   :  { %v6512_v51 = vpop.xlane.xlu1 %6511  ;;  %v6509_v1 = vpop.xlane.xlu0 %6508 }
0x13d5   :  { %11026 = vrsqrt.f32 %v6560_v26  ;;  %v6542_v63 = vmul.f32 0.0625, %v6512_v51  ;;  %v6541_v28 = vmul.f32 0.0625, %v6509_v1  ;;  %v6623_v31 = vmul.f32 %v14516_v35, %v6596_v27 }
0x13d6   :  { %v11021_v4 = vpop.eup %11020 }
0x13d7   :  { %v11023_v33 = vpop.eup %11022  ;;  %v6598_v11 = vmul.f32 %v11021_v4, %v14440_v22  ;;  %v6562_v21 = vadd.f32 1e-05, %v6542_v63  ;;  %v6561_v61 = vadd.f32 1e-05, %v6541_v28  ;;  %v14580_v22 = vadd.f32 %v14522_v25, %v6623_v31 }
0x13d8   :  { %v6515_v50 = vpop.xlane.xlu0 %6514  ;;  %v6597_v16 = vmul.f32 %v11023_v33, %v14443_v12 }
0x13d9   :  { %11028 = vrsqrt.f32 %v6562_v21  ;;  %v6543_v53 = vmul.f32 0.0625, %v6515_v50  ;;  %v6625_v6 = vmul.f32 %v14516_v35, %v6598_v11 }
0x13da   :  { %v11025_v42 = vpop.eup %11024  ;;  %11030 = vrsqrt.f32 %v6561_v61  ;;  %v6624_v46 = vmul.f32 %v14516_v35, %v6597_v16 }
0x13db   :  { %v6599_v38 = vmul.f32 %v11025_v42, %v14451_v56  ;;  %v6563_v59 = vadd.f32 1e-05, %v6543_v53  ;;  %v14589_v41 = vadd.f32 %v14522_v25, %v6625_v6 }
0x13dc   :  { %v14583_v45 = vadd.f32 %v14522_v25, %v6624_v46 }
0x13dd   :  { %11032 = vrsqrt.f32 %v6563_v59  ;;  %v6626_v12 = vmul.f32 %v14516_v35, %v6599_v38 }
0x13de   :  { %v6666_v44 = vpack.c.bf16 %v14583_v45, %v14580_v22 }
0x13df   :  { %v14592_v56 = vadd.f32 %v14522_v25, %v6626_v12 }
0x13e0   :  { %9948 = vmatprep.mubr.msk.bf16.mxu1 %vm1221_vm3, %v6666_v44  ;;  %v10592_v44 = vld [vmem:[%s16431_s27 + $0x10] sm:$0xff]  }
0x13e1   :  { %v6518_v52 = vpop.xlane.xlu1 %6517  ;;  %v6667_v3 = vpack.c.bf16 %v14592_v56, %v14589_v41  ;;  %9970 = vmatprep.subr.bf16.mxu0 %v10592_v44 }
0x13e2   :  { %v11027_v30 = vpop.eup %11026  ;;  %v6544_v23 = vmul.f32 0.0625, %v6518_v52  ;;  %9971 = vmatpush3.bf16.msra.mxu0 %v10592_v44  ;;  %v10594_v52 = vld [vmem:[%s16431_s27] sm:$0xff]  }
0x13e3   :  { %9949 = vmatmul.mubr.msk.bf16.gmra.mxu1 %vm1221_vm3, %v6667_v3  ;;  %v6600_v19 = vmul.f32 %v11027_v30, %v14460_v2 }
0x13e4   :  { %v6564_v39 = vadd.f32 1e-05, %v6544_v23 }
0x13e5   :  { %v6524_v13 = vpop.xlane.xlu1 %6523  ;;  %v6521_v15 = vpop.xlane.xlu0 %6520  ;;  %v6627_v55 = vmul.f32 %v14516_v35, %v6600_v19 }
0x13e6   :  { %v11029_v37 = vpop.eup %11028  ;;  %11034 = vrsqrt.f32 %v6564_v39  ;;  %v6546_v34 = vmul.f32 0.0625, %v6524_v13  ;;  %v6545_v5 = vmul.f32 0.0625, %v6521_v15 }
0x13e7   :  { %v11031_v0 = vpop.eup %11030  ;;  %v6602_v14 = vmul.f32 %v11029_v37, %v14465_v54  ;;  %v14606_v54 = vadd.f32 %v14522_v25, %v6627_v55 }
0x13e8   :  { %v6566_v36 = vadd.f32 1e-05, %v6546_v34  ;;  %v6565_v43 = vadd.f32 1e-05, %v6545_v5  ;;  %v6601_v7 = vmul.f32 %v11031_v0, %v14468_v20 }
0x13e9   :  { %v6527_v8 = vpop.xlane.xlu0 %6526  ;;  %v6629_v51 = vmul.f32 %v14516_v35, %v6602_v14 }
0x13ea   :  { %v11033_v58 = vpop.eup %11032  ;;  %11036 = vrsqrt.f32 %v6566_v36  ;;  %v6547_v60 = vmul.f32 0.0625, %v6527_v8  ;;  %v6628_v2 = vmul.f32 %v14516_v35, %v6601_v7 }
0x13eb   :  { %v6603_v26 = vmul.f32 %v11033_v58, %v14476_v29  ;;  %11038 = vrsqrt.f32 %v6565_v43  ;;  %v14615_v28 = vadd.f32 %v14522_v25, %v6629_v51 }
0x13ec   :  { %v6567_v1 = vadd.f32 1e-05, %v6547_v60  ;;  %v14609_v27 = vadd.f32 %v14522_v25, %v6628_v2 }
0x13ed   :  { %v6630_v20 = vmul.f32 %v14516_v35, %v6603_v26 }
0x13ee   :  { %11040 = vrsqrt.f32 %v6567_v1  ;;  %v6668_v63 = vpack.c.bf16 %v14609_v27, %v14606_v54 }
0x13ef   :  { %v14618_v29 = vadd.f32 %v14522_v25, %v6630_v20 }
0x13f0   :  { %9952 = vmatprep.mubr.msk.bf16.mxu1 %vm1221_vm3, %v6668_v63 }
0x13f1   :  { %v6669_v4 = vpack.c.bf16 %v14618_v29, %v14615_v28 }
0x13f3   :  { %v11035_v33 = vpop.eup %11034  ;;  %9953 = vmatmul.mubr.msk.bf16.gmra.mxu1 %vm1221_vm3, %v6669_v4 }
0x13f4   :  { %v6604_v11 = vmul.f32 %v11035_v33, %v14484_v48 }
0x13f6   :  { %v6631_v31 = vmul.f32 %v14516_v35, %v6604_v11 }
0x13f7   :  { %v11037_v21 = vpop.eup %11036 }
0x13f8   :  { %v11039_v61 = vpop.eup %11038  ;;  %v6606_v50 = vmul.f32 %v11037_v21, %v14489_v49  ;;  %v14632_v48 = vadd.f32 %v14522_v25, %v6631_v31 }
0x13f9   :  { %v6605_v16 = vmul.f32 %v11039_v61, %v14492_v62 }
0x13fa   :  { %v6633_v38 = vmul.f32 %v14516_v35, %v6606_v50 }
0x13fb   :  { %v11041_v53 = vpop.eup %11040  ;;  %v6632_v42 = vmul.f32 %v14516_v35, %v6605_v16 }
0x13fc   :  { %v6607_v46 = vmul.f32 %v11041_v53, %v14500_v40  ;;  %v14641_v6 = vadd.f32 %v14522_v25, %v6633_v38 }
0x13fd   :  { %v14635_v59 = vadd.f32 %v14522_v25, %v6632_v42 }
0x13fe   :  { %v6634_v49 = vmul.f32 %v14516_v35, %v6607_v46  ;;  %v10593_v35 = vld [vmem:[%s16431_s27 + $0x8] sm:$0xff]  }
0x13ff   :  { %v6670_v62 = vpack.c.bf16 %v14635_v59, %v14632_v48  ;;  %9972 = vmatprep.subr.bf16.mxu0 %v10593_v35 }
0x1400   :  { %v14644_v40 = vadd.f32 %v14522_v25, %v6634_v49  ;;  %9973 = vmatpush3.bf16.msra.mxu0 %v10593_v35  ;;  %v14654_v25 = vld [vmem:[%s16434_s1] ss:$0 sm:$0xff] }
0x1401   :  { %9956 = vmatprep.mubr.msk.bf16.mxu1 %vm1221_vm3, %v6670_v62  ;;  %9974 = vmatprep.subr.bf16.mxu0 %v10594_v52 }
0x1402   :  { %v6671_v12 = vpack.c.bf16 %v14644_v40, %v14641_v6 }
0x1404   :  { %9957 = vmatmul.mubr.msk.bf16.gmra.mxu1 %vm1221_vm3, %v6671_v12  ;;  %9975 = vmatpush3.bf16.msra.mxu0 %v10594_v52 }
0x1483   :  { %v9942_v3 = vpop.f32.mrf.mxu1 }
0x1484   :  { %v6760_v13 = vadd.f32 %v9942_v3, %v14654_v25 }
0x1485   :  { %v6751_v30 = vpop.f32.mrf.mxu1 }
0x1486   :  { %v6752_v39 = vadd.f32 %v14654_v25, %v6751_v30  ;;  %v6832_v14 = vmax.f32 %v6760_v13, 0.0 }
0x1487   :  { %v9943_v23 = vpop.f32.mrf.mxu1 }
0x1488   :  { %v6763_v19 = vadd.f32 %v9943_v23, %v14654_v25  ;;  %v6830_v5 = vmax.f32 %v6752_v39, 0.0 }
0x1489   :  { %v6754_v15 = vpop.f32.mrf.mxu1 }
0x148a   :  { %v6755_v37 = vadd.f32 %v14654_v25, %v6754_v15  ;;  %v6833_v34 = vmax.f32 %v6763_v19, 0.0 }
0x148c   :  { %v6831_v0 = vmax.f32 %v6755_v37, 0.0  ;;  %v6851_v43 = vpack.c.bf16 %v6833_v34, %v6832_v14 }
0x148e   :  { %v6850_v36 = vpack.c.bf16 %v6831_v0, %v6830_v5 }
0x1490   :  { %9976 = vmatprep.mubr.msk.bf16.mxu0 %vm3823_vm7, %v6850_v36 }
0x1491   :  { %9977 = vmatmul.mubr.msk.bf16.vlgmr.msra.gmra.mxu0 %vm3823_vm7, %v6851_v43 }
0x1493   :  { %v9946_v7 = vpop.f32.mrf.mxu1 }
0x1494   :  { %v6776_v2 = vadd.f32 %v9946_v7, %v14654_v25 }
0x1495   :  { %v6767_v55 = vpop.f32.mrf.mxu1 }
0x1496   :  { %v6768_v58 = vadd.f32 %v14654_v25, %v6767_v55  ;;  %v6836_v4 = vmax.f32 %v6776_v2, 0.0 }
0x1497   :  { %v9947_v8 = vpop.f32.mrf.mxu1 }
0x1498   :  { %v6779_v60 = vadd.f32 %v9947_v8, %v14654_v25  ;;  %v6834_v20 = vmax.f32 %v6768_v58, 0.0 }
0x1499   :  { %v6770_v26 = vpop.f32.mrf.mxu1 }
0x149a   :  { %v6771_v51 = vadd.f32 %v14654_v25, %v6770_v26  ;;  %v6837_v1 = vmax.f32 %v6779_v60, 0.0 }
0x149c   :  { %v6835_v63 = vmax.f32 %v6771_v51, 0.0  ;;  %v6853_v11 = vpack.c.bf16 %v6837_v1, %v6836_v4 }
0x149e   :  { %v6852_v33 = vpack.c.bf16 %v6835_v63, %v6834_v20 }
0x14a0   :  { %9980 = vmatprep.mubr.msk.bf16.mxu0 %vm3823_vm7, %v6852_v33 }
0x14a1   :  { %9981 = vmatmul.mubr.msk.bf16.gmra.mxu0 %vm3823_vm7, %v6853_v11 }
0x14a3   :  { %v9950_v21 = vpop.f32.mrf.mxu1 }
0x14a4   :  { %v6792_v53 = vadd.f32 %v9950_v21, %v14654_v25  ;;  %v14687_v21 = vld [vmem:[%s11308_s21] ss:$0 sm:$0xff]  ;;  %s16435_s21 = sld [smem:[#allocation5_spill]] }
0x14a5   :  { %v6783_v61 = vpop.f32.mrf.mxu1 }
0x14a6   :  { %v6784_v16 = vadd.f32 %v14654_v25, %v6783_v61  ;;  %v6840_v12 = vmax.f32 %v6792_v53, 0.0 }
0x14a7   :  { %v9951_v50 = vpop.f32.mrf.mxu1 }
0x14a8   :  { %v6795_v31 = vadd.f32 %v9951_v50, %v14654_v25  ;;  %v6838_v49 = vmax.f32 %v6784_v16, 0.0 }
0x14a9   :  { %v6786_v42 = vpop.f32.mrf.mxu1 }
0x14aa   :  { %v6787_v46 = vadd.f32 %v14654_v25, %v6786_v42  ;;  %v6841_v38 = vmax.f32 %v6795_v31, 0.0 }
0x14ac   :  { %v6839_v62 = vmax.f32 %v6787_v46, 0.0  ;;  %v6855_v35 = vpack.c.bf16 %v6841_v38, %v6840_v12 }
0x14ae   :  { %v6854_v44 = vpack.c.bf16 %v6839_v62, %v6838_v49 }
0x14b0   :  { %9984 = vmatprep.mubr.msk.bf16.mxu0 %vm3823_vm7, %v6854_v44 }
0x14b1   :  { %9985 = vmatmul.mubr.msk.bf16.gmra.mxu0 %vm3823_vm7, %v6855_v35 }
0x14b3   :  { %v9954_v52 = vpop.f32.mrf.mxu1 }
0x14b4   :  { %v6808_v19 = vadd.f32 %v9954_v52, %v14654_v25 }
0x14b5   :  { %v6799_v3 = vpop.f32.mrf.mxu1 }
0x14b6   :  { %v6800_v23 = vadd.f32 %v14654_v25, %v6799_v3  ;;  %v6844_v0 = vmax.f32 %v6808_v19, 0.0 }
0x14b7   :  { %v9955_v30 = vpop.f32.mrf.mxu1 }
0x14b8   :  { %v6811_v39 = vadd.f32 %v9955_v30, %v14654_v25  ;;  %v6842_v34 = vmax.f32 %v6800_v23, 0.0 }
0x14b9   :  { %v6802_v13 = vpop.f32.mrf.mxu1 }
0x14ba   :  { %v6803_v15 = vadd.f32 %v14654_v25, %v6802_v13  ;;  %v6845_v37 = vmax.f32 %v6811_v39, 0.0 }
0x14bc   :  { %v6843_v5 = vmax.f32 %v6803_v15, 0.0  ;;  %v6857_v36 = vpack.c.bf16 %v6845_v37, %v6844_v0 }
0x14be   :  { %v6856_v14 = vpack.c.bf16 %v6843_v5, %v6842_v34 }
0x14c0   :  { %9988 = vmatprep.mubr.msk.bf16.mxu0 %vm3823_vm7, %v6856_v14 }
0x14c1   :  { %9989 = vmatmul.mubr.msk.bf16.gmra.mxu0 %vm3823_vm7, %v6857_v36 }
0x14c4   :  { %v9958_v43 = vpop.f32.mrf.mxu1 }
0x14c5   :  { %v6824_v60 = vadd.f32 %v9958_v43, %v14654_v25 }
0x14c6   :  { %v6815_v7 = vpop.f32.mrf.mxu1 }
0x14c7   :  { %v6816_v8 = vadd.f32 %v14654_v25, %v6815_v7  ;;  %v6848_v63 = vmax.f32 %v6824_v60, 0.0 }
0x14c8   :  { %v9959_v55 = vpop.f32.mrf.mxu1 }
0x14c9   :  { %v6827_v58 = vadd.f32 %v9959_v55, %v14654_v25  ;;  %v6846_v1 = vmax.f32 %v6816_v8, 0.0 }
0x14ca   :  { %v6818_v2 = vpop.f32.mrf.mxu1 }
0x14cb   :  { %v6819_v26 = vadd.f32 %v14654_v25, %v6818_v2  ;;  %v6849_v51 = vmax.f32 %v6827_v58, 0.0 }
0x14cd   :  { %v6847_v20 = vmax.f32 %v6819_v26, 0.0  ;;  %v6859_v33 = vpack.c.bf16 %v6849_v51, %v6848_v63 }
0x14cf   :  { %v6858_v4 = vpack.c.bf16 %v6847_v20, %v6846_v1 }
0x14d1   :  { %9992 = vmatprep.mubr.msk.bf16.mxu0 %vm3823_vm7, %v6858_v4 }
0x14d2   :  { %9993 = vmatmul.mubr.msk.bf16.gmra.mxu0 %vm3823_vm7, %v6859_v33 }
0x1551   :  { %v9978_v11 = vpop.f32.mrf.mxu0 }
0x1552   :  { %v7003_v50 = vadd.f32 %v9978_v11, %v14687_v21 }
0x1553   :  { %v6994_v61 = vpop.f32.mrf.mxu0 }
0x1554   :  { %v6995_v16 = vadd.f32 %v14687_v21, %v6994_v61  ;;  %v14695_v42 = vadd.f32 %v7003_v50, %v14537_v9 }
0x1555   :  { %v9979_v31 = vpop.f32.mrf.mxu0 }
0x1556   :  { %v14692_v25 = vadd.f32 %v6995_v16, %v14528_v57  ;;  %v7006_v46 = vadd.f32 %v9979_v31, %v14687_v21  ;;  %v7099_v9 = vsel %vm1221_vm3, %v14695_v42, 0.0 }
0x1557   :  { %v6997_v53 = vpop.f32.mrf.mxu0 }
0x1558   :  { %v6998_v38 = vadd.f32 %v14687_v21, %v6997_v53  ;;  %v7093_v49 = vsel %vm1221_vm3, %v14692_v25, 0.0  ;;  %v14705_v12 = vadd.f32 %v7006_v46, %v14540_v32 }
0x1559   :  { %7094 = vadd.xlane.f32.xlu1 %v7093_v49 }
0x155a   :  { %v14702_v62 = vadd.f32 %v6998_v38, %v14531_v18  ;;  %v7102_v44 = vsel %vm1221_vm3, %v14705_v12, 0.0 }
0x155c   :  { %v7096_v57 = vsel %vm1221_vm3, %v14702_v62, 0.0 }
0x155d   :  { %7097 = vadd.xlane.f32.xlu0 %v7096_v57  ;;  %7100 = vadd.xlane.f32.xlu1 %v7099_v9 }
0x1561   :  { %7103 = vadd.xlane.f32.xlu0 %v7102_v44  ;;  %v9982_v35 = vpop.f32.mrf.mxu0 }
0x1562   :  { %v7019_v18 = vadd.f32 %v9982_v35, %v14687_v21 }
0x1563   :  { %v7010_v52 = vpop.f32.mrf.mxu0 }
0x1564   :  { %v7011_v3 = vadd.f32 %v14687_v21, %v7010_v52  ;;  %v14719_v39 = vadd.f32 %v7019_v18, %v14563_v47 }
0x1565   :  { %v9983_v32 = vpop.f32.mrf.mxu0 }
0x1566   :  { %v14716_v30 = vadd.f32 %v7011_v3, %v14554_v10  ;;  %v7022_v19 = vadd.f32 %v9983_v32, %v14687_v21  ;;  %v7111_v47 = vsel %vm1221_vm3, %v14719_v39, 0.0 }
0x1567   :  { %v7013_v23 = vpop.f32.mrf.mxu0 }
0x1568   :  { %v7014_v13 = vadd.f32 %v14687_v21, %v7013_v23  ;;  %v7105_v15 = vsel %vm1221_vm3, %v14716_v30, 0.0  ;;  %v14729_v34 = vadd.f32 %v7022_v19, %v14566_v17 }
0x1569   :  { %7106 = vadd.xlane.f32.xlu1 %v7105_v15 }
0x156a   :  { %v14726_v37 = vadd.f32 %v7014_v13, %v14557_v24  ;;  %v7114_v5 = vsel %vm1221_vm3, %v14729_v34, 0.0 }
0x156c   :  { %v7108_v10 = vsel %vm1221_vm3, %v14726_v37, 0.0 }
0x156d   :  { %7109 = vadd.xlane.f32.xlu0 %v7108_v10  ;;  %7112 = vadd.xlane.f32.xlu1 %v7111_v47 }
0x1571   :  { %7115 = vadd.xlane.f32.xlu0 %v7114_v5  ;;  %v9986_v0 = vpop.f32.mrf.mxu0 }
0x1572   :  { %v7035_v24 = vadd.f32 %v9986_v0, %v14687_v21 }
0x1573   :  { %v7026_v14 = vpop.f32.mrf.mxu0 }
0x1574   :  { %v7027_v36 = vadd.f32 %v14687_v21, %v7026_v14  ;;  %v14743_v55 = vadd.f32 %v7035_v24, %v14589_v41 }
0x1575   :  { %v9987_v17 = vpop.f32.mrf.mxu0 }
0x1576   :  { %v14740_v43 = vadd.f32 %v7027_v36, %v14580_v22  ;;  %v7038_v8 = vadd.f32 %v9987_v17, %v14687_v21  ;;  %v7123_v41 = vsel %vm1221_vm3, %v14743_v55, 0.0 }
0x1577   :  { %v7029_v7 = vpop.f32.mrf.mxu0 }
0x1578   :  { %v7030_v58 = vadd.f32 %v14687_v21, %v7029_v7  ;;  %v7117_v60 = vsel %vm1221_vm3, %v14740_v43, 0.0  ;;  %v14753_v26 = vadd.f32 %v7038_v8, %v14592_v56 }
0x1579   :  { %7118 = vadd.xlane.f32.xlu1 %v7117_v60 }
0x157a   :  { %v14750_v2 = vadd.f32 %v7030_v58, %v14583_v45  ;;  %v7126_v51 = vsel %vm1221_vm3, %v14753_v26, 0.0 }
0x157c   :  { %v7120_v22 = vsel %vm1221_vm3, %v14750_v2, 0.0 }
0x157d   :  { %7121 = vadd.xlane.f32.xlu0 %v7120_v22  ;;  %7124 = vadd.xlane.f32.xlu1 %v7123_v41 }
0x1581   :  { %7127 = vadd.xlane.f32.xlu0 %v7126_v51  ;;  %v9990_v1 = vpop.f32.mrf.mxu0 }
0x1582   :  { %v7051_v45 = vadd.f32 %v9990_v1, %v14687_v21 }
0x1583   :  { %v7042_v20 = vpop.f32.mrf.mxu0 }
0x1584   :  { %v7043_v63 = vadd.f32 %v14687_v21, %v7042_v20  ;;  %v14767_v11 = vadd.f32 %v7051_v45, %v14615_v28 }
0x1585   :  { %v9991_v56 = vpop.f32.mrf.mxu0 }
0x1586   :  { %v14764_v4 = vadd.f32 %v7043_v63, %v14606_v54  ;;  %v7054_v61 = vadd.f32 %v9991_v56, %v14687_v21  ;;  %v7135_v28 = vsel %vm1221_vm3, %v14767_v11, 0.0 }
0x1587   :  { %v7045_v33 = vpop.f32.mrf.mxu0 }
0x1588   :  { %v7046_v50 = vadd.f32 %v14687_v21, %v7045_v33  ;;  %v7129_v16 = vsel %vm1221_vm3, %v14764_v4, 0.0  ;;  %v14777_v53 = vadd.f32 %v7054_v61, %v14618_v29 }
0x1589   :  { %7130 = vadd.xlane.f32.xlu1 %v7129_v16 }
0x158a   :  { %v14774_v31 = vadd.f32 %v7046_v50, %v14609_v27  ;;  %v7138_v46 = vsel %vm1221_vm3, %v14777_v53, 0.0 }
0x158c   :  { %v7132_v54 = vsel %vm1221_vm3, %v14774_v31, 0.0 }
0x158d   :  { %7133 = vadd.xlane.f32.xlu0 %v7132_v54  ;;  %7136 = vadd.xlane.f32.xlu1 %v7135_v28 }
0x1591   :  { %7139 = vadd.xlane.f32.xlu0 %v7138_v46 }
0x1592   :  { %v9994_v38 = vpop.f32.mrf.mxu0 }
0x1593   :  { %v7067_v27 = vadd.f32 %v9994_v38, %v14687_v21 }
0x1594   :  { %v7058_v49 = vpop.f32.mrf.mxu0 }
0x1595   :  { %v7059_v57 = vadd.f32 %v14687_v21, %v7058_v49  ;;  %v14791_v35 = vadd.f32 %v7067_v27, %v14641_v6 }
0x1596   :  { %v9995_v29 = vpop.f32.mrf.mxu0 }
0x1597   :  { %v14788_v9 = vadd.f32 %v7059_v57, %v14632_v48  ;;  %v7070_v52 = vadd.f32 %v9995_v29, %v14687_v21  ;;  %v7147_v6 = vsel %vm1221_vm3, %v14791_v35, 0.0 }
0x1598   :  { %v7061_v44 = vpop.f32.mrf.mxu0 }
0x1599   :  { %v7062_v18 = vadd.f32 %v14687_v21, %v7061_v44  ;;  %v7141_v3 = vsel %vm1221_vm3, %v14788_v9, 0.0  ;;  %v14801_v23 = vadd.f32 %v7070_v52, %v14644_v40 }
0x159a   :  { %7142 = vadd.xlane.f32.xlu1 %v7141_v3 }
0x159b   :  { %v14798_v32 = vadd.f32 %v7062_v18, %v14635_v59  ;;  %v7150_v21 = vsel %vm1221_vm3, %v14801_v23, 0.0 }
0x159d   :  { %v7144_v48 = vsel %vm1221_vm3, %v14798_v32, 0.0 }
0x159e   :  { %7145 = vadd.xlane.f32.xlu0 %v7144_v48  ;;  %7148 = vadd.xlane.f32.xlu1 %v7147_v6 }
0x15a2   :  { %7151 = vadd.xlane.f32.xlu0 %v7150_v21 }
0x15e2   :  { %v7095_v19 = vpop.xlane.xlu1 %7094 }
0x15e3   :  { %v7153_v13 = vmul.f32 0.0625, %v7095_v19 }
0x15e5   :  { %v14810_v59 = vsub.f32 %v14692_v25, %v7153_v13 }
0x15e6   :  { %v7101_v15 = vpop.xlane.xlu1 %7100  ;;  %v7098_v40 = vpop.xlane.xlu0 %7097 }
0x15e7   :  { %v7155_v10 = vmul.f32 0.0625, %v7101_v15  ;;  %v7154_v47 = vmul.f32 0.0625, %v7098_v40  ;;  %v7193_v5 = vmul.f32 %v14810_v59, %v14810_v59 }
0x15e9   :  { %v14815_v0 = vsub.f32 %v14695_v42, %v7155_v10  ;;  %v14818_v14 = vsub.f32 %v14702_v62, %v7154_v47  ;;  %v7213_v24 = vsel %vm1221_vm3, %v7193_v5, 0.0  ;;  %v10597_v10 = vld [vmem:[%s16435_s21 + $0x4] ss:$20 sps:$4 sm:$0xff]   ;;  %v10600_v47 = vld [vmem:[%s16435_s21 + $0xc] ss:$20 sps:$4 sm:$0xff]  }
0x15ea   :  { %7214 = vadd.xlane.f32.xlu1 %v7213_v24  ;;  %v7104_v36 = vpop.xlane.xlu0 %7103  ;;  %v10595_v5 = vld [vmem:[%s16435_s21] ss:$20 sps:$4 sm:$0xff]   ;;  %v10598_v24 = vld [vmem:[%s16435_s21 + $0x8] ss:$20 sps:$4 sm:$0xff]   ;;  %7520 = vmatprep.subr.bf16.mxu1 %v10597_v10 }
0x15eb   :  { %v7156_v17 = vmul.f32 0.0625, %v7104_v36  ;;  %v7195_v25 = vmul.f32 %v14815_v0, %v14815_v0  ;;  %v7194_v7 = vmul.f32 %v14818_v14, %v14818_v14  ;;  %7653 = vmatprep.subr.bf16.mxu0 %v10600_v47  ;;  %7521 = vmatpush1.bf16.msra.mxu1 %v10595_v5 }
0x15ec   :  { %7654 = vmatpush1.bf16.msra.mxu0 %v10598_v24 }
0x15ed   :  { %v14826_v8 = vsub.f32 %v14705_v12, %v7156_v17  ;;  %v7219_v42 = vsel %vm1221_vm3, %v7195_v25, 0.0  ;;  %v7216_v58 = vsel %vm1221_vm3, %v7194_v7, 0.0  ;;  %v11153_v25 = vmov 0  }
0x15ee   :  { %7220 = vadd.xlane.f32.xlu1 %v7219_v42  ;;  %7217 = vadd.xlane.f32.xlu0 %v7216_v58 }
0x15ef   :  { %v7196_v62 = vmul.f32 %v14826_v8, %v14826_v8  ;;  %7538 = vmatprep.mubr.bf16.mxu1 %v11153_v25  ;;  %7671 = vmatprep.mubr.bf16.mxu0 %v11153_v25 }
0x15f1   :  { %v7222_v60 = vsel %vm1221_vm3, %v7196_v62, 0.0 }
0x15f2   :  { %v7107_v22 = vpop.xlane.xlu1 %7106  ;;  %7223 = vadd.xlane.f32.xlu0 %v7222_v60 }
0x15f3   :  { %v7157_v41 = vmul.f32 0.0625, %v7107_v22 }
0x15f5   :  { %v14834_v51 = vsub.f32 %v14716_v30, %v7157_v41 }
0x15f6   :  { %v7113_v1 = vpop.xlane.xlu1 %7112  ;;  %v7110_v12 = vpop.xlane.xlu0 %7109 }
0x15f7   :  { %v7159_v20 = vmul.f32 0.0625, %v7113_v1  ;;  %v7158_v45 = vmul.f32 0.0625, %v7110_v12  ;;  %v7197_v63 = vmul.f32 %v14834_v51, %v14834_v51 }
0x15f9   :  { %v14839_v56 = vsub.f32 %v14719_v39, %v7159_v20  ;;  %v14842_v33 = vsub.f32 %v14726_v37, %v7158_v45  ;;  %v7225_v61 = vsel %vm1221_vm3, %v7197_v63, 0.0 }
0x15fa   :  { %7226 = vadd.xlane.f32.xlu1 %v7225_v61  ;;  %v7116_v50 = vpop.xlane.xlu0 %7115 }
0x15fb   :  { %v7160_v16 = vmul.f32 0.0625, %v7116_v50  ;;  %v7199_v30 = vmul.f32 %v14839_v56, %v14839_v56  ;;  %v7198_v54 = vmul.f32 %v14842_v33, %v14842_v33 }
0x15fd   :  { %v14850_v28 = vsub.f32 %v14729_v34, %v7160_v16  ;;  %v7231_v39 = vsel %vm1221_vm3, %v7199_v30, 0.0  ;;  %v7228_v46 = vsel %vm1221_vm3, %v7198_v54, 0.0 }
0x15fe   :  { %7232 = vadd.xlane.f32.xlu1 %v7231_v39  ;;  %7229 = vadd.xlane.f32.xlu0 %v7228_v46 }
0x15ff   :  { %v7200_v37 = vmul.f32 %v14850_v28, %v14850_v28 }
0x1601   :  { %v7234_v38 = vsel %vm1221_vm3, %v7200_v37, 0.0 }
0x1602   :  { %v7119_v49 = vpop.xlane.xlu1 %7118  ;;  %7235 = vadd.xlane.f32.xlu0 %v7234_v38 }
0x1603   :  { %v7161_v27 = vmul.f32 0.0625, %v7119_v49 }
0x1605   :  { %v14858_v57 = vsub.f32 %v14740_v43, %v7161_v27 }
0x1606   :  { %v7125_v29 = vpop.xlane.xlu1 %7124  ;;  %v7122_v34 = vpop.xlane.xlu0 %7121 }
0x1607   :  { %v7163_v44 = vmul.f32 0.0625, %v7125_v29  ;;  %v7162_v52 = vmul.f32 0.0625, %v7122_v34  ;;  %v7201_v18 = vmul.f32 %v14858_v57, %v14858_v57 }
0x1609   :  { %v14863_v3 = vsub.f32 %v14743_v55, %v7163_v44  ;;  %v14866_v48 = vsub.f32 %v14750_v2, %v7162_v52  ;;  %v7237_v43 = vsel %vm1221_vm3, %v7201_v18, 0.0 }
0x160a   :  { %7238 = vadd.xlane.f32.xlu1 %v7237_v43  ;;  %v7128_v6 = vpop.xlane.xlu0 %7127 }
0x160b   :  { %v7164_v21 = vmul.f32 0.0625, %v7128_v6  ;;  %v7203_v19 = vmul.f32 %v14863_v3, %v14863_v3  ;;  %v7202_v13 = vmul.f32 %v14866_v48, %v14866_v48 }
0x160d   :  { %v14874_v15 = vsub.f32 %v14753_v26, %v7164_v21  ;;  %v7243_v55 = vsel %vm1221_vm3, %v7203_v19, 0.0  ;;  %v7240_v2 = vsel %vm1221_vm3, %v7202_v13, 0.0  ;;  %v10601_v19 = vld [vmem:[%s16435_s21 + $0x10] ss:$20 sps:$4 sm:$0xff]  }
0x160e   :  { %7244 = vadd.xlane.f32.xlu1 %v7243_v55  ;;  %7241 = vadd.xlane.f32.xlu0 %v7240_v2 }
0x160f   :  { %v7204_v40 = vmul.f32 %v14874_v15, %v14874_v15  ;;  %9996 = vmatprep.subr.bf16.mxu1 %v10601_v19 }
0x1611   :  { %v7246_v36 = vsel %vm1221_vm3, %v7204_v40, 0.0 }
0x1612   :  { %v7131_v17 = vpop.xlane.xlu1 %7130  ;;  %7247 = vadd.xlane.f32.xlu0 %v7246_v36 }
0x1613   :  { %v7165_v26 = vmul.f32 0.0625, %v7131_v17 }
0x1615   :  { %v14888_v7 = vsub.f32 %v14764_v4, %v7165_v26 }
0x1616   :  { %v7137_v42 = vpop.xlane.xlu1 %7136  ;;  %v7134_v58 = vpop.xlane.xlu0 %7133 }
0x1617   :  { %v7167_v62 = vmul.f32 0.0625, %v7137_v42  ;;  %v7166_v60 = vmul.f32 0.0625, %v7134_v58  ;;  %v7205_v22 = vmul.f32 %v14888_v7, %v14888_v7 }
0x1619   :  { %v14893_v41 = vsub.f32 %v14767_v11, %v7167_v62  ;;  %v14896_v1 = vsub.f32 %v14774_v31, %v7166_v60  ;;  %v7249_v12 = vsel %vm1221_vm3, %v7205_v22, 0.0 }
0x161a   :  { %7250 = vadd.xlane.f32.xlu1 %v7249_v12  ;;  %v7140_v20 = vpop.xlane.xlu0 %7139 }
0x161b   :  { %v7168_v45 = vmul.f32 0.0625, %v7140_v20  ;;  %v7207_v4 = vmul.f32 %v14893_v41, %v14893_v41  ;;  %v7206_v63 = vmul.f32 %v14896_v1, %v14896_v1 }
0x161d   :  { %v14904_v61 = vsub.f32 %v14777_v53, %v7168_v45  ;;  %v7255_v11 = vsel %vm1221_vm3, %v7207_v4, 0.0  ;;  %v7252_v50 = vsel %vm1221_vm3, %v7206_v63, 0.0  ;;  %v14938_v45 = vld [vmem:[%s11313_s3] ss:$0 sm:$0xff]  ;;  %s16437_s3 = sld [smem:[#allocation7_spill]] }
0x161e   :  { %7256 = vadd.xlane.f32.xlu1 %v7255_v11  ;;  %7253 = vadd.xlane.f32.xlu0 %v7252_v50 }
0x161f   :  { %v7208_v31 = vmul.f32 %v14904_v61, %v14904_v61 }
0x1621   :  { %v7258_v16 = vsel %vm1221_vm3, %v7208_v31, 0.0 }
0x1622   :  { %7259 = vadd.xlane.f32.xlu0 %v7258_v16 }
0x1623   :  { %v7143_v30 = vpop.xlane.xlu1 %7142 }
0x1624   :  { %v7169_v54 = vmul.f32 0.0625, %v7143_v30 }
0x1626   :  { %v14912_v39 = vsub.f32 %v14788_v9, %v7169_v54 }
0x1627   :  { %v7149_v46 = vpop.xlane.xlu1 %7148  ;;  %v7146_v53 = vpop.xlane.xlu0 %7145 }
0x1628   :  { %v7171_v37 = vmul.f32 0.0625, %v7149_v46  ;;  %v7170_v38 = vmul.f32 0.0625, %v7146_v53  ;;  %v7209_v49 = vmul.f32 %v14912_v39, %v14912_v39  ;;  %v14943_v53 = vld [vmem:[%s11318_s29] ss:$0 sm:$0xff]  ;;  %s16436_s29 = sld [smem:[#allocation6_spill]] }
0x162a   :  { %v14917_v27 = vsub.f32 %v14791_v35, %v7171_v37  ;;  %v14920_v29 = vsub.f32 %v14798_v32, %v7170_v38  ;;  %v7261_v34 = vsel %vm1221_vm3, %v7209_v49, 0.0 }
0x162b   :  { %7262 = vadd.xlane.f32.xlu1 %v7261_v34  ;;  %v7152_v44 = vpop.xlane.xlu0 %7151 }
0x162c   :  { %v7172_v9 = vmul.f32 0.0625, %v7152_v44  ;;  %v7211_v52 = vmul.f32 %v14917_v27, %v14917_v27  ;;  %v7210_v18 = vmul.f32 %v14920_v29, %v14920_v29 }
0x162e   :  { %v14928_v43 = vsub.f32 %v14801_v23, %v7172_v9  ;;  %v7267_v35 = vsel %vm1221_vm3, %v7211_v52, 0.0  ;;  %v7264_v6 = vsel %vm1221_vm3, %v7210_v18, 0.0 }
0x162f   :  { %7268 = vadd.xlane.f32.xlu1 %v7267_v35  ;;  %7265 = vadd.xlane.f32.xlu0 %v7264_v6 }
0x1630   :  { %v7212_v32 = vmul.f32 %v14928_v43, %v14928_v43 }
0x1632   :  { %v7270_v21 = vsel %vm1221_vm3, %v7212_v32, 0.0 }
0x1633   :  { %7271 = vadd.xlane.f32.xlu0 %v7270_v21 }
0x1673   :  { %v7215_v13 = vpop.xlane.xlu1 %7214 }
0x1674   :  { %v7273_v55 = vmul.f32 0.0625, %v7215_v13 }
0x1676   :  { %v7293_v2 = vadd.f32 1e-05, %v7273_v55 }
0x1677   :  { %v7221_v40 = vpop.xlane.xlu1 %7220  ;;  %v7218_v23 = vpop.xlane.xlu0 %7217 }
0x1678   :  { %11042 = vrsqrt.f32 %v7293_v2  ;;  %v7275_v10 = vmul.f32 0.0625, %v7221_v40  ;;  %v7274_v47 = vmul.f32 0.0625, %v7218_v23 }
0x167a   :  { %v7294_v5 = vadd.f32 1e-05, %v7274_v47  ;;  %v7295_v24 = vadd.f32 1e-05, %v7275_v10 }
0x167b   :  { %v7224_v36 = vpop.xlane.xlu0 %7223 }
0x167c   :  { %v7276_v17 = vmul.f32 0.0625, %v7224_v36  ;;  %11044 = vrsqrt.f32 %v7294_v5 }
0x167d   :  { %11046 = vrsqrt.f32 %v7295_v24 }
0x167e   :  { %v7296_v26 = vadd.f32 1e-05, %v7276_v17 }
0x1680   :  { %11048 = vrsqrt.f32 %v7296_v26 }
0x1683   :  { %v7227_v42 = vpop.xlane.xlu1 %7226 }
0x1684   :  { %v7277_v58 = vmul.f32 0.0625, %v7227_v42 }
0x1685   :  { %v11043_v62 = vpop.eup %11042 }
0x1686   :  { %v7297_v60 = vadd.f32 1e-05, %v7277_v58  ;;  %v7333_v22 = vmul.f32 %v11043_v62, %v14810_v59 }
0x1687   :  { %v7233_v12 = vpop.xlane.xlu1 %7232  ;;  %v7230_v20 = vpop.xlane.xlu0 %7229 }
0x1688   :  { %11050 = vrsqrt.f32 %v7297_v60  ;;  %v7279_v4 = vmul.f32 0.0625, %v7233_v12  ;;  %v7278_v63 = vmul.f32 0.0625, %v7230_v20  ;;  %v7360_v31 = vmul.f32 %v14938_v45, %v7333_v22 }
0x1689   :  { %v11045_v11 = vpop.eup %11044 }
0x168a   :  { %v7298_v50 = vadd.f32 1e-05, %v7278_v63  ;;  %v7334_v16 = vmul.f32 %v11045_v11, %v14818_v14  ;;  %v7299_v30 = vadd.f32 1e-05, %v7279_v4  ;;  %v11047_v46 = vpop.eup %11046  ;;  %v7387_v44 = vadd.f32 %v14943_v53, %v7360_v31 }
0x168b   :  { %v7236_v54 = vpop.xlane.xlu0 %7235  ;;  %v7335_v9 = vmul.f32 %v11047_v46, %v14815_v0 }
0x168c   :  { %v7280_v37 = vmul.f32 0.0625, %v7236_v54  ;;  %v7361_v38 = vmul.f32 %v14938_v45, %v7334_v16  ;;  %11052 = vrsqrt.f32 %v7298_v50 }
0x168d   :  { %v11049_v59 = vpop.eup %11048  ;;  %11054 = vrsqrt.f32 %v7299_v30  ;;  %v7362_v35 = vmul.f32 %v14938_v45, %v7335_v9 }
0x168e   :  { %v7336_v49 = vmul.f32 %v11049_v59, %v14826_v8  ;;  %v7300_v34 = vadd.f32 1e-05, %v7280_v37  ;;  %v7388_v52 = vadd.f32 %v14943_v53, %v7361_v38 }
0x168f   :  { %v7389_v40 = vadd.f32 %v14943_v53, %v7362_v35 }
0x1690   :  { %11056 = vrsqrt.f32 %v7300_v34  ;;  %v14950_v14 = vpack.c.bf16 %v7388_v52, %v7387_v44  ;;  %v7363_v18 = vmul.f32 %v14938_v45, %v7336_v49 }
0x1692   :  { %8899 = vmatmul.mubr.msk.bf16.vlgmr.msra.gmra.mxu1 %vm1221_vm3, %v14950_v14  ;;  %8909 = vmatmul.mubr.msk.bf16.vlgmr.msra.gmra.mxu0 %vm1221_vm3, %v14950_v14  ;;  %v7390_v32 = vadd.f32 %v14943_v53, %v7363_v18 }
0x1693   :  { %v7239_v8 = vpop.xlane.xlu1 %7238  ;;  %7548 = vmatprep.mubr.bf16.mxu1 %v11153_v25  ;;  %7681 = vmatprep.mubr.bf16.mxu0 %v11153_v25 }
0x1694   :  { %v7281_v6 = vmul.f32 0.0625, %v7239_v8  ;;  %9997 = vmatpush3.bf16.msra.mxu1 %v10601_v19  ;;  %v14963_v47 = vpack.c.bf16 %v7390_v32, %v7389_v40 }
0x1695   :  { %v11051_v0 = vpop.eup %11050 }
0x1696   :  { %v7301_v21 = vadd.f32 1e-05, %v7281_v6  ;;  %v7337_v13 = vmul.f32 %v11051_v0, %v14834_v51 }
0x1697   :  { %v7245_v55 = vpop.xlane.xlu1 %7244  ;;  %v7242_v2 = vpop.xlane.xlu0 %7241 }
0x1698   :  { %11058 = vrsqrt.f32 %v7301_v21  ;;  %v7283_v23 = vmul.f32 0.0625, %v7245_v55  ;;  %v7282_v10 = vmul.f32 0.0625, %v7242_v2  ;;  %v7364_v19 = vmul.f32 %v14938_v45, %v7337_v13 }
0x1699   :  { %v11053_v5 = vpop.eup %11052 }
0x169a   :  { %v7302_v24 = vadd.f32 1e-05, %v7282_v10  ;;  %v7338_v36 = vmul.f32 %v11053_v5, %v14842_v33  ;;  %v7303_v17 = vadd.f32 1e-05, %v7283_v23  ;;  %8900 = vmatmul.mubr.msk.bf16.gmra.mxu1 %vm1221_vm3, %v14963_v47  ;;  %8910 = vmatmul.mubr.msk.bf16.gmra.mxu0 %vm1221_vm3, %v14963_v47  ;;  %v11055_v26 = vpop.eup %11054  ;;  %v7391_v12 = vadd.f32 %v14943_v53, %v7364_v19 }
0x169b   :  { %v7248_v51 = vpop.xlane.xlu0 %7247  ;;  %7558 = vmatprep.mubr.bf16.mxu1 %v11153_v25  ;;  %7691 = vmatprep.mubr.bf16.mxu0 %v11153_v25  ;;  %v7339_v22 = vmul.f32 %v11055_v26, %v14839_v56 }
0x169c   :  { %v7284_v42 = vmul.f32 0.0625, %v7248_v51  ;;  %11060 = vrsqrt.f32 %v7302_v24  ;;  %v7365_v33 = vmul.f32 %v14938_v45, %v7338_v36 }
0x169d   :  { %v11057_v58 = vpop.eup %11056  ;;  %11062 = vrsqrt.f32 %v7303_v17  ;;  %v7366_v11 = vmul.f32 %v14938_v45, %v7339_v22 }
0x169e   :  { %v7340_v62 = vmul.f32 %v11057_v58, %v14850_v28  ;;  %v7304_v60 = vadd.f32 1e-05, %v7284_v42  ;;  %v7392_v20 = vadd.f32 %v14943_v53, %v7365_v33 }
0x169f   :  { %v7393_v37 = vadd.f32 %v14943_v53, %v7366_v11 }
0x16a0   :  { %11064 = vrsqrt.f32 %v7304_v60  ;;  %v14978_v4 = vpack.c.bf16 %v7392_v20, %v7391_v12  ;;  %v7367_v63 = vmul.f32 %v14938_v45, %v7340_v62 }
0x16a2   :  { %8901 = vmatmul.mubr.msk.bf16.gmra.mxu1 %vm1221_vm3, %v14978_v4  ;;  %8911 = vmatmul.mubr.msk.bf16.gmra.mxu0 %vm1221_vm3, %v14978_v4  ;;  %v7394_v31 = vadd.f32 %v14943_v53, %v7367_v63 }
0x16a3   :  { %v7251_v28 = vpop.xlane.xlu1 %7250  ;;  %7568 = vmatprep.mubr.bf16.mxu1 %v11153_v25  ;;  %7701 = vmatprep.mubr.bf16.mxu0 %v11153_v25 }
0x16a4   :  { %v7285_v56 = vmul.f32 0.0625, %v7251_v28  ;;  %v14991_v49 = vpack.c.bf16 %v7394_v31, %v7393_v37 }
0x16a5   :  { %v11059_v50 = vpop.eup %11058 }
0x16a6   :  { %v7305_v16 = vadd.f32 1e-05, %v7285_v56  ;;  %v7341_v30 = vmul.f32 %v11059_v50, %v14858_v57 }
0x16a7   :  { %v7257_v54 = vpop.xlane.xlu1 %7256  ;;  %v7254_v46 = vpop.xlane.xlu0 %7253 }
0x16a8   :  { %11066 = vrsqrt.f32 %v7305_v16  ;;  %v7287_v59 = vmul.f32 0.0625, %v7257_v54  ;;  %v7286_v38 = vmul.f32 0.0625, %v7254_v46  ;;  %v7368_v18 = vmul.f32 %v14938_v45, %v7341_v30 }
0x16a9   :  { %v11061_v34 = vpop.eup %11060 }
0x16aa   :  { %v7306_v44 = vadd.f32 1e-05, %v7286_v38  ;;  %v7342_v9 = vmul.f32 %v11061_v34, %v14866_v48  ;;  %v7307_v52 = vadd.f32 1e-05, %v7287_v59  ;;  %8902 = vmatmul.mubr.msk.bf16.gmra.mxu1 %vm1221_vm3, %v14991_v49  ;;  %8912 = vmatmul.mubr.msk.bf16.gmra.mxu0 %vm1221_vm3, %v14991_v49  ;;  %v11063_v8 = vpop.eup %11062  ;;  %v7395_v13 = vadd.f32 %v14943_v53, %v7368_v18 }
0x16ab   :  { %v7260_v57 = vpop.xlane.xlu0 %7259  ;;  %7578 = vmatprep.mubr.bf16.mxu1 %v11153_v25  ;;  %7711 = vmatprep.mubr.bf16.mxu0 %v11153_v25  ;;  %v7343_v21 = vmul.f32 %v11063_v8, %v14863_v3 }
0x16ac   :  { %v7288_v35 = vmul.f32 0.0625, %v7260_v57  ;;  %11068 = vrsqrt.f32 %v7306_v44  ;;  %v7369_v48 = vmul.f32 %v14938_v45, %v7342_v9 }
0x16ad   :  { %v11065_v6 = vpop.eup %11064  ;;  %11070 = vrsqrt.f32 %v7307_v52 }
0x16ae   :  { %v7344_v0 = vmul.f32 %v11065_v6, %v14874_v15  ;;  %v7308_v32 = vadd.f32 1e-05, %v7288_v35  ;;  %v7396_v55 = vadd.f32 %v14943_v53, %v7369_v48  ;;  %v7370_v15 = vmul.f32 %v14938_v45, %v7343_v21 }
0x16b0   :  { %11072 = vrsqrt.f32 %v7308_v32  ;;  %v15006_v2 = vpack.c.bf16 %v7396_v55, %v7395_v13  ;;  %v7371_v40 = vmul.f32 %v14938_v45, %v7344_v0  ;;  %v7397_v17 = vadd.f32 %v14943_v53, %v7370_v15 }
0x16b2   :  { %8903 = vmatmul.mubr.msk.bf16.gmra.mxu1 %vm1221_vm3, %v15006_v2  ;;  %8913 = vmatmul.mubr.msk.bf16.gmra.mxu0 %vm1221_vm3, %v15006_v2  ;;  %v7398_v5 = vadd.f32 %v14943_v53, %v7371_v40 }
0x16b3   :  { %7588 = vmatprep.mubr.bf16.mxu1 %v11153_v25  ;;  %7721 = vmatprep.mubr.bf16.mxu0 %v11153_v25 }
0x16b4   :  { %v7263_v23 = vpop.xlane.xlu1 %7262  ;;  %v15019_v58 = vpack.c.bf16 %v7398_v5, %v7397_v17 }
0x16b5   :  { %v11067_v3 = vpop.eup %11066  ;;  %v7289_v10 = vmul.f32 0.0625, %v7263_v23  ;;  %v15102_v23 = vld [vmem:[%s16437_s3 + $0x190] sm:$0xff] }
0x16b6   :  { %v7345_v24 = vmul.f32 %v11067_v3, %v14888_v7  ;;  %v15105_v3 = vld [vmem:[%s16437_s3 + $0x8] sm:$0xff] }
0x16b7   :  { %v7309_v36 = vadd.f32 1e-05, %v7289_v10  ;;  %v15108_v10 = vld [vmem:[%s16437_s3 + $0x198] sm:$0xff] }
0x16b8   :  { %v7269_v51 = vpop.xlane.xlu1 %7268  ;;  %v7266_v19 = vpop.xlane.xlu0 %7265  ;;  %v7372_v7 = vmul.f32 %v14938_v45, %v7345_v24 }
0x16b9   :  { %11074 = vrsqrt.f32 %v7309_v36  ;;  %v7291_v26 = vmul.f32 0.0625, %v7269_v51  ;;  %v7290_v42 = vmul.f32 0.0625, %v7266_v19  ;;  %v11069_v33 = vpop.eup %11068 }
0x16ba   :  { %v7346_v62 = vmul.f32 %v11069_v33, %v14896_v1  ;;  %8904 = vmatmul.mubr.msk.bf16.gmra.mxu1 %vm1221_vm3, %v15019_v58  ;;  %8914 = vmatmul.mubr.msk.bf16.gmra.mxu0 %vm1221_vm3, %v15019_v58  ;;  %v11071_v22 = vpop.eup %11070  ;;  %v7399_v31 = vadd.f32 %v14943_v53, %v7372_v7  ;;  %v15127_v7 = vld [vmem:[%s16437_s3 + $0x30] sm:$0xff] }
0x16bb   :  { %v7310_v60 = vadd.f32 1e-05, %v7290_v42  ;;  %v7311_v12 = vadd.f32 1e-05, %v7291_v26  ;;  %7598 = vmatprep.mubr.bf16.mxu1 %v11153_v25  ;;  %7731 = vmatprep.mubr.bf16.mxu0 %v11153_v25  ;;  %v7347_v56 = vmul.f32 %v11071_v22, %v14893_v41  ;;  %v15130_v22 = vld [vmem:[%s16437_s3 + $0x1c0] sm:$0xff] }
0x16bc   :  { %v7272_v20 = vpop.xlane.xlu0 %7271  ;;  %v7373_v1 = vmul.f32 %v14938_v45, %v7346_v62 }
0x16bd   :  { %v11073_v63 = vpop.eup %11072  ;;  %v7292_v28 = vmul.f32 0.0625, %v7272_v20  ;;  %11076 = vrsqrt.f32 %v7310_v60  ;;  %v7374_v46 = vmul.f32 %v14938_v45, %v7347_v56  ;;  %v15124_v60 = vld [vmem:[%s16437_s3 + $0x1b8] sm:$0xff] }
0x16be   :  { %v7348_v11 = vmul.f32 %v11073_v63, %v14904_v61  ;;  %v7400_v16 = vadd.f32 %v14943_v53, %v7373_v1  ;;  %11078 = vrsqrt.f32 %v7311_v12 }
0x16bf   :  { %v7312_v50 = vadd.f32 1e-05, %v7292_v28  ;;  %v7401_v37 = vadd.f32 %v14943_v53, %v7374_v46  ;;  %v15147_v46 = vld [vmem:[%s16437_s3 + $0x50] sm:$0xff] }
0x16c0   :  { %v7413_v30 = vpack.c.bf16 %v7400_v16, %v7399_v31  ;;  %v7375_v54 = vmul.f32 %v14938_v45, %v7348_v11 }
0x16c1   :  { %11080 = vrsqrt.f32 %v7312_v50 }
0x16c2   :  { %8905 = vmatmul.mubr.msk.bf16.gmra.mxu1 %vm1221_vm3, %v7413_v30  ;;  %8915 = vmatmul.mubr.msk.bf16.gmra.mxu0 %vm1221_vm3, %v7413_v30  ;;  %v7402_v41 = vadd.f32 %v14943_v53, %v7375_v54 }
0x16c3   :  { %7608 = vmatprep.mubr.bf16.mxu1 %v11153_v25  ;;  %7741 = vmatprep.mubr.bf16.mxu0 %v11153_v25 }
0x16c4   :  { %v7414_v38 = vpack.c.bf16 %v7402_v41, %v7401_v37  ;;  %v15154_v37 = vld [vmem:[%s16437_s3 + $0x1e0] sm:$0xff] }
0x16c6   :  { %v11075_v61 = vpop.eup %11074 }
0x16c7   :  { %v7349_v59 = vmul.f32 %v11075_v61, %v14912_v39 }
0x16c9   :  { %v7376_v9 = vmul.f32 %v14938_v45, %v7349_v59  ;;  %v15157_v59 = vld [vmem:[%s16437_s3 + $0x58] sm:$0xff] }
0x16ca   :  { %v11077_v34 = vpop.eup %11076  ;;  %8906 = vmatmul.mubr.msk.bf16.gmra.mxu1 %vm1221_vm3, %v7414_v38  ;;  %8916 = vmatmul.mubr.msk.bf16.gmra.mxu0 %vm1221_vm3, %v7414_v38 }
0x16cb   :  { %v7350_v44 = vmul.f32 %v11077_v34, %v14920_v29  ;;  %7618 = vmatprep.mubr.bf16.mxu1 %v11153_v25  ;;  %7751 = vmatprep.mubr.bf16.mxu0 %v11153_v25  ;;  %v11079_v52 = vpop.eup %11078  ;;  %v7403_v35 = vadd.f32 %v14943_v53, %v7376_v9 }
0x16cc   :  { %v7351_v8 = vmul.f32 %v11079_v52, %v14917_v27 }
0x16cd   :  { %v7377_v18 = vmul.f32 %v14938_v45, %v7350_v44 }
0x16ce   :  { %v11081_v57 = vpop.eup %11080  ;;  %v7378_v0 = vmul.f32 %v14938_v45, %v7351_v8 }
0x16cf   :  { %v7352_v39 = vmul.f32 %v11081_v57, %v14928_v43  ;;  %v7404_v6 = vadd.f32 %v14943_v53, %v7377_v18 }
0x16d0   :  { %v7405_v27 = vadd.f32 %v14943_v53, %v7378_v0 }
0x16d1   :  { %v7415_v48 = vpack.c.bf16 %v7404_v6, %v7403_v35  ;;  %v7379_v29 = vmul.f32 %v14938_v45, %v7352_v39 }
0x16d3   :  { %8907 = vmatmul.mubr.msk.bf16.gmra.mxu1 %vm1221_vm3, %v7415_v48  ;;  %8917 = vmatmul.mubr.msk.bf16.gmra.mxu0 %vm1221_vm3, %v7415_v48  ;;  %v7406_v43 = vadd.f32 %v14943_v53, %v7379_v29 }
0x16d4   :  { %7628 = vmatprep.mubr.bf16.mxu1 %v11153_v25  ;;  %7761 = vmatprep.mubr.bf16.mxu0 %v11153_v25  ;;  %v7425_v25 = vlaneseq }
0x16d5   :  { %v7416_v32 = vpack.c.bf16 %v7406_v43, %v7405_v27 }
0x16d6   :  { %v15080_v45 = vshrl.u32 %v7425_v25, 7  ;;  %v15185_v25 = vld [vmem:[%s16437_s3 + $0x80] sm:$0xff] }
0x16d8   :  { %v7427_v53 = vsub.s32 0, %v15080_v45 }
0x16db   :  { %8908 = vmatmul.mubr.msk.bf16.gmra.mxu1 %vm1221_vm3, %v7416_v32  ;;  %8918 = vmatmul.mubr.msk.bf16.gmra.mxu0 %vm1221_vm3, %v7416_v32 }
0x16dc   :  { %9998 = vmatprep.mubr.msk.bf16.mxu1 %vm1221_vm3, %v14950_v14  ;;  %v15084_v14 = vld [vmem:[%s16436_s29] sm:$0x1f] }
0x16e3   :  { %9999 = vmatmul.mubr.msk.bf16.vlgmr.msra.gmra.mxu1 %vm1221_vm3, %v14963_v47  ;;  %v7431_v47 = vsub.s32 1, %v15080_v45 }
0x16e4   :  { %10002 = vmatprep.mubr.msk.bf16.mxu1 %vm1221_vm3, %v14978_v4  ;;  %v15088_v4 = vrot.slane %v15084_v14, %v7427_v53  ;;  %v15188_v53 = vld [vmem:[%s16437_s3 + $0x210] sm:$0xff] }
0x16e5   :  { %v15093_v13 = vrot.slane %v15084_v14, %v7431_v47 }
0x16e6   :  { %16438 = vst [vmem:[#allocation30_spill] sm:$0xff] %v15088_v4 }
0x16e7   :  { %16439 = vst [vmem:[#allocation33_spill] sm:$0xff] %v15093_v13 }
0x16eb   :  { %10003 = vmatmul.mubr.msk.bf16.gmra.mxu1 %vm1221_vm3, %v14991_v49 }
0x16ec   :  { %10006 = vmatprep.mubr.msk.bf16.mxu1 %vm1221_vm3, %v15006_v2  ;;  %v15097_v2 = vld [vmem:[%s16437_s3] sm:$0xff] }
0x16f3   :  { %10007 = vmatmul.mubr.msk.bf16.gmra.mxu1 %vm1221_vm3, %v15019_v58  ;;  %v15119_v58 = vld [vmem:[%s16437_s3 + $0x28] sm:$0xff] }
0x16f4   :  { %10010 = vmatprep.mubr.msk.bf16.mxu1 %vm1221_vm3, %v7413_v30 }
0x16fb   :  { %10011 = vmatmul.mubr.msk.bf16.gmra.mxu1 %vm1221_vm3, %v7414_v38  ;;  %v15160_v38 = vld [vmem:[%s16437_s3 + $0x1e8] sm:$0xff] }
0x16fc   :  { %10014 = vmatprep.mubr.msk.bf16.mxu1 %vm1221_vm3, %v7415_v48  ;;  %v15173_v48 = vld [vmem:[%s16437_s3 + $0x78] sm:$0xff] }
0x1703   :  { %10015 = vmatmul.mubr.msk.bf16.gmra.mxu1 %vm1221_vm3, %v7416_v32  ;;  %v15182_v32 = vld [vmem:[%s16437_s3 + $0x208] sm:$0xff] }
0x1752   :  { %v7540_v49 = vpop.f32.mrf.mxu1  ;;  %v15090_v21 = vpop.f32.mrf.mxu0 }
0x1753   :  { %v7541_v55 = vadd.f32 %v7540_v49, %v15088_v4 }
0x1754   :  { %v7542_v40 = vpop.f32.mrf.mxu1  ;;  %v15099_v15 = vpop.f32.mrf.mxu0 }
0x1755   :  { %v7543_v5 = vadd.f32 %v7542_v40, %v15093_v13  ;;  %v7985_v17 = vmul.f32 %v15097_v2, %v7541_v55  ;;  %v8120_v51 = vmul.f32 %v15102_v23, %v7541_v55 }
0x1756   :  { %v7544_v24 = vpop.f32.mrf.mxu1  ;;  %v15111_v36 = vpop.f32.mrf.mxu0 }
0x1757   :  { %v7986_v19 = vmul.f32 %v15105_v3, %v7543_v5  ;;  %v8121_v26 = vmul.f32 %v15108_v10, %v7543_v5  ;;  %v7545_v42 = vadd.f32 %v7544_v24, %v15088_v4  ;;  %v15195_v5 = vld [vmem:[%s16437_s3 + $0xa0] sm:$0xff] }
0x1758   :  { %v7546_v33 = vpop.f32.mrf.mxu1  ;;  %v15121_v62 = vpop.f32.mrf.mxu0  ;;  %16440 = vst [vmem:[#allocation31_spill] sm:$0xff] %v15195_v5 }
0x1759   :  { %v15132_v12 = vadd.f32 %v7986_v19, %v7985_v17  ;;  %v15134_v20 = vadd.f32 %v8121_v26, %v8120_v51  ;;  %v7547_v63 = vadd.f32 %v7546_v33, %v15093_v13  ;;  %v7990_v11 = vmul.f32 %v15119_v58, %v7545_v42  ;;  %v15206_v33 = vld [vmem:[%s16437_s3 + $0xa8] sm:$0xff] }
0x175a   :  { %v7550_v28 = vpop.f32.mrf.mxu1  ;;  %v15137_v1 = vpop.f32.mrf.mxu0  ;;  %v8125_v56 = vmul.f32 %v15124_v60, %v7545_v42  ;;  %v15203_v42 = vld [vmem:[%s16437_s3 + $0x230] sm:$0xff]  ;;  %16442 = vst [vmem:[#allocation24_spill] sm:$0xff] %v15206_v33 }
0x175b   :  { %v7991_v50 = vmul.f32 %v15127_v7, %v7547_v63  ;;  %v8126_v31 = vmul.f32 %v15130_v22, %v7547_v63  ;;  %v7551_v54 = vadd.f32 %v7550_v28, %v15088_v4  ;;  %16441 = vst [vmem:[#allocation26_spill] sm:$0xff] %v15203_v42  ;;  %v15209_v63 = vld [vmem:[%s16437_s3 + $0x238] sm:$0xff] }
0x175c   :  { %v7552_v16 = vpop.f32.mrf.mxu1  ;;  %v15143_v30 = vpop.f32.mrf.mxu0  ;;  %16443 = vst [vmem:[#allocation21_spill] sm:$0xff] %v15209_v63 }
0x175d   :  { %v15149_v41 = vadd.f32 %v7991_v50, %v7990_v11  ;;  %v15151_v61 = vadd.f32 %v8126_v31, %v8125_v56  ;;  %v7553_v9 = vadd.f32 %v7552_v16, %v15093_v13  ;;  %v7995_v18 = vmul.f32 %v15147_v46, %v7551_v54 }
0x175e   :  { %v7554_v34 = vpop.f32.mrf.mxu1  ;;  %v15162_v44 = vpop.f32.mrf.mxu0  ;;  %v8130_v39 = vmul.f32 %v15154_v37, %v7551_v54 }
0x175f   :  { %v7996_v8 = vmul.f32 %v15157_v59, %v7553_v9  ;;  %v8131_v35 = vmul.f32 %v15160_v38, %v7553_v9  ;;  %v7555_v6 = vadd.f32 %v7554_v34, %v15088_v4 }
0x1760   :  { %v7556_v52 = vpop.f32.mrf.mxu1  ;;  %v15165_v57 = vpop.f32.mrf.mxu0 }
0x1761   :  { %v15177_v43 = vadd.f32 %v7996_v8, %v7995_v18  ;;  %v15179_v27 = vadd.f32 %v8131_v35, %v8130_v39  ;;  %v7557_v47 = vadd.f32 %v7556_v52, %v15093_v13  ;;  %v8000_v17 = vmul.f32 %v15173_v48, %v7555_v6  ;;  %v15225_v39 = vld [vmem:[%s16437_s3 + $0xc8] sm:$0xff] }
0x1762   :  { %v7560_v29 = vpop.f32.mrf.mxu1  ;;  %v15175_v0 = vpop.f32.mrf.mxu0  ;;  %v8135_v51 = vmul.f32 %v15182_v32, %v7555_v6  ;;  %16445 = vst [vmem:[#allocation29_spill] sm:$0xff] %v15225_v39 }
0x1763   :  { %v7561_v40 = vadd.f32 %v7560_v29, %v15088_v4  ;;  %v8001_v19 = vmul.f32 %v15185_v25, %v7557_v47  ;;  %v8136_v26 = vmul.f32 %v15188_v53, %v7557_v47  ;;  %v15234_v47 = vld [vmem:[%s16437_s3 + $0x258] sm:$0xff] }
0x1764   :  { %v7562_v49 = vpop.f32.mrf.mxu1  ;;  %v15191_v55 = vpop.f32.mrf.mxu0  ;;  %16449 = vst [vmem:[#allocation25_spill] sm:$0xff] %v15234_v47 }
0x1765   :  { %v7563_v24 = vadd.f32 %v7562_v49, %v15093_v13  ;;  %v15213_v56 = vadd.f32 %v8001_v19, %v8000_v17  ;;  %v15215_v50 = vadd.f32 %v8136_v26, %v8135_v51  ;;  %v8005_v54 = vmul.f32 %v15195_v5, %v7561_v40 }
0x1766   :  { %v7564_v28 = vpop.f32.mrf.mxu1  ;;  %v15211_v11 = vpop.f32.mrf.mxu0  ;;  %v8140_v34 = vmul.f32 %v15203_v42, %v7561_v40  ;;  %v15238_v40 = vld [vmem:[%s16437_s3 + $0xd0] sm:$0xff]  ;;  %v15262_v42 = vld [vmem:[%s16437_s3 + $0x288] sm:$0xff] }
0x1767   :  { %v8006_v9 = vmul.f32 %v15206_v33, %v7563_v24  ;;  %v8141_v52 = vmul.f32 %v15209_v63, %v7563_v24  ;;  %v7565_v18 = vadd.f32 %v7564_v28, %v15088_v4  ;;  %16450 = vst [vmem:[#allocation47_spill] sm:$0xff] %v15238_v40  ;;  %v15241_v24 = vld [vmem:[%s16437_s3 + $0x260] sm:$0xff]  ;;  %v15259_v33 = vld [vmem:[%s16437_s3 + $0xf8] sm:$0xff]  ;;  %16457 = vst [vmem:[#allocation35_spill] sm:$0xff] %v15262_v42 }
0x1768   :  { %v7566_v31 = vpop.f32.mrf.mxu1  ;;  %v15217_v16 = vpop.f32.mrf.mxu0  ;;  %16451 = vst [vmem:[#allocation49_spill] sm:$0xff] %v15241_v24  ;;  %v15256_v63 = vld [vmem:[%s16437_s3 + $0x280] sm:$0xff]  ;;  %16456 = vst [vmem:[#allocation51_spill] sm:$0xff] %v15259_v33 }
0x1769   :  { %16444 = vst [vmem:[#allocation32_spill] sm:$0xff] %v15217_v16  ;;  %v15229_v6 = vadd.f32 %v8006_v9, %v8005_v54  ;;  %v15231_v29 = vadd.f32 %v8141_v52, %v8140_v34  ;;  %v7567_v49 = vadd.f32 %v7566_v31, %v15093_v13  ;;  %v8010_v19 = vmul.f32 %v15225_v39, %v7565_v18  ;;  %v15250_v34 = vld [vmem:[%s16437_s3 + $0xf0] sm:$0xff] }
0x176a   :  { %v7570_v8 = vpop.f32.mrf.mxu1  ;;  %v15227_v35 = vpop.f32.mrf.mxu0  ;;  %v8145_v26 = vmul.f32 %v15234_v47, %v7565_v18  ;;  %16453 = vst [vmem:[#allocation48_spill] sm:$0xff] %v15250_v34  ;;  %16455 = vst [vmem:[#allocation50_spill] sm:$0xff] %v15256_v63 }
0x176b   :  { %16446 = vst [vmem:[#allocation20_spill] sm:$0xff] %v15227_v35  ;;  %16447 = vst [vmem:[#allocation22_spill] sm:$0xff] %v15229_v6  ;;  %v8011_v28 = vmul.f32 %v15238_v40, %v7567_v49  ;;  %v8146_v54 = vmul.f32 %v15241_v24, %v7567_v49  ;;  %v7571_v31 = vadd.f32 %v7570_v8, %v15088_v4  ;;  %v7435_v8 = vsub.s32 2, %v15080_v45 }
0x176c   :  { %16448 = vst [vmem:[#allocation23_spill] sm:$0xff] %v15231_v29  ;;  %v7572_v17 = vpop.f32.mrf.mxu1  ;;  %v15243_v51 = vpop.f32.mrf.mxu0  ;;  %v15325_v29 = vld [vmem:[%s16437_s3 + $0x10] sm:$0xff] }
0x176d   :  { %16452 = vst [vmem:[#allocation46_spill] sm:$0xff] %v15243_v51  ;;  %v15264_v5 = vadd.f32 %v8011_v28, %v8010_v19  ;;  %v15266_v18 = vadd.f32 %v8146_v54, %v8145_v26  ;;  %v7573_v49 = vadd.f32 %v7572_v17, %v15093_v13  ;;  %v8015_v47 = vmul.f32 %v15250_v34, %v7571_v31  ;;  %v7926_v51 = vld [vmem:[%s16437_s3 + $0x148] sm:$0xff] }
0x176e   :  { %v7574_v9 = vpop.f32.mrf.mxu1  ;;  %v15252_v52 = vpop.f32.mrf.mxu0  ;;  %v8150_v39 = vmul.f32 %v15256_v63, %v7571_v31  ;;  %v15289_v31 = vld [vmem:[%s16437_s3 + $0x2a8] sm:$0xff]  ;;  %16473 = vst [vmem:[#allocation55_spill] sm:$0xff] %v15325_v29 }
0x176f   :  { %16454 = vst [vmem:[#allocation34_spill] sm:$0xff] %v15252_v52  ;;  %16458 = vst [vmem:[#allocation27_spill] sm:$0xff] %v15264_v5  ;;  %v8016_v52 = vmul.f32 %v15259_v33, %v7573_v49  ;;  %v8151_v19 = vmul.f32 %v15262_v42, %v7573_v49  ;;  %v15292_v49 = vld [vmem:[%s16437_s3 + $0x120] sm:$0xff]  ;;  %v15295_v42 = vld [vmem:[%s16437_s3 + $0x2b0] sm:$0xff] }
0x1770   :  { %16459 = vst [vmem:[#allocation44_spill] sm:$0xff] %v15266_v18  ;;  %v7576_v24 = vpop.f32.mrf.mxu1  ;;  %v15269_v40 = vpop.f32.mrf.mxu0  ;;  %v15284_v18 = vld [vmem:[%s16437_s3 + $0x118] sm:$0xff]  ;;  %16466 = vst [vmem:[#allocation41_spill] sm:$0xff] %v15289_v31  ;;  %v7925_v33 = vld [vmem:[%s16437_s3 + $0x140] sm:$0xff] }
0x1771   :  { %16460 = vst [vmem:[#allocation28_spill] sm:$0xff] %v15269_v40  ;;  %v15278_v17 = vadd.f32 %v8016_v52, %v8015_v47  ;;  %v15280_v54 = vadd.f32 %v8151_v19, %v8150_v39  ;;  %v7575_v40 = vadd.f32 %v7574_v9, %v15088_v4  ;;  %16464 = vst [vmem:[#allocation36_spill] sm:$0xff] %v15284_v18 }
0x1772   :  { %v7580_v26 = vpop.f32.mrf.mxu1  ;;  %v15276_v28 = vpop.f32.mrf.mxu0  ;;  %16467 = vst [vmem:[#allocation42_spill] sm:$0xff] %v15292_v49  ;;  %16468 = vst [vmem:[#allocation43_spill] sm:$0xff] %v15295_v42  ;;  %v15298_v47 = vrot.slane %v15084_v14, %v7435_v8  ;;  %v7577_v39 = vadd.f32 %v7576_v24, %v15093_v13  ;;  %v7975_v8 = vld [vmem:[%s16437_s3 + $0x2d0] sm:$0xff]  ;;  %v7976_v24 = vld [vmem:[%s16437_s3 + $0x2d8] sm:$0xff] }
0x1773   :  { %16461 = vst [vmem:[#allocation45_spill] sm:$0xff] %v15276_v28  ;;  %16462 = vst [vmem:[#allocation37_spill] sm:$0xff] %v15278_v17  ;;  %v7581_v19 = vadd.f32 %v7580_v26, %v15088_v4  ;;  %v8155_v28 = vmul.f32 %v15289_v31, %v7575_v40  ;;  %v7439_v26 = vsub.s32 3, %v15080_v45 }
0x1774   :  { %16463 = vst [vmem:[#allocation38_spill] sm:$0xff] %v15280_v54  ;;  %v7582_v5 = vpop.f32.mrf.mxu1  ;;  %v15286_v34 = vpop.f32.mrf.mxu0  ;;  %v8021_v54 = vmul.f32 %v15292_v49, %v7577_v39  ;;  %v8156_v17 = vmul.f32 %v15295_v42, %v7577_v39 }
0x1775   :  { %16465 = vst [vmem:[#allocation39_spill] sm:$0xff] %v15286_v34  ;;  %v7583_v63 = vadd.f32 %v7582_v5, %v15093_v13  ;;  %v8020_v34 = vmul.f32 %v15284_v18, %v7575_v40  ;;  %v7674_v5 = vadd.f32 %v15090_v21, %v15298_v47  ;;  %v8025_v42 = vmul.f32 %v7925_v33, %v7581_v19  ;;  %v15329_v21 = vld [vmem:[%s16437_s3 + $0x168] sm:$0xff]  ;;  %v15341_v33 = vld [vmem:[%s16437_s3 + $0x2f8] sm:$0xff] }
0x1776   :  { %v7584_v9 = vpop.f32.mrf.mxu1  ;;  %v15301_v52 = vpop.f32.mrf.mxu0  ;;  %v15320_v40 = vadd.f32 %v8156_v17, %v8155_v28  ;;  %v8160_v31 = vmul.f32 %v7975_v8, %v7581_v19  ;;  %16474 = vst [vmem:[#allocation56_spill] sm:$0xff] %v15329_v21  ;;  %v15334_v28 = vrot.slane %v15084_v14, %v7439_v26  ;;  %16478 = vst [vmem:[#allocation60_spill] sm:$0xff] %v15341_v33  ;;  %v15351_v19 = vld [vmem:[%s16437_s3 + $0x1a0] sm:$0xff] }
0x1777   :  { %16469 = vst [vmem:[#allocation40_spill] sm:$0xff] %v15301_v52  ;;  %v15318_v18 = vadd.f32 %v8021_v54, %v8020_v34  ;;  %v8026_v16 = vmul.f32 %v7926_v51, %v7583_v63  ;;  %v7585_v6 = vadd.f32 %v7584_v9, %v15088_v4  ;;  %v15345_v51 = vld [vmem:[%s16437_s3 + $0x170] sm:$0xff]  ;;  %v15348_v9 = vld [vmem:[%s16437_s3 + $0x300] sm:$0xff]  ;;  %16481 = vst [vmem:[#allocation63_spill] sm:$0xff] %v15351_v19 }
0x1778   :  { %v7586_v35 = vpop.f32.mrf.mxu1  ;;  %v15313_v52 = vpop.f32.mrf.mxu0  ;;  %16472 = vst [vmem:[#allocation54_spill] sm:$0xff] %v15320_v40  ;;  %16479 = vst [vmem:[#allocation61_spill] sm:$0xff] %v15345_v51 }
0x1779   :  { %16470 = vst [vmem:[#allocation52_spill] sm:$0xff] %v15313_v52  ;;  %16471 = vst [vmem:[#allocation53_spill] sm:$0xff] %v15318_v18  ;;  %v8161_v52 = vmul.f32 %v7976_v24, %v7583_v63  ;;  %v15336_v17 = vadd.f32 %v8026_v16, %v8025_v42  ;;  %v7587_v63 = vadd.f32 %v7586_v35, %v15093_v13  ;;  %v7443_v16 = vsub.s32 4, %v15080_v45 }
0x177a   :  { %v7590_v49 = vpop.f32.mrf.mxu1  ;;  %v15322_v39 = vpop.f32.mrf.mxu0  ;;  %16480 = vst [vmem:[#allocation62_spill] sm:$0xff] %v15348_v9  ;;  %v7987_v42 = vmul.f32 %v15325_v29, %v7674_v5  ;;  %v8165_v35 = vmul.f32 %v15341_v33, %v7585_v6  ;;  %v15367_v29 = vld [vmem:[%s16437_s3 + $0x18] sm:$0xff]  ;;  %v7678_v45 = vadd.f32 %v15111_v36, %v15298_v47  ;;  %v7684_v18 = vadd.f32 %v15137_v1, %v15298_v47 }
0x177b   :  { %16476 = vst [vmem:[#allocation58_spill] sm:$0xff] %v15336_v17  ;;  %v15338_v40 = vadd.f32 %v8161_v52, %v8160_v31  ;;  %v8030_v31 = vmul.f32 %v15329_v21, %v7585_v6  ;;  %v8031_v52 = vmul.f32 %v15345_v51, %v7587_v63  ;;  %v8166_v26 = vmul.f32 %v15348_v9, %v7587_v63  ;;  %v15373_v51 = vld [vmem:[%s16437_s3 + $0x1a8] sm:$0xff]  ;;  %v15376_v63 = vld [vmem:[%s16437_s3 + $0x38] sm:$0xff] }
0x177c   :  { %v7592_v34 = vpop.f32.mrf.mxu1  ;;  %v15331_v54 = vpop.f32.mrf.mxu0  ;;  %v8122_v17 = vmul.f32 %v15351_v19, %v7674_v5  ;;  %v7591_v6 = vadd.f32 %v7590_v49, %v15088_v4  ;;  %v15379_v9 = vld [vmem:[%s16437_s3 + $0x1c8] sm:$0xff]  ;;  %v7680_v5 = vadd.f32 %v15121_v62, %v15334_v28  ;;  %v8036_v36 = vadd.f32 %v15132_v12, %v7987_v42  ;;  %v15391_v19 = vld [vmem:[%s16437_s3 + $0x40] sm:$0xff] }
0x177d   :  { %16475 = vst [vmem:[#allocation57_spill] sm:$0xff] %v15331_v54  ;;  %16477 = vst [vmem:[#allocation59_spill] sm:$0xff] %v15338_v40  ;;  %v15383_v33 = vadd.f32 %v8031_v52, %v8030_v31  ;;  %v7593_v21 = vadd.f32 %v7592_v34, %v15093_v13  ;;  %v15396_v62 = vrot.slane %v15084_v14, %v7443_v16  ;;  %v15399_v31 = vld [vmem:[%s16437_s3 + $0x1d0] sm:$0xff] }
0x177e   :  { %v7594_v8 = vpop.f32.mrf.mxu1  ;;  %v15353_v24 = vpop.f32.mrf.mxu0  ;;  %16484 = vst [vmem:[#allocation66_spill] sm:$0xff] %v15379_v9  ;;  %v8171_v49 = vadd.f32 %v15134_v20, %v8122_v17  ;;  %16485 = vst [vmem:[#allocation67_spill] sm:$0xff] %v15391_v19  ;;  %v8394_v34 = vmul.f32 %v15102_v23, %v7591_v6  ;;  %v7992_v14 = vmul.f32 %v15376_v63, %v7678_v45 }
0x177f   :  { %16482 = vst [vmem:[#allocation64_spill] sm:$0xff] %v15353_v24  ;;  %v7676_v24 = vadd.f32 %v15099_v15, %v15334_v28  ;;  %v15385_v15 = vadd.f32 %v8166_v26, %v8165_v35  ;;  %16486 = vst [vmem:[#allocation68_spill] sm:$0xff] %v15396_v62  ;;  %v8259_v35 = vmul.f32 %v15097_v2, %v7591_v6  ;;  %v15412_v2 = vld [vmem:[%s16437_s3 + $0x60] sm:$0xff] }
0x1780   :  { %v7596_v54 = vpop.f32.mrf.mxu1  ;;  %v15361_v40 = vpop.f32.mrf.mxu0  ;;  %v8260_v12 = vmul.f32 %v15105_v3, %v7593_v21  ;;  %v8395_v42 = vmul.f32 %v15108_v10, %v7593_v21  ;;  %v8127_v16 = vmul.f32 %v15379_v9, %v7678_v45  ;;  %v7993_v23 = vmul.f32 %v15391_v19, %v7680_v5  ;;  %v15416_v3 = vld [vmem:[%s16437_s3 + $0x1f0] sm:$0xff] }
0x1781   :  { %16483 = vst [vmem:[#allocation65_spill] sm:$0xff] %v15361_v40  ;;  %v7988_v52 = vmul.f32 %v15367_v29, %v7676_v24  ;;  %v8123_v1 = vmul.f32 %v15373_v51, %v7676_v24  ;;  %v7595_v26 = vadd.f32 %v7594_v8, %v15088_v4  ;;  %v8043_v24 = vadd.f32 %v15149_v41, %v7992_v14 }
0x1782   :  { %v7600_v40 = vpop.f32.mrf.mxu1  ;;  %v15405_v20 = vpop.f32.mrf.mxu0  ;;  %v15418_v10 = vadd.f32 %v8260_v12, %v8259_v35  ;;  %v15420_v21 = vadd.f32 %v8395_v42, %v8394_v34  ;;  %v8128_v62 = vmul.f32 %v15399_v31, %v7680_v5  ;;  %v8178_v45 = vadd.f32 %v15151_v61, %v8127_v16  ;;  %v15434_v34 = vld [vmem:[%s16437_s3 + $0x68] sm:$0xff]  ;;  %v15437_v12 = vld [vmem:[%s16437_s3 + $0x1f8] sm:$0xff] }
0x1783   :  { %16487 = vst [vmem:[#allocation69_spill] sm:$0xff] %v15405_v20  ;;  %v7686_v20 = vadd.f32 %v15143_v30, %v15334_v28  ;;  %v15428_v9 = vadd.f32 %v8036_v36, %v7988_v52  ;;  %v15430_v19 = vadd.f32 %v8171_v49, %v8123_v1  ;;  %v7997_v35 = vmul.f32 %v15412_v2, %v7684_v18 }
0x1784   :  { %v7602_v17 = vpop.f32.mrf.mxu1  ;;  %v7597_v8 = vadd.f32 %v7596_v54, %v15093_v13  ;;  %v15440_v41 = vpop.f32.mrf.mxu0  ;;  %v8132_v5 = vmul.f32 %v15416_v3, %v7684_v18  ;;  %v7688_v30 = vadd.f32 %v15162_v44, %v15298_v47  ;;  %v7601_v36 = vadd.f32 %v7600_v40, %v15088_v4 }
0x1785   :  { %16488 = vst [vmem:[#allocation70_spill] sm:$0xff] %v15428_v9  ;;  %16489 = vst [vmem:[#allocation71_spill] sm:$0xff] %v15430_v19  ;;  %v7603_v49 = vadd.f32 %v7602_v17, %v15093_v13  ;;  %v8264_v42 = vmul.f32 %v15119_v58, %v7595_v26  ;;  %v8399_v52 = vmul.f32 %v15124_v60, %v7595_v26  ;;  %v15460_v17 = vld [vmem:[%s16437_s3 + $0x88] sm:$0xff]  ;;  %v15463_v58 = vld [vmem:[%s16437_s3 + $0x218] sm:$0xff] }
0x1786   :  { %v7604_v6 = vpop.f32.mrf.mxu1  ;;  %v8265_v54 = vmul.f32 %v15127_v7, %v7597_v8  ;;  %v8400_v1 = vmul.f32 %v15130_v22, %v7597_v8  ;;  %v15453_v18 = vadd.f32 %v8043_v24, %v7993_v23  ;;  %v15455_v16 = vadd.f32 %v8178_v45, %v8128_v62  ;;  %16492 = vst [vmem:[#allocation74_spill] sm:$0xff] %v15460_v17  ;;  %v15473_v23 = vpop.f32.mrf.mxu0  ;;  %v15481_v24 = vld [vmem:[%s16437_s3 + $0x220] sm:$0xff] }
0x1787   :  { %v7998_v44 = vmul.f32 %v15434_v34, %v7686_v20  ;;  %v8133_v40 = vmul.f32 %v15437_v12, %v7686_v20  ;;  %16493 = vst [vmem:[#allocation75_spill] sm:$0xff] %v15463_v58  ;;  %v7690_v60 = vadd.f32 %v15165_v57, %v15334_v28  ;;  %v7694_v7 = vadd.f32 %v15175_v0, %v15298_v47  ;;  %v15478_v20 = vld [vmem:[%s16437_s3 + $0x90] sm:$0xff] }
0x1788   :  { %v7606_v61 = vpop.f32.mrf.mxu1  ;;  %16490 = vst [vmem:[#allocation72_spill] sm:$0xff] %v15453_v18  ;;  %16491 = vst [vmem:[#allocation73_spill] sm:$0xff] %v15455_v16  ;;  %v15469_v22 = vadd.f32 %v8265_v54, %v8264_v42  ;;  %v15471_v62 = vadd.f32 %v8400_v1, %v8399_v52  ;;  %v8269_v45 = vmul.f32 %v15147_v46, %v7601_v36  ;;  %v15491_v1 = vld [vmem:[%s16437_s3 + $0xb0] sm:$0xff]  ;;  %v15494_v16 = vld [vmem:[%s16437_s3 + $0x240] sm:$0xff] }
0x1789   :  { %16494 = vst [vmem:[#allocation76_spill] sm:$0xff] %v15478_v20  ;;  %16495 = vst [vmem:[#allocation77_spill] sm:$0xff] %v15481_v24  ;;  %v8404_v57 = vmul.f32 %v15154_v37, %v7601_v36  ;;  %v8270_v8 = vmul.f32 %v15157_v59, %v7603_v49  ;;  %v8405_v0 = vmul.f32 %v15160_v38, %v7603_v49  ;;  %v15509_v49 = vpop.f32.mrf.mxu0  ;;  %v16505_v18 = vld [vmem:[#allocation20_spill] sm:$0xff] }
0x178a   :  { %v15451_v14 = vpop.f32.mrf.mxu1  ;;  %v8050_v42 = vadd.f32 %v15177_v43, %v7997_v35  ;;  %v8002_v52 = vmul.f32 %v15460_v17, %v7688_v30  ;;  %v8137_v54 = vmul.f32 %v15463_v58, %v7688_v30  ;;  %16496 = vst [vmem:[#allocation78_spill] sm:$0xff] %v15491_v1  ;;  %16497 = vst [vmem:[#allocation79_spill] sm:$0xff] %v15494_v16 }
0x178b   :  { %v7605_v19 = vadd.f32 %v7604_v6, %v15088_v4  ;;  %v8185_v37 = vadd.f32 %v15179_v27, %v8132_v5  ;;  %v15498_v59 = vadd.f32 %v8270_v8, %v8269_v45  ;;  %v15500_v38 = vadd.f32 %v8405_v0, %v8404_v57  ;;  %v15519_v8 = vld [vmem:[%s16437_s3 + $0x268] sm:$0xff] }
0x178c   :  { %v15475_v26 = vpop.f32.mrf.mxu1  ;;  %v7607_v43 = vadd.f32 %v7606_v61, %v15093_v13  ;;  %v8003_v35 = vmul.f32 %v15478_v20, %v7690_v60  ;;  %v8138_v30 = vmul.f32 %v15481_v24, %v7690_v60  ;;  %v7696_v6 = vadd.f32 %v15191_v55, %v15334_v28  ;;  %v15516_v60 = vld [vmem:[%s16437_s3 + $0xd8] sm:$0xff]  ;;  %16499 = vst [vmem:[#allocation81_spill] sm:$0xff] %v15519_v8 }
0x178d   :  { %v7698_v36 = vadd.f32 %v15211_v11, %v15298_v47  ;;  %v8057_v5 = vadd.f32 %v15213_v56, %v8002_v52  ;;  %v8192_v45 = vadd.f32 %v15215_v50, %v8137_v54  ;;  %v8007_v61 = vmul.f32 %v15491_v1, %v7694_v7  ;;  %16498 = vst [vmem:[#allocation80_spill] sm:$0xff] %v15516_v60  ;;  %v15522_v55 = vld [vmem:[%s16437_s3 + $0xb8] sm:$0xff]  ;;  %v15529_v52 = vld [vmem:[%s16437_s3 + $0x248] sm:$0xff] }
0x178e   :  { %v7614_v46 = vpop.f32.mrf.mxu1  ;;  %v8142_v57 = vmul.f32 %v15494_v16, %v7694_v7  ;;  %16500 = vst [vmem:[#allocation82_spill] sm:$0xff] %v15522_v55  ;;  %v8274_v11 = vmul.f32 %v15173_v48, %v7605_v19  ;;  %v8409_v0 = vmul.f32 %v15182_v32, %v7605_v19  ;;  %v8275_v56 = vmul.f32 %v15185_v25, %v7607_v43  ;;  %v16502_v7 = vld [vmem:[#allocation22_spill] sm:$0xff]  ;;  %v16503_v24 = vld [vmem:[#allocation23_spill] sm:$0xff]  ;;  %v16504_v1 = vld [vmem:[#allocation32_spill] sm:$0xff] }
0x178f   :  { %v8410_v50 = vmul.f32 %v15188_v53, %v7607_v43  ;;  %16501 = vst [vmem:[#allocation83_spill] sm:$0xff] %v15529_v52  ;;  %v8064_v54 = vadd.f32 %v16502_v7, %v8007_v61  ;;  %v7700_v20 = vadd.f32 %v16504_v1, %v15334_v28  ;;  %v7704_v9 = vadd.f32 %v16505_v18, %v15298_v47  ;;  %v15540_v19 = vld [vmem:[%s16437_s3 + $0xe0] sm:$0xff]  ;;  %v15543_v53 = vld [vmem:[%s16437_s3 + $0x270] sm:$0xff]  ;;  %v15552_v1 = vpop.f32.mrf.mxu0 }
0x1790   :  { %v7616_v27 = vpop.f32.mrf.mxu1  ;;  %v8199_v16 = vadd.f32 %v16503_v24, %v8142_v57  ;;  %v8012_v32 = vmul.f32 %v15516_v60, %v7698_v36  ;;  %v8147_v25 = vmul.f32 %v15519_v8, %v7698_v36  ;;  %16506 = vst [vmem:[#allocation22_spill] sm:$0xff] %v15540_v19  ;;  %16507 = vst [vmem:[#allocation23_spill] sm:$0xff] %v15543_v53  ;;  %v15546_v43 = vld [vmem:[%s16437_s3 + $0x100] sm:$0xff]  ;;  %v15560_v7 = vld [vmem:[%s16437_s3 + $0x290] sm:$0xff] }
0x1791   :  { %16508 = vst [vmem:[#allocation32_spill] sm:$0xff] %v15546_v43  ;;  %v15548_v24 = vadd.f32 %v8275_v56, %v8274_v11  ;;  %v15550_v61 = vadd.f32 %v8410_v50, %v8409_v0  ;;  %16511 = vst [vmem:[#allocation85_spill] sm:$0xff] %v15552_v1  ;;  %v15554_v18 = vadd.f32 %v8050_v42, %v7998_v44  ;;  %v16513_v8 = vld [vmem:[#allocation46_spill] sm:$0xff]  ;;  %v16515_v0 = vld [vmem:[#allocation27_spill] sm:$0xff] }
0x1792   :  { %v15556_v57 = vadd.f32 %v8185_v37, %v8133_v40  ;;  %v8008_v36 = vmul.f32 %v15522_v55, %v7696_v6  ;;  %16512 = vst [vmem:[#allocation86_spill] sm:$0xff] %v15560_v7  ;;  %v7706_v60 = vadd.f32 %v16513_v8, %v15334_v28  ;;  %v15564_v17 = vadd.f32 %v8057_v5, %v8003_v35  ;;  %v16516_v50 = vld [vmem:[#allocation44_spill] sm:$0xff]  ;;  %v15573_v40 = vld [vmem:[%s16437_s3 + $0x298] sm:$0xff]  ;;  %v16572_v1 = vld [vmem:[#allocation57_spill] sm:$0xff] }
0x1793   :  { %v7620_v48 = vpop.f32.mrf.mxu1  ;;  %16509 = vst [vmem:[#allocation20_spill] sm:$0xff] %v15548_v24  ;;  %16510 = vst [vmem:[#allocation84_spill] sm:$0xff] %v15550_v61  ;;  %v8143_v11 = vmul.f32 %v15529_v52, %v7696_v6  ;;  %v8071_v56 = vadd.f32 %v16515_v0, %v8012_v32  ;;  %v8206_v61 = vadd.f32 %v16516_v50, %v8147_v25  ;;  %v15570_v44 = vld [vmem:[%s16437_s3 + $0x108] sm:$0xff]  ;;  %v15585_v25 = vpop.f32.mrf.mxu0 }
0x1794   :  { %16514 = vst [vmem:[#allocation46_spill] sm:$0xff] %v15564_v17  ;;  %16517 = vst [vmem:[#allocation27_spill] sm:$0xff] %v15570_v44  ;;  %v15575_v42 = vadd.f32 %v8192_v45, %v8138_v30  ;;  %v8013_v37 = vmul.f32 %v15540_v19, %v7700_v20  ;;  %v8148_v55 = vmul.f32 %v15543_v53, %v7700_v20  ;;  %v16523_v0 = vld [vmem:[#allocation37_spill] sm:$0xff]  ;;  %v16524_v53 = vld [vmem:[#allocation34_spill] sm:$0xff] }
0x1795   :  { %v7622_v58 = vpop.f32.mrf.mxu1  ;;  %16518 = vst [vmem:[#allocation44_spill] sm:$0xff] %v15573_v40  ;;  %v8017_v35 = vmul.f32 %v15546_v43, %v7704_v9  ;;  %v15580_v6 = vadd.f32 %v8064_v54, %v8008_v36  ;;  %v15582_v8 = vadd.f32 %v8199_v16, %v8143_v11  ;;  %v8152_v32 = vmul.f32 %v15560_v7, %v7704_v9  ;;  %v16527_v36 = vld [vmem:[#allocation38_spill] sm:$0xff]  ;;  %v15599_v11 = vld [vmem:[%s16437_s3 + $0x128] sm:$0xff]  ;;  %v16571_v7 = vld [vmem:[#allocation63_spill] sm:$0xff] }
0x1796   :  { %16519 = vst [vmem:[#allocation87_spill] sm:$0xff] %v15575_v42  ;;  %16522 = vst [vmem:[#allocation90_spill] sm:$0xff] %v15585_v25  ;;  %v7615_v30 = vadd.f32 %v7614_v46, %v15088_v4  ;;  %v8018_v45 = vmul.f32 %v15570_v44, %v7706_v60  ;;  %v8153_v20 = vmul.f32 %v15573_v40, %v7706_v60  ;;  %v15602_v46 = vld [vmem:[%s16437_s3 + $0x2b8] sm:$0xff]  ;;  %v16530_v60 = vld [vmem:[#allocation28_spill] sm:$0xff] }
0x1797   :  { %v7624_v5 = vpop.f32.mrf.mxu1  ;;  %16520 = vst [vmem:[#allocation88_spill] sm:$0xff] %v15580_v6  ;;  %16521 = vst [vmem:[#allocation89_spill] sm:$0xff] %v15582_v8  ;;  %v8078_v50 = vadd.f32 %v16523_v0, %v8017_v35  ;;  %v7708_v19 = vadd.f32 %v16524_v53, %v15298_v47  ;;  %v15593_v54 = vadd.f32 %v8071_v56, %v8013_v37  ;;  %v16531_v53 = vld [vmem:[#allocation45_spill] sm:$0xff]  ;;  %v16550_v17 = vld [vmem:[#allocation48_spill] sm:$0xff] }
0x1798   :  { %v15595_v16 = vadd.f32 %v8206_v61, %v8148_v55  ;;  %v8213_v9 = vadd.f32 %v16527_v36, %v8152_v32  ;;  %16528 = vst [vmem:[#allocation38_spill] sm:$0xff] %v15599_v11  ;;  %16529 = vst [vmem:[#allocation91_spill] sm:$0xff] %v15602_v46  ;;  %v7617_v35 = vadd.f32 %v7616_v27, %v15093_v13  ;;  %v16533_v32 = vld [vmem:[#allocation29_spill] sm:$0xff]  ;;  %v16536_v27 = vld [vmem:[#allocation47_spill] sm:$0xff] }
0x1799   :  { %v7626_v52 = vpop.f32.mrf.mxu1  ;;  %16525 = vst [vmem:[#allocation37_spill] sm:$0xff] %v15593_v54  ;;  %v7710_v0 = vadd.f32 %v16530_v60, %v15334_v28  ;;  %v7714_v56 = vadd.f32 %v16531_v53, %v15298_v47  ;;  %v7621_v55 = vadd.f32 %v7620_v48, %v15088_v4  ;;  %v7623_v61 = vadd.f32 %v7622_v58, %v15093_v13  ;;  %v16534_v24 = vld [vmem:[#allocation25_spill] sm:$0xff]  ;;  %v15615_v54 = vpop.f32.mrf.mxu0  ;;  %v16553_v44 = vld [vmem:[#allocation35_spill] sm:$0xff] }
0x179a   :  { %16526 = vst [vmem:[#allocation34_spill] sm:$0xff] %v15595_v16  ;;  %v8284_v36 = vmul.f32 %v16533_v32, %v7615_v30  ;;  %v8419_v25 = vmul.f32 %v16534_v24, %v7615_v30  ;;  %16535 = vst [vmem:[#allocation45_spill] sm:$0xff] %v15615_v54  ;;  %v8285_v16 = vmul.f32 %v16536_v27, %v7617_v35  ;;  %v16537_v60 = vld [vmem:[#allocation49_spill] sm:$0xff]  ;;  %v16542_v24 = vld [vmem:[#allocation39_spill] sm:$0xff] }
0x179b   :  { %v15611_v37 = vpop.f32.mrf.mxu1  ;;  %v8420_v6 = vmul.f32 %v16537_v60, %v7617_v35  ;;  %v15619_v8 = vadd.f32 %v8078_v50, %v8018_v45  ;;  %v8022_v48 = vmul.f32 %v15599_v11, %v7708_v19  ;;  %v8157_v58 = vmul.f32 %v15602_v46, %v7708_v19  ;;  %v15624_v53 = vld [vmem:[%s16437_s3 + $0x130] sm:$0xff]  ;;  %v16545_v45 = vld [vmem:[#allocation40_spill] sm:$0xff]  ;;  %v16552_v11 = vld [vmem:[#allocation51_spill] sm:$0xff] }
0x179c   :  { %16532 = vst [vmem:[#allocation28_spill] sm:$0xff] %v15611_v37  ;;  %16539 = vst [vmem:[#allocation25_spill] sm:$0xff] %v15624_v53  ;;  %v15627_v37 = vld [vmem:[%s16437_s3 + $0x2c0] sm:$0xff]  ;;  %v15630_v32 = vld [vmem:[%s16437_s3 + $0x150] sm:$0xff]  ;;  %v7716_v30 = vadd.f32 %v16542_v24, %v15334_v28  ;;  %v15636_v35 = vadd.f32 %v8213_v9, %v8153_v20  ;;  %v7718_v50 = vadd.f32 %v16545_v45, %v15298_v47  ;;  %v15663_v45 = vpop.f32.mrf.mxu0 }
0x179d   :  { %16538 = vst [vmem:[#allocation29_spill] sm:$0xff] %v15619_v8  ;;  %16540 = vst [vmem:[#allocation47_spill] sm:$0xff] %v15627_v37  ;;  %v15634_v54 = vpop.f32.mrf.mxu1  ;;  %v15640_v27 = vadd.f32 %v8285_v16, %v8284_v36  ;;  %v15642_v19 = vadd.f32 %v8420_v6, %v8419_v25  ;;  %v15645_v60 = vld [vmem:[%s16437_s3 + $0x2e0] sm:$0xff]  ;;  %v15648_v8 = vld [vmem:[%s16437_s3 + $0x158] sm:$0xff]  ;;  %v8289_v40 = vmul.f32 %v16550_v17, %v7621_v55 }
0x179e   :  { %16541 = vst [vmem:[#allocation49_spill] sm:$0xff] %v15630_v32  ;;  %16543 = vst [vmem:[#allocation39_spill] sm:$0xff] %v15634_v54  ;;  %v16551_v24 = vld [vmem:[#allocation50_spill] sm:$0xff]  ;;  %v8290_v54 = vmul.f32 %v16552_v11, %v7623_v61  ;;  %v8425_v20 = vmul.f32 %v16553_v44, %v7623_v61  ;;  %v8158_v16 = vmul.f32 %v15627_v37, %v7710_v0  ;;  %v15661_v36 = vld [vmem:[%s16437_s3 + $0x308] sm:$0xff] }
0x179f   :  { %16544 = vst [vmem:[#allocation92_spill] sm:$0xff] %v15636_v35  ;;  %16546 = vst [vmem:[#allocation40_spill] sm:$0xff] %v15640_v27  ;;  %v8424_v46 = vmul.f32 %v16551_v24, %v7621_v55  ;;  %v7634_v9 = vpop.f32.mrf.mxu1  ;;  %v8023_v35 = vmul.f32 %v15624_v53, %v7710_v0  ;;  %v8027_v6 = vmul.f32 %v15630_v32, %v7714_v56  ;;  %v15658_v25 = vld [vmem:[%s16437_s3 + $0x178] sm:$0xff]  ;;  %v16559_v24 = vld [vmem:[#allocation53_spill] sm:$0xff] }
0x17a0   :  { %16547 = vst [vmem:[#allocation93_spill] sm:$0xff] %v15642_v19  ;;  %16548 = vst [vmem:[#allocation94_spill] sm:$0xff] %v15645_v60  ;;  %v7625_v17 = vadd.f32 %v7624_v5, %v15088_v4  ;;  %v7724_v44 = vadd.f32 %v15322_v39, %v15298_v47  ;;  %v15668_v11 = vadd.f32 %v8290_v54, %v8289_v40  ;;  %v16560_v19 = vld [vmem:[#allocation54_spill] sm:$0xff]  ;;  %v16562_v54 = vld [vmem:[#allocation52_spill] sm:$0xff] }
0x17a1   :  { %16549 = vst [vmem:[#allocation95_spill] sm:$0xff] %v15648_v8  ;;  %16554 = vst [vmem:[#allocation48_spill] sm:$0xff] %v15658_v25  ;;  %v15670_v55 = vadd.f32 %v8425_v20, %v8424_v46  ;;  %v7627_v0 = vadd.f32 %v7626_v52, %v15093_v13  ;;  %v7636_v61 = vpop.f32.mrf.mxu1  ;;  %v8085_v32 = vadd.f32 %v16559_v24, %v8022_v48  ;;  %v16561_v37 = vld [vmem:[#allocation58_spill] sm:$0xff]  ;;  %v15683_v20 = vld [vmem:[%s16437_s3 + $0x2e8] sm:$0xff] }
0x17a2   :  { %16555 = vst [vmem:[#allocation50_spill] sm:$0xff] %v15661_v36  ;;  %16556 = vst [vmem:[#allocation51_spill] sm:$0xff] %v15663_v45  ;;  %v8220_v27 = vadd.f32 %v16560_v19, %v8157_v58  ;;  %v8162_v45 = vmul.f32 %v15645_v60, %v7714_v56  ;;  %v8028_v5 = vmul.f32 %v15648_v8, %v7716_v30  ;;  %v15686_v48 = vld [vmem:[%s16437_s3 + $0x180] sm:$0xff]  ;;  %v15688_v58 = vpop.f32.mrf.mxu0  ;;  %v16566_v24 = vld [vmem:[#allocation41_spill] sm:$0xff] }
0x17a3   :  { %16557 = vst [vmem:[#allocation35_spill] sm:$0xff] %v15668_v11  ;;  %16558 = vst [vmem:[#allocation96_spill] sm:$0xff] %v15670_v55  ;;  %v8092_v53 = vadd.f32 %v16561_v37, %v8027_v6  ;;  %v8032_v39 = vmul.f32 %v15658_v25, %v7718_v50  ;;  %v8167_v40 = vmul.f32 %v15661_v36, %v7718_v50  ;;  %v10000_v52 = vpop.f32.mrf.mxu1  ;;  %v16565_v19 = vld [vmem:[#allocation36_spill] sm:$0xff]  ;;  %v16567_v60 = vld [vmem:[#allocation42_spill] sm:$0xff] }
0x17a4   :  { %v7720_v46 = vadd.f32 %v16562_v54, %v15334_v28  ;;  %16563 = vst [vmem:[#allocation53_spill] sm:$0xff] %v15683_v20  ;;  %16564 = vst [vmem:[#allocation54_spill] sm:$0xff] %v15688_v58  ;;  %v8294_v56 = vmul.f32 %v16565_v19, %v7625_v17  ;;  %v8429_v8 = vmul.f32 %v16566_v24, %v7625_v17  ;;  %v16568_v6 = vld [vmem:[#allocation43_spill] sm:$0xff]  ;;  %v15696_v36 = vld [vmem:[%s16437_s3 + $0x310] sm:$0xff] }
0x17a5   :  { %v8295_v37 = vmul.f32 %v16567_v60, %v7627_v0  ;;  %v8430_v25 = vmul.f32 %v16568_v6, %v7627_v0  ;;  %v16569_v55 = vld [vmem:[#allocation59_spill] sm:$0xff]  ;;  %v8396_v43 = vmul.f32 %v16571_v7, %v7724_v44  ;;  %v7726_v42 = vadd.f32 %v16572_v1, %v15334_v28  ;;  %v7806_v58 = vpop.f32.mrf.mxu1  ;;  %v16573_v7 = vld [vmem:[#allocation64_spill] sm:$0xff] }
0x17a6   :  { %v8227_v50 = vadd.f32 %v16569_v55, %v8162_v45  ;;  %v16570_v54 = vld [vmem:[#allocation55_spill] sm:$0xff]  ;;  %v8099_v19 = vadd.f32 %v15383_v33, %v8032_v39  ;;  %v8234_v17 = vadd.f32 %v15385_v15, %v8167_v40  ;;  %v15708_v0 = vadd.f32 %v8085_v32, %v8023_v35  ;;  %v16574_v39 = vld [vmem:[#allocation65_spill] sm:$0xff] }
0x17a7   :  { %v8261_v11 = vmul.f32 %v16570_v54, %v7724_v44  ;;  %v15704_v24 = vadd.f32 %v8295_v37, %v8294_v56  ;;  %v15706_v60 = vadd.f32 %v8430_v25, %v8429_v8  ;;  %v8163_v45 = vmul.f32 %v15683_v20, %v7716_v30  ;;  %v10001_v6 = vpop.f32.mrf.mxu1  ;;  %v15719_v25 = vpop.f32.mrf.mxu0  ;;  %v15768_v20 = vld [vmem:[%s16437_s3 + $0x228] sm:$0xff] }
0x17a8   :  { %v8033_v55 = vmul.f32 %v15686_v48, %v7720_v46  ;;  %v7728_v44 = vadd.f32 %v16573_v7, %v15298_v47  ;;  %v8168_v1 = vmul.f32 %v15696_v36, %v7720_v46  ;;  %v8445_v15 = vadd.f32 %v15420_v21, %v8396_v43  ;;  %16587 = vst [vmem:[#allocation42_spill] sm:$0xff] %v15768_v20 }
0x17a9   :  { %v8310_v33 = vadd.f32 %v15418_v10, %v8261_v11  ;;  %v7730_v8 = vadd.f32 %v16574_v39, %v15334_v28  ;;  %v15721_v32 = vadd.f32 %v8220_v27, %v8158_v16  ;;  %v15723_v30 = vadd.f32 %v8092_v53, %v8028_v5  ;;  %v7809_v56 = vpop.f32.mrf.mxu1  ;;  %v16576_v16 = vld [vmem:[#allocation66_spill] sm:$0xff]  ;;  %v16577_v11 = vld [vmem:[#allocation69_spill] sm:$0xff]  ;;  %v16584_v39 = vld [vmem:[#allocation60_spill] sm:$0xff] }
0x17aa   :  { %v15725_v35 = vadd.f32 %v8227_v50, %v8163_v45  ;;  %v8262_v40 = vmul.f32 %v15367_v29, %v7726_v42  ;;  %v15728_v46 = vadd.f32 %v8099_v19, %v8033_v55  ;;  %v15730_v10 = vadd.f32 %v8234_v17, %v8168_v1  ;;  %v15749_v19 = vld [vmem:[%s16437_s3 + $0x70] sm:$0xff]  ;;  %v15752_v17 = vld [vmem:[%s16437_s3 + $0x200] sm:$0xff] }
0x17ab   :  { %16575 = vst [vmem:[#allocation58_spill] sm:$0xff] %v15723_v30  ;;  %v8397_v21 = vmul.f32 %v15373_v51, %v7726_v42  ;;  %v7635_v43 = vadd.f32 %v7634_v9, %v15088_v4  ;;  %v8266_v27 = vmul.f32 %v15376_v63, %v7728_v44  ;;  %v8401_v53 = vmul.f32 %v16576_v16, %v7728_v44  ;;  %v15740_v37 = vpop.f32.mrf.mxu1  ;;  %v16579_v51 = vld [vmem:[#allocation67_spill] sm:$0xff]  ;;  %v7757_v9 = vpop.f32.mrf.mxu0  ;;  %v16586_v16 = vld [vmem:[#allocation62_spill] sm:$0xff] }
0x17ac   :  { %v7734_v5 = vadd.f32 %v16577_v11, %v15298_v47  ;;  %v7736_v29 = vadd.f32 %v15440_v41, %v15334_v28  ;;  %v15742_v50 = vadd.f32 %v8310_v33, %v8262_v40  ;;  %v8267_v42 = vmul.f32 %v16579_v51, %v7730_v8  ;;  %16580 = vst [vmem:[#allocation36_spill] sm:$0xff] %v15749_v19  ;;  %v16582_v41 = vld [vmem:[#allocation68_spill] sm:$0xff] }
0x17ad   :  { %v15744_v54 = vadd.f32 %v8445_v15, %v8397_v21  ;;  %v7637_v63 = vadd.f32 %v7636_v61, %v15093_v13  ;;  %16581 = vst [vmem:[#allocation41_spill] sm:$0xff] %v15752_v17  ;;  %v8402_v45 = vmul.f32 %v15399_v31, %v7730_v8  ;;  %v7815_v55 = vadd.f32 %v10000_v52, %v16582_v41  ;;  %v15758_v1 = vpop.f32.mrf.mxu1  ;;  %v16583_v33 = vld [vmem:[#allocation56_spill] sm:$0xff]  ;;  %v16585_v21 = vld [vmem:[#allocation61_spill] sm:$0xff] }
0x17ae   :  { %v7807_v7 = vadd.f32 %v7806_v58, %v16582_v41  ;;  %v7818_v44 = vadd.f32 %v10001_v6, %v16582_v41  ;;  %v8304_v15 = vmul.f32 %v16583_v33, %v7635_v43  ;;  %v8439_v40 = vmul.f32 %v16584_v39, %v7635_v43  ;;  %v15765_v51 = vld [vmem:[%s16437_s3 + $0x20] sm:$0xff]  ;;  %v7759_v33 = vpop.f32.mrf.mxu0 }
0x17af   :  { %16578 = vst [vmem:[#allocation52_spill] sm:$0xff] %v15744_v54  ;;  %v8305_v61 = vmul.f32 %v16585_v21, %v7637_v63  ;;  %v8440_v11 = vmul.f32 %v16586_v16, %v7637_v63  ;;  %v8317_v31 = vadd.f32 %v15469_v22, %v8266_v27  ;;  %v8452_v52 = vadd.f32 %v15471_v62, %v8401_v53  ;;  %v15774_v8 = vpop.f32.mrf.mxu1  ;;  %v16615_v54 = vld [vmem:[#allocation35_spill] sm:$0xff] }
0x17b0   :  { %v7999_v58 = vmul.f32 %v15749_v19, %v7815_v55  ;;  %v8134_v6 = vmul.f32 %v15752_v17, %v7815_v55  ;;  %v8271_v43 = vmul.f32 %v15412_v2, %v7734_v5  ;;  %v7810_v21 = vadd.f32 %v7809_v56, %v16582_v41  ;;  %v16610_v19 = vld [vmem:[#allocation38_spill] sm:$0xff] }
0x17b1   :  { %v15777_v63 = vadd.f32 %v8305_v61, %v8304_v15  ;;  %v15779_v39 = vadd.f32 %v8440_v11, %v8439_v40  ;;  %v7989_v27 = vmul.f32 %v15765_v51, %v7807_v7  ;;  %v8139_v53 = vmul.f32 %v15768_v20, %v7818_v44  ;;  %v15786_v55 = vpop.f32.mrf.mxu1  ;;  %v15798_v40 = vld [vmem:[%s16437_s3 + $0x1b0] sm:$0xff]  ;;  %v15801_v61 = vld [vmem:[%s16437_s3 + $0x48] sm:$0xff] }
0x17b2   :  { %v8052_v22 = vsel %vm769_vm2, %v7999_v58, 0.0  ;;  %v8187_v62 = vsel %vm769_vm2, %v8134_v6, 0.0  ;;  %v8406_v16 = vmul.f32 %v15416_v3, %v7734_v5  ;;  %v15790_v2 = vmul.f32 %v15434_v34, %v7736_v29  ;;  %v15829_v6 = vld [vmem:[%s16437_s3 + $0x98] sm:$0xff] }
0x17b3   :  { %v15793_v15 = vmul.f32 %v15437_v12, %v7736_v29  ;;  %v7738_v56 = vadd.f32 %v15473_v23, %v15298_v47  ;;  %v15803_v11 = vadd.f32 %v8317_v31, %v8267_v42  ;;  %v15805_v58 = vadd.f32 %v8452_v52, %v8402_v45  ;;  %v15812_v12 = vpop.f32.mrf.mxu1  ;;  %v15819_v29 = vpop.f32.mrf.mxu0  ;;  %16593 = vst [vmem:[#allocation64_spill] sm:$0xff] %v15829_v6 }
0x17b4   :  { %v15809_v3 = vadd.f32 %v15509_v49, %v15334_v28  ;;  %v8194_v34 = vsel %vm769_vm2, %v8139_v53, 0.0  ;;  %v15815_v23 = vadd.f32 %v15498_v59, %v8271_v43  ;;  %v7611_v5 = vadd.f32 %v15451_v14, %v15088_v4  ;;  %16591 = vst [vmem:[#allocation63_spill] sm:$0xff] %v15819_v29  ;;  %v16598_v53 = vld [vmem:[#allocation75_spill] sm:$0xff] }
0x17b5   :  { %16588 = vst [vmem:[#allocation43_spill] sm:$0xff] %v15793_v15  ;;  %16589 = vst [vmem:[#allocation59_spill] sm:$0xff] %v15803_v11  ;;  %v8188_v42 = vadd.f32 %v8187_v62, %v15556_v57  ;;  %v8053_v45 = vadd.f32 %v8052_v22, %v15554_v18  ;;  %v15824_v49 = vadd.f32 %v15500_v38, %v8406_v16  ;;  %v8038_v31 = vsel %vm769_vm2, %v7989_v27, 0.0  ;;  %v15832_v43 = vpop.f32.mrf.mxu1  ;;  %v16594_v57 = vld [vmem:[#allocation54_spill] sm:$0xff]  ;;  %v16595_v38 = vld [vmem:[#allocation87_spill] sm:$0xff] }
0x17b6   :  { %16590 = vst [vmem:[#allocation55_spill] sm:$0xff] %v15805_v58  ;;  %v8124_v52 = vmul.f32 %v15798_v40, %v7807_v7  ;;  %v7994_v59 = vmul.f32 %v15801_v61, %v7810_v21  ;;  %v15836_v14 = vadd.f32 %v15475_v26, %v15093_v13  ;;  %v7754_v18 = vadd.f32 %v16594_v57, %v15298_v47  ;;  %v15841_v22 = vld [vmem:[%s16437_s3 + $0x1d8] sm:$0xff] }
0x17b7   :  { %16592 = vst [vmem:[#allocation57_spill] sm:$0xff] %v15824_v49  ;;  %8189 = vadd.xlane.f32.xlu0 %v8188_v42  ;;  %8054 = vadd.xlane.f32.xlu1 %v8053_v45  ;;  %v8195_v62 = vadd.f32 %v8194_v34, %v16595_v38  ;;  %v16596_v7 = vld [vmem:[#allocation74_spill] sm:$0xff]  ;;  %v15848_v16 = vmul.f32 %v16598_v53, %v7738_v56  ;;  %v15853_v57 = vpop.f32.mrf.mxu1  ;;  %v16600_v29 = vld [vmem:[#allocation31_spill] sm:$0xff]  ;;  %v16601_v34 = vld [vmem:[#allocation85_spill] sm:$0xff]  ;;  %v15862_v38 = vpop.f32.mrf.mxu0 }
0x17b8   :  { %v15845_v27 = vmul.f32 %v16596_v7, %v7738_v56  ;;  %v7756_v20 = vadd.f32 %v15719_v25, %v15334_v28  ;;  %v7758_v26 = vadd.f32 %v7757_v9, %v15298_v47  ;;  %v15856_v42 = vmul.f32 %v16600_v29, %v7611_v5  ;;  %16603 = vst [vmem:[#allocation67_spill] sm:$0xff] %v15862_v38  ;;  %v16604_v7 = vld [vmem:[#allocation70_spill] sm:$0xff]  ;;  %v16606_v38 = vld [vmem:[#allocation24_spill] sm:$0xff] }
0x17b9   :  { %16599 = vst [vmem:[#allocation66_spill] sm:$0xff] %v15848_v16  ;;  %v15860_v45 = vadd.f32 %v16601_v34, %v15298_v47  ;;  %v8004_v56 = vmul.f32 %v15829_v6, %v7818_v44  ;;  %v8039_v53 = vadd.f32 %v8038_v31, %v16604_v7  ;;  %v8173_v25 = vsel %vm769_vm2, %v8124_v52, 0.0  ;;  %v15871_v16 = vpop.f32.mrf.mxu1  ;;  %v16605_v13 = vld [vmem:[#allocation26_spill] sm:$0xff]  ;;  %v16607_v44 = vld [vmem:[#allocation32_spill] sm:$0xff]  ;;  %v7767_v58 = vpop.f32.mrf.mxu0 }
0x17ba   :  { %16597 = vst [vmem:[#allocation65_spill] sm:$0xff] %v15845_v27  ;;  %v8045_v9 = vsel %vm769_vm2, %v7994_v59, 0.0  ;;  %v8129_v4 = vmul.f32 %v15841_v22, %v7810_v21  ;;  %v7831_v29 = vadd.f32 %v15740_v37, %v16582_v41  ;;  %v15874_v34 = vmul.f32 %v16605_v13, %v7611_v5  ;;  %v15882_v7 = vld [vmem:[%s16437_s3 + $0x110] sm:$0xff]  ;;  %v15885_v52 = vld [vmem:[%s16437_s3 + $0x2a0] sm:$0xff] }
0x17bb   :  { %16602 = vst [vmem:[#allocation69_spill] sm:$0xff] %v15860_v45  ;;  %v15878_v17 = vmul.f32 %v16606_v38, %v15836_v14  ;;  %v8291_v31 = vmul.f32 %v16607_v44, %v7754_v18  ;;  %8196 = vadd.xlane.f32.xlu0 %v8195_v62  ;;  %8040 = vadd.xlane.f32.xlu1 %v8039_v53  ;;  %v16608_v21 = vld [vmem:[#allocation86_spill] sm:$0xff]  ;;  %v16609_v37 = vld [vmem:[#allocation27_spill] sm:$0xff]  ;;  %v15891_v5 = vpop.f32.mrf.mxu1  ;;  %v8059_v27 = vsel %vm769_vm2, %v8004_v56, 0.0  ;;  %v16612_v49 = vld [vmem:[#allocation72_spill] sm:$0xff] }
0x17bc   :  { %v8426_v59 = vmul.f32 %v16608_v21, %v7754_v18  ;;  %v8292_v6 = vmul.f32 %v16609_v37, %v7756_v20  ;;  %v8296_v30 = vmul.f32 %v16610_v19, %v7758_v26  ;;  %v7760_v13 = vadd.f32 %v7759_v33, %v15334_v28  ;;  %v16611_v38 = vld [vmem:[#allocation91_spill] sm:$0xff]  ;;  %v16617_v56 = vld [vmem:[#allocation96_spill] sm:$0xff] }
0x17bd   :  { %v8431_v44 = vmul.f32 %v16611_v38, %v7758_v26  ;;  %v8046_v62 = vadd.f32 %v8045_v9, %v16612_v49  ;;  %v16613_v53 = vld [vmem:[#allocation71_spill] sm:$0xff]  ;;  %v8180_v18 = vsel %vm769_vm2, %v8129_v4, 0.0  ;;  %v8019_v21 = vmul.f32 %v15882_v7, %v7831_v29  ;;  %v15902_v37 = vpop.f32.mrf.mxu1  ;;  %v16616_v38 = vld [vmem:[#allocation44_spill] sm:$0xff]  ;;  %v16618_v4 = vld [vmem:[#allocation25_spill] sm:$0xff] }
0x17be   :  { %v8174_v15 = vadd.f32 %v8173_v25, %v16613_v53  ;;  %v8154_v19 = vmul.f32 %v15885_v52, %v7831_v29  ;;  %v7823_v33 = vadd.f32 %v15758_v1, %v16582_v41  ;;  %16614 = vst [vmem:[#allocation68_spill] sm:$0xff] %v15902_v37  ;;  %v8352_v26 = vadd.f32 %v16615_v54, %v8291_v31  ;;  %v15908_v49 = vld [vmem:[%s16437_s3 + $0xc0] sm:$0xff]  ;;  %v15911_v25 = vld [vmem:[%s16437_s3 + $0x250] sm:$0xff] }
0x17bf   :  { %v8427_v11 = vmul.f32 %v16616_v38, %v7756_v20  ;;  %v8487_v45 = vadd.f32 %v16617_v56, %v8426_v59  ;;  %8047 = vadd.xlane.f32.xlu0 %v8046_v62  ;;  %v8297_v9 = vmul.f32 %v16618_v4, %v7760_v13  ;;  %v8359_v29 = vadd.f32 %v15704_v24, %v8296_v30  ;;  %v16619_v1 = vld [vmem:[#allocation47_spill] sm:$0xff]  ;;  %v15917_v31 = vpop.f32.mrf.mxu1  ;;  %v7769_v59 = vpop.f32.mrf.mxu0  ;;  %v16620_v62 = vld [vmem:[#allocation73_spill] sm:$0xff] }
0x17c0   :  { %8175 = vadd.xlane.f32.xlu1 %v8174_v15  ;;  %v8432_v53 = vmul.f32 %v16619_v1, %v7760_v13  ;;  %v8494_v54 = vadd.f32 %v15706_v60, %v8431_v44  ;;  %v7768_v20 = vadd.f32 %v7767_v58, %v15298_v47  ;;  %v7834_v38 = vadd.f32 %v15774_v8, %v16582_v41  ;;  %v16621_v15 = vld [vmem:[#allocation46_spill] sm:$0xff]  ;;  %v16623_v44 = vld [vmem:[#allocation21_spill] sm:$0xff] }
0x17c1   :  { %v8181_v56 = vadd.f32 %v8180_v18, %v16620_v62  ;;  %v8060_v37 = vadd.f32 %v8059_v27, %v16621_v15  ;;  %v8080_v4 = vsel %vm769_vm2, %v8019_v21, 0.0  ;;  %v8215_v24 = vsel %vm769_vm2, %v8154_v19, 0.0  ;;  %v7924_v13 = vld [vmem:[%s16437_s3 + $0x138] sm:$0xff]  ;;  %v15929_v58 = vpop.f32.mrf.mxu1  ;;  %v7974_v27 = vld [vmem:[%s16437_s3 + $0x2c8] sm:$0xff] }
0x17c2   :  { %v8009_v60 = vmul.f32 %v15908_v49, %v7823_v33  ;;  %v8144_v30 = vmul.f32 %v15911_v25, %v7823_v33  ;;  %16622 = vst [vmem:[#allocation56_spill] sm:$0xff] %v15929_v58  ;;  %v15933_v8 = vmul.f32 %v16623_v44, %v15836_v14  ;;  %v15935_v18 = vadd.f32 %v8352_v26, %v8292_v6  ;;  %v15948_v15 = vld [vmem:[%s16437_s3 + $0xe8] sm:$0xff]  ;;  %v15951_v14 = vld [vmem:[%s16437_s3 + $0x278] sm:$0xff] }
0x17c3   :  { %v7826_v21 = vadd.f32 %v15786_v55, %v16582_v41  ;;  %8182 = vadd.xlane.f32.xlu0 %v8181_v56  ;;  %v15940_v19 = vadd.f32 %v8487_v45, %v8427_v11  ;;  %v15942_v1 = vadd.f32 %v8359_v29, %v8297_v9  ;;  %v15944_v33 = vadd.f32 %v8494_v54, %v8432_v53  ;;  %v15953_v6 = vpop.f32.mrf.mxu1  ;;  %v16627_v26 = vld [vmem:[#allocation48_spill] sm:$0xff] }
0x17c4   :  { %8061 = vadd.xlane.f32.xlu1 %v8060_v37  ;;  %v7770_v62 = vadd.f32 %v7769_v59, %v15334_v28  ;;  %16624 = vst [vmem:[#allocation60_spill] sm:$0xff] %v15948_v15  ;;  %16625 = vst [vmem:[#allocation61_spill] sm:$0xff] %v15951_v14  ;;  %v8306_v44 = vmul.f32 %v16627_v26, %v7768_v20  ;;  %v8024_v58 = vmul.f32 %v7924_v13, %v7834_v38  ;;  %v16628_v55 = vld [vmem:[#allocation92_spill] sm:$0xff]  ;;  %v16629_v37 = vld [vmem:[#allocation29_spill] sm:$0xff] }
0x17c5   :  { %16626 = vst [vmem:[#allocation62_spill] sm:$0xff] %v15953_v6  ;;  %v8216_v56 = vadd.f32 %v8215_v24, %v16628_v55  ;;  %v8081_v11 = vadd.f32 %v8080_v4, %v16629_v37  ;;  %v8066_v45 = vsel %vm769_vm2, %v8009_v60, 0.0  ;;  %v8201_v9 = vsel %vm769_vm2, %v8144_v30, 0.0  ;;  %v7870_v54 = vpop.f32.mrf.mxu1  ;;  %v16630_v24 = vld [vmem:[#allocation50_spill] sm:$0xff]  ;;  %v16631_v37 = vld [vmem:[#allocation89_spill] sm:$0xff] }
0x17c6   :  { %v8159_v29 = vmul.f32 %v7974_v27, %v7834_v38  ;;  %v7847_v53 = vadd.f32 %v15812_v12, %v16582_v41  ;;  %v8014_v59 = vmul.f32 %v15948_v15, %v7826_v21  ;;  %v8149_v6 = vmul.f32 %v15951_v14, %v7826_v21  ;;  %v7984_v12 = vld [vmem:[%s16437_s3 + $0x318] sm:$0xff]  ;;  %v16632_v21 = vld [vmem:[#allocation88_spill] sm:$0xff] }
0x17c7   :  { %v7842_v26 = vadd.f32 %v15871_v16, %v16582_v41  ;;  %8217 = vadd.xlane.f32.xlu0 %v8216_v56  ;;  %v8441_v4 = vmul.f32 %v16630_v24, %v7768_v20  ;;  %v8307_v60 = vmul.f32 %v15686_v48, %v7770_v62  ;;  %v8373_v30 = vadd.f32 %v15777_v63, %v8306_v44  ;;  %v10017_v55 = vpop.f32.mrf.mxu1 }
0x17c8   :  { %8082 = vadd.xlane.f32.xlu1 %v8081_v11  ;;  %v8442_v38 = vmul.f32 %v15696_v36, %v7770_v62  ;;  %v8202_v15 = vadd.f32 %v8201_v9, %v16631_v37  ;;  %v8067_v14 = vadd.f32 %v8066_v45, %v16632_v21  ;;  %v7871_v16 = vadd.f32 %v7870_v54, %v16582_v41  ;;  %v15984_v9 = vld [vmem:[%s16437_s3 + $0x2f0] sm:$0xff]  ;;  %v7934_v54 = vld [vmem:[%s16437_s3 + $0x188] sm:$0xff] }
0x17c9   :  { %v7882_v56 = vadd.f32 %v10017_v55, %v16582_v41  ;;  %v8508_v20 = vadd.f32 %v15779_v39, %v8441_v4  ;;  %v8087_v48 = vsel %vm769_vm2, %v8024_v58, 0.0  ;;  %v8222_v63 = vsel %vm769_vm2, %v8159_v29, 0.0  ;;  %v7873_v62 = vpop.f32.mrf.mxu1 }
0x17ca   :  { %v7839_v36 = vadd.f32 %v15832_v43, %v16582_v41  ;;  %v8073_v44 = vsel %vm769_vm2, %v8014_v59, 0.0  ;;  %v8208_v11 = vsel %vm769_vm2, %v8149_v6, 0.0  ;;  %v8263_v45 = vmul.f32 %v15765_v51, %v7847_v53 }
0x17cb   :  { %v8169_v24 = vmul.f32 %v7984_v12, %v7842_v26  ;;  %8203 = vadd.xlane.f32.xlu0 %v8202_v15  ;;  %v7850_v39 = vadd.f32 %v15853_v57, %v16582_v41  ;;  %v8293_v58 = vmul.f32 %v15882_v7, %v7871_v16  ;;  %v8428_v43 = vmul.f32 %v15885_v52, %v7871_v16  ;;  %v16633_v16 = vld [vmem:[#allocation34_spill] sm:$0xff] }
0x17cc   :  { %8068 = vadd.xlane.f32.xlu1 %v8067_v14  ;;  %v7874_v29 = vadd.f32 %v7873_v62, %v16582_v41  ;;  %v8223_v59 = vadd.f32 %v8222_v63, %v15721_v32  ;;  %v8088_v6 = vadd.f32 %v8087_v48, %v15708_v0  ;;  %v8308_v51 = vmul.f32 %v7934_v54, %v7882_v56 }
0x17cd   :  { %v8443_v4 = vmul.f32 %v7984_v12, %v7882_v56  ;;  %v8164_v55 = vmul.f32 %v15984_v9, %v7839_v36  ;;  %v8034_v37 = vmul.f32 %v7934_v54, %v7842_v26  ;;  %v8374_v21 = vadd.f32 %v8373_v30, %v8307_v60  ;;  %v16634_v26 = vld [vmem:[#allocation37_spill] sm:$0xff]  ;;  %v16007_v30 = vld [vmem:[%s16437_s3 + $0x160] sm:$0xff] }
0x17ce   :  { %v8298_v15 = vmul.f32 %v7924_v13, %v7874_v29  ;;  %v8433_v14 = vmul.f32 %v7974_v27, %v7874_v29  ;;  %v8509_v57 = vadd.f32 %v8508_v20, %v8442_v38  ;;  %v8398_v7 = vmul.f32 %v15798_v40, %v7847_v53 }
0x17cf   :  { %v8236_v52 = vsel %vm769_vm2, %v8169_v24, 0.0  ;;  %8224 = vadd.xlane.f32.xlu0 %v8223_v59  ;;  %v8354_v32 = vsel %vm769_vm2, %v8293_v58, 0.0  ;;  %v8489_v0 = vsel %vm769_vm2, %v8428_v43, 0.0  ;;  %v8209_v12 = vadd.f32 %v8208_v11, %v16633_v16 }
0x17d0   :  { %8089 = vadd.xlane.f32.xlu1 %v8088_v6  ;;  %v8496_v56 = vsel %vm769_vm2, %v8433_v14, 0.0  ;;  %v8375_v13 = vsel %vm769_vm2, %v8308_v51, 0.0  ;;  %v8510_v27 = vsel %vm769_vm2, %v8443_v4, 0.0  ;;  %v8074_v60 = vadd.f32 %v8073_v44, %v16634_v26  ;;  %v16639_v51 = vld [vmem:[#allocation45_spill] sm:$0xff] }
0x17d1   :  { %v8361_v40 = vsel %vm769_vm2, %v8298_v15, 0.0  ;;  %v8312_v53 = vsel %vm769_vm2, %v8263_v45, 0.0  ;;  %v8229_v38 = vsel %vm769_vm2, %v8164_v55, 0.0  ;;  %v8268_v20 = vmul.f32 %v15801_v61, %v7850_v39  ;;  %v16640_v55 = vld [vmem:[#allocation79_spill] sm:$0xff] }
0x17d2   :  { %v8101_v48 = vsel %vm769_vm2, %v8034_v37, 0.0  ;;  %v16013_v63 = vadd.f32 %v8489_v0, %v15940_v19  ;;  %v16016_v62 = vadd.f32 %v8354_v32, %v15935_v18  ;;  %v16019_v44 = vadd.f32 %v8496_v56, %v15944_v33  ;;  %v16642_v37 = vld [vmem:[#allocation52_spill] sm:$0xff] }
0x17d3   :  { %8210 = vadd.xlane.f32.xlu0 %v8209_v12  ;;  %v16022_v11 = vadd.f32 %v8361_v40, %v15942_v1  ;;  %v16024_v45 = vadd.f32 %v8510_v27, %v8509_v57  ;;  %v16026_v54 = vadd.f32 %v8375_v13, %v8374_v21  ;;  %v16029_v61 = vadd.f32 %v8236_v52, %v15730_v10  ;;  %v16635_v10 = vld [vmem:[#allocation76_spill] sm:$0xff]  ;;  %v16645_v52 = vld [vmem:[#allocation57_spill] sm:$0xff]  ;;  %v16648_v27 = vld [vmem:[#allocation82_spill] sm:$0xff] }
0x17d4   :  { %8075 = vadd.xlane.f32.xlu1 %v8074_v60  ;;  %v8029_v24 = vmul.f32 %v16007_v30, %v7839_v36  ;;  %v8230_v19 = vadd.f32 %v8229_v38, %v15725_v35  ;;  %v8313_v18 = vadd.f32 %v8312_v53, %v15742_v50  ;;  %v16035_v58 = vadd.f32 %v8101_v48, %v15728_v46  ;;  %v16636_v36 = vld [vmem:[#allocation69_spill] sm:$0xff]  ;;  %v16643_v21 = vld [vmem:[#allocation68_spill] sm:$0xff]  ;;  %v16649_v60 = vld [vmem:[#allocation83_spill] sm:$0xff] }
0x17d5   :  { %v8447_v33 = vsel %vm769_vm2, %v8398_v7, 0.0  ;;  %v8319_v1 = vsel %vm769_vm2, %v8268_v20, 0.0  ;;  %v8403_v43 = vmul.f32 %v15841_v22, %v7850_v39  ;;  %v7863_v29 = vadd.f32 %v15891_v5, %v16582_v41  ;;  %v16637_v22 = vld [vmem:[#allocation78_spill] sm:$0xff]  ;;  %v16644_v7 = vld [vmem:[#allocation43_spill] sm:$0xff]  ;;  %v16646_v12 = vld [vmem:[#allocation65_spill] sm:$0xff] }
0x17d6   :  { %v16044_v59 = vmul.f32 %v16635_v10, %v15809_v3  ;;  %v8337_v35 = vadd.f32 %v15878_v17, %v15856_v42  ;;  %v8472_v46 = vadd.f32 %v15933_v8, %v15874_v34  ;;  %v8325_v50 = vadd.f32 %v15815_v23, %v15790_v2  ;;  %v16638_v5 = vld [vmem:[#allocation90_spill] sm:$0xff]  ;;  %v16641_v34 = vld [vmem:[#allocation59_spill] sm:$0xff]  ;;  %v16647_v56 = vld [vmem:[#allocation20_spill] sm:$0xff] }
0x17d7   :  { %8231 = vadd.xlane.f32.xlu0 %v8230_v19  ;;  %v8281_v39 = vmul.f32 %v16637_v22, %v16636_v36  ;;  %v7746_v6 = vadd.f32 %v16638_v5, %v15334_v28  ;;  %v7748_v4 = vadd.f32 %v16639_v51, %v15298_v47  ;;  %v8416_v17 = vmul.f32 %v16640_v55, %v16636_v36  ;;  %v16652_v48 = vld [vmem:[#allocation55_spill] sm:$0xff]  ;;  %v16653_v19 = vld [vmem:[#allocation58_spill] sm:$0xff]  ;;  %v16655_v10 = vld [vmem:[#allocation41_spill] sm:$0xff] }
0x17d8   :  { %8314 = vadd.xlane.f32.xlu1 %v8313_v18  ;;  %v8094_v42 = vsel %vm769_vm2, %v8029_v24, 0.0  ;;  %v8320_v8 = vadd.f32 %v8319_v1, %v16641_v34  ;;  %v8448_v15 = vadd.f32 %v8447_v33, %v16642_v37  ;;  %v8454_v2 = vsel %vm769_vm2, %v8403_v43, 0.0  ;;  %v16654_v43 = vld [vmem:[#allocation36_spill] sm:$0xff]  ;;  %v16656_v22 = vld [vmem:[#allocation33_spill] sm:$0xff] }
0x17d9   :  { %v8283_v23 = vmul.f32 %v15908_v49, %v7863_v29  ;;  %v8418_v14 = vmul.f32 %v15911_v25, %v7863_v29  ;;  %v7855_v57 = vadd.f32 %v16643_v21, %v16582_v41  ;;  %v8460_v32 = vadd.f32 %v16645_v52, %v16644_v7  ;;  %v16650_v49 = vld [vmem:[#allocation80_spill] sm:$0xff]  ;;  %v16651_v25 = vld [vmem:[#allocation51_spill] sm:$0xff]  ;;  %v16660_v55 = vld [vmem:[#allocation81_spill] sm:$0xff] }
0x17da   :  { %v8338_v0 = vadd.f32 %v8337_v35, %v8281_v39  ;;  %v8473_v16 = vadd.f32 %v8472_v46, %v8416_v17  ;;  %v8331_v13 = vadd.f32 %v16647_v56, %v16646_v12  ;;  %v8282_v26 = vmul.f32 %v16648_v27, %v7746_v6  ;;  %v16657_v39 = vld [vmem:[#allocation39_spill] sm:$0xff]  ;;  %v16663_v37 = vld [vmem:[#allocation28_spill] sm:$0xff]  ;;  %v16668_v27 = vld [vmem:[#allocation93_spill] sm:$0xff] }
0x17db   :  { %8321 = vadd.xlane.f32.xlu0 %v8320_v8  ;;  %v8417_v40 = vmul.f32 %v16649_v60, %v7746_v6  ;;  %v8286_v53 = vmul.f32 %v16650_v49, %v7748_v4  ;;  %v7750_v38 = vadd.f32 %v16651_v25, %v15334_v28  ;;  %v7866_v20 = vadd.f32 %v15917_v31, %v16582_v41  ;;  %v16658_v31 = vld [vmem:[#allocation66_spill] sm:$0xff]  ;;  %v16659_v6 = vld [vmem:[#allocation84_spill] sm:$0xff] }
0x17dc   :  { %8449 = vadd.xlane.f32.xlu1 %v8448_v15  ;;  %v8455_v24 = vadd.f32 %v8454_v2, %v16652_v48  ;;  %v8095_v18 = vadd.f32 %v8094_v42, %v16653_v19  ;;  %v8340_v33 = vsel %vm769_vm2, %v8283_v23, 0.0  ;;  %v8475_v1 = vsel %vm769_vm2, %v8418_v14, 0.0  ;;  %v16661_v42 = vld [vmem:[#allocation40_spill] sm:$0xff]  ;;  %v16662_v8 = vld [vmem:[#allocation30_spill] sm:$0xff]  ;;  %v16669_v48 = vld [vmem:[#allocation23_spill] sm:$0xff] }
0x17dd   :  { %v8273_v29 = vmul.f32 %v16654_v43, %v7855_v57  ;;  %v8408_v35 = vmul.f32 %v16655_v10, %v7855_v57  ;;  %v8339_v46 = vadd.f32 %v8338_v0, %v8282_v26  ;;  %v8474_v36 = vadd.f32 %v8473_v16, %v8417_v40  ;;  %v16664_v2 = vld [vmem:[#allocation22_spill] sm:$0xff]  ;;  %v16665_v14 = vld [vmem:[#allocation60_spill] sm:$0xff]  ;;  %v16666_v16 = vld [vmem:[#allocation61_spill] sm:$0xff] }
0x17de   :  { %v7633_v5 = vadd.f32 %v16657_v39, %v16656_v22  ;;  %v8466_v51 = vadd.f32 %v16659_v6, %v16658_v31  ;;  %v8421_v17 = vmul.f32 %v16660_v55, %v7748_v4  ;;  %v8345_v34 = vadd.f32 %v16661_v42, %v8286_v53  ;;  %v16667_v4 = vld [vmem:[#allocation56_spill] sm:$0xff]  ;;  %v11087_v49 = vld [vmem:[%s16437_s3 + $0x2d8] sm:$0xff]  ;;  %v16674_v42 = vld [vmem:[#allocation77_spill] sm:$0xff] }
0x17df   :  { %8456 = vadd.xlane.f32.xlu0 %v8455_v24  ;;  %v7631_v15 = vadd.f32 %v16663_v37, %v16662_v8  ;;  %v8287_v23 = vmul.f32 %v16664_v2, %v7750_v38  ;;  %v8288_v21 = vmul.f32 %v16665_v14, %v7866_v20  ;;  %v8476_v57 = vadd.f32 %v8475_v1, %v8474_v36  ;;  %v11086_v60 = vld [vmem:[%s16437_s3 + $0x148] sm:$0xff]  ;;  %v11088_v19 = vld [vmem:[%s16437_s3 + $0x140] sm:$0xff]  ;;  %v16673_v31 = vld [vmem:[#allocation42_spill] sm:$0xff] }
0x17e0   :  { %8096 = vadd.xlane.f32.xlu1 %v8095_v18  ;;  %v8341_v7 = vadd.f32 %v8340_v33, %v8339_v46  ;;  %v8326_v52 = vsel %vm769_vm2, %v8273_v29, 0.0  ;;  %v8461_v0 = vsel %vm769_vm2, %v8408_v35, 0.0  ;;  %v8423_v12 = vmul.f32 %v16666_v16, %v7866_v20  ;;  %v16670_v33 = vld [vmem:[#allocation63_spill] sm:$0xff]  ;;  %v11089_v20 = vld [vmem:[%s16437_s3 + $0x2d0] sm:$0xff]  ;;  %v16672_v39 = vld [vmem:[#allocation64_spill] sm:$0xff] }
0x17e1   :  { %v7858_v56 = vadd.f32 %v16667_v4, %v16582_v41  ;;  %v8480_v26 = vadd.f32 %v16668_v27, %v8421_v17  ;;  %v8300_v40 = vmul.f32 %v11086_v60, %v7633_v5  ;;  %v8435_v53 = vmul.f32 %v11087_v49, %v7633_v5  ;;  %v16671_v29 = vld [vmem:[#allocation62_spill] sm:$0xff] }
0x17e2   :  { %v8346_v25 = vadd.f32 %v8345_v34, %v8287_v23  ;;  %v8422_v24 = vmul.f32 %v16669_v48, %v7750_v38  ;;  %v8299_v18 = vmul.f32 %v11088_v19, %v7631_v15  ;;  %v7764_v1 = vadd.f32 %v16670_v33, %v15298_v47  ;;  %v16676_v34 = vld [vmem:[#allocation49_spill] sm:$0xff]  ;;  %v16677_v37 = vld [vmem:[#allocation94_spill] sm:$0xff] }
0x17e3   :  { %8477 = vadd.xlane.f32.xlu0 %v8476_v57  ;;  %v8434_v43 = vmul.f32 %v11089_v20, %v7631_v15  ;;  %v7879_v10 = vadd.f32 %v16671_v29, %v16582_v41  ;;  %v8462_v35 = vadd.f32 %v8461_v0, %v8460_v32  ;;  %v8327_v46 = vadd.f32 %v8326_v52, %v8325_v50  ;;  %v16675_v50 = vld [vmem:[#allocation67_spill] sm:$0xff]  ;;  %v16679_v0 = vld [vmem:[#allocation53_spill] sm:$0xff] }
0x17e4   :  { %8342 = vadd.xlane.f32.xlu1 %v8341_v7  ;;  %v8347_v36 = vsel %vm769_vm2, %v8288_v21, 0.0  ;;  %v8482_v22 = vsel %vm769_vm2, %v8423_v12, 0.0  ;;  %v8278_v5 = vmul.f32 %v16672_v39, %v7858_v56  ;;  %v8413_v38 = vmul.f32 %v16673_v31, %v7858_v56 }
0x17e5   :  { %v8481_v6 = vadd.f32 %v8480_v26, %v8422_v24  ;;  %v8365_v55 = vadd.f32 %v8300_v40, %v8299_v18  ;;  %v8500_v17 = vadd.f32 %v8435_v53, %v8434_v43  ;;  %v8332_v47 = vadd.f32 %v8331_v13, %v16044_v59 }
0x17e6   :  { %v8412_v41 = vmul.f32 %v16674_v42, %v15809_v3  ;;  %v7766_v32 = vadd.f32 %v16675_v50, %v15334_v28  ;;  %v8301_v8 = vmul.f32 %v16676_v34, %v7764_v1  ;;  %v8436_v15 = vmul.f32 %v16677_v37, %v7764_v1  ;;  %v16678_v28 = vld [vmem:[#allocation95_spill] sm:$0xff] }
0x17e7   :  { %8463 = vadd.xlane.f32.xlu0 %v8462_v35  ;;  %v8483_v2 = vadd.f32 %v8482_v22, %v8481_v6  ;;  %v8348_v23 = vadd.f32 %v8347_v36, %v8346_v25  ;;  %v8333_v14 = vsel %vm769_vm2, %v8278_v5, 0.0  ;;  %v8468_v21 = vsel %vm769_vm2, %v8413_v38, 0.0 }
0x17e8   :  { %8328 = vadd.xlane.f32.xlu1 %v8327_v46  ;;  %v8303_v57 = vmul.f32 %v16007_v30, %v7879_v10  ;;  %v8438_v59 = vmul.f32 %v15984_v9, %v7879_v10  ;;  %v8467_v13 = vadd.f32 %v8466_v51, %v8412_v41  ;;  %v8366_v7 = vadd.f32 %v8365_v55, %v8301_v8 }
0x17e9   :  { %v8501_v3 = vadd.f32 %v8500_v17, %v8436_v15  ;;  %v8302_v52 = vmul.f32 %v16678_v28, %v7766_v32  ;;  %v8437_v16 = vmul.f32 %v16679_v0, %v7766_v32  ;;  %v8334_v4 = vadd.f32 %v8333_v14, %v8332_v47 }
0x17ea   :  { %v8469_v12 = vadd.f32 %v8468_v21, %v8467_v13  ;;  %v8368_v56 = vsel %vm769_vm2, %v8303_v57, 0.0  ;;  %v8503_v27 = vsel %vm769_vm2, %v8438_v59, 0.0 }
0x17eb   :  { %8484 = vadd.xlane.f32.xlu0 %v8483_v2  ;;  %v8367_v26 = vadd.f32 %v8366_v7, %v8302_v52  ;;  %v8502_v60 = vadd.f32 %v8501_v3, %v8437_v16 }
0x17ec   :  { %8349 = vadd.xlane.f32.xlu1 %v8348_v23 }
0x17ed   :  { %v8504_v9 = vadd.f32 %v8503_v27, %v8502_v60  ;;  %v8369_v30 = vadd.f32 %v8368_v56, %v8367_v26 }
0x17ef   :  { %8470 = vadd.xlane.f32.xlu0 %v8469_v12 }
0x17f0   :  { %8335 = vadd.xlane.f32.xlu1 %v8334_v4 }
0x17f3   :  { %8505 = vadd.xlane.f32.xlu0 %v8504_v9 }
0x17f4   :  { %8370 = vadd.xlane.f32.xlu1 %v8369_v30 }
0x17f7   :  { %8491 = vadd.xlane.f32.xlu0 %v16013_v63 }
0x17f8   :  { %8356 = vadd.xlane.f32.xlu1 %v16016_v62 }
0x17fb   :  { %8498 = vadd.xlane.f32.xlu0 %v16019_v44 }
0x17fc   :  { %8363 = vadd.xlane.f32.xlu1 %v16022_v11 }
0x17ff   :  { %8512 = vadd.xlane.f32.xlu0 %v16024_v45 }
0x1800   :  { %8377 = vadd.xlane.f32.xlu1 %v16026_v54 }
0x1803   :  { %8238 = vadd.xlane.f32.xlu0 %v16029_v61 }
0x1804   :  { %8103 = vadd.xlane.f32.xlu1 %v16035_v58 }
0x1840   :  { %v8190_v51 = vpop.xlane.xlu0 %8189  ;;  %v8055_v40 = vpop.xlane.xlu1 %8054 }
0x1844   :  { %v8197_v49 = vpop.xlane.xlu0 %8196  ;;  %v8041_v53 = vpop.xlane.xlu1 %8040 }
0x1848   :  { %v8048_v25 = vpop.xlane.xlu0 %8047 }
0x1849   :  { %v8176_v63 = vpop.xlane.xlu1 %8175  ;;  %v8105_v31 = vadd.f32 %v8048_v25, %v8041_v53 }
0x184b   :  { %v8106_v50 = vadd.f32 %v8105_v31, %v8055_v40 }
0x184c   :  { %v8183_v48 = vpop.xlane.xlu0 %8182 }
0x184d   :  { %v8062_v62 = vpop.xlane.xlu1 %8061  ;;  %v8240_v22 = vadd.f32 %v8183_v48, %v8176_v63 }
0x184e   :  { %v8107_v2 = vadd.f32 %v8106_v50, %v8062_v62 }
0x184f   :  { %v8241_v55 = vadd.f32 %v8240_v22, %v8190_v51 }
0x1850   :  { %v8218_v24 = vpop.xlane.xlu0 %8217 }
0x1851   :  { %v8083_v44 = vpop.xlane.xlu1 %8082  ;;  %v8242_v8 = vadd.f32 %v8241_v55, %v8197_v49  ;;  %v8257_v55 = vld [vmem:[%s16680_s2] sm:$0x1] }
0x1854   :  { %v8204_v19 = vpop.xlane.xlu0 %8203 }
0x1855   :  { %v8069_v11 = vpop.xlane.xlu1 %8068  ;;  %v8243_v23 = vadd.f32 %v8242_v8, %v8204_v19 }
0x1856   :  { %v8108_v57 = vadd.f32 %v8107_v2, %v8069_v11 }
0x1858   :  { %v8225_v18 = vpop.xlane.xlu0 %8224 }
0x1859   :  { %v8090_v45 = vpop.xlane.xlu1 %8089 }
0x185c   :  { %v8211_v33 = vpop.xlane.xlu0 %8210 }
0x185d   :  { %v8076_v54 = vpop.xlane.xlu1 %8075  ;;  %v8244_v59 = vadd.f32 %v8243_v23, %v8211_v33 }
0x185e   :  { %v8109_v3 = vadd.f32 %v8108_v57, %v8076_v54 }
0x185f   :  { %v8245_v0 = vadd.f32 %v8244_v59, %v8218_v24 }
0x1860   :  { %v8232_v1 = vpop.xlane.xlu0 %8231  ;;  %v8110_v27 = vadd.f32 %v8109_v3, %v8083_v44 }
0x1861   :  { %v8315_v61 = vpop.xlane.xlu1 %8314  ;;  %v8246_v9 = vadd.f32 %v8245_v0, %v8225_v18 }
0x1862   :  { %v8111_v53 = vadd.f32 %v8110_v27, %v8090_v45 }
0x1863   :  { %v8247_v48 = vadd.f32 %v8246_v9, %v8232_v1 }
0x1864   :  { %v8322_v20 = vpop.xlane.xlu0 %8321 }
0x1865   :  { %v8450_v58 = vpop.xlane.xlu1 %8449  ;;  %v8379_v38 = vadd.f32 %v8322_v20, %v8315_v61 }
0x1868   :  { %v8457_v43 = vpop.xlane.xlu0 %8456 }
0x1869   :  { %v8097_v29 = vpop.xlane.xlu1 %8096  ;;  %v8514_v6 = vadd.f32 %v8457_v43, %v8450_v58 }
0x186a   :  { %v8112_v62 = vadd.f32 %v8111_v53, %v8097_v29 }
0x186c   :  { %v8478_v10 = vpop.xlane.xlu0 %8477 }
0x186d   :  { %v8343_v35 = vpop.xlane.xlu1 %8342 }
0x1870   :  { %v8464_v46 = vpop.xlane.xlu0 %8463 }
0x1871   :  { %v8329_v36 = vpop.xlane.xlu1 %8328  ;;  %v8515_v17 = vadd.f32 %v8514_v6, %v8464_v46 }
0x1872   :  { %v8380_v47 = vadd.f32 %v8379_v38, %v8329_v36 }
0x1874   :  { %v8485_v39 = vpop.xlane.xlu0 %8484 }
0x1875   :  { %v8350_v5 = vpop.xlane.xlu1 %8349 }
0x1878   :  { %v8471_v42 = vpop.xlane.xlu0 %8470 }
0x1879   :  { %v8336_v41 = vpop.xlane.xlu1 %8335  ;;  %v8516_v32 = vadd.f32 %v8515_v17, %v8471_v42 }
0x187a   :  { %v8381_v34 = vadd.f32 %v8380_v47, %v8336_v41 }
0x187b   :  { %v8517_v14 = vadd.f32 %v8516_v32, %v8478_v10 }
0x187c   :  { %v8506_v37 = vpop.xlane.xlu0 %8505  ;;  %v8382_v21 = vadd.f32 %v8381_v34, %v8343_v35 }
0x187d   :  { %v8371_v15 = vpop.xlane.xlu1 %8370  ;;  %v8518_v28 = vadd.f32 %v8517_v14, %v8485_v39 }
0x187e   :  { %v8383_v52 = vadd.f32 %v8382_v21, %v8350_v5 }
0x1880   :  { %v8492_v13 = vpop.xlane.xlu0 %8491 }
0x1881   :  { %v8357_v7 = vpop.xlane.xlu1 %8356  ;;  %v8519_v16 = vadd.f32 %v8518_v28, %v8492_v13 }
0x1882   :  { %v8384_v12 = vadd.f32 %v8383_v52, %v8357_v7 }
0x1884   :  { %v8499_v4 = vpop.xlane.xlu0 %8498 }
0x1885   :  { %v8364_v56 = vpop.xlane.xlu1 %8363  ;;  %v8520_v26 = vadd.f32 %v8519_v16, %v8499_v4 }
0x1886   :  { %v8385_v60 = vadd.f32 %v8384_v12, %v8364_v56 }
0x1887   :  { %v8521_v30 = vadd.f32 %v8520_v26, %v8506_v37 }
0x1888   :  { %v8386_v51 = vadd.f32 %v8385_v60, %v8371_v15  ;;  %v8513_v40 = vpop.xlane.xlu0 %8512 }
0x1889   :  { %v8378_v49 = vpop.xlane.xlu1 %8377  ;;  %v8522_v25 = vadd.f32 %v8521_v30, %v8513_v40 }
0x188a   :  { %v8387_v63 = vadd.f32 %v8386_v51, %v8378_v49 }
0x188b   :  { %v8523_v19 = vrot.slane %v8522_v25, 4 }
0x188c   :  { %v8388_v11 = vrot.slane %v8387_v63, 4  ;;  %v8239_v24 = vpop.xlane.xlu0 %8238 }
0x188d   :  { %v8104_v33 = vpop.xlane.xlu1 %8103  ;;  %v8524_v54 = vadd.f32 %v8523_v19, %v8522_v25  ;;  %v8248_v20 = vadd.f32 %v8247_v48, %v8239_v24 }
0x188e   :  { %v8389_v61 = vadd.f32 %v8388_v11, %v8387_v63  ;;  %v8113_v44 = vadd.f32 %v8112_v62, %v8104_v33 }
0x188f   :  { %v8525_v58 = vrot.slane %v8524_v54, 2  ;;  %v8249_v18 = vrot.slane %v8248_v20, 4 }
0x1890   :  { %v8390_v43 = vrot.slane %v8389_v61, 2  ;;  %v8114_v10 = vrot.slane %v8113_v44, 4 }
0x1891   :  { %v8526_v35 = vadd.f32 %v8525_v58, %v8524_v54  ;;  %v8250_v45 = vadd.f32 %v8249_v18, %v8248_v20 }
0x1892   :  { %v8391_v46 = vadd.f32 %v8390_v43, %v8389_v61  ;;  %v8115_v36 = vadd.f32 %v8114_v10, %v8113_v44 }
0x1893   :  { %v8527_v22 = vrot.slane %v8526_v35, 1  ;;  %v8251_v29 = vrot.slane %v8250_v45, 2 }
0x1894   :  { %v8392_v1 = vrot.slane %v8391_v46, 1  ;;  %v8116_v39 = vrot.slane %v8115_v36, 2 }
0x1895   :  { %v8528_v5 = vadd.f32 %v8527_v22, %v8526_v35  ;;  %v8252_v38 = vadd.f32 %v8251_v29, %v8250_v45 }
0x1896   :  { %v8393_v31 = vadd.f32 %v8392_v1, %v8391_v46  ;;  %v8117_v6 = vadd.f32 %v8116_v39, %v8115_v36 }
0x1897   :  { %v8253_v17 = vrot.slane %v8252_v38, 1 }
0x1898   :  { %v8118_v47 = vrot.slane %v8117_v6, 1  ;;  %v8529_v42 = vsel %vm8255_vm8, %v8393_v31, %v8528_v5 }
0x1899   :  { %v8530_v41 = vadd.f32 %v8529_v42, %v8257_v55  ;;  %v8254_v50 = vadd.f32 %v8253_v17, %v8252_v38 }
0x189a   :  { %v8119_v32 = vadd.f32 %v8118_v47, %v8117_v6 }
0x189b   :  { %v8532_v37 = vrot.slane %v8530_v41, 7 }
0x189c   :  { %v8256_v34 = vsel %vm8255_vm8, %v8119_v32, %v8254_v50 }
0x189d   :  { %v8258_v8 = vadd.f32 %v8257_v55, %v8256_v34 }
0x189f   :  { %v8535_v15 = vsel %vm8534_vm9, %v8258_v8, %v8532_v37 }
0x18a0   :  { %v8537_v2 = vsel %vm8536_vm10, %v8535_v15, -inf }
0x18a1   :  { %8538 = vmax.xlane.f32.xlu1 %v8537_v2 }
0x192a   :  { %v8539_v23 = vpop.xlane.xlu1 %8538 }
0x192b   :  { %v8540_v14 = vsub.f32 %v8535_v15, %v8539_v23 }
0x192d   :  { %v8541_v21 = vmul.f32 1.442695, %v8540_v14 }
0x192f   :  { %11082 = vpow2.f32 %v8541_v21 }
0x193c   :  { %v11083_v57 = vpop.eup %11082 }
0x193d   :  { %v8543_v59 = vsel %vm8536_vm10, %v11083_v57, 0.0 }
0x193e   :  { %8544 = vadd.xlane.f32.xlu0 %v8543_v59 }
0x19c7   :  { %v8545_v13 = vpop.xlane.xlu0 %8544 }
0x19c8   :  { %11084 = vrcp.f32 %v8545_v13 }
0x19d5   :  { %v11085_v7 = vpop.eup %11084 }
0x19d6   :  { %v8547_v3 = vmul.f32 %v11085_v7, %v11083_v57 }
0x19d8   :  { %8548 = vst.msk [vmem:[#allocation2] sm:$0x3] %vm8536_vm10, %v8547_v3 }
0x19d9   :  { %11101 = shalt.err (!%p11098_p4)
}
0x19da   :  { %8558 = dma.vmem_to_hbm [thread:$0]  %s8556_s10, 32, %s11323_s25, [#allocation3]  }
0x19db   :  { %11110 = dma.done.wait [#allocation3], 32  }
0x19dc   :  { %11111 = vsyncadd [#allocation3], 4294967264 }
0x19dd   :  { %8562 = vsyncpa [#allocation3], 1 }

</bundles_post_ra>
